<compile_context>
chip_gen: v6e
topology: v6e:2x2x1
jax: 0.10.0
libtpu: 0.0.40
codegen_flags: <defaults>
</compile_context>

<pallas_src>
import jax
import jax.numpy as jnp
from jax import lax
from jax.experimental import pallas as pl
from jax.experimental.pallas import tpu as pltpu


# ----------------------------- in-kernel helpers ----------------------------

def _bf16(x):
    return x.astype(jnp.bfloat16)


def _erf(x):
    # Abramowitz & Stegun 7.1.26, |err| <= 1.5e-7 (f32-level accuracy).
    # TODO(synk): switch to lax.erf if a Mosaic erf lowering is guaranteed.
    p = 0.3275911
    a1, a2, a3, a4, a5 = (0.254829592, -0.284496736, 1.421413741,
                          -1.453152027, 1.061405429)
    ax = jnp.abs(x)
    t = 1.0 / (1.0 + p * ax)
    poly = ((((a5 * t + a4) * t + a3) * t + a2) * t + a1) * t
    y = 1.0 - poly * jnp.exp(-(ax * ax))
    return jnp.where(x < 0.0, -y, y)


def _gelu_exact(x):
    return x * (0.5 * (1.0 + _erf(x * 0.7071067811865476)))


def _normalize(x, eps=1e-5):
    # LayerNorm without affine (gains/biases are folded into the weights).
    mu = jnp.mean(x, axis=-1, keepdims=True)
    xc = x - mu
    var = jnp.mean(xc * xc, axis=-1, keepdims=True)   # biased var == torch LayerNorm
    return xc * lax.rsqrt(var + eps)


# ------------------------------- fused kernel -------------------------------

def _make_fused_kernel(depth, heads, dh, n_tok, n_lat, bt_blk):
    inner = heads * dh
    rows_x = bt_blk * n_tok

    def kernel(x_ref, pos_ref, lat_ref,
               emb_w_ref, emb_b_ref,
               wq_ref, bq_ref, wkvx_ref, bkvx_ref, wkvl_ref, bkvl_ref, wo_ref,
               ffw1_ref, bff1_ref, ffw2_ref,
               res_g_ref, res_b_ref, pred_w_ref, pred_b_ref,
               o_ref):
        blk = pl.program_id(0)

        # decoder_embed over all slabs of this grid step in one MXU matmul,
        # plus the media positional rows (whole table is VMEM-resident; the
        # rows for this grid step are selected here, no per-step pos DMA).
        x_e = jnp.dot(_bf16(x_ref[0]), emb_w_ref[...],
                      preferred_element_type=jnp.float32) + emb_b_ref[...]
        x_e = x_e + pos_ref[blk]                               # (rows_x, D) f32

        # x-side LayerNorm statistics hoisted out of the depth loop (x is the
        # same for every layer); the per-layer norm_media affine is folded into
        # wkvx / bkvx at pack time.  Cast to bf16 exactly once.
        xhat_b = _bf16(_normalize(x_e))                        # (rows_x, D) bf16

        lat0 = lat_ref[...]                                    # (n_lat, D) f32
        latents = [lat0 for _ in range(bt_blk)]                # per-(b,t) slab

        for l in range(depth):          # depth=2 -> static unroll is fine here
            # Media-side k/v for every slab at once (gains/biases folded in).
            kvx = jnp.dot(xhat_b, wkvx_ref[l],
                          preferred_element_type=jnp.float32) + bkvx_ref[l]
            kvxb = _bf16(kvx)                                  # cast once/layer

            for s in range(bt_blk):
                lat_s = latents[s]

                # ---------------- PerceiverAttention ----------------
                # norm_latents affine + softmax scale folded into wq / wkvl.
                lhat_b = _bf16(_normalize(lat_s))              # cast once
                q = jnp.dot(lhat_b, wq_ref[l],
                            preferred_element_type=jnp.float32) + bq_ref[l]
                kvl = jnp.dot(lhat_b, wkvl_ref[l],
                              preferred_element_type=jnp.float32) + bkvl_ref[l]
                qb = _bf16(q)
                kvlb = _bf16(kvl)
                kvxb_s = kvxb[s * n_tok:(s + 1) * n_tok, :]    # this slab's media kv

                outs = []
                for h in range(heads):
                    ksl = slice(h * dh, (h + 1) * dh)
                    vsl = slice(inner + h * dh, inner + (h + 1) * dh)
                    qh = qb[:, ksl]
                    sim_x = jnp.einsum('id,jd->ij', qh, kvxb_s[:, ksl],
                                       preferred_element_type=jnp.float32)
                    sim_l = jnp.einsum('id,jd->ij', qh, kvlb[:, ksl],
                                       preferred_element_type=jnp.float32)
                    # softmax over the joint (media, latent) key axis without
                    # materializing torch.cat((x, latents), dim=-2).
                    m = jnp.maximum(jnp.max(sim_x, axis=-1, keepdims=True),
                                    jnp.max(sim_l, axis=-1, keepdims=True))
                    px = jnp.exp(sim_x - m)
                    pz = jnp.exp(sim_l - m)
                    r = pl.reciprocal(jnp.sum(px, axis=-1, keepdims=True)
                                      + jnp.sum(pz, axis=-1, keepdims=True),
                                      approx=True)
                    oh = (jnp.dot(_bf16(px), kvxb_s[:, vsl],
                                  preferred_element_type=jnp.float32)
                          + jnp.dot(_bf16(pz), kvlb[:, vsl],
                                    preferred_element_type=jnp.float32)) * r
                    outs.append(oh)
                attn = jnp.concatenate(outs, axis=-1)          # (n_lat, inner)

                lat_s = jnp.dot(_bf16(attn), wo_ref[l],
                                preferred_element_type=jnp.float32) + lat_s

                # -------------------- FeedForward --------------------
                # FFN LayerNorm affine folded into ff_w1 / bff1.
                fhat_b = _bf16(_normalize(lat_s))
                y = jnp.dot(fhat_b, ffw1_ref[l],
                            preferred_element_type=jnp.float32) + bff1_ref[l]
                y = _gelu_exact(y)
                lat_s = jnp.dot(_bf16(y), ffw2_ref[l],
                                preferred_element_type=jnp.float32) + lat_s
                latents[s] = lat_s

        # resampler.norm -> decoder_norm -> decoder_pred
        # (decoder_norm affine folded into pred_w / pred_b at pack time).
        # One output block (all slabs of this step) -> single output DMA.
        for s in range(bt_blk):
            res = _normalize(latents[s]) * res_g_ref[...] + res_b_ref[...]
            dechat = _normalize(res)
            preds = jnp.dot(_bf16(dechat), pred_w_ref[...],
                            preferred_element_type=jnp.float32) + pred_b_ref[...]
            o_ref[0, s * n_lat:(s + 1) * n_lat, :] = preds

    return kernel


# ------------------------------- parameters ---------------------------------

def init_params(key, cfg):
    H = cfg['hidden_size']
    D = cfg['patch_feat_dim']
    inner = cfg['heads'] * cfg['dim_head']
    ff_inner = D * 4
    patch_dim = cfg['patch_size'] ** 2 * 3

    keys = iter(jax.random.split(key, 16 + 16 * cfg['depth']))
    nrm = lambda shape, s: s * jax.random.normal(next(keys), shape, jnp.float32)
    gain = lambda: 1.0 + nrm((D,), 0.1)     # non-trivial norms exercise the folding
    bias = lambda: nrm((D,), 0.1)

    params = dict(
        embed_w=nrm((H, D), 0.02), embed_b=nrm((D,), 0.02),
        latents=nrm((cfg['num_latents'], D), 1.0),
        media_pos_emb=nrm((cfg['num_media_embeds'], 1, D), 1.0),
        layers=[],
        res_norm_g=gain(), res_norm_b=bias(),
        dec_norm_g=gain(), dec_norm_b=bias(),
        pred_w=nrm((D, patch_dim), 0.02), pred_b=nrm((patch_dim,), 0.02),
        # decoder_pos_embed exists in the torch module but is unused in forward().
    )
    for _ in range(cfg['depth']):
        params['layers'].append(dict(
            nm_g=gain(), nm_b=bias(), nl_g=gain(), nl_b=bias(),
            wq=nrm((D, inner), 0.02), wkv=nrm((D, 2 * inner), 0.02),
            wo=nrm((inner, D), 0.02),
            ffn_g=gain(), ffn_b=bias(),
            ff_w1=nrm((D, ff_inner), 0.02), ff_w2=nrm((ff_inner, D), 0.02),
        ))
    return params


def pack_params(params, cfg):
    """Fold LayerNorm affines + the attention scale into the matmul weights
    (precomputing the matching f32 bias rows), stack per-layer weights on a
    depth axis, cast matmul weights to bf16 (biases / norm rows stay f32)."""
    scale = cfg['dim_head'] ** -0.5
    bf = jnp.bfloat16
    f32 = jnp.float32
    layers = params['layers']
    row = lambda a: a.reshape(1, -1).astype(f32)

    def stack_w(fn):
        return jnp.stack([fn(l) for l in layers]).astype(bf)

    def stack_b(fn):
        return jnp.stack([fn(l).reshape(1, -1) for l in layers]).astype(f32)

    return dict(
        latents=params['latents'].astype(f32),
        media_pos_emb=params['media_pos_emb'].astype(f32),
        embed_w=params['embed_w'].astype(bf),
        embed_b=row(params['embed_b']),
        # norm_latents (+ softmax scale) folded into to_q and latent-side to_kv;
        # norm_media folded into media-side to_kv; FFN norm folded into ff_w1.
        wq=stack_w(lambda l: l['nl_g'][:, None] * l['wq'] * scale),
        bq=stack_b(lambda l: (l['nl_b'] @ l['wq']) * scale),
        wkvx=stack_w(lambda l: l['nm_g'][:, None] * l['wkv']),
        bkvx=stack_b(lambda l: l['nm_b'] @ l['wkv']),
        wkvl=stack_w(lambda l: l['nl_g'][:, None] * l['wkv']),
        bkvl=stack_b(lambda l: l['nl_b'] @ l['wkv']),
        wo=stack_w(lambda l: l['wo']),
        ffw1=stack_w(lambda l: l['ffn_g'][:, None] * l['ff_w1']),
        bff1=stack_b(lambda l: l['ffn_b'] @ l['ff_w1']),
        ffw2=stack_w(lambda l: l['ff_w2']),
        res_g=row(params['res_norm_g']), res_b=row(params['res_norm_b']),
        # decoder_norm affine folded into decoder_pred.
        pred_w=(params['dec_norm_g'][:, None] * params['pred_w']).astype(bf),
        pred_b=(params['dec_norm_b'] @ params['pred_w']
                + params['pred_b']).reshape(1, -1).astype(f32),
    )


# --------------------------------- forward ----------------------------------

def resampler_forward_pred_head(packed, obs_pred, cfg):
    b, T, n_tok, h_in = obs_pred.shape
    D = cfg['patch_feat_dim']
    depth = cfg['depth']
    heads, dh = cfg['heads'], cfg['dim_head']
    n_lat = cfg['num_latents']
    patch_dim = cfg['patch_size'] ** 2 * 3
    assert T <= cfg['num_media_embeds'], \
        "sequence length exceeds num_media_embeds of the resampler"

    BT = b * T
    # Two parallel grid steps when possible (keeps both v7x TensorCores busy,
    # amortizes per-step fixed cost on v5e/v6e); one step otherwise.
    num_blocks = 2 if (BT % 2 == 0 and BT >= 2) else 1
    bt_blk = BT // num_blocks
    rows_x = bt_blk * n_tok

    x = obs_pred.reshape(num_blocks, rows_x, h_in)

    # Media positional rows pre-expanded to one row per media token so the whole
    # (tiny) table stays VMEM-resident and is selected by grid index in-kernel.
    pe = packed['media_pos_emb'][:T, 0, :]                               # (T, D)
    pos_rows = jnp.broadcast_to(pe[None, :, None, :], (b, T, n_tok, D))
    pos_rows = pos_rows.reshape(num_blocks, rows_x, D)

    weight_order = ['embed_w', 'embed_b', 'wq', 'bq', 'wkvx', 'bkvx',
                    'wkvl', 'bkvl', 'wo', 'ffw1', 'bff1', 'ffw2',
                    'res_g', 'res_b', 'pred_w', 'pred_b']
    weights = [packed[k] for k in weight_order]

    def const_spec(arr):
        nd = arr.ndim
        # Constant index_map -> block is DMA'd once and stays VMEM-resident.
        return pl.BlockSpec(arr.shape, lambda i, _nd=nd: (0,) * _nd)

    in_specs = ([pl.BlockSpec((1, rows_x, h_in), lambda i: (i, 0, 0)),
                 const_spec(pos_rows),
                 const_spec(packed['latents'])]
                + [const_spec(a) for a in weights])

    # TODO(synk): at realistic sizes (D~1k, ff_inner~4k, depth>=6) stream the
    # depth-stacked weights per layer instead of keeping them all resident
    # (v7x has 64 MiB VMEM) and set vmem_limit_bytes explicitly.
    out = pl.pallas_call(
        _make_fused_kernel(depth, heads, dh, n_tok, n_lat, bt_blk),
        grid=(num_blocks,),
        in_specs=in_specs,
        out_specs=pl.BlockSpec((1, bt_blk * n_lat, patch_dim),
                               lambda i: (i, 0, 0)),
        out_shape=jax.ShapeDtypeStruct((num_blocks, bt_blk * n_lat, patch_dim),
                                       jnp.float32),
        compiler_params=pltpu.CompilerParams(dimension_semantics=("parallel",)),
    )(x, pos_rows, packed['latents'], *weights)

    return out.reshape(b, T, cfg['chunk_size'], cfg['n_patch'], patch_dim)


# ----------------------- pure-JAX f32 reference (check) ----------------------

def reference_forward(params, obs_pred, cfg):
    D = cfg['patch_feat_dim']
    heads, dh = cfg['heads'], cfg['dim_head']
    inner = heads * dh
    scale = dh ** -0.5
    b, T, n_tok, _ = obs_pred.shape
    n_lat = cfg['num_latents']

    def ln(x, g, bb, eps=1e-5):
        mu = x.mean(-1, keepdims=True)
        var = ((x - mu) ** 2).mean(-1, keepdims=True)
        return (x - mu) / jnp.sqrt(var + eps) * g + bb

    x = obs_pred @ params['embed_w'] + params['embed_b']
    x = x + params['media_pos_emb'][:T][None]
    latents = jnp.broadcast_to(params['latents'][None, None], (b, T, n_lat, D))
    for lyr in params['layers']:
        xm = ln(x, lyr['nm_g'], lyr['nm_b'])
        lm = ln(latents, lyr['nl_g'], lyr['nl_b'])
        q = lm @ lyr['wq']
        kv = jnp.concatenate([xm, lm], axis=-2) @ lyr['wkv']
        k, v = jnp.split(kv, 2, axis=-1)
        qh = q.reshape(b, T, n_lat, heads, dh) * scale
        kh = k.reshape(b, T, -1, heads, dh)
        vh = v.reshape(b, T, -1, heads, dh)
        sim = jnp.einsum('btihd,btjhd->bthij', qh, kh)
        attn = jax.nn.softmax(sim - sim.max(-1, keepdims=True), axis=-1)
        o = jnp.einsum('bthij,btjhd->btihd', attn, vh).reshape(b, T, n_lat, inner)
        latents = o @ lyr['wo'] + latents
        y = ln(latents, lyr['ffn_g'], lyr['ffn_b'])
        y = jax.nn.gelu(y @ lyr['ff_w1'], approximate=False)
        latents = y @ lyr['ff_w2'] + latents
    latents = ln(latents, params['res_norm_g'], params['res_norm_b'])
    out = ln(latents, params['dec_norm_g'], params['dec_norm_b'])
    out = out.reshape(b, T, cfg['chunk_size'], cfg['n_patch'], D)
    return out @ params['pred_w'] + params['pred_b']


# ----------------------------------- main ------------------------------------

if __name__ == "__main__":
    cfg = dict(image_size=8, patch_size=4, hidden_size=32, patch_feat_dim=32,
               depth=2, dim_head=8, heads=4, num_media_embeds=4, chunk_size=1)
    cfg['n_patch'] = (cfg['image_size'] // cfg['patch_size']) ** 2          # 4
    cfg['num_latents'] = cfg['chunk_size'] * cfg['n_patch']                 # 4

    key = jax.random.PRNGKey(0)
    pkey, xkey = jax.random.split(key)
    params = init_params(pkey, cfg)
    packed = pack_params(params, cfg)

    b, T, n_tok = 2, 3, 8
    obs_pred = jax.random.normal(xkey, (b, T, n_tok, cfg['hidden_size']), jnp.float32)

    fwd = jax.jit(lambda pk, x: resampler_forward_pred_head(pk, x, cfg))
    preds = fwd(packed, obs_pred)
    jax.block_until_ready(preds)

    expected = (b, T, cfg['chunk_size'], cfg['n_patch'], cfg['patch_size'] ** 2 * 3)
    assert preds.shape == expected, (preds.shape, expected)
    assert bool(jnp.all(jnp.isfinite(preds)))

    # Numerical check vs pure-JAX f32 reference; tolerance covers bf16 matmul
    # operands, bf16-quantized affine/scale folding, and the approximate
    # softmax reciprocal used in-kernel.
    ref = reference_forward(params, obs_pred, cfg)
    max_err = float(jnp.max(jnp.abs(preds - ref)))
    assert max_err < 5e-2, f"max |pred - ref| = {max_err}"
    print("KERNEL_OK")
</pallas_src>

<mosaic_0001>
module attributes {stable_mosaic.version = 11 : i64} {
  func.func @kernel(%arg0: i32, %arg1: memref<1x24x32xf32, #tpu.memory_space<vmem>>, %arg2: memref<2x24x32xf32, #tpu.memory_space<vmem>>, %arg3: memref<4x32xf32, #tpu.memory_space<vmem>>, %arg4: memref<32x32xbf16, #tpu.memory_space<vmem>>, %arg5: memref<1x32xf32, #tpu.memory_space<vmem>>, %arg6: memref<2x32x32xbf16, #tpu.memory_space<vmem>>, %arg7: memref<2x1x32xf32, #tpu.memory_space<vmem>>, %arg8: memref<2x32x64xbf16, #tpu.memory_space<vmem>>, %arg9: memref<2x1x64xf32, #tpu.memory_space<vmem>>, %arg10: memref<2x32x64xbf16, #tpu.memory_space<vmem>>, %arg11: memref<2x1x64xf32, #tpu.memory_space<vmem>>, %arg12: memref<2x32x32xbf16, #tpu.memory_space<vmem>>, %arg13: memref<2x32x128xbf16, #tpu.memory_space<vmem>>, %arg14: memref<2x1x128xf32, #tpu.memory_space<vmem>>, %arg15: memref<2x128x32xbf16, #tpu.memory_space<vmem>>, %arg16: memref<1x32xf32, #tpu.memory_space<vmem>>, %arg17: memref<1x32xf32, #tpu.memory_space<vmem>>, %arg18: memref<32x48xbf16, #tpu.memory_space<vmem>>, %arg19: memref<1x48xf32, #tpu.memory_space<vmem>>, %arg20: memref<1x12x48xf32, #tpu.memory_space<vmem>>) attributes {dimension_semantics = [#tpu.dimension_semantics<parallel>], iteration_bounds = array<i64: 2>, scalar_prefetch = 0 : i64, scratch_operands = 0 : i64, tpu.core_type = #tpu.core_type<tc>, window_params = [{transform_indices = @transform_0, window_bounds = array<i64: 1, 24, 32>}, {pipeline_mode = #tpu.pipeline_mode<synchronous>, transform_indices = @transform_1, window_bounds = array<i64: 2, 24, 32>}, {pipeline_mode = #tpu.pipeline_mode<synchronous>, transform_indices = @transform_2, window_bounds = array<i64: 4, 32>}, {pipeline_mode = #tpu.pipeline_mode<synchronous>, transform_indices = @transform_3, window_bounds = array<i64: 32, 32>}, {pipeline_mode = #tpu.pipeline_mode<synchronous>, transform_indices = @transform_4, window_bounds = array<i64: 1, 32>}, {pipeline_mode = #tpu.pipeline_mode<synchronous>, transform_indices = @transform_5, window_bounds = array<i64: 2, 32, 32>}, {pipeline_mode = #tpu.pipeline_mode<synchronous>, transform_indices = @transform_6, window_bounds = array<i64: 2, 1, 32>}, {pipeline_mode = #tpu.pipeline_mode<synchronous>, transform_indices = @transform_7, window_bounds = array<i64: 2, 32, 64>}, {pipeline_mode = #tpu.pipeline_mode<synchronous>, transform_indices = @transform_8, window_bounds = array<i64: 2, 1, 64>}, {pipeline_mode = #tpu.pipeline_mode<synchronous>, transform_indices = @transform_9, window_bounds = array<i64: 2, 32, 64>}, {pipeline_mode = #tpu.pipeline_mode<synchronous>, transform_indices = @transform_10, window_bounds = array<i64: 2, 1, 64>}, {pipeline_mode = #tpu.pipeline_mode<synchronous>, transform_indices = @transform_11, window_bounds = array<i64: 2, 32, 32>}, {pipeline_mode = #tpu.pipeline_mode<synchronous>, transform_indices = @transform_12, window_bounds = array<i64: 2, 32, 128>}, {pipeline_mode = #tpu.pipeline_mode<synchronous>, transform_indices = @transform_13, window_bounds = array<i64: 2, 1, 128>}, {pipeline_mode = #tpu.pipeline_mode<synchronous>, transform_indices = @transform_14, window_bounds = array<i64: 2, 128, 32>}, {pipeline_mode = #tpu.pipeline_mode<synchronous>, transform_indices = @transform_15, window_bounds = array<i64: 1, 32>}, {pipeline_mode = #tpu.pipeline_mode<synchronous>, transform_indices = @transform_16, window_bounds = array<i64: 1, 32>}, {pipeline_mode = #tpu.pipeline_mode<synchronous>, transform_indices = @transform_17, window_bounds = array<i64: 32, 48>}, {pipeline_mode = #tpu.pipeline_mode<synchronous>, transform_indices = @transform_18, window_bounds = array<i64: 1, 48>}, {transform_indices = @transform_19, window_bounds = array<i64: 1, 12, 48>}]} {
    %c0 = arith.constant 0 : index
    %c0_0 = arith.constant 0 : index
    %c0_1 = arith.constant 0 : index
    %0 = vector.load %arg1[%c0, %c0_0, %c0_1] : memref<1x24x32xf32, #tpu.memory_space<vmem>>, vector<1x24x32xf32>
    %1 = vector.shape_cast %0 : vector<1x24x32xf32> to vector<24x32xf32>
    %2 = arith.truncf %1 : vector<24x32xf32> to vector<24x32xbf16>
    %c0_2 = arith.constant 0 : index
    %c0_3 = arith.constant 0 : index
    %3 = vector.load %arg4[%c0_2, %c0_3] : memref<32x32xbf16, #tpu.memory_space<vmem>>, vector<32x32xbf16>
    %cst = arith.constant dense<0.000000e+00> : vector<24x32xf32>
    %4 = tpu.matmul %2, %3, %cst {dimension_numbers = #tpu.dot_dimension_numbers<[1], [0], [0], [1], [0, 0, 1, 1], [], []>} : vector<24x32xbf16>, vector<32x32xbf16>, vector<24x32xf32> -> vector<24x32xf32>
    %c0_4 = arith.constant 0 : index
    %c0_5 = arith.constant 0 : index
    %5 = vector.load %arg5[%c0_4, %c0_5] : memref<1x32xf32, #tpu.memory_space<vmem>>, vector<1x32xf32>
    %6 = vector.broadcast %5 : vector<1x32xf32> to vector<24x32xf32>
    %7 = arith.addf %4, %6 : vector<24x32xf32>
    %8 = arith.index_cast %arg0 : i32 to index
    %c0_6 = arith.constant 0 : index
    %c0_7 = arith.constant 0 : index
    %9 = vector.load %arg2[%8, %c0_6, %c0_7] : memref<2x24x32xf32, #tpu.memory_space<vmem>>, vector<1x24x32xf32>
    %10 = vector.shape_cast %9 : vector<1x24x32xf32> to vector<24x32xf32>
    %11 = arith.addf %7, %10 : vector<24x32xf32>
    %cst_8 = arith.constant dense<0.000000e+00> : vector<24xf32>
    %12 = vector.multi_reduction <add>, %11, %cst_8 [1] : vector<24x32xf32> to vector<24xf32>
    %13 = vector.shape_cast %12 : vector<24xf32> to vector<24x1xf32>
    %cst_9 = arith.constant 3.200000e+01 : f32
    %14 = vector.broadcast %cst_9 : f32 to vector<24x1xf32>
    %15 = arith.divf %13, %14 : vector<24x1xf32>
    %16 = vector.broadcast %15 : vector<24x1xf32> to vector<24x32xf32>
    %17 = arith.subf %11, %16 : vector<24x32xf32>
    %18 = arith.mulf %17, %17 : vector<24x32xf32>
    %cst_10 = arith.constant dense<0.000000e+00> : vector<24xf32>
    %19 = vector.multi_reduction <add>, %18, %cst_10 [1] : vector<24x32xf32> to vector<24xf32>
    %20 = vector.shape_cast %19 : vector<24xf32> to vector<24x1xf32>
    %cst_11 = arith.constant 3.200000e+01 : f32
    %21 = vector.broadcast %cst_11 : f32 to vector<24x1xf32>
    %22 = arith.divf %20, %21 : vector<24x1xf32>
    %cst_12 = arith.constant 9.99999974E-6 : f32
    %23 = vector.broadcast %cst_12 : f32 to vector<24x1xf32>
    %24 = arith.addf %22, %23 : vector<24x1xf32>
    %25 = math.rsqrt %24 : vector<24x1xf32>
    %26 = vector.broadcast %25 : vector<24x1xf32> to vector<24x32xf32>
    %27 = arith.mulf %17, %26 : vector<24x32xf32>
    %28 = arith.truncf %27 : vector<24x32xf32> to vector<24x32xbf16>
    %c0_13 = arith.constant 0 : index
    %c0_14 = arith.constant 0 : index
    %29 = vector.load %arg3[%c0_13, %c0_14] : memref<4x32xf32, #tpu.memory_space<vmem>>, vector<4x32xf32>
    %c0_15 = arith.constant 0 : index
    %c0_16 = arith.constant 0 : index
    %c0_17 = arith.constant 0 : index
    %30 = vector.load %arg8[%c0_15, %c0_16, %c0_17] : memref<2x32x64xbf16, #tpu.memory_space<vmem>>, vector<1x32x64xbf16>
    %31 = vector.shape_cast %30 : vector<1x32x64xbf16> to vector<32x64xbf16>
    %cst_18 = arith.constant dense<0.000000e+00> : vector<24x64xf32>
    %32 = tpu.matmul %28, %31, %cst_18 {dimension_numbers = #tpu.dot_dimension_numbers<[1], [0], [0], [1], [0, 0, 1, 1], [], []>} : vector<24x32xbf16>, vector<32x64xbf16>, vector<24x64xf32> -> vector<24x64xf32>
    %c0_19 = arith.constant 0 : index
    %c0_20 = arith.constant 0 : index
    %c0_21 = arith.constant 0 : index
    %33 = vector.load %arg9[%c0_19, %c0_20, %c0_21] : memref<2x1x64xf32, #tpu.memory_space<vmem>>, vector<1x1x64xf32>
    %34 = vector.shape_cast %33 : vector<1x1x64xf32> to vector<1x64xf32>
    %35 = vector.broadcast %34 : vector<1x64xf32> to vector<24x64xf32>
    %36 = arith.addf %32, %35 : vector<24x64xf32>
    %37 = arith.truncf %36 : vector<24x64xf32> to vector<24x64xbf16>
    %cst_22 = arith.constant dense<0.000000e+00> : vector<4xf32>
    %38 = vector.multi_reduction <add>, %29, %cst_22 [1] : vector<4x32xf32> to vector<4xf32>
    %39 = vector.shape_cast %38 : vector<4xf32> to vector<4x1xf32>
    %cst_23 = arith.constant 3.200000e+01 : f32
    %40 = vector.broadcast %cst_23 : f32 to vector<4x1xf32>
    %41 = arith.divf %39, %40 : vector<4x1xf32>
    %42 = vector.broadcast %41 : vector<4x1xf32> to vector<4x32xf32>
    %43 = arith.subf %29, %42 : vector<4x32xf32>
    %44 = arith.mulf %43, %43 : vector<4x32xf32>
    %cst_24 = arith.constant dense<0.000000e+00> : vector<4xf32>
    %45 = vector.multi_reduction <add>, %44, %cst_24 [1] : vector<4x32xf32> to vector<4xf32>
    %46 = vector.shape_cast %45 : vector<4xf32> to vector<4x1xf32>
    %cst_25 = arith.constant 3.200000e+01 : f32
    %47 = vector.broadcast %cst_25 : f32 to vector<4x1xf32>
    %48 = arith.divf %46, %47 : vector<4x1xf32>
    %cst_26 = arith.constant 9.99999974E-6 : f32
    %49 = vector.broadcast %cst_26 : f32 to vector<4x1xf32>
    %50 = arith.addf %48, %49 : vector<4x1xf32>
    %51 = math.rsqrt %50 : vector<4x1xf32>
    %52 = vector.broadcast %51 : vector<4x1xf32> to vector<4x32xf32>
    %53 = arith.mulf %43, %52 : vector<4x32xf32>
    %54 = arith.truncf %53 : vector<4x32xf32> to vector<4x32xbf16>
    %c0_27 = arith.constant 0 : index
    %c0_28 = arith.constant 0 : index
    %c0_29 = arith.constant 0 : index
    %55 = vector.load %arg6[%c0_27, %c0_28, %c0_29] : memref<2x32x32xbf16, #tpu.memory_space<vmem>>, vector<1x32x32xbf16>
    %56 = vector.shape_cast %55 : vector<1x32x32xbf16> to vector<32x32xbf16>
    %cst_30 = arith.constant dense<0.000000e+00> : vector<4x32xf32>
    %57 = tpu.matmul %54, %56, %cst_30 {dimension_numbers = #tpu.dot_dimension_numbers<[1], [0], [0], [1], [0, 0, 1, 1], [], []>} : vector<4x32xbf16>, vector<32x32xbf16>, vector<4x32xf32> -> vector<4x32xf32>
    %c0_31 = arith.constant 0 : index
    %c0_32 = arith.constant 0 : index
    %c0_33 = arith.constant 0 : index
    %58 = vector.load %arg7[%c0_31, %c0_32, %c0_33] : memref<2x1x32xf32, #tpu.memory_space<vmem>>, vector<1x1x32xf32>
    %59 = vector.shape_cast %58 : vector<1x1x32xf32> to vector<1x32xf32>
    %60 = vector.broadcast %59 : vector<1x32xf32> to vector<4x32xf32>
    %61 = arith.addf %57, %60 : vector<4x32xf32>
    %c0_34 = arith.constant 0 : index
    %c0_35 = arith.constant 0 : index
    %c0_36 = arith.constant 0 : index
    %62 = vector.load %arg10[%c0_34, %c0_35, %c0_36] : memref<2x32x64xbf16, #tpu.memory_space<vmem>>, vector<1x32x64xbf16>
    %63 = vector.shape_cast %62 : vector<1x32x64xbf16> to vector<32x64xbf16>
    %cst_37 = arith.constant dense<0.000000e+00> : vector<4x64xf32>
    %64 = tpu.matmul %54, %63, %cst_37 {dimension_numbers = #tpu.dot_dimension_numbers<[1], [0], [0], [1], [0, 0, 1, 1], [], []>} : vector<4x32xbf16>, vector<32x64xbf16>, vector<4x64xf32> -> vector<4x64xf32>
    %c0_38 = arith.constant 0 : index
    %c0_39 = arith.constant 0 : index
    %c0_40 = arith.constant 0 : index
    %65 = vector.load %arg11[%c0_38, %c0_39, %c0_40] : memref<2x1x64xf32, #tpu.memory_space<vmem>>, vector<1x1x64xf32>
    %66 = vector.shape_cast %65 : vector<1x1x64xf32> to vector<1x64xf32>
    %67 = vector.broadcast %66 : vector<1x64xf32> to vector<4x64xf32>
    %68 = arith.addf %64, %67 : vector<4x64xf32>
    %69 = arith.truncf %61 : vector<4x32xf32> to vector<4x32xbf16>
    %70 = arith.truncf %68 : vector<4x64xf32> to vector<4x64xbf16>
    %71 = vector.extract_strided_slice %37 {offsets = [0, 0], sizes = [8, 64], strides = [1, 1]} : vector<24x64xbf16> to vector<8x64xbf16>
    %72 = vector.extract_strided_slice %69 {offsets = [0, 0], sizes = [4, 8], strides = [1, 1]} : vector<4x32xbf16> to vector<4x8xbf16>
    %73 = vector.extract_strided_slice %71 {offsets = [0, 0], sizes = [8, 8], strides = [1, 1]} : vector<8x64xbf16> to vector<8x8xbf16>
    "tpu.trace_start"() <{level = 10 : i32, message = "id,jd->ij"}> : () -> ()
    %cst_41 = arith.constant dense<0.000000e+00> : vector<4x8xf32>
    %74 = tpu.matmul %72, %73, %cst_41 {dimension_numbers = #tpu.dot_dimension_numbers<[1], [1], [0], [0], [0, 0, 1, 0], [], []>} : vector<4x8xbf16>, vector<8x8xbf16>, vector<4x8xf32> -> vector<4x8xf32>
    "tpu.trace_stop"() : () -> ()
    %75 = vector.extract_strided_slice %70 {offsets = [0, 0], sizes = [4, 8], strides = [1, 1]} : vector<4x64xbf16> to vector<4x8xbf16>
    "tpu.trace_start"() <{level = 10 : i32, message = "id,jd->ij"}> : () -> ()
    %cst_42 = arith.constant dense<0.000000e+00> : vector<4x4xf32>
    %76 = tpu.matmul %72, %75, %cst_42 {dimension_numbers = #tpu.dot_dimension_numbers<[1], [1], [0], [0], [0, 0, 1, 0], [], []>} : vector<4x8xbf16>, vector<4x8xbf16>, vector<4x4xf32> -> vector<4x4xf32>
    "tpu.trace_stop"() : () -> ()
    %cst_43 = arith.constant dense<0xFF800000> : vector<4xf32>
    %77 = vector.multi_reduction <maximumf>, %74, %cst_43 [1] : vector<4x8xf32> to vector<4xf32>
    %78 = vector.shape_cast %77 : vector<4xf32> to vector<4x1xf32>
    %cst_44 = arith.constant dense<0xFF800000> : vector<4xf32>
    %79 = vector.multi_reduction <maximumf>, %76, %cst_44 [1] : vector<4x4xf32> to vector<4xf32>
    %80 = vector.shape_cast %79 : vector<4xf32> to vector<4x1xf32>
    %81 = arith.maximumf %78, %80 : vector<4x1xf32>
    %82 = vector.broadcast %81 : vector<4x1xf32> to vector<4x8xf32>
    %83 = arith.subf %74, %82 : vector<4x8xf32>
    %84 = math.exp %83 : vector<4x8xf32>
    %85 = vector.broadcast %81 : vector<4x1xf32> to vector<4x4xf32>
    %86 = arith.subf %76, %85 : vector<4x4xf32>
    %87 = math.exp %86 : vector<4x4xf32>
    %cst_45 = arith.constant dense<0.000000e+00> : vector<4xf32>
    %88 = vector.multi_reduction <add>, %84, %cst_45 [1] : vector<4x8xf32> to vector<4xf32>
    %89 = vector.shape_cast %88 : vector<4xf32> to vector<4x1xf32>
    %cst_46 = arith.constant dense<0.000000e+00> : vector<4xf32>
    %90 = vector.multi_reduction <add>, %87, %cst_46 [1] : vector<4x4xf32> to vector<4xf32>
    %91 = vector.shape_cast %90 : vector<4xf32> to vector<4x1xf32>
    %92 = arith.addf %89, %91 : vector<4x1xf32>
    %93 = tpu.reciprocal %92 {approx = true} : vector<4x1xf32> -> vector<4x1xf32>
    %94 = arith.truncf %84 : vector<4x8xf32> to vector<4x8xbf16>
    %95 = vector.extract_strided_slice %71 {offsets = [0, 32], sizes = [8, 8], strides = [1, 1]} : vector<8x64xbf16> to vector<8x8xbf16>
    %cst_47 = arith.constant dense<0.000000e+00> : vector<4x8xf32>
    %96 = tpu.matmul %94, %95, %cst_47 {dimension_numbers = #tpu.dot_dimension_numbers<[1], [0], [0], [1], [0, 0, 1, 1], [], []>} : vector<4x8xbf16>, vector<8x8xbf16>, vector<4x8xf32> -> vector<4x8xf32>
    %97 = arith.truncf %87 : vector<4x4xf32> to vector<4x4xbf16>
    %98 = vector.extract_strided_slice %70 {offsets = [0, 32], sizes = [4, 8], strides = [1, 1]} : vector<4x64xbf16> to vector<4x8xbf16>
    %cst_48 = arith.constant dense<0.000000e+00> : vector<4x8xf32>
    %99 = tpu.matmul %97, %98, %cst_48 {dimension_numbers = #tpu.dot_dimension_numbers<[1], [0], [0], [1], [0, 0, 1, 1], [], []>} : vector<4x4xbf16>, vector<4x8xbf16>, vector<4x8xf32> -> vector<4x8xf32>
    %100 = arith.addf %96, %99 : vector<4x8xf32>
    %101 = vector.broadcast %93 : vector<4x1xf32> to vector<4x8xf32>
    %102 = arith.mulf %100, %101 : vector<4x8xf32>
    %103 = vector.extract_strided_slice %69 {offsets = [0, 8], sizes = [4, 8], strides = [1, 1]} : vector<4x32xbf16> to vector<4x8xbf16>
    %104 = vector.extract_strided_slice %71 {offsets = [0, 8], sizes = [8, 8], strides = [1, 1]} : vector<8x64xbf16> to vector<8x8xbf16>
    "tpu.trace_start"() <{level = 10 : i32, message = "id,jd->ij"}> : () -> ()
    %cst_49 = arith.constant dense<0.000000e+00> : vector<4x8xf32>
    %105 = tpu.matmul %103, %104, %cst_49 {dimension_numbers = #tpu.dot_dimension_numbers<[1], [1], [0], [0], [0, 0, 1, 0], [], []>} : vector<4x8xbf16>, vector<8x8xbf16>, vector<4x8xf32> -> vector<4x8xf32>
    "tpu.trace_stop"() : () -> ()
    %106 = vector.extract_strided_slice %70 {offsets = [0, 8], sizes = [4, 8], strides = [1, 1]} : vector<4x64xbf16> to vector<4x8xbf16>
    "tpu.trace_start"() <{level = 10 : i32, message = "id,jd->ij"}> : () -> ()
    %cst_50 = arith.constant dense<0.000000e+00> : vector<4x4xf32>
    %107 = tpu.matmul %103, %106, %cst_50 {dimension_numbers = #tpu.dot_dimension_numbers<[1], [1], [0], [0], [0, 0, 1, 0], [], []>} : vector<4x8xbf16>, vector<4x8xbf16>, vector<4x4xf32> -> vector<4x4xf32>
    "tpu.trace_stop"() : () -> ()
    %cst_51 = arith.constant dense<0xFF800000> : vector<4xf32>
    %108 = vector.multi_reduction <maximumf>, %105, %cst_51 [1] : vector<4x8xf32> to vector<4xf32>
    %109 = vector.shape_cast %108 : vector<4xf32> to vector<4x1xf32>
    %cst_52 = arith.constant dense<0xFF800000> : vector<4xf32>
    %110 = vector.multi_reduction <maximumf>, %107, %cst_52 [1] : vector<4x4xf32> to vector<4xf32>
    %111 = vector.shape_cast %110 : vector<4xf32> to vector<4x1xf32>
    %112 = arith.maximumf %109, %111 : vector<4x1xf32>
    %113 = vector.broadcast %112 : vector<4x1xf32> to vector<4x8xf32>
    %114 = arith.subf %105, %113 : vector<4x8xf32>
    %115 = math.exp %114 : vector<4x8xf32>
    %116 = vector.broadcast %112 : vector<4x1xf32> to vector<4x4xf32>
    %117 = arith.subf %107, %116 : vector<4x4xf32>
    %118 = math.exp %117 : vector<4x4xf32>
    %cst_53 = arith.constant dense<0.000000e+00> : vector<4xf32>
    %119 = vector.multi_reduction <add>, %115, %cst_53 [1] : vector<4x8xf32> to vector<4xf32>
    %120 = vector.shape_cast %119 : vector<4xf32> to vector<4x1xf32>
    %cst_54 = arith.constant dense<0.000000e+00> : vector<4xf32>
    %121 = vector.multi_reduction <add>, %118, %cst_54 [1] : vector<4x4xf32> to vector<4xf32>
    %122 = vector.shape_cast %121 : vector<4xf32> to vector<4x1xf32>
    %123 = arith.addf %120, %122 : vector<4x1xf32>
    %124 = tpu.reciprocal %123 {approx = true} : vector<4x1xf32> -> vector<4x1xf32>
    %125 = arith.truncf %115 : vector<4x8xf32> to vector<4x8xbf16>
    %126 = vector.extract_strided_slice %71 {offsets = [0, 40], sizes = [8, 8], strides = [1, 1]} : vector<8x64xbf16> to vector<8x8xbf16>
    %cst_55 = arith.constant dense<0.000000e+00> : vector<4x8xf32>
    %127 = tpu.matmul %125, %126, %cst_55 {dimension_numbers = #tpu.dot_dimension_numbers<[1], [0], [0], [1], [0, 0, 1, 1], [], []>} : vector<4x8xbf16>, vector<8x8xbf16>, vector<4x8xf32> -> vector<4x8xf32>
    %128 = arith.truncf %118 : vector<4x4xf32> to vector<4x4xbf16>
    %129 = vector.extract_strided_slice %70 {offsets = [0, 40], sizes = [4, 8], strides = [1, 1]} : vector<4x64xbf16> to vector<4x8xbf16>
    %cst_56 = arith.constant dense<0.000000e+00> : vector<4x8xf32>
    %130 = tpu.matmul %128, %129, %cst_56 {dimension_numbers = #tpu.dot_dimension_numbers<[1], [0], [0], [1], [0, 0, 1, 1], [], []>} : vector<4x4xbf16>, vector<4x8xbf16>, vector<4x8xf32> -> vector<4x8xf32>
    %131 = arith.addf %127, %130 : vector<4x8xf32>
    %132 = vector.broadcast %124 : vector<4x1xf32> to vector<4x8xf32>
    %133 = arith.mulf %131, %132 : vector<4x8xf32>
    %134 = vector.extract_strided_slice %69 {offsets = [0, 16], sizes = [4, 8], strides = [1, 1]} : vector<4x32xbf16> to vector<4x8xbf16>
    %135 = vector.extract_strided_slice %71 {offsets = [0, 16], sizes = [8, 8], strides = [1, 1]} : vector<8x64xbf16> to vector<8x8xbf16>
    "tpu.trace_start"() <{level = 10 : i32, message = "id,jd->ij"}> : () -> ()
    %cst_57 = arith.constant dense<0.000000e+00> : vector<4x8xf32>
    %136 = tpu.matmul %134, %135, %cst_57 {dimension_numbers = #tpu.dot_dimension_numbers<[1], [1], [0], [0], [0, 0, 1, 0], [], []>} : vector<4x8xbf16>, vector<8x8xbf16>, vector<4x8xf32> -> vector<4x8xf32>
    "tpu.trace_stop"() : () -> ()
    %137 = vector.extract_strided_slice %70 {offsets = [0, 16], sizes = [4, 8], strides = [1, 1]} : vector<4x64xbf16> to vector<4x8xbf16>
    "tpu.trace_start"() <{level = 10 : i32, message = "id,jd->ij"}> : () -> ()
    %cst_58 = arith.constant dense<0.000000e+00> : vector<4x4xf32>
    %138 = tpu.matmul %134, %137, %cst_58 {dimension_numbers = #tpu.dot_dimension_numbers<[1], [1], [0], [0], [0, 0, 1, 0], [], []>} : vector<4x8xbf16>, vector<4x8xbf16>, vector<4x4xf32> -> vector<4x4xf32>
    "tpu.trace_stop"() : () -> ()
    %cst_59 = arith.constant dense<0xFF800000> : vector<4xf32>
    %139 = vector.multi_reduction <maximumf>, %136, %cst_59 [1] : vector<4x8xf32> to vector<4xf32>
    %140 = vector.shape_cast %139 : vector<4xf32> to vector<4x1xf32>
    %cst_60 = arith.constant dense<0xFF800000> : vector<4xf32>
    %141 = vector.multi_reduction <maximumf>, %138, %cst_60 [1] : vector<4x4xf32> to vector<4xf32>
    %142 = vector.shape_cast %141 : vector<4xf32> to vector<4x1xf32>
    %143 = arith.maximumf %140, %142 : vector<4x1xf32>
    %144 = vector.broadcast %143 : vector<4x1xf32> to vector<4x8xf32>
    %145 = arith.subf %136, %144 : vector<4x8xf32>
    %146 = math.exp %145 : vector<4x8xf32>
    %147 = vector.broadcast %143 : vector<4x1xf32> to vector<4x4xf32>
    %148 = arith.subf %138, %147 : vector<4x4xf32>
    %149 = math.exp %148 : vector<4x4xf32>
    %cst_61 = arith.constant dense<0.000000e+00> : vector<4xf32>
    %150 = vector.multi_reduction <add>, %146, %cst_61 [1] : vector<4x8xf32> to vector<4xf32>
    %151 = vector.shape_cast %150 : vector<4xf32> to vector<4x1xf32>
    %cst_62 = arith.constant dense<0.000000e+00> : vector<4xf32>
    %152 = vector.multi_reduction <add>, %149, %cst_62 [1] : vector<4x4xf32> to vector<4xf32>
    %153 = vector.shape_cast %152 : vector<4xf32> to vector<4x1xf32>
    %154 = arith.addf %151, %153 : vector<4x1xf32>
    %155 = tpu.reciprocal %154 {approx = true} : vector<4x1xf32> -> vector<4x1xf32>
    %156 = arith.truncf %146 : vector<4x8xf32> to vector<4x8xbf16>
    %157 = vector.extract_strided_slice %71 {offsets = [0, 48], sizes = [8, 8], strides = [1, 1]} : vector<8x64xbf16> to vector<8x8xbf16>
    %cst_63 = arith.constant dense<0.000000e+00> : vector<4x8xf32>
    %158 = tpu.matmul %156, %157, %cst_63 {dimension_numbers = #tpu.dot_dimension_numbers<[1], [0], [0], [1], [0, 0, 1, 1], [], []>} : vector<4x8xbf16>, vector<8x8xbf16>, vector<4x8xf32> -> vector<4x8xf32>
    %159 = arith.truncf %149 : vector<4x4xf32> to vector<4x4xbf16>
    %160 = vector.extract_strided_slice %70 {offsets = [0, 48], sizes = [4, 8], strides = [1, 1]} : vector<4x64xbf16> to vector<4x8xbf16>
    %cst_64 = arith.constant dense<0.000000e+00> : vector<4x8xf32>
    %161 = tpu.matmul %159, %160, %cst_64 {dimension_numbers = #tpu.dot_dimension_numbers<[1], [0], [0], [1], [0, 0, 1, 1], [], []>} : vector<4x4xbf16>, vector<4x8xbf16>, vector<4x8xf32> -> vector<4x8xf32>
    %162 = arith.addf %158, %161 : vector<4x8xf32>
    %163 = vector.broadcast %155 : vector<4x1xf32> to vector<4x8xf32>
    %164 = arith.mulf %162, %163 : vector<4x8xf32>
    %165 = vector.extract_strided_slice %69 {offsets = [0, 24], sizes = [4, 8], strides = [1, 1]} : vector<4x32xbf16> to vector<4x8xbf16>
    %166 = vector.extract_strided_slice %71 {offsets = [0, 24], sizes = [8, 8], strides = [1, 1]} : vector<8x64xbf16> to vector<8x8xbf16>
    "tpu.trace_start"() <{level = 10 : i32, message = "id,jd->ij"}> : () -> ()
    %cst_65 = arith.constant dense<0.000000e+00> : vector<4x8xf32>
    %167 = tpu.matmul %165, %166, %cst_65 {dimension_numbers = #tpu.dot_dimension_numbers<[1], [1], [0], [0], [0, 0, 1, 0], [], []>} : vector<4x8xbf16>, vector<8x8xbf16>, vector<4x8xf32> -> vector<4x8xf32>
    "tpu.trace_stop"() : () -> ()
    %168 = vector.extract_strided_slice %70 {offsets = [0, 24], sizes = [4, 8], strides = [1, 1]} : vector<4x64xbf16> to vector<4x8xbf16>
    "tpu.trace_start"() <{level = 10 : i32, message = "id,jd->ij"}> : () -> ()
    %cst_66 = arith.constant dense<0.000000e+00> : vector<4x4xf32>
    %169 = tpu.matmul %165, %168, %cst_66 {dimension_numbers = #tpu.dot_dimension_numbers<[1], [1], [0], [0], [0, 0, 1, 0], [], []>} : vector<4x8xbf16>, vector<4x8xbf16>, vector<4x4xf32> -> vector<4x4xf32>
    "tpu.trace_stop"() : () -> ()
    %cst_67 = arith.constant dense<0xFF800000> : vector<4xf32>
    %170 = vector.multi_reduction <maximumf>, %167, %cst_67 [1] : vector<4x8xf32> to vector<4xf32>
    %171 = vector.shape_cast %170 : vector<4xf32> to vector<4x1xf32>
    %cst_68 = arith.constant dense<0xFF800000> : vector<4xf32>
    %172 = vector.multi_reduction <maximumf>, %169, %cst_68 [1] : vector<4x4xf32> to vector<4xf32>
    %173 = vector.shape_cast %172 : vector<4xf32> to vector<4x1xf32>
    %174 = arith.maximumf %171, %173 : vector<4x1xf32>
    %175 = vector.broadcast %174 : vector<4x1xf32> to vector<4x8xf32>
    %176 = arith.subf %167, %175 : vector<4x8xf32>
    %177 = math.exp %176 : vector<4x8xf32>
    %178 = vector.broadcast %174 : vector<4x1xf32> to vector<4x4xf32>
    %179 = arith.subf %169, %178 : vector<4x4xf32>
    %180 = math.exp %179 : vector<4x4xf32>
    %cst_69 = arith.constant dense<0.000000e+00> : vector<4xf32>
    %181 = vector.multi_reduction <add>, %177, %cst_69 [1] : vector<4x8xf32> to vector<4xf32>
    %182 = vector.shape_cast %181 : vector<4xf32> to vector<4x1xf32>
    %cst_70 = arith.constant dense<0.000000e+00> : vector<4xf32>
    %183 = vector.multi_reduction <add>, %180, %cst_70 [1] : vector<4x4xf32> to vector<4xf32>
    %184 = vector.shape_cast %183 : vector<4xf32> to vector<4x1xf32>
    %185 = arith.addf %182, %184 : vector<4x1xf32>
    %186 = tpu.reciprocal %185 {approx = true} : vector<4x1xf32> -> vector<4x1xf32>
    %187 = arith.truncf %177 : vector<4x8xf32> to vector<4x8xbf16>
    %188 = vector.extract_strided_slice %71 {offsets = [0, 56], sizes = [8, 8], strides = [1, 1]} : vector<8x64xbf16> to vector<8x8xbf16>
    %cst_71 = arith.constant dense<0.000000e+00> : vector<4x8xf32>
    %189 = tpu.matmul %187, %188, %cst_71 {dimension_numbers = #tpu.dot_dimension_numbers<[1], [0], [0], [1], [0, 0, 1, 1], [], []>} : vector<4x8xbf16>, vector<8x8xbf16>, vector<4x8xf32> -> vector<4x8xf32>
    %190 = arith.truncf %180 : vector<4x4xf32> to vector<4x4xbf16>
    %191 = vector.extract_strided_slice %70 {offsets = [0, 56], sizes = [4, 8], strides = [1, 1]} : vector<4x64xbf16> to vector<4x8xbf16>
    %cst_72 = arith.constant dense<0.000000e+00> : vector<4x8xf32>
    %192 = tpu.matmul %190, %191, %cst_72 {dimension_numbers = #tpu.dot_dimension_numbers<[1], [0], [0], [1], [0, 0, 1, 1], [], []>} : vector<4x4xbf16>, vector<4x8xbf16>, vector<4x8xf32> -> vector<4x8xf32>
    %193 = arith.addf %189, %192 : vector<4x8xf32>
    %194 = vector.broadcast %186 : vector<4x1xf32> to vector<4x8xf32>
    %195 = arith.mulf %193, %194 : vector<4x8xf32>
    %196 = tpu.concatenate %102, %133, %164, %195 in 1 : vector<4x8xf32>, vector<4x8xf32>, vector<4x8xf32>, vector<4x8xf32> -> vector<4x32xf32>
    %197 = arith.truncf %196 : vector<4x32xf32> to vector<4x32xbf16>
    %c0_73 = arith.constant 0 : index
    %c0_74 = arith.constant 0 : index
    %c0_75 = arith.constant 0 : index
    %198 = vector.load %arg12[%c0_73, %c0_74, %c0_75] : memref<2x32x32xbf16, #tpu.memory_space<vmem>>, vector<1x32x32xbf16>
    %199 = vector.shape_cast %198 : vector<1x32x32xbf16> to vector<32x32xbf16>
    %cst_76 = arith.constant dense<0.000000e+00> : vector<4x32xf32>
    %200 = tpu.matmul %197, %199, %cst_76 {dimension_numbers = #tpu.dot_dimension_numbers<[1], [0], [0], [1], [0, 0, 1, 1], [], []>} : vector<4x32xbf16>, vector<32x32xbf16>, vector<4x32xf32> -> vector<4x32xf32>
    %201 = arith.addf %200, %29 : vector<4x32xf32>
    %cst_77 = arith.constant dense<0.000000e+00> : vector<4xf32>
    %202 = vector.multi_reduction <add>, %201, %cst_77 [1] : vector<4x32xf32> to vector<4xf32>
    %203 = vector.shape_cast %202 : vector<4xf32> to vector<4x1xf32>
    %cst_78 = arith.constant 3.200000e+01 : f32
    %204 = vector.broadcast %cst_78 : f32 to vector<4x1xf32>
    %205 = arith.divf %203, %204 : vector<4x1xf32>
    %206 = vector.broadcast %205 : vector<4x1xf32> to vector<4x32xf32>
    %207 = arith.subf %201, %206 : vector<4x32xf32>
    %208 = arith.mulf %207, %207 : vector<4x32xf32>
    %cst_79 = arith.constant dense<0.000000e+00> : vector<4xf32>
    %209 = vector.multi_reduction <add>, %208, %cst_79 [1] : vector<4x32xf32> to vector<4xf32>
    %210 = vector.shape_cast %209 : vector<4xf32> to vector<4x1xf32>
    %cst_80 = arith.constant 3.200000e+01 : f32
    %211 = vector.broadcast %cst_80 : f32 to vector<4x1xf32>
    %212 = arith.divf %210, %211 : vector<4x1xf32>
    %cst_81 = arith.constant 9.99999974E-6 : f32
    %213 = vector.broadcast %cst_81 : f32 to vector<4x1xf32>
    %214 = arith.addf %212, %213 : vector<4x1xf32>
    %215 = math.rsqrt %214 : vector<4x1xf32>
    %216 = vector.broadcast %215 : vector<4x1xf32> to vector<4x32xf32>
    %217 = arith.mulf %207, %216 : vector<4x32xf32>
    %218 = arith.truncf %217 : vector<4x32xf32> to vector<4x32xbf16>
    %c0_82 = arith.constant 0 : index
    %c0_83 = arith.constant 0 : index
    %c0_84 = arith.constant 0 : index
    %219 = vector.load %arg13[%c0_82, %c0_83, %c0_84] : memref<2x32x128xbf16, #tpu.memory_space<vmem>>, vector<1x32x128xbf16>
    %220 = vector.shape_cast %219 : vector<1x32x128xbf16> to vector<32x128xbf16>
    %cst_85 = arith.constant dense<0.000000e+00> : vector<4x128xf32>
    %221 = tpu.matmul %218, %220, %cst_85 {dimension_numbers = #tpu.dot_dimension_numbers<[1], [0], [0], [1], [0, 0, 1, 1], [], []>} : vector<4x32xbf16>, vector<32x128xbf16>, vector<4x128xf32> -> vector<4x128xf32>
    %c0_86 = arith.constant 0 : index
    %c0_87 = arith.constant 0 : index
    %c0_88 = arith.constant 0 : index
    %222 = vector.load %arg14[%c0_86, %c0_87, %c0_88] : memref<2x1x128xf32, #tpu.memory_space<vmem>>, vector<1x1x128xf32>
    %223 = vector.shape_cast %222 : vector<1x1x128xf32> to vector<1x128xf32>
    %224 = vector.broadcast %223 : vector<1x128xf32> to vector<4x128xf32>
    %225 = arith.addf %221, %224 : vector<4x128xf32>
    %cst_89 = arith.constant 0.707106769 : f32
    %226 = vector.broadcast %cst_89 : f32 to vector<4x128xf32>
    %227 = arith.mulf %225, %226 : vector<4x128xf32>
    %228 = math.absf %227 : vector<4x128xf32>
    %cst_90 = arith.constant 0.327591091 : f32
    %229 = vector.broadcast %cst_90 : f32 to vector<4x128xf32>
    %230 = arith.mulf %229, %228 : vector<4x128xf32>
    %cst_91 = arith.constant 1.000000e+00 : f32
    %231 = vector.broadcast %cst_91 : f32 to vector<4x128xf32>
    %232 = arith.addf %231, %230 : vector<4x128xf32>
    %cst_92 = arith.constant 1.000000e+00 : f32
    %233 = vector.broadcast %cst_92 : f32 to vector<4x128xf32>
    %234 = arith.divf %233, %232 : vector<4x128xf32>
    %cst_93 = arith.constant 1.06140542 : f32
    %235 = vector.broadcast %cst_93 : f32 to vector<4x128xf32>
    %236 = arith.mulf %235, %234 : vector<4x128xf32>
    %cst_94 = arith.constant -1.45315206 : f32
    %237 = vector.broadcast %cst_94 : f32 to vector<4x128xf32>
    %238 = arith.addf %236, %237 : vector<4x128xf32>
    %239 = arith.mulf %238, %234 : vector<4x128xf32>
    %cst_95 = arith.constant 1.42141378 : f32
    %240 = vector.broadcast %cst_95 : f32 to vector<4x128xf32>
    %241 = arith.addf %239, %240 : vector<4x128xf32>
    %242 = arith.mulf %241, %234 : vector<4x128xf32>
    %cst_96 = arith.constant -0.284496725 : f32
    %243 = vector.broadcast %cst_96 : f32 to vector<4x128xf32>
    %244 = arith.addf %242, %243 : vector<4x128xf32>
    %245 = arith.mulf %244, %234 : vector<4x128xf32>
    %cst_97 = arith.constant 0.254829586 : f32
    %246 = vector.broadcast %cst_97 : f32 to vector<4x128xf32>
    %247 = arith.addf %245, %246 : vector<4x128xf32>
    %248 = arith.mulf %247, %234 : vector<4x128xf32>
    %249 = arith.mulf %228, %228 : vector<4x128xf32>
    %cst_98 = arith.constant 0.000000e+00 : f32
    %250 = vector.broadcast %cst_98 : f32 to vector<4x128xf32>
    %251 = arith.subf %250, %249 : vector<4x128xf32>
    %252 = math.exp %251 : vector<4x128xf32>
    %253 = arith.mulf %248, %252 : vector<4x128xf32>
    %cst_99 = arith.constant 1.000000e+00 : f32
    %254 = vector.broadcast %cst_99 : f32 to vector<4x128xf32>
    %255 = arith.subf %254, %253 : vector<4x128xf32>
    %cst_100 = arith.constant 0.000000e+00 : f32
    %256 = vector.broadcast %cst_100 : f32 to vector<4x128xf32>
    %257 = arith.cmpf olt, %227, %256 : vector<4x128xf32>
    %cst_101 = arith.constant 0.000000e+00 : f32
    %258 = vector.broadcast %cst_101 : f32 to vector<4x128xf32>
    %259 = arith.subf %258, %255 : vector<4x128xf32>
    %260 = arith.select %257, %259, %255 : vector<4x128xi1>, vector<4x128xf32>
    %cst_102 = arith.constant 1.000000e+00 : f32
    %261 = vector.broadcast %cst_102 : f32 to vector<4x128xf32>
    %262 = arith.addf %261, %260 : vector<4x128xf32>
    %cst_103 = arith.constant 5.000000e-01 : f32
    %263 = vector.broadcast %cst_103 : f32 to vector<4x128xf32>
    %264 = arith.mulf %263, %262 : vector<4x128xf32>
    %265 = arith.mulf %225, %264 : vector<4x128xf32>
    %266 = arith.truncf %265 : vector<4x128xf32> to vector<4x128xbf16>
    %c0_104 = arith.constant 0 : index
    %c0_105 = arith.constant 0 : index
    %c0_106 = arith.constant 0 : index
    %267 = vector.load %arg15[%c0_104, %c0_105, %c0_106] : memref<2x128x32xbf16, #tpu.memory_space<vmem>>, vector<1x128x32xbf16>
    %268 = vector.shape_cast %267 : vector<1x128x32xbf16> to vector<128x32xbf16>
    %cst_107 = arith.constant dense<0.000000e+00> : vector<4x32xf32>
    %269 = tpu.matmul %266, %268, %cst_107 {dimension_numbers = #tpu.dot_dimension_numbers<[1], [0], [0], [1], [0, 0, 1, 1], [], []>} : vector<4x128xbf16>, vector<128x32xbf16>, vector<4x32xf32> -> vector<4x32xf32>
    %270 = arith.addf %269, %201 : vector<4x32xf32>
    %cst_108 = arith.constant dense<0.000000e+00> : vector<4xf32>
    %271 = vector.multi_reduction <add>, %29, %cst_108 [1] : vector<4x32xf32> to vector<4xf32>
    %272 = vector.shape_cast %271 : vector<4xf32> to vector<4x1xf32>
    %cst_109 = arith.constant 3.200000e+01 : f32
    %273 = vector.broadcast %cst_109 : f32 to vector<4x1xf32>
    %274 = arith.divf %272, %273 : vector<4x1xf32>
    %275 = vector.broadcast %274 : vector<4x1xf32> to vector<4x32xf32>
    %276 = arith.subf %29, %275 : vector<4x32xf32>
    %277 = arith.mulf %276, %276 : vector<4x32xf32>
    %cst_110 = arith.constant dense<0.000000e+00> : vector<4xf32>
    %278 = vector.multi_reduction <add>, %277, %cst_110 [1] : vector<4x32xf32> to vector<4xf32>
    %279 = vector.shape_cast %278 : vector<4xf32> to vector<4x1xf32>
    %cst_111 = arith.constant 3.200000e+01 : f32
    %280 = vector.broadcast %cst_111 : f32 to vector<4x1xf32>
    %281 = arith.divf %279, %280 : vector<4x1xf32>
    %cst_112 = arith.constant 9.99999974E-6 : f32
    %282 = vector.broadcast %cst_112 : f32 to vector<4x1xf32>
    %283 = arith.addf %281, %282 : vector<4x1xf32>
    %284 = math.rsqrt %283 : vector<4x1xf32>
    %285 = vector.broadcast %284 : vector<4x1xf32> to vector<4x32xf32>
    %286 = arith.mulf %276, %285 : vector<4x32xf32>
    %287 = arith.truncf %286 : vector<4x32xf32> to vector<4x32xbf16>
    %c0_113 = arith.constant 0 : index
    %c0_114 = arith.constant 0 : index
    %c0_115 = arith.constant 0 : index
    %288 = vector.load %arg6[%c0_113, %c0_114, %c0_115] : memref<2x32x32xbf16, #tpu.memory_space<vmem>>, vector<1x32x32xbf16>
    %289 = vector.shape_cast %288 : vector<1x32x32xbf16> to vector<32x32xbf16>
    %cst_116 = arith.constant dense<0.000000e+00> : vector<4x32xf32>
    %290 = tpu.matmul %287, %289, %cst_116 {dimension_numbers = #tpu.dot_dimension_numbers<[1], [0], [0], [1], [0, 0, 1, 1], [], []>} : vector<4x32xbf16>, vector<32x32xbf16>, vector<4x32xf32> -> vector<4x32xf32>
    %c0_117 = arith.constant 0 : index
    %c0_118 = arith.constant 0 : index
    %c0_119 = arith.constant 0 : index
    %291 = vector.load %arg7[%c0_117, %c0_118, %c0_119] : memref<2x1x32xf32, #tpu.memory_space<vmem>>, vector<1x1x32xf32>
    %292 = vector.shape_cast %291 : vector<1x1x32xf32> to vector<1x32xf32>
    %293 = vector.broadcast %292 : vector<1x32xf32> to vector<4x32xf32>
    %294 = arith.addf %290, %293 : vector<4x32xf32>
    %c0_120 = arith.constant 0 : index
    %c0_121 = arith.constant 0 : index
    %c0_122 = arith.constant 0 : index
    %295 = vector.load %arg10[%c0_120, %c0_121, %c0_122] : memref<2x32x64xbf16, #tpu.memory_space<vmem>>, vector<1x32x64xbf16>
    %296 = vector.shape_cast %295 : vector<1x32x64xbf16> to vector<32x64xbf16>
    %cst_123 = arith.constant dense<0.000000e+00> : vector<4x64xf32>
    %297 = tpu.matmul %287, %296, %cst_123 {dimension_numbers = #tpu.dot_dimension_numbers<[1], [0], [0], [1], [0, 0, 1, 1], [], []>} : vector<4x32xbf16>, vector<32x64xbf16>, vector<4x64xf32> -> vector<4x64xf32>
    %c0_124 = arith.constant 0 : index
    %c0_125 = arith.constant 0 : index
    %c0_126 = arith.constant 0 : index
    %298 = vector.load %arg11[%c0_124, %c0_125, %c0_126] : memref<2x1x64xf32, #tpu.memory_space<vmem>>, vector<1x1x64xf32>
    %299 = vector.shape_cast %298 : vector<1x1x64xf32> to vector<1x64xf32>
    %300 = vector.broadcast %299 : vector<1x64xf32> to vector<4x64xf32>
    %301 = arith.addf %297, %300 : vector<4x64xf32>
    %302 = arith.truncf %294 : vector<4x32xf32> to vector<4x32xbf16>
    %303 = arith.truncf %301 : vector<4x64xf32> to vector<4x64xbf16>
    %304 = vector.extract_strided_slice %37 {offsets = [8, 0], sizes = [8, 64], strides = [1, 1]} : vector<24x64xbf16> to vector<8x64xbf16>
    %305 = vector.extract_strided_slice %302 {offsets = [0, 0], sizes = [4, 8], strides = [1, 1]} : vector<4x32xbf16> to vector<4x8xbf16>
    %306 = vector.extract_strided_slice %304 {offsets = [0, 0], sizes = [8, 8], strides = [1, 1]} : vector<8x64xbf16> to vector<8x8xbf16>
    "tpu.trace_start"() <{level = 10 : i32, message = "id,jd->ij"}> : () -> ()
    %cst_127 = arith.constant dense<0.000000e+00> : vector<4x8xf32>
    %307 = tpu.matmul %305, %306, %cst_127 {dimension_numbers = #tpu.dot_dimension_numbers<[1], [1], [0], [0], [0, 0, 1, 0], [], []>} : vector<4x8xbf16>, vector<8x8xbf16>, vector<4x8xf32> -> vector<4x8xf32>
    "tpu.trace_stop"() : () -> ()
    %308 = vector.extract_strided_slice %303 {offsets = [0, 0], sizes = [4, 8], strides = [1, 1]} : vector<4x64xbf16> to vector<4x8xbf16>
    "tpu.trace_start"() <{level = 10 : i32, message = "id,jd->ij"}> : () -> ()
    %cst_128 = arith.constant dense<0.000000e+00> : vector<4x4xf32>
    %309 = tpu.matmul %305, %308, %cst_128 {dimension_numbers = #tpu.dot_dimension_numbers<[1], [1], [0], [0], [0, 0, 1, 0], [], []>} : vector<4x8xbf16>, vector<4x8xbf16>, vector<4x4xf32> -> vector<4x4xf32>
    "tpu.trace_stop"() : () -> ()
    %cst_129 = arith.constant dense<0xFF800000> : vector<4xf32>
    %310 = vector.multi_reduction <maximumf>, %307, %cst_129 [1] : vector<4x8xf32> to vector<4xf32>
    %311 = vector.shape_cast %310 : vector<4xf32> to vector<4x1xf32>
    %cst_130 = arith.constant dense<0xFF800000> : vector<4xf32>
    %312 = vector.multi_reduction <maximumf>, %309, %cst_130 [1] : vector<4x4xf32> to vector<4xf32>
    %313 = vector.shape_cast %312 : vector<4xf32> to vector<4x1xf32>
    %314 = arith.maximumf %311, %313 : vector<4x1xf32>
    %315 = vector.broadcast %314 : vector<4x1xf32> to vector<4x8xf32>
    %316 = arith.subf %307, %315 : vector<4x8xf32>
    %317 = math.exp %316 : vector<4x8xf32>
    %318 = vector.broadcast %314 : vector<4x1xf32> to vector<4x4xf32>
    %319 = arith.subf %309, %318 : vector<4x4xf32>
    %320 = math.exp %319 : vector<4x4xf32>
    %cst_131 = arith.constant dense<0.000000e+00> : vector<4xf32>
    %321 = vector.multi_reduction <add>, %317, %cst_131 [1] : vector<4x8xf32> to vector<4xf32>
    %322 = vector.shape_cast %321 : vector<4xf32> to vector<4x1xf32>
    %cst_132 = arith.constant dense<0.000000e+00> : vector<4xf32>
    %323 = vector.multi_reduction <add>, %320, %cst_132 [1] : vector<4x4xf32> to vector<4xf32>
    %324 = vector.shape_cast %323 : vector<4xf32> to vector<4x1xf32>
    %325 = arith.addf %322, %324 : vector<4x1xf32>
    %326 = tpu.reciprocal %325 {approx = true} : vector<4x1xf32> -> vector<4x1xf32>
    %327 = arith.truncf %317 : vector<4x8xf32> to vector<4x8xbf16>
    %328 = vector.extract_strided_slice %304 {offsets = [0, 32], sizes = [8, 8], strides = [1, 1]} : vector<8x64xbf16> to vector<8x8xbf16>
    %cst_133 = arith.constant dense<0.000000e+00> : vector<4x8xf32>
    %329 = tpu.matmul %327, %328, %cst_133 {dimension_numbers = #tpu.dot_dimension_numbers<[1], [0], [0], [1], [0, 0, 1, 1], [], []>} : vector<4x8xbf16>, vector<8x8xbf16>, vector<4x8xf32> -> vector<4x8xf32>
    %330 = arith.truncf %320 : vector<4x4xf32> to vector<4x4xbf16>
    %331 = vector.extract_strided_slice %303 {offsets = [0, 32], sizes = [4, 8], strides = [1, 1]} : vector<4x64xbf16> to vector<4x8xbf16>
    %cst_134 = arith.constant dense<0.000000e+00> : vector<4x8xf32>
    %332 = tpu.matmul %330, %331, %cst_134 {dimension_numbers = #tpu.dot_dimension_numbers<[1], [0], [0], [1], [0, 0, 1, 1], [], []>} : vector<4x4xbf16>, vector<4x8xbf16>, vector<4x8xf32> -> vector<4x8xf32>
    %333 = arith.addf %329, %332 : vector<4x8xf32>
    %334 = vector.broadcast %326 : vector<4x1xf32> to vector<4x8xf32>
    %335 = arith.mulf %333, %334 : vector<4x8xf32>
    %336 = vector.extract_strided_slice %302 {offsets = [0, 8], sizes = [4, 8], strides = [1, 1]} : vector<4x32xbf16> to vector<4x8xbf16>
    %337 = vector.extract_strided_slice %304 {offsets = [0, 8], sizes = [8, 8], strides = [1, 1]} : vector<8x64xbf16> to vector<8x8xbf16>
    "tpu.trace_start"() <{level = 10 : i32, message = "id,jd->ij"}> : () -> ()
    %cst_135 = arith.constant dense<0.000000e+00> : vector<4x8xf32>
    %338 = tpu.matmul %336, %337, %cst_135 {dimension_numbers = #tpu.dot_dimension_numbers<[1], [1], [0], [0], [0, 0, 1, 0], [], []>} : vector<4x8xbf16>, vector<8x8xbf16>, vector<4x8xf32> -> vector<4x8xf32>
    "tpu.trace_stop"() : () -> ()
    %339 = vector.extract_strided_slice %303 {offsets = [0, 8], sizes = [4, 8], strides = [1, 1]} : vector<4x64xbf16> to vector<4x8xbf16>
    "tpu.trace_start"() <{level = 10 : i32, message = "id,jd->ij"}> : () -> ()
    %cst_136 = arith.constant dense<0.000000e+00> : vector<4x4xf32>
    %340 = tpu.matmul %336, %339, %cst_136 {dimension_numbers = #tpu.dot_dimension_numbers<[1], [1], [0], [0], [0, 0, 1, 0], [], []>} : vector<4x8xbf16>, vector<4x8xbf16>, vector<4x4xf32> -> vector<4x4xf32>
    "tpu.trace_stop"() : () -> ()
    %cst_137 = arith.constant dense<0xFF800000> : vector<4xf32>
    %341 = vector.multi_reduction <maximumf>, %338, %cst_137 [1] : vector<4x8xf32> to vector<4xf32>
    %342 = vector.shape_cast %341 : vector<4xf32> to vector<4x1xf32>
    %cst_138 = arith.constant dense<0xFF800000> : vector<4xf32>
    %343 = vector.multi_reduction <maximumf>, %340, %cst_138 [1] : vector<4x4xf32> to vector<4xf32>
    %344 = vector.shape_cast %343 : vector<4xf32> to vector<4x1xf32>
    %345 = arith.maximumf %342, %344 : vector<4x1xf32>
    %346 = vector.broadcast %345 : vector<4x1xf32> to vector<4x8xf32>
    %347 = arith.subf %338, %346 : vector<4x8xf32>
    %348 = math.exp %347 : vector<4x8xf32>
    %349 = vector.broadcast %345 : vector<4x1xf32> to vector<4x4xf32>
    %350 = arith.subf %340, %349 : vector<4x4xf32>
    %351 = math.exp %350 : vector<4x4xf32>
    %cst_139 = arith.constant dense<0.000000e+00> : vector<4xf32>
    %352 = vector.multi_reduction <add>, %348, %cst_139 [1] : vector<4x8xf32> to vector<4xf32>
    %353 = vector.shape_cast %352 : vector<4xf32> to vector<4x1xf32>
    %cst_140 = arith.constant dense<0.000000e+00> : vector<4xf32>
    %354 = vector.multi_reduction <add>, %351, %cst_140 [1] : vector<4x4xf32> to vector<4xf32>
    %355 = vector.shape_cast %354 : vector<4xf32> to vector<4x1xf32>
    %356 = arith.addf %353, %355 : vector<4x1xf32>
    %357 = tpu.reciprocal %356 {approx = true} : vector<4x1xf32> -> vector<4x1xf32>
    %358 = arith.truncf %348 : vector<4x8xf32> to vector<4x8xbf16>
    %359 = vector.extract_strided_slice %304 {offsets = [0, 40], sizes = [8, 8], strides = [1, 1]} : vector<8x64xbf16> to vector<8x8xbf16>
    %cst_141 = arith.constant dense<0.000000e+00> : vector<4x8xf32>
    %360 = tpu.matmul %358, %359, %cst_141 {dimension_numbers = #tpu.dot_dimension_numbers<[1], [0], [0], [1], [0, 0, 1, 1], [], []>} : vector<4x8xbf16>, vector<8x8xbf16>, vector<4x8xf32> -> vector<4x8xf32>
    %361 = arith.truncf %351 : vector<4x4xf32> to vector<4x4xbf16>
    %362 = vector.extract_strided_slice %303 {offsets = [0, 40], sizes = [4, 8], strides = [1, 1]} : vector<4x64xbf16> to vector<4x8xbf16>
    %cst_142 = arith.constant dense<0.000000e+00> : vector<4x8xf32>
    %363 = tpu.matmul %361, %362, %cst_142 {dimension_numbers = #tpu.dot_dimension_numbers<[1], [0], [0], [1], [0, 0, 1, 1], [], []>} : vector<4x4xbf16>, vector<4x8xbf16>, vector<4x8xf32> -> vector<4x8xf32>
    %364 = arith.addf %360, %363 : vector<4x8xf32>
    %365 = vector.broadcast %357 : vector<4x1xf32> to vector<4x8xf32>
    %366 = arith.mulf %364, %365 : vector<4x8xf32>
    %367 = vector.extract_strided_slice %302 {offsets = [0, 16], sizes = [4, 8], strides = [1, 1]} : vector<4x32xbf16> to vector<4x8xbf16>
    %368 = vector.extract_strided_slice %304 {offsets = [0, 16], sizes = [8, 8], strides = [1, 1]} : vector<8x64xbf16> to vector<8x8xbf16>
    "tpu.trace_start"() <{level = 10 : i32, message = "id,jd->ij"}> : () -> ()
    %cst_143 = arith.constant dense<0.000000e+00> : vector<4x8xf32>
    %369 = tpu.matmul %367, %368, %cst_143 {dimension_numbers = #tpu.dot_dimension_numbers<[1], [1], [0], [0], [0, 0, 1, 0], [], []>} : vector<4x8xbf16>, vector<8x8xbf16>, vector<4x8xf32> -> vector<4x8xf32>
    "tpu.trace_stop"() : () -> ()
    %370 = vector.extract_strided_slice %303 {offsets = [0, 16], sizes = [4, 8], strides = [1, 1]} : vector<4x64xbf16> to vector<4x8xbf16>
    "tpu.trace_start"() <{level = 10 : i32, message = "id,jd->ij"}> : () -> ()
    %cst_144 = arith.constant dense<0.000000e+00> : vector<4x4xf32>
    %371 = tpu.matmul %367, %370, %cst_144 {dimension_numbers = #tpu.dot_dimension_numbers<[1], [1], [0], [0], [0, 0, 1, 0], [], []>} : vector<4x8xbf16>, vector<4x8xbf16>, vector<4x4xf32> -> vector<4x4xf32>
    "tpu.trace_stop"() : () -> ()
    %cst_145 = arith.constant dense<0xFF800000> : vector<4xf32>
    %372 = vector.multi_reduction <maximumf>, %369, %cst_145 [1] : vector<4x8xf32> to vector<4xf32>
    %373 = vector.shape_cast %372 : vector<4xf32> to vector<4x1xf32>
    %cst_146 = arith.constant dense<0xFF800000> : vector<4xf32>
    %374 = vector.multi_reduction <maximumf>, %371, %cst_146 [1] : vector<4x4xf32> to vector<4xf32>
    %375 = vector.shape_cast %374 : vector<4xf32> to vector<4x1xf32>
    %376 = arith.maximumf %373, %375 : vector<4x1xf32>
    %377 = vector.broadcast %376 : vector<4x1xf32> to vector<4x8xf32>
    %378 = arith.subf %369, %377 : vector<4x8xf32>
    %379 = math.exp %378 : vector<4x8xf32>
    %380 = vector.broadcast %376 : vector<4x1xf32> to vector<4x4xf32>
    %381 = arith.subf %371, %380 : vector<4x4xf32>
    %382 = math.exp %381 : vector<4x4xf32>
    %cst_147 = arith.constant dense<0.000000e+00> : vector<4xf32>
    %383 = vector.multi_reduction <add>, %379, %cst_147 [1] : vector<4x8xf32> to vector<4xf32>
    %384 = vector.shape_cast %383 : vector<4xf32> to vector<4x1xf32>
    %cst_148 = arith.constant dense<0.000000e+00> : vector<4xf32>
    %385 = vector.multi_reduction <add>, %382, %cst_148 [1] : vector<4x4xf32> to vector<4xf32>
    %386 = vector.shape_cast %385 : vector<4xf32> to vector<4x1xf32>
    %387 = arith.addf %384, %386 : vector<4x1xf32>
    %388 = tpu.reciprocal %387 {approx = true} : vector<4x1xf32> -> vector<4x1xf32>
    %389 = arith.truncf %379 : vector<4x8xf32> to vector<4x8xbf16>
    %390 = vector.extract_strided_slice %304 {offsets = [0, 48], sizes = [8, 8], strides = [1, 1]} : vector<8x64xbf16> to vector<8x8xbf16>
    %cst_149 = arith.constant dense<0.000000e+00> : vector<4x8xf32>
    %391 = tpu.matmul %389, %390, %cst_149 {dimension_numbers = #tpu.dot_dimension_numbers<[1], [0], [0], [1], [0, 0, 1, 1], [], []>} : vector<4x8xbf16>, vector<8x8xbf16>, vector<4x8xf32> -> vector<4x8xf32>
    %392 = arith.truncf %382 : vector<4x4xf32> to vector<4x4xbf16>
    %393 = vector.extract_strided_slice %303 {offsets = [0, 48], sizes = [4, 8], strides = [1, 1]} : vector<4x64xbf16> to vector<4x8xbf16>
    %cst_150 = arith.constant dense<0.000000e+00> : vector<4x8xf32>
    %394 = tpu.matmul %392, %393, %cst_150 {dimension_numbers = #tpu.dot_dimension_numbers<[1], [0], [0], [1], [0, 0, 1, 1], [], []>} : vector<4x4xbf16>, vector<4x8xbf16>, vector<4x8xf32> -> vector<4x8xf32>
    %395 = arith.addf %391, %394 : vector<4x8xf32>
    %396 = vector.broadcast %388 : vector<4x1xf32> to vector<4x8xf32>
    %397 = arith.mulf %395, %396 : vector<4x8xf32>
    %398 = vector.extract_strided_slice %302 {offsets = [0, 24], sizes = [4, 8], strides = [1, 1]} : vector<4x32xbf16> to vector<4x8xbf16>
    %399 = vector.extract_strided_slice %304 {offsets = [0, 24], sizes = [8, 8], strides = [1, 1]} : vector<8x64xbf16> to vector<8x8xbf16>
    "tpu.trace_start"() <{level = 10 : i32, message = "id,jd->ij"}> : () -> ()
    %cst_151 = arith.constant dense<0.000000e+00> : vector<4x8xf32>
    %400 = tpu.matmul %398, %399, %cst_151 {dimension_numbers = #tpu.dot_dimension_numbers<[1], [1], [0], [0], [0, 0, 1, 0], [], []>} : vector<4x8xbf16>, vector<8x8xbf16>, vector<4x8xf32> -> vector<4x8xf32>
    "tpu.trace_stop"() : () -> ()
    %401 = vector.extract_strided_slice %303 {offsets = [0, 24], sizes = [4, 8], strides = [1, 1]} : vector<4x64xbf16> to vector<4x8xbf16>
    "tpu.trace_start"() <{level = 10 : i32, message = "id,jd->ij"}> : () -> ()
    %cst_152 = arith.constant dense<0.000000e+00> : vector<4x4xf32>
    %402 = tpu.matmul %398, %401, %cst_152 {dimension_numbers = #tpu.dot_dimension_numbers<[1], [1], [0], [0], [0, 0, 1, 0], [], []>} : vector<4x8xbf16>, vector<4x8xbf16>, vector<4x4xf32> -> vector<4x4xf32>
    "tpu.trace_stop"() : () -> ()
    %cst_153 = arith.constant dense<0xFF800000> : vector<4xf32>
    %403 = vector.multi_reduction <maximumf>, %400, %cst_153 [1] : vector<4x8xf32> to vector<4xf32>
    %404 = vector.shape_cast %403 : vector<4xf32> to vector<4x1xf32>
    %cst_154 = arith.constant dense<0xFF800000> : vector<4xf32>
    %405 = vector.multi_reduction <maximumf>, %402, %cst_154 [1] : vector<4x4xf32> to vector<4xf32>
    %406 = vector.shape_cast %405 : vector<4xf32> to vector<4x1xf32>
    %407 = arith.maximumf %404, %406 : vector<4x1xf32>
    %408 = vector.broadcast %407 : vector<4x1xf32> to vector<4x8xf32>
    %409 = arith.subf %400, %408 : vector<4x8xf32>
    %410 = math.exp %409 : vector<4x8xf32>
    %411 = vector.broadcast %407 : vector<4x1xf32> to vector<4x4xf32>
    %412 = arith.subf %402, %411 : vector<4x4xf32>
    %413 = math.exp %412 : vector<4x4xf32>
    %cst_155 = arith.constant dense<0.000000e+00> : vector<4xf32>
    %414 = vector.multi_reduction <add>, %410, %cst_155 [1] : vector<4x8xf32> to vector<4xf32>
    %415 = vector.shape_cast %414 : vector<4xf32> to vector<4x1xf32>
    %cst_156 = arith.constant dense<0.000000e+00> : vector<4xf32>
    %416 = vector.multi_reduction <add>, %413, %cst_156 [1] : vector<4x4xf32> to vector<4xf32>
    %417 = vector.shape_cast %416 : vector<4xf32> to vector<4x1xf32>
    %418 = arith.addf %415, %417 : vector<4x1xf32>
    %419 = tpu.reciprocal %418 {approx = true} : vector<4x1xf32> -> vector<4x1xf32>
    %420 = arith.truncf %410 : vector<4x8xf32> to vector<4x8xbf16>
    %421 = vector.extract_strided_slice %304 {offsets = [0, 56], sizes = [8, 8], strides = [1, 1]} : vector<8x64xbf16> to vector<8x8xbf16>
    %cst_157 = arith.constant dense<0.000000e+00> : vector<4x8xf32>
    %422 = tpu.matmul %420, %421, %cst_157 {dimension_numbers = #tpu.dot_dimension_numbers<[1], [0], [0], [1], [0, 0, 1, 1], [], []>} : vector<4x8xbf16>, vector<8x8xbf16>, vector<4x8xf32> -> vector<4x8xf32>
    %423 = arith.truncf %413 : vector<4x4xf32> to vector<4x4xbf16>
    %424 = vector.extract_strided_slice %303 {offsets = [0, 56], sizes = [4, 8], strides = [1, 1]} : vector<4x64xbf16> to vector<4x8xbf16>
    %cst_158 = arith.constant dense<0.000000e+00> : vector<4x8xf32>
    %425 = tpu.matmul %423, %424, %cst_158 {dimension_numbers = #tpu.dot_dimension_numbers<[1], [0], [0], [1], [0, 0, 1, 1], [], []>} : vector<4x4xbf16>, vector<4x8xbf16>, vector<4x8xf32> -> vector<4x8xf32>
    %426 = arith.addf %422, %425 : vector<4x8xf32>
    %427 = vector.broadcast %419 : vector<4x1xf32> to vector<4x8xf32>
    %428 = arith.mulf %426, %427 : vector<4x8xf32>
    %429 = tpu.concatenate %335, %366, %397, %428 in 1 : vector<4x8xf32>, vector<4x8xf32>, vector<4x8xf32>, vector<4x8xf32> -> vector<4x32xf32>
    %430 = arith.truncf %429 : vector<4x32xf32> to vector<4x32xbf16>
    %c0_159 = arith.constant 0 : index
    %c0_160 = arith.constant 0 : index
    %c0_161 = arith.constant 0 : index
    %431 = vector.load %arg12[%c0_159, %c0_160, %c0_161] : memref<2x32x32xbf16, #tpu.memory_space<vmem>>, vector<1x32x32xbf16>
    %432 = vector.shape_cast %431 : vector<1x32x32xbf16> to vector<32x32xbf16>
    %cst_162 = arith.constant dense<0.000000e+00> : vector<4x32xf32>
    %433 = tpu.matmul %430, %432, %cst_162 {dimension_numbers = #tpu.dot_dimension_numbers<[1], [0], [0], [1], [0, 0, 1, 1], [], []>} : vector<4x32xbf16>, vector<32x32xbf16>, vector<4x32xf32> -> vector<4x32xf32>
    %434 = arith.addf %433, %29 : vector<4x32xf32>
    %cst_163 = arith.constant dense<0.000000e+00> : vector<4xf32>
    %435 = vector.multi_reduction <add>, %434, %cst_163 [1] : vector<4x32xf32> to vector<4xf32>
    %436 = vector.shape_cast %435 : vector<4xf32> to vector<4x1xf32>
    %cst_164 = arith.constant 3.200000e+01 : f32
    %437 = vector.broadcast %cst_164 : f32 to vector<4x1xf32>
    %438 = arith.divf %436, %437 : vector<4x1xf32>
    %439 = vector.broadcast %438 : vector<4x1xf32> to vector<4x32xf32>
    %440 = arith.subf %434, %439 : vector<4x32xf32>
    %441 = arith.mulf %440, %440 : vector<4x32xf32>
    %cst_165 = arith.constant dense<0.000000e+00> : vector<4xf32>
    %442 = vector.multi_reduction <add>, %441, %cst_165 [1] : vector<4x32xf32> to vector<4xf32>
    %443 = vector.shape_cast %442 : vector<4xf32> to vector<4x1xf32>
    %cst_166 = arith.constant 3.200000e+01 : f32
    %444 = vector.broadcast %cst_166 : f32 to vector<4x1xf32>
    %445 = arith.divf %443, %444 : vector<4x1xf32>
    %cst_167 = arith.constant 9.99999974E-6 : f32
    %446 = vector.broadcast %cst_167 : f32 to vector<4x1xf32>
    %447 = arith.addf %445, %446 : vector<4x1xf32>
    %448 = math.rsqrt %447 : vector<4x1xf32>
    %449 = vector.broadcast %448 : vector<4x1xf32> to vector<4x32xf32>
    %450 = arith.mulf %440, %449 : vector<4x32xf32>
    %451 = arith.truncf %450 : vector<4x32xf32> to vector<4x32xbf16>
    %c0_168 = arith.constant 0 : index
    %c0_169 = arith.constant 0 : index
    %c0_170 = arith.constant 0 : index
    %452 = vector.load %arg13[%c0_168, %c0_169, %c0_170] : memref<2x32x128xbf16, #tpu.memory_space<vmem>>, vector<1x32x128xbf16>
    %453 = vector.shape_cast %452 : vector<1x32x128xbf16> to vector<32x128xbf16>
    %cst_171 = arith.constant dense<0.000000e+00> : vector<4x128xf32>
    %454 = tpu.matmul %451, %453, %cst_171 {dimension_numbers = #tpu.dot_dimension_numbers<[1], [0], [0], [1], [0, 0, 1, 1], [], []>} : vector<4x32xbf16>, vector<32x128xbf16>, vector<4x128xf32> -> vector<4x128xf32>
    %c0_172 = arith.constant 0 : index
    %c0_173 = arith.constant 0 : index
    %c0_174 = arith.constant 0 : index
    %455 = vector.load %arg14[%c0_172, %c0_173, %c0_174] : memref<2x1x128xf32, #tpu.memory_space<vmem>>, vector<1x1x128xf32>
    %456 = vector.shape_cast %455 : vector<1x1x128xf32> to vector<1x128xf32>
    %457 = vector.broadcast %456 : vector<1x128xf32> to vector<4x128xf32>
    %458 = arith.addf %454, %457 : vector<4x128xf32>
    %cst_175 = arith.constant 0.707106769 : f32
    %459 = vector.broadcast %cst_175 : f32 to vector<4x128xf32>
    %460 = arith.mulf %458, %459 : vector<4x128xf32>
    %461 = math.absf %460 : vector<4x128xf32>
    %cst_176 = arith.constant 0.327591091 : f32
    %462 = vector.broadcast %cst_176 : f32 to vector<4x128xf32>
    %463 = arith.mulf %462, %461 : vector<4x128xf32>
    %cst_177 = arith.constant 1.000000e+00 : f32
    %464 = vector.broadcast %cst_177 : f32 to vector<4x128xf32>
    %465 = arith.addf %464, %463 : vector<4x128xf32>
    %cst_178 = arith.constant 1.000000e+00 : f32
    %466 = vector.broadcast %cst_178 : f32 to vector<4x128xf32>
    %467 = arith.divf %466, %465 : vector<4x128xf32>
    %cst_179 = arith.constant 1.06140542 : f32
    %468 = vector.broadcast %cst_179 : f32 to vector<4x128xf32>
    %469 = arith.mulf %468, %467 : vector<4x128xf32>
    %cst_180 = arith.constant -1.45315206 : f32
    %470 = vector.broadcast %cst_180 : f32 to vector<4x128xf32>
    %471 = arith.addf %469, %470 : vector<4x128xf32>
    %472 = arith.mulf %471, %467 : vector<4x128xf32>
    %cst_181 = arith.constant 1.42141378 : f32
    %473 = vector.broadcast %cst_181 : f32 to vector<4x128xf32>
    %474 = arith.addf %472, %473 : vector<4x128xf32>
    %475 = arith.mulf %474, %467 : vector<4x128xf32>
    %cst_182 = arith.constant -0.284496725 : f32
    %476 = vector.broadcast %cst_182 : f32 to vector<4x128xf32>
    %477 = arith.addf %475, %476 : vector<4x128xf32>
    %478 = arith.mulf %477, %467 : vector<4x128xf32>
    %cst_183 = arith.constant 0.254829586 : f32
    %479 = vector.broadcast %cst_183 : f32 to vector<4x128xf32>
    %480 = arith.addf %478, %479 : vector<4x128xf32>
    %481 = arith.mulf %480, %467 : vector<4x128xf32>
    %482 = arith.mulf %461, %461 : vector<4x128xf32>
    %cst_184 = arith.constant 0.000000e+00 : f32
    %483 = vector.broadcast %cst_184 : f32 to vector<4x128xf32>
    %484 = arith.subf %483, %482 : vector<4x128xf32>
    %485 = math.exp %484 : vector<4x128xf32>
    %486 = arith.mulf %481, %485 : vector<4x128xf32>
    %cst_185 = arith.constant 1.000000e+00 : f32
    %487 = vector.broadcast %cst_185 : f32 to vector<4x128xf32>
    %488 = arith.subf %487, %486 : vector<4x128xf32>
    %cst_186 = arith.constant 0.000000e+00 : f32
    %489 = vector.broadcast %cst_186 : f32 to vector<4x128xf32>
    %490 = arith.cmpf olt, %460, %489 : vector<4x128xf32>
    %cst_187 = arith.constant 0.000000e+00 : f32
    %491 = vector.broadcast %cst_187 : f32 to vector<4x128xf32>
    %492 = arith.subf %491, %488 : vector<4x128xf32>
    %493 = arith.select %490, %492, %488 : vector<4x128xi1>, vector<4x128xf32>
    %cst_188 = arith.constant 1.000000e+00 : f32
    %494 = vector.broadcast %cst_188 : f32 to vector<4x128xf32>
    %495 = arith.addf %494, %493 : vector<4x128xf32>
    %cst_189 = arith.constant 5.000000e-01 : f32
    %496 = vector.broadcast %cst_189 : f32 to vector<4x128xf32>
    %497 = arith.mulf %496, %495 : vector<4x128xf32>
    %498 = arith.mulf %458, %497 : vector<4x128xf32>
    %499 = arith.truncf %498 : vector<4x128xf32> to vector<4x128xbf16>
    %c0_190 = arith.constant 0 : index
    %c0_191 = arith.constant 0 : index
    %c0_192 = arith.constant 0 : index
    %500 = vector.load %arg15[%c0_190, %c0_191, %c0_192] : memref<2x128x32xbf16, #tpu.memory_space<vmem>>, vector<1x128x32xbf16>
    %501 = vector.shape_cast %500 : vector<1x128x32xbf16> to vector<128x32xbf16>
    %cst_193 = arith.constant dense<0.000000e+00> : vector<4x32xf32>
    %502 = tpu.matmul %499, %501, %cst_193 {dimension_numbers = #tpu.dot_dimension_numbers<[1], [0], [0], [1], [0, 0, 1, 1], [], []>} : vector<4x128xbf16>, vector<128x32xbf16>, vector<4x32xf32> -> vector<4x32xf32>
    %503 = arith.addf %502, %434 : vector<4x32xf32>
    %cst_194 = arith.constant dense<0.000000e+00> : vector<4xf32>
    %504 = vector.multi_reduction <add>, %29, %cst_194 [1] : vector<4x32xf32> to vector<4xf32>
    %505 = vector.shape_cast %504 : vector<4xf32> to vector<4x1xf32>
    %cst_195 = arith.constant 3.200000e+01 : f32
    %506 = vector.broadcast %cst_195 : f32 to vector<4x1xf32>
    %507 = arith.divf %505, %506 : vector<4x1xf32>
    %508 = vector.broadcast %507 : vector<4x1xf32> to vector<4x32xf32>
    %509 = arith.subf %29, %508 : vector<4x32xf32>
    %510 = arith.mulf %509, %509 : vector<4x32xf32>
    %cst_196 = arith.constant dense<0.000000e+00> : vector<4xf32>
    %511 = vector.multi_reduction <add>, %510, %cst_196 [1] : vector<4x32xf32> to vector<4xf32>
    %512 = vector.shape_cast %511 : vector<4xf32> to vector<4x1xf32>
    %cst_197 = arith.constant 3.200000e+01 : f32
    %513 = vector.broadcast %cst_197 : f32 to vector<4x1xf32>
    %514 = arith.divf %512, %513 : vector<4x1xf32>
    %cst_198 = arith.constant 9.99999974E-6 : f32
    %515 = vector.broadcast %cst_198 : f32 to vector<4x1xf32>
    %516 = arith.addf %514, %515 : vector<4x1xf32>
    %517 = math.rsqrt %516 : vector<4x1xf32>
    %518 = vector.broadcast %517 : vector<4x1xf32> to vector<4x32xf32>
    %519 = arith.mulf %509, %518 : vector<4x32xf32>
    %520 = arith.truncf %519 : vector<4x32xf32> to vector<4x32xbf16>
    %c0_199 = arith.constant 0 : index
    %c0_200 = arith.constant 0 : index
    %c0_201 = arith.constant 0 : index
    %521 = vector.load %arg6[%c0_199, %c0_200, %c0_201] : memref<2x32x32xbf16, #tpu.memory_space<vmem>>, vector<1x32x32xbf16>
    %522 = vector.shape_cast %521 : vector<1x32x32xbf16> to vector<32x32xbf16>
    %cst_202 = arith.constant dense<0.000000e+00> : vector<4x32xf32>
    %523 = tpu.matmul %520, %522, %cst_202 {dimension_numbers = #tpu.dot_dimension_numbers<[1], [0], [0], [1], [0, 0, 1, 1], [], []>} : vector<4x32xbf16>, vector<32x32xbf16>, vector<4x32xf32> -> vector<4x32xf32>
    %c0_203 = arith.constant 0 : index
    %c0_204 = arith.constant 0 : index
    %c0_205 = arith.constant 0 : index
    %524 = vector.load %arg7[%c0_203, %c0_204, %c0_205] : memref<2x1x32xf32, #tpu.memory_space<vmem>>, vector<1x1x32xf32>
    %525 = vector.shape_cast %524 : vector<1x1x32xf32> to vector<1x32xf32>
    %526 = vector.broadcast %525 : vector<1x32xf32> to vector<4x32xf32>
    %527 = arith.addf %523, %526 : vector<4x32xf32>
    %c0_206 = arith.constant 0 : index
    %c0_207 = arith.constant 0 : index
    %c0_208 = arith.constant 0 : index
    %528 = vector.load %arg10[%c0_206, %c0_207, %c0_208] : memref<2x32x64xbf16, #tpu.memory_space<vmem>>, vector<1x32x64xbf16>
    %529 = vector.shape_cast %528 : vector<1x32x64xbf16> to vector<32x64xbf16>
    %cst_209 = arith.constant dense<0.000000e+00> : vector<4x64xf32>
    %530 = tpu.matmul %520, %529, %cst_209 {dimension_numbers = #tpu.dot_dimension_numbers<[1], [0], [0], [1], [0, 0, 1, 1], [], []>} : vector<4x32xbf16>, vector<32x64xbf16>, vector<4x64xf32> -> vector<4x64xf32>
    %c0_210 = arith.constant 0 : index
    %c0_211 = arith.constant 0 : index
    %c0_212 = arith.constant 0 : index
    %531 = vector.load %arg11[%c0_210, %c0_211, %c0_212] : memref<2x1x64xf32, #tpu.memory_space<vmem>>, vector<1x1x64xf32>
    %532 = vector.shape_cast %531 : vector<1x1x64xf32> to vector<1x64xf32>
    %533 = vector.broadcast %532 : vector<1x64xf32> to vector<4x64xf32>
    %534 = arith.addf %530, %533 : vector<4x64xf32>
    %535 = arith.truncf %527 : vector<4x32xf32> to vector<4x32xbf16>
    %536 = arith.truncf %534 : vector<4x64xf32> to vector<4x64xbf16>
    %537 = vector.extract_strided_slice %37 {offsets = [16, 0], sizes = [8, 64], strides = [1, 1]} : vector<24x64xbf16> to vector<8x64xbf16>
    %538 = vector.extract_strided_slice %535 {offsets = [0, 0], sizes = [4, 8], strides = [1, 1]} : vector<4x32xbf16> to vector<4x8xbf16>
    %539 = vector.extract_strided_slice %537 {offsets = [0, 0], sizes = [8, 8], strides = [1, 1]} : vector<8x64xbf16> to vector<8x8xbf16>
    "tpu.trace_start"() <{level = 10 : i32, message = "id,jd->ij"}> : () -> ()
    %cst_213 = arith.constant dense<0.000000e+00> : vector<4x8xf32>
    %540 = tpu.matmul %538, %539, %cst_213 {dimension_numbers = #tpu.dot_dimension_numbers<[1], [1], [0], [0], [0, 0, 1, 0], [], []>} : vector<4x8xbf16>, vector<8x8xbf16>, vector<4x8xf32> -> vector<4x8xf32>
    "tpu.trace_stop"() : () -> ()
    %541 = vector.extract_strided_slice %536 {offsets = [0, 0], sizes = [4, 8], strides = [1, 1]} : vector<4x64xbf16> to vector<4x8xbf16>
    "tpu.trace_start"() <{level = 10 : i32, message = "id,jd->ij"}> : () -> ()
    %cst_214 = arith.constant dense<0.000000e+00> : vector<4x4xf32>
    %542 = tpu.matmul %538, %541, %cst_214 {dimension_numbers = #tpu.dot_dimension_numbers<[1], [1], [0], [0], [0, 0, 1, 0], [], []>} : vector<4x8xbf16>, vector<4x8xbf16>, vector<4x4xf32> -> vector<4x4xf32>
    "tpu.trace_stop"() : () -> ()
    %cst_215 = arith.constant dense<0xFF800000> : vector<4xf32>
    %543 = vector.multi_reduction <maximumf>, %540, %cst_215 [1] : vector<4x8xf32> to vector<4xf32>
    %544 = vector.shape_cast %543 : vector<4xf32> to vector<4x1xf32>
    %cst_216 = arith.constant dense<0xFF800000> : vector<4xf32>
    %545 = vector.multi_reduction <maximumf>, %542, %cst_216 [1] : vector<4x4xf32> to vector<4xf32>
    %546 = vector.shape_cast %545 : vector<4xf32> to vector<4x1xf32>
    %547 = arith.maximumf %544, %546 : vector<4x1xf32>
    %548 = vector.broadcast %547 : vector<4x1xf32> to vector<4x8xf32>
    %549 = arith.subf %540, %548 : vector<4x8xf32>
    %550 = math.exp %549 : vector<4x8xf32>
    %551 = vector.broadcast %547 : vector<4x1xf32> to vector<4x4xf32>
    %552 = arith.subf %542, %551 : vector<4x4xf32>
    %553 = math.exp %552 : vector<4x4xf32>
    %cst_217 = arith.constant dense<0.000000e+00> : vector<4xf32>
    %554 = vector.multi_reduction <add>, %550, %cst_217 [1] : vector<4x8xf32> to vector<4xf32>
    %555 = vector.shape_cast %554 : vector<4xf32> to vector<4x1xf32>
    %cst_218 = arith.constant dense<0.000000e+00> : vector<4xf32>
    %556 = vector.multi_reduction <add>, %553, %cst_218 [1] : vector<4x4xf32> to vector<4xf32>
    %557 = vector.shape_cast %556 : vector<4xf32> to vector<4x1xf32>
    %558 = arith.addf %555, %557 : vector<4x1xf32>
    %559 = tpu.reciprocal %558 {approx = true} : vector<4x1xf32> -> vector<4x1xf32>
    %560 = arith.truncf %550 : vector<4x8xf32> to vector<4x8xbf16>
    %561 = vector.extract_strided_slice %537 {offsets = [0, 32], sizes = [8, 8], strides = [1, 1]} : vector<8x64xbf16> to vector<8x8xbf16>
    %cst_219 = arith.constant dense<0.000000e+00> : vector<4x8xf32>
    %562 = tpu.matmul %560, %561, %cst_219 {dimension_numbers = #tpu.dot_dimension_numbers<[1], [0], [0], [1], [0, 0, 1, 1], [], []>} : vector<4x8xbf16>, vector<8x8xbf16>, vector<4x8xf32> -> vector<4x8xf32>
    %563 = arith.truncf %553 : vector<4x4xf32> to vector<4x4xbf16>
    %564 = vector.extract_strided_slice %536 {offsets = [0, 32], sizes = [4, 8], strides = [1, 1]} : vector<4x64xbf16> to vector<4x8xbf16>
    %cst_220 = arith.constant dense<0.000000e+00> : vector<4x8xf32>
    %565 = tpu.matmul %563, %564, %cst_220 {dimension_numbers = #tpu.dot_dimension_numbers<[1], [0], [0], [1], [0, 0, 1, 1], [], []>} : vector<4x4xbf16>, vector<4x8xbf16>, vector<4x8xf32> -> vector<4x8xf32>
    %566 = arith.addf %562, %565 : vector<4x8xf32>
    %567 = vector.broadcast %559 : vector<4x1xf32> to vector<4x8xf32>
    %568 = arith.mulf %566, %567 : vector<4x8xf32>
    %569 = vector.extract_strided_slice %535 {offsets = [0, 8], sizes = [4, 8], strides = [1, 1]} : vector<4x32xbf16> to vector<4x8xbf16>
    %570 = vector.extract_strided_slice %537 {offsets = [0, 8], sizes = [8, 8], strides = [1, 1]} : vector<8x64xbf16> to vector<8x8xbf16>
    "tpu.trace_start"() <{level = 10 : i32, message = "id,jd->ij"}> : () -> ()
    %cst_221 = arith.constant dense<0.000000e+00> : vector<4x8xf32>
    %571 = tpu.matmul %569, %570, %cst_221 {dimension_numbers = #tpu.dot_dimension_numbers<[1], [1], [0], [0], [0, 0, 1, 0], [], []>} : vector<4x8xbf16>, vector<8x8xbf16>, vector<4x8xf32> -> vector<4x8xf32>
    "tpu.trace_stop"() : () -> ()
    %572 = vector.extract_strided_slice %536 {offsets = [0, 8], sizes = [4, 8], strides = [1, 1]} : vector<4x64xbf16> to vector<4x8xbf16>
    "tpu.trace_start"() <{level = 10 : i32, message = "id,jd->ij"}> : () -> ()
    %cst_222 = arith.constant dense<0.000000e+00> : vector<4x4xf32>
    %573 = tpu.matmul %569, %572, %cst_222 {dimension_numbers = #tpu.dot_dimension_numbers<[1], [1], [0], [0], [0, 0, 1, 0], [], []>} : vector<4x8xbf16>, vector<4x8xbf16>, vector<4x4xf32> -> vector<4x4xf32>
    "tpu.trace_stop"() : () -> ()
    %cst_223 = arith.constant dense<0xFF800000> : vector<4xf32>
    %574 = vector.multi_reduction <maximumf>, %571, %cst_223 [1] : vector<4x8xf32> to vector<4xf32>
    %575 = vector.shape_cast %574 : vector<4xf32> to vector<4x1xf32>
    %cst_224 = arith.constant dense<0xFF800000> : vector<4xf32>
    %576 = vector.multi_reduction <maximumf>, %573, %cst_224 [1] : vector<4x4xf32> to vector<4xf32>
    %577 = vector.shape_cast %576 : vector<4xf32> to vector<4x1xf32>
    %578 = arith.maximumf %575, %577 : vector<4x1xf32>
    %579 = vector.broadcast %578 : vector<4x1xf32> to vector<4x8xf32>
    %580 = arith.subf %571, %579 : vector<4x8xf32>
    %581 = math.exp %580 : vector<4x8xf32>
    %582 = vector.broadcast %578 : vector<4x1xf32> to vector<4x4xf32>
    %583 = arith.subf %573, %582 : vector<4x4xf32>
    %584 = math.exp %583 : vector<4x4xf32>
    %cst_225 = arith.constant dense<0.000000e+00> : vector<4xf32>
    %585 = vector.multi_reduction <add>, %581, %cst_225 [1] : vector<4x8xf32> to vector<4xf32>
    %586 = vector.shape_cast %585 : vector<4xf32> to vector<4x1xf32>
    %cst_226 = arith.constant dense<0.000000e+00> : vector<4xf32>
    %587 = vector.multi_reduction <add>, %584, %cst_226 [1] : vector<4x4xf32> to vector<4xf32>
    %588 = vector.shape_cast %587 : vector<4xf32> to vector<4x1xf32>
    %589 = arith.addf %586, %588 : vector<4x1xf32>
    %590 = tpu.reciprocal %589 {approx = true} : vector<4x1xf32> -> vector<4x1xf32>
    %591 = arith.truncf %581 : vector<4x8xf32> to vector<4x8xbf16>
    %592 = vector.extract_strided_slice %537 {offsets = [0, 40], sizes = [8, 8], strides = [1, 1]} : vector<8x64xbf16> to vector<8x8xbf16>
    %cst_227 = arith.constant dense<0.000000e+00> : vector<4x8xf32>
    %593 = tpu.matmul %591, %592, %cst_227 {dimension_numbers = #tpu.dot_dimension_numbers<[1], [0], [0], [1], [0, 0, 1, 1], [], []>} : vector<4x8xbf16>, vector<8x8xbf16>, vector<4x8xf32> -> vector<4x8xf32>
    %594 = arith.truncf %584 : vector<4x4xf32> to vector<4x4xbf16>
    %595 = vector.extract_strided_slice %536 {offsets = [0, 40], sizes = [4, 8], strides = [1, 1]} : vector<4x64xbf16> to vector<4x8xbf16>
    %cst_228 = arith.constant dense<0.000000e+00> : vector<4x8xf32>
    %596 = tpu.matmul %594, %595, %cst_228 {dimension_numbers = #tpu.dot_dimension_numbers<[1], [0], [0], [1], [0, 0, 1, 1], [], []>} : vector<4x4xbf16>, vector<4x8xbf16>, vector<4x8xf32> -> vector<4x8xf32>
    %597 = arith.addf %593, %596 : vector<4x8xf32>
    %598 = vector.broadcast %590 : vector<4x1xf32> to vector<4x8xf32>
    %599 = arith.mulf %597, %598 : vector<4x8xf32>
    %600 = vector.extract_strided_slice %535 {offsets = [0, 16], sizes = [4, 8], strides = [1, 1]} : vector<4x32xbf16> to vector<4x8xbf16>
    %601 = vector.extract_strided_slice %537 {offsets = [0, 16], sizes = [8, 8], strides = [1, 1]} : vector<8x64xbf16> to vector<8x8xbf16>
    "tpu.trace_start"() <{level = 10 : i32, message = "id,jd->ij"}> : () -> ()
    %cst_229 = arith.constant dense<0.000000e+00> : vector<4x8xf32>
    %602 = tpu.matmul %600, %601, %cst_229 {dimension_numbers = #tpu.dot_dimension_numbers<[1], [1], [0], [0], [0, 0, 1, 0], [], []>} : vector<4x8xbf16>, vector<8x8xbf16>, vector<4x8xf32> -> vector<4x8xf32>
    "tpu.trace_stop"() : () -> ()
    %603 = vector.extract_strided_slice %536 {offsets = [0, 16], sizes = [4, 8], strides = [1, 1]} : vector<4x64xbf16> to vector<4x8xbf16>
    "tpu.trace_start"() <{level = 10 : i32, message = "id,jd->ij"}> : () -> ()
    %cst_230 = arith.constant dense<0.000000e+00> : vector<4x4xf32>
    %604 = tpu.matmul %600, %603, %cst_230 {dimension_numbers = #tpu.dot_dimension_numbers<[1], [1], [0], [0], [0, 0, 1, 0], [], []>} : vector<4x8xbf16>, vector<4x8xbf16>, vector<4x4xf32> -> vector<4x4xf32>
    "tpu.trace_stop"() : () -> ()
    %cst_231 = arith.constant dense<0xFF800000> : vector<4xf32>
    %605 = vector.multi_reduction <maximumf>, %602, %cst_231 [1] : vector<4x8xf32> to vector<4xf32>
    %606 = vector.shape_cast %605 : vector<4xf32> to vector<4x1xf32>
    %cst_232 = arith.constant dense<0xFF800000> : vector<4xf32>
    %607 = vector.multi_reduction <maximumf>, %604, %cst_232 [1] : vector<4x4xf32> to vector<4xf32>
    %608 = vector.shape_cast %607 : vector<4xf32> to vector<4x1xf32>
    %609 = arith.maximumf %606, %608 : vector<4x1xf32>
    %610 = vector.broadcast %609 : vector<4x1xf32> to vector<4x8xf32>
    %611 = arith.subf %602, %610 : vector<4x8xf32>
    %612 = math.exp %611 : vector<4x8xf32>
    %613 = vector.broadcast %609 : vector<4x1xf32> to vector<4x4xf32>
    %614 = arith.subf %604, %613 : vector<4x4xf32>
    %615 = math.exp %614 : vector<4x4xf32>
    %cst_233 = arith.constant dense<0.000000e+00> : vector<4xf32>
    %616 = vector.multi_reduction <add>, %612, %cst_233 [1] : vector<4x8xf32> to vector<4xf32>
    %617 = vector.shape_cast %616 : vector<4xf32> to vector<4x1xf32>
    %cst_234 = arith.constant dense<0.000000e+00> : vector<4xf32>
    %618 = vector.multi_reduction <add>, %615, %cst_234 [1] : vector<4x4xf32> to vector<4xf32>
    %619 = vector.shape_cast %618 : vector<4xf32> to vector<4x1xf32>
    %620 = arith.addf %617, %619 : vector<4x1xf32>
    %621 = tpu.reciprocal %620 {approx = true} : vector<4x1xf32> -> vector<4x1xf32>
    %622 = arith.truncf %612 : vector<4x8xf32> to vector<4x8xbf16>
    %623 = vector.extract_strided_slice %537 {offsets = [0, 48], sizes = [8, 8], strides = [1, 1]} : vector<8x64xbf16> to vector<8x8xbf16>
    %cst_235 = arith.constant dense<0.000000e+00> : vector<4x8xf32>
    %624 = tpu.matmul %622, %623, %cst_235 {dimension_numbers = #tpu.dot_dimension_numbers<[1], [0], [0], [1], [0, 0, 1, 1], [], []>} : vector<4x8xbf16>, vector<8x8xbf16>, vector<4x8xf32> -> vector<4x8xf32>
    %625 = arith.truncf %615 : vector<4x4xf32> to vector<4x4xbf16>
    %626 = vector.extract_strided_slice %536 {offsets = [0, 48], sizes = [4, 8], strides = [1, 1]} : vector<4x64xbf16> to vector<4x8xbf16>
    %cst_236 = arith.constant dense<0.000000e+00> : vector<4x8xf32>
    %627 = tpu.matmul %625, %626, %cst_236 {dimension_numbers = #tpu.dot_dimension_numbers<[1], [0], [0], [1], [0, 0, 1, 1], [], []>} : vector<4x4xbf16>, vector<4x8xbf16>, vector<4x8xf32> -> vector<4x8xf32>
    %628 = arith.addf %624, %627 : vector<4x8xf32>
    %629 = vector.broadcast %621 : vector<4x1xf32> to vector<4x8xf32>
    %630 = arith.mulf %628, %629 : vector<4x8xf32>
    %631 = vector.extract_strided_slice %535 {offsets = [0, 24], sizes = [4, 8], strides = [1, 1]} : vector<4x32xbf16> to vector<4x8xbf16>
    %632 = vector.extract_strided_slice %537 {offsets = [0, 24], sizes = [8, 8], strides = [1, 1]} : vector<8x64xbf16> to vector<8x8xbf16>
    "tpu.trace_start"() <{level = 10 : i32, message = "id,jd->ij"}> : () -> ()
    %cst_237 = arith.constant dense<0.000000e+00> : vector<4x8xf32>
    %633 = tpu.matmul %631, %632, %cst_237 {dimension_numbers = #tpu.dot_dimension_numbers<[1], [1], [0], [0], [0, 0, 1, 0], [], []>} : vector<4x8xbf16>, vector<8x8xbf16>, vector<4x8xf32> -> vector<4x8xf32>
    "tpu.trace_stop"() : () -> ()
    %634 = vector.extract_strided_slice %536 {offsets = [0, 24], sizes = [4, 8], strides = [1, 1]} : vector<4x64xbf16> to vector<4x8xbf16>
    "tpu.trace_start"() <{level = 10 : i32, message = "id,jd->ij"}> : () -> ()
    %cst_238 = arith.constant dense<0.000000e+00> : vector<4x4xf32>
    %635 = tpu.matmul %631, %634, %cst_238 {dimension_numbers = #tpu.dot_dimension_numbers<[1], [1], [0], [0], [0, 0, 1, 0], [], []>} : vector<4x8xbf16>, vector<4x8xbf16>, vector<4x4xf32> -> vector<4x4xf32>
    "tpu.trace_stop"() : () -> ()
    %cst_239 = arith.constant dense<0xFF800000> : vector<4xf32>
    %636 = vector.multi_reduction <maximumf>, %633, %cst_239 [1] : vector<4x8xf32> to vector<4xf32>
    %637 = vector.shape_cast %636 : vector<4xf32> to vector<4x1xf32>
    %cst_240 = arith.constant dense<0xFF800000> : vector<4xf32>
    %638 = vector.multi_reduction <maximumf>, %635, %cst_240 [1] : vector<4x4xf32> to vector<4xf32>
    %639 = vector.shape_cast %638 : vector<4xf32> to vector<4x1xf32>
    %640 = arith.maximumf %637, %639 : vector<4x1xf32>
    %641 = vector.broadcast %640 : vector<4x1xf32> to vector<4x8xf32>
    %642 = arith.subf %633, %641 : vector<4x8xf32>
    %643 = math.exp %642 : vector<4x8xf32>
    %644 = vector.broadcast %640 : vector<4x1xf32> to vector<4x4xf32>
    %645 = arith.subf %635, %644 : vector<4x4xf32>
    %646 = math.exp %645 : vector<4x4xf32>
    %cst_241 = arith.constant dense<0.000000e+00> : vector<4xf32>
    %647 = vector.multi_reduction <add>, %643, %cst_241 [1] : vector<4x8xf32> to vector<4xf32>
    %648 = vector.shape_cast %647 : vector<4xf32> to vector<4x1xf32>
    %cst_242 = arith.constant dense<0.000000e+00> : vector<4xf32>
    %649 = vector.multi_reduction <add>, %646, %cst_242 [1] : vector<4x4xf32> to vector<4xf32>
    %650 = vector.shape_cast %649 : vector<4xf32> to vector<4x1xf32>
    %651 = arith.addf %648, %650 : vector<4x1xf32>
    %652 = tpu.reciprocal %651 {approx = true} : vector<4x1xf32> -> vector<4x1xf32>
    %653 = arith.truncf %643 : vector<4x8xf32> to vector<4x8xbf16>
    %654 = vector.extract_strided_slice %537 {offsets = [0, 56], sizes = [8, 8], strides = [1, 1]} : vector<8x64xbf16> to vector<8x8xbf16>
    %cst_243 = arith.constant dense<0.000000e+00> : vector<4x8xf32>
    %655 = tpu.matmul %653, %654, %cst_243 {dimension_numbers = #tpu.dot_dimension_numbers<[1], [0], [0], [1], [0, 0, 1, 1], [], []>} : vector<4x8xbf16>, vector<8x8xbf16>, vector<4x8xf32> -> vector<4x8xf32>
    %656 = arith.truncf %646 : vector<4x4xf32> to vector<4x4xbf16>
    %657 = vector.extract_strided_slice %536 {offsets = [0, 56], sizes = [4, 8], strides = [1, 1]} : vector<4x64xbf16> to vector<4x8xbf16>
    %cst_244 = arith.constant dense<0.000000e+00> : vector<4x8xf32>
    %658 = tpu.matmul %656, %657, %cst_244 {dimension_numbers = #tpu.dot_dimension_numbers<[1], [0], [0], [1], [0, 0, 1, 1], [], []>} : vector<4x4xbf16>, vector<4x8xbf16>, vector<4x8xf32> -> vector<4x8xf32>
    %659 = arith.addf %655, %658 : vector<4x8xf32>
    %660 = vector.broadcast %652 : vector<4x1xf32> to vector<4x8xf32>
    %661 = arith.mulf %659, %660 : vector<4x8xf32>
    %662 = tpu.concatenate %568, %599, %630, %661 in 1 : vector<4x8xf32>, vector<4x8xf32>, vector<4x8xf32>, vector<4x8xf32> -> vector<4x32xf32>
    %663 = arith.truncf %662 : vector<4x32xf32> to vector<4x32xbf16>
    %c0_245 = arith.constant 0 : index
    %c0_246 = arith.constant 0 : index
    %c0_247 = arith.constant 0 : index
    %664 = vector.load %arg12[%c0_245, %c0_246, %c0_247] : memref<2x32x32xbf16, #tpu.memory_space<vmem>>, vector<1x32x32xbf16>
    %665 = vector.shape_cast %664 : vector<1x32x32xbf16> to vector<32x32xbf16>
    %cst_248 = arith.constant dense<0.000000e+00> : vector<4x32xf32>
    %666 = tpu.matmul %663, %665, %cst_248 {dimension_numbers = #tpu.dot_dimension_numbers<[1], [0], [0], [1], [0, 0, 1, 1], [], []>} : vector<4x32xbf16>, vector<32x32xbf16>, vector<4x32xf32> -> vector<4x32xf32>
    %667 = arith.addf %666, %29 : vector<4x32xf32>
    %cst_249 = arith.constant dense<0.000000e+00> : vector<4xf32>
    %668 = vector.multi_reduction <add>, %667, %cst_249 [1] : vector<4x32xf32> to vector<4xf32>
    %669 = vector.shape_cast %668 : vector<4xf32> to vector<4x1xf32>
    %cst_250 = arith.constant 3.200000e+01 : f32
    %670 = vector.broadcast %cst_250 : f32 to vector<4x1xf32>
    %671 = arith.divf %669, %670 : vector<4x1xf32>
    %672 = vector.broadcast %671 : vector<4x1xf32> to vector<4x32xf32>
    %673 = arith.subf %667, %672 : vector<4x32xf32>
    %674 = arith.mulf %673, %673 : vector<4x32xf32>
    %cst_251 = arith.constant dense<0.000000e+00> : vector<4xf32>
    %675 = vector.multi_reduction <add>, %674, %cst_251 [1] : vector<4x32xf32> to vector<4xf32>
    %676 = vector.shape_cast %675 : vector<4xf32> to vector<4x1xf32>
    %cst_252 = arith.constant 3.200000e+01 : f32
    %677 = vector.broadcast %cst_252 : f32 to vector<4x1xf32>
    %678 = arith.divf %676, %677 : vector<4x1xf32>
    %cst_253 = arith.constant 9.99999974E-6 : f32
    %679 = vector.broadcast %cst_253 : f32 to vector<4x1xf32>
    %680 = arith.addf %678, %679 : vector<4x1xf32>
    %681 = math.rsqrt %680 : vector<4x1xf32>
    %682 = vector.broadcast %681 : vector<4x1xf32> to vector<4x32xf32>
    %683 = arith.mulf %673, %682 : vector<4x32xf32>
    %684 = arith.truncf %683 : vector<4x32xf32> to vector<4x32xbf16>
    %c0_254 = arith.constant 0 : index
    %c0_255 = arith.constant 0 : index
    %c0_256 = arith.constant 0 : index
    %685 = vector.load %arg13[%c0_254, %c0_255, %c0_256] : memref<2x32x128xbf16, #tpu.memory_space<vmem>>, vector<1x32x128xbf16>
    %686 = vector.shape_cast %685 : vector<1x32x128xbf16> to vector<32x128xbf16>
    %cst_257 = arith.constant dense<0.000000e+00> : vector<4x128xf32>
    %687 = tpu.matmul %684, %686, %cst_257 {dimension_numbers = #tpu.dot_dimension_numbers<[1], [0], [0], [1], [0, 0, 1, 1], [], []>} : vector<4x32xbf16>, vector<32x128xbf16>, vector<4x128xf32> -> vector<4x128xf32>
    %c0_258 = arith.constant 0 : index
    %c0_259 = arith.constant 0 : index
    %c0_260 = arith.constant 0 : index
    %688 = vector.load %arg14[%c0_258, %c0_259, %c0_260] : memref<2x1x128xf32, #tpu.memory_space<vmem>>, vector<1x1x128xf32>
    %689 = vector.shape_cast %688 : vector<1x1x128xf32> to vector<1x128xf32>
    %690 = vector.broadcast %689 : vector<1x128xf32> to vector<4x128xf32>
    %691 = arith.addf %687, %690 : vector<4x128xf32>
    %cst_261 = arith.constant 0.707106769 : f32
    %692 = vector.broadcast %cst_261 : f32 to vector<4x128xf32>
    %693 = arith.mulf %691, %692 : vector<4x128xf32>
    %694 = math.absf %693 : vector<4x128xf32>
    %cst_262 = arith.constant 0.327591091 : f32
    %695 = vector.broadcast %cst_262 : f32 to vector<4x128xf32>
    %696 = arith.mulf %695, %694 : vector<4x128xf32>
    %cst_263 = arith.constant 1.000000e+00 : f32
    %697 = vector.broadcast %cst_263 : f32 to vector<4x128xf32>
    %698 = arith.addf %697, %696 : vector<4x128xf32>
    %cst_264 = arith.constant 1.000000e+00 : f32
    %699 = vector.broadcast %cst_264 : f32 to vector<4x128xf32>
    %700 = arith.divf %699, %698 : vector<4x128xf32>
    %cst_265 = arith.constant 1.06140542 : f32
    %701 = vector.broadcast %cst_265 : f32 to vector<4x128xf32>
    %702 = arith.mulf %701, %700 : vector<4x128xf32>
    %cst_266 = arith.constant -1.45315206 : f32
    %703 = vector.broadcast %cst_266 : f32 to vector<4x128xf32>
    %704 = arith.addf %702, %703 : vector<4x128xf32>
    %705 = arith.mulf %704, %700 : vector<4x128xf32>
    %cst_267 = arith.constant 1.42141378 : f32
    %706 = vector.broadcast %cst_267 : f32 to vector<4x128xf32>
    %707 = arith.addf %705, %706 : vector<4x128xf32>
    %708 = arith.mulf %707, %700 : vector<4x128xf32>
    %cst_268 = arith.constant -0.284496725 : f32
    %709 = vector.broadcast %cst_268 : f32 to vector<4x128xf32>
    %710 = arith.addf %708, %709 : vector<4x128xf32>
    %711 = arith.mulf %710, %700 : vector<4x128xf32>
    %cst_269 = arith.constant 0.254829586 : f32
    %712 = vector.broadcast %cst_269 : f32 to vector<4x128xf32>
    %713 = arith.addf %711, %712 : vector<4x128xf32>
    %714 = arith.mulf %713, %700 : vector<4x128xf32>
    %715 = arith.mulf %694, %694 : vector<4x128xf32>
    %cst_270 = arith.constant 0.000000e+00 : f32
    %716 = vector.broadcast %cst_270 : f32 to vector<4x128xf32>
    %717 = arith.subf %716, %715 : vector<4x128xf32>
    %718 = math.exp %717 : vector<4x128xf32>
    %719 = arith.mulf %714, %718 : vector<4x128xf32>
    %cst_271 = arith.constant 1.000000e+00 : f32
    %720 = vector.broadcast %cst_271 : f32 to vector<4x128xf32>
    %721 = arith.subf %720, %719 : vector<4x128xf32>
    %cst_272 = arith.constant 0.000000e+00 : f32
    %722 = vector.broadcast %cst_272 : f32 to vector<4x128xf32>
    %723 = arith.cmpf olt, %693, %722 : vector<4x128xf32>
    %cst_273 = arith.constant 0.000000e+00 : f32
    %724 = vector.broadcast %cst_273 : f32 to vector<4x128xf32>
    %725 = arith.subf %724, %721 : vector<4x128xf32>
    %726 = arith.select %723, %725, %721 : vector<4x128xi1>, vector<4x128xf32>
    %cst_274 = arith.constant 1.000000e+00 : f32
    %727 = vector.broadcast %cst_274 : f32 to vector<4x128xf32>
    %728 = arith.addf %727, %726 : vector<4x128xf32>
    %cst_275 = arith.constant 5.000000e-01 : f32
    %729 = vector.broadcast %cst_275 : f32 to vector<4x128xf32>
    %730 = arith.mulf %729, %728 : vector<4x128xf32>
    %731 = arith.mulf %691, %730 : vector<4x128xf32>
    %732 = arith.truncf %731 : vector<4x128xf32> to vector<4x128xbf16>
    %c0_276 = arith.constant 0 : index
    %c0_277 = arith.constant 0 : index
    %c0_278 = arith.constant 0 : index
    %733 = vector.load %arg15[%c0_276, %c0_277, %c0_278] : memref<2x128x32xbf16, #tpu.memory_space<vmem>>, vector<1x128x32xbf16>
    %734 = vector.shape_cast %733 : vector<1x128x32xbf16> to vector<128x32xbf16>
    %cst_279 = arith.constant dense<0.000000e+00> : vector<4x32xf32>
    %735 = tpu.matmul %732, %734, %cst_279 {dimension_numbers = #tpu.dot_dimension_numbers<[1], [0], [0], [1], [0, 0, 1, 1], [], []>} : vector<4x128xbf16>, vector<128x32xbf16>, vector<4x32xf32> -> vector<4x32xf32>
    %736 = arith.addf %735, %667 : vector<4x32xf32>
    %c1 = arith.constant 1 : index
    %c0_280 = arith.constant 0 : index
    %c0_281 = arith.constant 0 : index
    %737 = vector.load %arg8[%c1, %c0_280, %c0_281] : memref<2x32x64xbf16, #tpu.memory_space<vmem>>, vector<1x32x64xbf16>
    %738 = vector.shape_cast %737 : vector<1x32x64xbf16> to vector<32x64xbf16>
    %cst_282 = arith.constant dense<0.000000e+00> : vector<24x64xf32>
    %739 = tpu.matmul %28, %738, %cst_282 {dimension_numbers = #tpu.dot_dimension_numbers<[1], [0], [0], [1], [0, 0, 1, 1], [], []>} : vector<24x32xbf16>, vector<32x64xbf16>, vector<24x64xf32> -> vector<24x64xf32>
    %c1_283 = arith.constant 1 : index
    %c0_284 = arith.constant 0 : index
    %c0_285 = arith.constant 0 : index
    %740 = vector.load %arg9[%c1_283, %c0_284, %c0_285] : memref<2x1x64xf32, #tpu.memory_space<vmem>>, vector<1x1x64xf32>
    %741 = vector.shape_cast %740 : vector<1x1x64xf32> to vector<1x64xf32>
    %742 = vector.broadcast %741 : vector<1x64xf32> to vector<24x64xf32>
    %743 = arith.addf %739, %742 : vector<24x64xf32>
    %744 = arith.truncf %743 : vector<24x64xf32> to vector<24x64xbf16>
    %cst_286 = arith.constant dense<0.000000e+00> : vector<4xf32>
    %745 = vector.multi_reduction <add>, %270, %cst_286 [1] : vector<4x32xf32> to vector<4xf32>
    %746 = vector.shape_cast %745 : vector<4xf32> to vector<4x1xf32>
    %cst_287 = arith.constant 3.200000e+01 : f32
    %747 = vector.broadcast %cst_287 : f32 to vector<4x1xf32>
    %748 = arith.divf %746, %747 : vector<4x1xf32>
    %749 = vector.broadcast %748 : vector<4x1xf32> to vector<4x32xf32>
    %750 = arith.subf %270, %749 : vector<4x32xf32>
    %751 = arith.mulf %750, %750 : vector<4x32xf32>
    %cst_288 = arith.constant dense<0.000000e+00> : vector<4xf32>
    %752 = vector.multi_reduction <add>, %751, %cst_288 [1] : vector<4x32xf32> to vector<4xf32>
    %753 = vector.shape_cast %752 : vector<4xf32> to vector<4x1xf32>
    %cst_289 = arith.constant 3.200000e+01 : f32
    %754 = vector.broadcast %cst_289 : f32 to vector<4x1xf32>
    %755 = arith.divf %753, %754 : vector<4x1xf32>
    %cst_290 = arith.constant 9.99999974E-6 : f32
    %756 = vector.broadcast %cst_290 : f32 to vector<4x1xf32>
    %757 = arith.addf %755, %756 : vector<4x1xf32>
    %758 = math.rsqrt %757 : vector<4x1xf32>
    %759 = vector.broadcast %758 : vector<4x1xf32> to vector<4x32xf32>
    %760 = arith.mulf %750, %759 : vector<4x32xf32>
    %761 = arith.truncf %760 : vector<4x32xf32> to vector<4x32xbf16>
    %c1_291 = arith.constant 1 : index
    %c0_292 = arith.constant 0 : index
    %c0_293 = arith.constant 0 : index
    %762 = vector.load %arg6[%c1_291, %c0_292, %c0_293] : memref<2x32x32xbf16, #tpu.memory_space<vmem>>, vector<1x32x32xbf16>
    %763 = vector.shape_cast %762 : vector<1x32x32xbf16> to vector<32x32xbf16>
    %cst_294 = arith.constant dense<0.000000e+00> : vector<4x32xf32>
    %764 = tpu.matmul %761, %763, %cst_294 {dimension_numbers = #tpu.dot_dimension_numbers<[1], [0], [0], [1], [0, 0, 1, 1], [], []>} : vector<4x32xbf16>, vector<32x32xbf16>, vector<4x32xf32> -> vector<4x32xf32>
    %c1_295 = arith.constant 1 : index
    %c0_296 = arith.constant 0 : index
    %c0_297 = arith.constant 0 : index
    %765 = vector.load %arg7[%c1_295, %c0_296, %c0_297] : memref<2x1x32xf32, #tpu.memory_space<vmem>>, vector<1x1x32xf32>
    %766 = vector.shape_cast %765 : vector<1x1x32xf32> to vector<1x32xf32>
    %767 = vector.broadcast %766 : vector<1x32xf32> to vector<4x32xf32>
    %768 = arith.addf %764, %767 : vector<4x32xf32>
    %c1_298 = arith.constant 1 : index
    %c0_299 = arith.constant 0 : index
    %c0_300 = arith.constant 0 : index
    %769 = vector.load %arg10[%c1_298, %c0_299, %c0_300] : memref<2x32x64xbf16, #tpu.memory_space<vmem>>, vector<1x32x64xbf16>
    %770 = vector.shape_cast %769 : vector<1x32x64xbf16> to vector<32x64xbf16>
    %cst_301 = arith.constant dense<0.000000e+00> : vector<4x64xf32>
    %771 = tpu.matmul %761, %770, %cst_301 {dimension_numbers = #tpu.dot_dimension_numbers<[1], [0], [0], [1], [0, 0, 1, 1], [], []>} : vector<4x32xbf16>, vector<32x64xbf16>, vector<4x64xf32> -> vector<4x64xf32>
    %c1_302 = arith.constant 1 : index
    %c0_303 = arith.constant 0 : index
    %c0_304 = arith.constant 0 : index
    %772 = vector.load %arg11[%c1_302, %c0_303, %c0_304] : memref<2x1x64xf32, #tpu.memory_space<vmem>>, vector<1x1x64xf32>
    %773 = vector.shape_cast %772 : vector<1x1x64xf32> to vector<1x64xf32>
    %774 = vector.broadcast %773 : vector<1x64xf32> to vector<4x64xf32>
    %775 = arith.addf %771, %774 : vector<4x64xf32>
    %776 = arith.truncf %768 : vector<4x32xf32> to vector<4x32xbf16>
    %777 = arith.truncf %775 : vector<4x64xf32> to vector<4x64xbf16>
    %778 = vector.extract_strided_slice %744 {offsets = [0, 0], sizes = [8, 64], strides = [1, 1]} : vector<24x64xbf16> to vector<8x64xbf16>
    %779 = vector.extract_strided_slice %776 {offsets = [0, 0], sizes = [4, 8], strides = [1, 1]} : vector<4x32xbf16> to vector<4x8xbf16>
    %780 = vector.extract_strided_slice %778 {offsets = [0, 0], sizes = [8, 8], strides = [1, 1]} : vector<8x64xbf16> to vector<8x8xbf16>
    "tpu.trace_start"() <{level = 10 : i32, message = "id,jd->ij"}> : () -> ()
    %cst_305 = arith.constant dense<0.000000e+00> : vector<4x8xf32>
    %781 = tpu.matmul %779, %780, %cst_305 {dimension_numbers = #tpu.dot_dimension_numbers<[1], [1], [0], [0], [0, 0, 1, 0], [], []>} : vector<4x8xbf16>, vector<8x8xbf16>, vector<4x8xf32> -> vector<4x8xf32>
    "tpu.trace_stop"() : () -> ()
    %782 = vector.extract_strided_slice %777 {offsets = [0, 0], sizes = [4, 8], strides = [1, 1]} : vector<4x64xbf16> to vector<4x8xbf16>
    "tpu.trace_start"() <{level = 10 : i32, message = "id,jd->ij"}> : () -> ()
    %cst_306 = arith.constant dense<0.000000e+00> : vector<4x4xf32>
    %783 = tpu.matmul %779, %782, %cst_306 {dimension_numbers = #tpu.dot_dimension_numbers<[1], [1], [0], [0], [0, 0, 1, 0], [], []>} : vector<4x8xbf16>, vector<4x8xbf16>, vector<4x4xf32> -> vector<4x4xf32>
    "tpu.trace_stop"() : () -> ()
    %cst_307 = arith.constant dense<0xFF800000> : vector<4xf32>
    %784 = vector.multi_reduction <maximumf>, %781, %cst_307 [1] : vector<4x8xf32> to vector<4xf32>
    %785 = vector.shape_cast %784 : vector<4xf32> to vector<4x1xf32>
    %cst_308 = arith.constant dense<0xFF800000> : vector<4xf32>
    %786 = vector.multi_reduction <maximumf>, %783, %cst_308 [1] : vector<4x4xf32> to vector<4xf32>
    %787 = vector.shape_cast %786 : vector<4xf32> to vector<4x1xf32>
    %788 = arith.maximumf %785, %787 : vector<4x1xf32>
    %789 = vector.broadcast %788 : vector<4x1xf32> to vector<4x8xf32>
    %790 = arith.subf %781, %789 : vector<4x8xf32>
    %791 = math.exp %790 : vector<4x8xf32>
    %792 = vector.broadcast %788 : vector<4x1xf32> to vector<4x4xf32>
    %793 = arith.subf %783, %792 : vector<4x4xf32>
    %794 = math.exp %793 : vector<4x4xf32>
    %cst_309 = arith.constant dense<0.000000e+00> : vector<4xf32>
    %795 = vector.multi_reduction <add>, %791, %cst_309 [1] : vector<4x8xf32> to vector<4xf32>
    %796 = vector.shape_cast %795 : vector<4xf32> to vector<4x1xf32>
    %cst_310 = arith.constant dense<0.000000e+00> : vector<4xf32>
    %797 = vector.multi_reduction <add>, %794, %cst_310 [1] : vector<4x4xf32> to vector<4xf32>
    %798 = vector.shape_cast %797 : vector<4xf32> to vector<4x1xf32>
    %799 = arith.addf %796, %798 : vector<4x1xf32>
    %800 = tpu.reciprocal %799 {approx = true} : vector<4x1xf32> -> vector<4x1xf32>
    %801 = arith.truncf %791 : vector<4x8xf32> to vector<4x8xbf16>
    %802 = vector.extract_strided_slice %778 {offsets = [0, 32], sizes = [8, 8], strides = [1, 1]} : vector<8x64xbf16> to vector<8x8xbf16>
    %cst_311 = arith.constant dense<0.000000e+00> : vector<4x8xf32>
    %803 = tpu.matmul %801, %802, %cst_311 {dimension_numbers = #tpu.dot_dimension_numbers<[1], [0], [0], [1], [0, 0, 1, 1], [], []>} : vector<4x8xbf16>, vector<8x8xbf16>, vector<4x8xf32> -> vector<4x8xf32>
    %804 = arith.truncf %794 : vector<4x4xf32> to vector<4x4xbf16>
    %805 = vector.extract_strided_slice %777 {offsets = [0, 32], sizes = [4, 8], strides = [1, 1]} : vector<4x64xbf16> to vector<4x8xbf16>
    %cst_312 = arith.constant dense<0.000000e+00> : vector<4x8xf32>
    %806 = tpu.matmul %804, %805, %cst_312 {dimension_numbers = #tpu.dot_dimension_numbers<[1], [0], [0], [1], [0, 0, 1, 1], [], []>} : vector<4x4xbf16>, vector<4x8xbf16>, vector<4x8xf32> -> vector<4x8xf32>
    %807 = arith.addf %803, %806 : vector<4x8xf32>
    %808 = vector.broadcast %800 : vector<4x1xf32> to vector<4x8xf32>
    %809 = arith.mulf %807, %808 : vector<4x8xf32>
    %810 = vector.extract_strided_slice %776 {offsets = [0, 8], sizes = [4, 8], strides = [1, 1]} : vector<4x32xbf16> to vector<4x8xbf16>
    %811 = vector.extract_strided_slice %778 {offsets = [0, 8], sizes = [8, 8], strides = [1, 1]} : vector<8x64xbf16> to vector<8x8xbf16>
    "tpu.trace_start"() <{level = 10 : i32, message = "id,jd->ij"}> : () -> ()
    %cst_313 = arith.constant dense<0.000000e+00> : vector<4x8xf32>
    %812 = tpu.matmul %810, %811, %cst_313 {dimension_numbers = #tpu.dot_dimension_numbers<[1], [1], [0], [0], [0, 0, 1, 0], [], []>} : vector<4x8xbf16>, vector<8x8xbf16>, vector<4x8xf32> -> vector<4x8xf32>
    "tpu.trace_stop"() : () -> ()
    %813 = vector.extract_strided_slice %777 {offsets = [0, 8], sizes = [4, 8], strides = [1, 1]} : vector<4x64xbf16> to vector<4x8xbf16>
    "tpu.trace_start"() <{level = 10 : i32, message = "id,jd->ij"}> : () -> ()
    %cst_314 = arith.constant dense<0.000000e+00> : vector<4x4xf32>
    %814 = tpu.matmul %810, %813, %cst_314 {dimension_numbers = #tpu.dot_dimension_numbers<[1], [1], [0], [0], [0, 0, 1, 0], [], []>} : vector<4x8xbf16>, vector<4x8xbf16>, vector<4x4xf32> -> vector<4x4xf32>
    "tpu.trace_stop"() : () -> ()
    %cst_315 = arith.constant dense<0xFF800000> : vector<4xf32>
    %815 = vector.multi_reduction <maximumf>, %812, %cst_315 [1] : vector<4x8xf32> to vector<4xf32>
    %816 = vector.shape_cast %815 : vector<4xf32> to vector<4x1xf32>
    %cst_316 = arith.constant dense<0xFF800000> : vector<4xf32>
    %817 = vector.multi_reduction <maximumf>, %814, %cst_316 [1] : vector<4x4xf32> to vector<4xf32>
    %818 = vector.shape_cast %817 : vector<4xf32> to vector<4x1xf32>
    %819 = arith.maximumf %816, %818 : vector<4x1xf32>
    %820 = vector.broadcast %819 : vector<4x1xf32> to vector<4x8xf32>
    %821 = arith.subf %812, %820 : vector<4x8xf32>
    %822 = math.exp %821 : vector<4x8xf32>
    %823 = vector.broadcast %819 : vector<4x1xf32> to vector<4x4xf32>
    %824 = arith.subf %814, %823 : vector<4x4xf32>
    %825 = math.exp %824 : vector<4x4xf32>
    %cst_317 = arith.constant dense<0.000000e+00> : vector<4xf32>
    %826 = vector.multi_reduction <add>, %822, %cst_317 [1] : vector<4x8xf32> to vector<4xf32>
    %827 = vector.shape_cast %826 : vector<4xf32> to vector<4x1xf32>
    %cst_318 = arith.constant dense<0.000000e+00> : vector<4xf32>
    %828 = vector.multi_reduction <add>, %825, %cst_318 [1] : vector<4x4xf32> to vector<4xf32>
    %829 = vector.shape_cast %828 : vector<4xf32> to vector<4x1xf32>
    %830 = arith.addf %827, %829 : vector<4x1xf32>
    %831 = tpu.reciprocal %830 {approx = true} : vector<4x1xf32> -> vector<4x1xf32>
    %832 = arith.truncf %822 : vector<4x8xf32> to vector<4x8xbf16>
    %833 = vector.extract_strided_slice %778 {offsets = [0, 40], sizes = [8, 8], strides = [1, 1]} : vector<8x64xbf16> to vector<8x8xbf16>
    %cst_319 = arith.constant dense<0.000000e+00> : vector<4x8xf32>
    %834 = tpu.matmul %832, %833, %cst_319 {dimension_numbers = #tpu.dot_dimension_numbers<[1], [0], [0], [1], [0, 0, 1, 1], [], []>} : vector<4x8xbf16>, vector<8x8xbf16>, vector<4x8xf32> -> vector<4x8xf32>
    %835 = arith.truncf %825 : vector<4x4xf32> to vector<4x4xbf16>
    %836 = vector.extract_strided_slice %777 {offsets = [0, 40], sizes = [4, 8], strides = [1, 1]} : vector<4x64xbf16> to vector<4x8xbf16>
    %cst_320 = arith.constant dense<0.000000e+00> : vector<4x8xf32>
    %837 = tpu.matmul %835, %836, %cst_320 {dimension_numbers = #tpu.dot_dimension_numbers<[1], [0], [0], [1], [0, 0, 1, 1], [], []>} : vector<4x4xbf16>, vector<4x8xbf16>, vector<4x8xf32> -> vector<4x8xf32>
    %838 = arith.addf %834, %837 : vector<4x8xf32>
    %839 = vector.broadcast %831 : vector<4x1xf32> to vector<4x8xf32>
    %840 = arith.mulf %838, %839 : vector<4x8xf32>
    %841 = vector.extract_strided_slice %776 {offsets = [0, 16], sizes = [4, 8], strides = [1, 1]} : vector<4x32xbf16> to vector<4x8xbf16>
    %842 = vector.extract_strided_slice %778 {offsets = [0, 16], sizes = [8, 8], strides = [1, 1]} : vector<8x64xbf16> to vector<8x8xbf16>
    "tpu.trace_start"() <{level = 10 : i32, message = "id,jd->ij"}> : () -> ()
    %cst_321 = arith.constant dense<0.000000e+00> : vector<4x8xf32>
    %843 = tpu.matmul %841, %842, %cst_321 {dimension_numbers = #tpu.dot_dimension_numbers<[1], [1], [0], [0], [0, 0, 1, 0], [], []>} : vector<4x8xbf16>, vector<8x8xbf16>, vector<4x8xf32> -> vector<4x8xf32>
    "tpu.trace_stop"() : () -> ()
    %844 = vector.extract_strided_slice %777 {offsets = [0, 16], sizes = [4, 8], strides = [1, 1]} : vector<4x64xbf16> to vector<4x8xbf16>
    "tpu.trace_start"() <{level = 10 : i32, message = "id,jd->ij"}> : () -> ()
    %cst_322 = arith.constant dense<0.000000e+00> : vector<4x4xf32>
    %845 = tpu.matmul %841, %844, %cst_322 {dimension_numbers = #tpu.dot_dimension_numbers<[1], [1], [0], [0], [0, 0, 1, 0], [], []>} : vector<4x8xbf16>, vector<4x8xbf16>, vector<4x4xf32> -> vector<4x4xf32>
    "tpu.trace_stop"() : () -> ()
    %cst_323 = arith.constant dense<0xFF800000> : vector<4xf32>
    %846 = vector.multi_reduction <maximumf>, %843, %cst_323 [1] : vector<4x8xf32> to vector<4xf32>
    %847 = vector.shape_cast %846 : vector<4xf32> to vector<4x1xf32>
    %cst_324 = arith.constant dense<0xFF800000> : vector<4xf32>
    %848 = vector.multi_reduction <maximumf>, %845, %cst_324 [1] : vector<4x4xf32> to vector<4xf32>
    %849 = vector.shape_cast %848 : vector<4xf32> to vector<4x1xf32>
    %850 = arith.maximumf %847, %849 : vector<4x1xf32>
    %851 = vector.broadcast %850 : vector<4x1xf32> to vector<4x8xf32>
    %852 = arith.subf %843, %851 : vector<4x8xf32>
    %853 = math.exp %852 : vector<4x8xf32>
    %854 = vector.broadcast %850 : vector<4x1xf32> to vector<4x4xf32>
    %855 = arith.subf %845, %854 : vector<4x4xf32>
    %856 = math.exp %855 : vector<4x4xf32>
    %cst_325 = arith.constant dense<0.000000e+00> : vector<4xf32>
    %857 = vector.multi_reduction <add>, %853, %cst_325 [1] : vector<4x8xf32> to vector<4xf32>
    %858 = vector.shape_cast %857 : vector<4xf32> to vector<4x1xf32>
    %cst_326 = arith.constant dense<0.000000e+00> : vector<4xf32>
    %859 = vector.multi_reduction <add>, %856, %cst_326 [1] : vector<4x4xf32> to vector<4xf32>
    %860 = vector.shape_cast %859 : vector<4xf32> to vector<4x1xf32>
    %861 = arith.addf %858, %860 : vector<4x1xf32>
    %862 = tpu.reciprocal %861 {approx = true} : vector<4x1xf32> -> vector<4x1xf32>
    %863 = arith.truncf %853 : vector<4x8xf32> to vector<4x8xbf16>
    %864 = vector.extract_strided_slice %778 {offsets = [0, 48], sizes = [8, 8], strides = [1, 1]} : vector<8x64xbf16> to vector<8x8xbf16>
    %cst_327 = arith.constant dense<0.000000e+00> : vector<4x8xf32>
    %865 = tpu.matmul %863, %864, %cst_327 {dimension_numbers = #tpu.dot_dimension_numbers<[1], [0], [0], [1], [0, 0, 1, 1], [], []>} : vector<4x8xbf16>, vector<8x8xbf16>, vector<4x8xf32> -> vector<4x8xf32>
    %866 = arith.truncf %856 : vector<4x4xf32> to vector<4x4xbf16>
    %867 = vector.extract_strided_slice %777 {offsets = [0, 48], sizes = [4, 8], strides = [1, 1]} : vector<4x64xbf16> to vector<4x8xbf16>
    %cst_328 = arith.constant dense<0.000000e+00> : vector<4x8xf32>
    %868 = tpu.matmul %866, %867, %cst_328 {dimension_numbers = #tpu.dot_dimension_numbers<[1], [0], [0], [1], [0, 0, 1, 1], [], []>} : vector<4x4xbf16>, vector<4x8xbf16>, vector<4x8xf32> -> vector<4x8xf32>
    %869 = arith.addf %865, %868 : vector<4x8xf32>
    %870 = vector.broadcast %862 : vector<4x1xf32> to vector<4x8xf32>
    %871 = arith.mulf %869, %870 : vector<4x8xf32>
    %872 = vector.extract_strided_slice %776 {offsets = [0, 24], sizes = [4, 8], strides = [1, 1]} : vector<4x32xbf16> to vector<4x8xbf16>
    %873 = vector.extract_strided_slice %778 {offsets = [0, 24], sizes = [8, 8], strides = [1, 1]} : vector<8x64xbf16> to vector<8x8xbf16>
    "tpu.trace_start"() <{level = 10 : i32, message = "id,jd->ij"}> : () -> ()
    %cst_329 = arith.constant dense<0.000000e+00> : vector<4x8xf32>
    %874 = tpu.matmul %872, %873, %cst_329 {dimension_numbers = #tpu.dot_dimension_numbers<[1], [1], [0], [0], [0, 0, 1, 0], [], []>} : vector<4x8xbf16>, vector<8x8xbf16>, vector<4x8xf32> -> vector<4x8xf32>
    "tpu.trace_stop"() : () -> ()
    %875 = vector.extract_strided_slice %777 {offsets = [0, 24], sizes = [4, 8], strides = [1, 1]} : vector<4x64xbf16> to vector<4x8xbf16>
    "tpu.trace_start"() <{level = 10 : i32, message = "id,jd->ij"}> : () -> ()
    %cst_330 = arith.constant dense<0.000000e+00> : vector<4x4xf32>
    %876 = tpu.matmul %872, %875, %cst_330 {dimension_numbers = #tpu.dot_dimension_numbers<[1], [1], [0], [0], [0, 0, 1, 0], [], []>} : vector<4x8xbf16>, vector<4x8xbf16>, vector<4x4xf32> -> vector<4x4xf32>
    "tpu.trace_stop"() : () -> ()
    %cst_331 = arith.constant dense<0xFF800000> : vector<4xf32>
    %877 = vector.multi_reduction <maximumf>, %874, %cst_331 [1] : vector<4x8xf32> to vector<4xf32>
    %878 = vector.shape_cast %877 : vector<4xf32> to vector<4x1xf32>
    %cst_332 = arith.constant dense<0xFF800000> : vector<4xf32>
    %879 = vector.multi_reduction <maximumf>, %876, %cst_332 [1] : vector<4x4xf32> to vector<4xf32>
    %880 = vector.shape_cast %879 : vector<4xf32> to vector<4x1xf32>
    %881 = arith.maximumf %878, %880 : vector<4x1xf32>
    %882 = vector.broadcast %881 : vector<4x1xf32> to vector<4x8xf32>
    %883 = arith.subf %874, %882 : vector<4x8xf32>
    %884 = math.exp %883 : vector<4x8xf32>
    %885 = vector.broadcast %881 : vector<4x1xf32> to vector<4x4xf32>
    %886 = arith.subf %876, %885 : vector<4x4xf32>
    %887 = math.exp %886 : vector<4x4xf32>
    %cst_333 = arith.constant dense<0.000000e+00> : vector<4xf32>
    %888 = vector.multi_reduction <add>, %884, %cst_333 [1] : vector<4x8xf32> to vector<4xf32>
    %889 = vector.shape_cast %888 : vector<4xf32> to vector<4x1xf32>
    %cst_334 = arith.constant dense<0.000000e+00> : vector<4xf32>
    %890 = vector.multi_reduction <add>, %887, %cst_334 [1] : vector<4x4xf32> to vector<4xf32>
    %891 = vector.shape_cast %890 : vector<4xf32> to vector<4x1xf32>
    %892 = arith.addf %889, %891 : vector<4x1xf32>
    %893 = tpu.reciprocal %892 {approx = true} : vector<4x1xf32> -> vector<4x1xf32>
    %894 = arith.truncf %884 : vector<4x8xf32> to vector<4x8xbf16>
    %895 = vector.extract_strided_slice %778 {offsets = [0, 56], sizes = [8, 8], strides = [1, 1]} : vector<8x64xbf16> to vector<8x8xbf16>
    %cst_335 = arith.constant dense<0.000000e+00> : vector<4x8xf32>
    %896 = tpu.matmul %894, %895, %cst_335 {dimension_numbers = #tpu.dot_dimension_numbers<[1], [0], [0], [1], [0, 0, 1, 1], [], []>} : vector<4x8xbf16>, vector<8x8xbf16>, vector<4x8xf32> -> vector<4x8xf32>
    %897 = arith.truncf %887 : vector<4x4xf32> to vector<4x4xbf16>
    %898 = vector.extract_strided_slice %777 {offsets = [0, 56], sizes = [4, 8], strides = [1, 1]} : vector<4x64xbf16> to vector<4x8xbf16>
    %cst_336 = arith.constant dense<0.000000e+00> : vector<4x8xf32>
    %899 = tpu.matmul %897, %898, %cst_336 {dimension_numbers = #tpu.dot_dimension_numbers<[1], [0], [0], [1], [0, 0, 1, 1], [], []>} : vector<4x4xbf16>, vector<4x8xbf16>, vector<4x8xf32> -> vector<4x8xf32>
    %900 = arith.addf %896, %899 : vector<4x8xf32>
    %901 = vector.broadcast %893 : vector<4x1xf32> to vector<4x8xf32>
    %902 = arith.mulf %900, %901 : vector<4x8xf32>
    %903 = tpu.concatenate %809, %840, %871, %902 in 1 : vector<4x8xf32>, vector<4x8xf32>, vector<4x8xf32>, vector<4x8xf32> -> vector<4x32xf32>
    %904 = arith.truncf %903 : vector<4x32xf32> to vector<4x32xbf16>
    %c1_337 = arith.constant 1 : index
    %c0_338 = arith.constant 0 : index
    %c0_339 = arith.constant 0 : index
    %905 = vector.load %arg12[%c1_337, %c0_338, %c0_339] : memref<2x32x32xbf16, #tpu.memory_space<vmem>>, vector<1x32x32xbf16>
    %906 = vector.shape_cast %905 : vector<1x32x32xbf16> to vector<32x32xbf16>
    %cst_340 = arith.constant dense<0.000000e+00> : vector<4x32xf32>
    %907 = tpu.matmul %904, %906, %cst_340 {dimension_numbers = #tpu.dot_dimension_numbers<[1], [0], [0], [1], [0, 0, 1, 1], [], []>} : vector<4x32xbf16>, vector<32x32xbf16>, vector<4x32xf32> -> vector<4x32xf32>
    %908 = arith.addf %907, %270 : vector<4x32xf32>
    %cst_341 = arith.constant dense<0.000000e+00> : vector<4xf32>
    %909 = vector.multi_reduction <add>, %908, %cst_341 [1] : vector<4x32xf32> to vector<4xf32>
    %910 = vector.shape_cast %909 : vector<4xf32> to vector<4x1xf32>
    %cst_342 = arith.constant 3.200000e+01 : f32
    %911 = vector.broadcast %cst_342 : f32 to vector<4x1xf32>
    %912 = arith.divf %910, %911 : vector<4x1xf32>
    %913 = vector.broadcast %912 : vector<4x1xf32> to vector<4x32xf32>
    %914 = arith.subf %908, %913 : vector<4x32xf32>
    %915 = arith.mulf %914, %914 : vector<4x32xf32>
    %cst_343 = arith.constant dense<0.000000e+00> : vector<4xf32>
    %916 = vector.multi_reduction <add>, %915, %cst_343 [1] : vector<4x32xf32> to vector<4xf32>
    %917 = vector.shape_cast %916 : vector<4xf32> to vector<4x1xf32>
    %cst_344 = arith.constant 3.200000e+01 : f32
    %918 = vector.broadcast %cst_344 : f32 to vector<4x1xf32>
    %919 = arith.divf %917, %918 : vector<4x1xf32>
    %cst_345 = arith.constant 9.99999974E-6 : f32
    %920 = vector.broadcast %cst_345 : f32 to vector<4x1xf32>
    %921 = arith.addf %919, %920 : vector<4x1xf32>
    %922 = math.rsqrt %921 : vector<4x1xf32>
    %923 = vector.broadcast %922 : vector<4x1xf32> to vector<4x32xf32>
    %924 = arith.mulf %914, %923 : vector<4x32xf32>
    %925 = arith.truncf %924 : vector<4x32xf32> to vector<4x32xbf16>
    %c1_346 = arith.constant 1 : index
    %c0_347 = arith.constant 0 : index
    %c0_348 = arith.constant 0 : index
    %926 = vector.load %arg13[%c1_346, %c0_347, %c0_348] : memref<2x32x128xbf16, #tpu.memory_space<vmem>>, vector<1x32x128xbf16>
    %927 = vector.shape_cast %926 : vector<1x32x128xbf16> to vector<32x128xbf16>
    %cst_349 = arith.constant dense<0.000000e+00> : vector<4x128xf32>
    %928 = tpu.matmul %925, %927, %cst_349 {dimension_numbers = #tpu.dot_dimension_numbers<[1], [0], [0], [1], [0, 0, 1, 1], [], []>} : vector<4x32xbf16>, vector<32x128xbf16>, vector<4x128xf32> -> vector<4x128xf32>
    %c1_350 = arith.constant 1 : index
    %c0_351 = arith.constant 0 : index
    %c0_352 = arith.constant 0 : index
    %929 = vector.load %arg14[%c1_350, %c0_351, %c0_352] : memref<2x1x128xf32, #tpu.memory_space<vmem>>, vector<1x1x128xf32>
    %930 = vector.shape_cast %929 : vector<1x1x128xf32> to vector<1x128xf32>
    %931 = vector.broadcast %930 : vector<1x128xf32> to vector<4x128xf32>
    %932 = arith.addf %928, %931 : vector<4x128xf32>
    %cst_353 = arith.constant 0.707106769 : f32
    %933 = vector.broadcast %cst_353 : f32 to vector<4x128xf32>
    %934 = arith.mulf %932, %933 : vector<4x128xf32>
    %935 = math.absf %934 : vector<4x128xf32>
    %cst_354 = arith.constant 0.327591091 : f32
    %936 = vector.broadcast %cst_354 : f32 to vector<4x128xf32>
    %937 = arith.mulf %936, %935 : vector<4x128xf32>
    %cst_355 = arith.constant 1.000000e+00 : f32
    %938 = vector.broadcast %cst_355 : f32 to vector<4x128xf32>
    %939 = arith.addf %938, %937 : vector<4x128xf32>
    %cst_356 = arith.constant 1.000000e+00 : f32
    %940 = vector.broadcast %cst_356 : f32 to vector<4x128xf32>
    %941 = arith.divf %940, %939 : vector<4x128xf32>
    %cst_357 = arith.constant 1.06140542 : f32
    %942 = vector.broadcast %cst_357 : f32 to vector<4x128xf32>
    %943 = arith.mulf %942, %941 : vector<4x128xf32>
    %cst_358 = arith.constant -1.45315206 : f32
    %944 = vector.broadcast %cst_358 : f32 to vector<4x128xf32>
    %945 = arith.addf %943, %944 : vector<4x128xf32>
    %946 = arith.mulf %945, %941 : vector<4x128xf32>
    %cst_359 = arith.constant 1.42141378 : f32
    %947 = vector.broadcast %cst_359 : f32 to vector<4x128xf32>
    %948 = arith.addf %946, %947 : vector<4x128xf32>
    %949 = arith.mulf %948, %941 : vector<4x128xf32>
    %cst_360 = arith.constant -0.284496725 : f32
    %950 = vector.broadcast %cst_360 : f32 to vector<4x128xf32>
    %951 = arith.addf %949, %950 : vector<4x128xf32>
    %952 = arith.mulf %951, %941 : vector<4x128xf32>
    %cst_361 = arith.constant 0.254829586 : f32
    %953 = vector.broadcast %cst_361 : f32 to vector<4x128xf32>
    %954 = arith.addf %952, %953 : vector<4x128xf32>
    %955 = arith.mulf %954, %941 : vector<4x128xf32>
    %956 = arith.mulf %935, %935 : vector<4x128xf32>
    %cst_362 = arith.constant 0.000000e+00 : f32
    %957 = vector.broadcast %cst_362 : f32 to vector<4x128xf32>
    %958 = arith.subf %957, %956 : vector<4x128xf32>
    %959 = math.exp %958 : vector<4x128xf32>
    %960 = arith.mulf %955, %959 : vector<4x128xf32>
    %cst_363 = arith.constant 1.000000e+00 : f32
    %961 = vector.broadcast %cst_363 : f32 to vector<4x128xf32>
    %962 = arith.subf %961, %960 : vector<4x128xf32>
    %cst_364 = arith.constant 0.000000e+00 : f32
    %963 = vector.broadcast %cst_364 : f32 to vector<4x128xf32>
    %964 = arith.cmpf olt, %934, %963 : vector<4x128xf32>
    %cst_365 = arith.constant 0.000000e+00 : f32
    %965 = vector.broadcast %cst_365 : f32 to vector<4x128xf32>
    %966 = arith.subf %965, %962 : vector<4x128xf32>
    %967 = arith.select %964, %966, %962 : vector<4x128xi1>, vector<4x128xf32>
    %cst_366 = arith.constant 1.000000e+00 : f32
    %968 = vector.broadcast %cst_366 : f32 to vector<4x128xf32>
    %969 = arith.addf %968, %967 : vector<4x128xf32>
    %cst_367 = arith.constant 5.000000e-01 : f32
    %970 = vector.broadcast %cst_367 : f32 to vector<4x128xf32>
    %971 = arith.mulf %970, %969 : vector<4x128xf32>
    %972 = arith.mulf %932, %971 : vector<4x128xf32>
    %973 = arith.truncf %972 : vector<4x128xf32> to vector<4x128xbf16>
    %c1_368 = arith.constant 1 : index
    %c0_369 = arith.constant 0 : index
    %c0_370 = arith.constant 0 : index
    %974 = vector.load %arg15[%c1_368, %c0_369, %c0_370] : memref<2x128x32xbf16, #tpu.memory_space<vmem>>, vector<1x128x32xbf16>
    %975 = vector.shape_cast %974 : vector<1x128x32xbf16> to vector<128x32xbf16>
    %cst_371 = arith.constant dense<0.000000e+00> : vector<4x32xf32>
    %976 = tpu.matmul %973, %975, %cst_371 {dimension_numbers = #tpu.dot_dimension_numbers<[1], [0], [0], [1], [0, 0, 1, 1], [], []>} : vector<4x128xbf16>, vector<128x32xbf16>, vector<4x32xf32> -> vector<4x32xf32>
    %977 = arith.addf %976, %908 : vector<4x32xf32>
    %cst_372 = arith.constant dense<0.000000e+00> : vector<4xf32>
    %978 = vector.multi_reduction <add>, %503, %cst_372 [1] : vector<4x32xf32> to vector<4xf32>
    %979 = vector.shape_cast %978 : vector<4xf32> to vector<4x1xf32>
    %cst_373 = arith.constant 3.200000e+01 : f32
    %980 = vector.broadcast %cst_373 : f32 to vector<4x1xf32>
    %981 = arith.divf %979, %980 : vector<4x1xf32>
    %982 = vector.broadcast %981 : vector<4x1xf32> to vector<4x32xf32>
    %983 = arith.subf %503, %982 : vector<4x32xf32>
    %984 = arith.mulf %983, %983 : vector<4x32xf32>
    %cst_374 = arith.constant dense<0.000000e+00> : vector<4xf32>
    %985 = vector.multi_reduction <add>, %984, %cst_374 [1] : vector<4x32xf32> to vector<4xf32>
    %986 = vector.shape_cast %985 : vector<4xf32> to vector<4x1xf32>
    %cst_375 = arith.constant 3.200000e+01 : f32
    %987 = vector.broadcast %cst_375 : f32 to vector<4x1xf32>
    %988 = arith.divf %986, %987 : vector<4x1xf32>
    %cst_376 = arith.constant 9.99999974E-6 : f32
    %989 = vector.broadcast %cst_376 : f32 to vector<4x1xf32>
    %990 = arith.addf %988, %989 : vector<4x1xf32>
    %991 = math.rsqrt %990 : vector<4x1xf32>
    %992 = vector.broadcast %991 : vector<4x1xf32> to vector<4x32xf32>
    %993 = arith.mulf %983, %992 : vector<4x32xf32>
    %994 = arith.truncf %993 : vector<4x32xf32> to vector<4x32xbf16>
    %c1_377 = arith.constant 1 : index
    %c0_378 = arith.constant 0 : index
    %c0_379 = arith.constant 0 : index
    %995 = vector.load %arg6[%c1_377, %c0_378, %c0_379] : memref<2x32x32xbf16, #tpu.memory_space<vmem>>, vector<1x32x32xbf16>
    %996 = vector.shape_cast %995 : vector<1x32x32xbf16> to vector<32x32xbf16>
    %cst_380 = arith.constant dense<0.000000e+00> : vector<4x32xf32>
    %997 = tpu.matmul %994, %996, %cst_380 {dimension_numbers = #tpu.dot_dimension_numbers<[1], [0], [0], [1], [0, 0, 1, 1], [], []>} : vector<4x32xbf16>, vector<32x32xbf16>, vector<4x32xf32> -> vector<4x32xf32>
    %c1_381 = arith.constant 1 : index
    %c0_382 = arith.constant 0 : index
    %c0_383 = arith.constant 0 : index
    %998 = vector.load %arg7[%c1_381, %c0_382, %c0_383] : memref<2x1x32xf32, #tpu.memory_space<vmem>>, vector<1x1x32xf32>
    %999 = vector.shape_cast %998 : vector<1x1x32xf32> to vector<1x32xf32>
    %1000 = vector.broadcast %999 : vector<1x32xf32> to vector<4x32xf32>
    %1001 = arith.addf %997, %1000 : vector<4x32xf32>
    %c1_384 = arith.constant 1 : index
    %c0_385 = arith.constant 0 : index
    %c0_386 = arith.constant 0 : index
    %1002 = vector.load %arg10[%c1_384, %c0_385, %c0_386] : memref<2x32x64xbf16, #tpu.memory_space<vmem>>, vector<1x32x64xbf16>
    %1003 = vector.shape_cast %1002 : vector<1x32x64xbf16> to vector<32x64xbf16>
    %cst_387 = arith.constant dense<0.000000e+00> : vector<4x64xf32>
    %1004 = tpu.matmul %994, %1003, %cst_387 {dimension_numbers = #tpu.dot_dimension_numbers<[1], [0], [0], [1], [0, 0, 1, 1], [], []>} : vector<4x32xbf16>, vector<32x64xbf16>, vector<4x64xf32> -> vector<4x64xf32>
    %c1_388 = arith.constant 1 : index
    %c0_389 = arith.constant 0 : index
    %c0_390 = arith.constant 0 : index
    %1005 = vector.load %arg11[%c1_388, %c0_389, %c0_390] : memref<2x1x64xf32, #tpu.memory_space<vmem>>, vector<1x1x64xf32>
    %1006 = vector.shape_cast %1005 : vector<1x1x64xf32> to vector<1x64xf32>
    %1007 = vector.broadcast %1006 : vector<1x64xf32> to vector<4x64xf32>
    %1008 = arith.addf %1004, %1007 : vector<4x64xf32>
    %1009 = arith.truncf %1001 : vector<4x32xf32> to vector<4x32xbf16>
    %1010 = arith.truncf %1008 : vector<4x64xf32> to vector<4x64xbf16>
    %1011 = vector.extract_strided_slice %744 {offsets = [8, 0], sizes = [8, 64], strides = [1, 1]} : vector<24x64xbf16> to vector<8x64xbf16>
    %1012 = vector.extract_strided_slice %1009 {offsets = [0, 0], sizes = [4, 8], strides = [1, 1]} : vector<4x32xbf16> to vector<4x8xbf16>
    %1013 = vector.extract_strided_slice %1011 {offsets = [0, 0], sizes = [8, 8], strides = [1, 1]} : vector<8x64xbf16> to vector<8x8xbf16>
    "tpu.trace_start"() <{level = 10 : i32, message = "id,jd->ij"}> : () -> ()
    %cst_391 = arith.constant dense<0.000000e+00> : vector<4x8xf32>
    %1014 = tpu.matmul %1012, %1013, %cst_391 {dimension_numbers = #tpu.dot_dimension_numbers<[1], [1], [0], [0], [0, 0, 1, 0], [], []>} : vector<4x8xbf16>, vector<8x8xbf16>, vector<4x8xf32> -> vector<4x8xf32>
    "tpu.trace_stop"() : () -> ()
    %1015 = vector.extract_strided_slice %1010 {offsets = [0, 0], sizes = [4, 8], strides = [1, 1]} : vector<4x64xbf16> to vector<4x8xbf16>
    "tpu.trace_start"() <{level = 10 : i32, message = "id,jd->ij"}> : () -> ()
    %cst_392 = arith.constant dense<0.000000e+00> : vector<4x4xf32>
    %1016 = tpu.matmul %1012, %1015, %cst_392 {dimension_numbers = #tpu.dot_dimension_numbers<[1], [1], [0], [0], [0, 0, 1, 0], [], []>} : vector<4x8xbf16>, vector<4x8xbf16>, vector<4x4xf32> -> vector<4x4xf32>
    "tpu.trace_stop"() : () -> ()
    %cst_393 = arith.constant dense<0xFF800000> : vector<4xf32>
    %1017 = vector.multi_reduction <maximumf>, %1014, %cst_393 [1] : vector<4x8xf32> to vector<4xf32>
    %1018 = vector.shape_cast %1017 : vector<4xf32> to vector<4x1xf32>
    %cst_394 = arith.constant dense<0xFF800000> : vector<4xf32>
    %1019 = vector.multi_reduction <maximumf>, %1016, %cst_394 [1] : vector<4x4xf32> to vector<4xf32>
    %1020 = vector.shape_cast %1019 : vector<4xf32> to vector<4x1xf32>
    %1021 = arith.maximumf %1018, %1020 : vector<4x1xf32>
    %1022 = vector.broadcast %1021 : vector<4x1xf32> to vector<4x8xf32>
    %1023 = arith.subf %1014, %1022 : vector<4x8xf32>
    %1024 = math.exp %1023 : vector<4x8xf32>
    %1025 = vector.broadcast %1021 : vector<4x1xf32> to vector<4x4xf32>
    %1026 = arith.subf %1016, %1025 : vector<4x4xf32>
    %1027 = math.exp %1026 : vector<4x4xf32>
    %cst_395 = arith.constant dense<0.000000e+00> : vector<4xf32>
    %1028 = vector.multi_reduction <add>, %1024, %cst_395 [1] : vector<4x8xf32> to vector<4xf32>
    %1029 = vector.shape_cast %1028 : vector<4xf32> to vector<4x1xf32>
    %cst_396 = arith.constant dense<0.000000e+00> : vector<4xf32>
    %1030 = vector.multi_reduction <add>, %1027, %cst_396 [1] : vector<4x4xf32> to vector<4xf32>
    %1031 = vector.shape_cast %1030 : vector<4xf32> to vector<4x1xf32>
    %1032 = arith.addf %1029, %1031 : vector<4x1xf32>
    %1033 = tpu.reciprocal %1032 {approx = true} : vector<4x1xf32> -> vector<4x1xf32>
    %1034 = arith.truncf %1024 : vector<4x8xf32> to vector<4x8xbf16>
    %1035 = vector.extract_strided_slice %1011 {offsets = [0, 32], sizes = [8, 8], strides = [1, 1]} : vector<8x64xbf16> to vector<8x8xbf16>
    %cst_397 = arith.constant dense<0.000000e+00> : vector<4x8xf32>
    %1036 = tpu.matmul %1034, %1035, %cst_397 {dimension_numbers = #tpu.dot_dimension_numbers<[1], [0], [0], [1], [0, 0, 1, 1], [], []>} : vector<4x8xbf16>, vector<8x8xbf16>, vector<4x8xf32> -> vector<4x8xf32>
    %1037 = arith.truncf %1027 : vector<4x4xf32> to vector<4x4xbf16>
    %1038 = vector.extract_strided_slice %1010 {offsets = [0, 32], sizes = [4, 8], strides = [1, 1]} : vector<4x64xbf16> to vector<4x8xbf16>
    %cst_398 = arith.constant dense<0.000000e+00> : vector<4x8xf32>
    %1039 = tpu.matmul %1037, %1038, %cst_398 {dimension_numbers = #tpu.dot_dimension_numbers<[1], [0], [0], [1], [0, 0, 1, 1], [], []>} : vector<4x4xbf16>, vector<4x8xbf16>, vector<4x8xf32> -> vector<4x8xf32>
    %1040 = arith.addf %1036, %1039 : vector<4x8xf32>
    %1041 = vector.broadcast %1033 : vector<4x1xf32> to vector<4x8xf32>
    %1042 = arith.mulf %1040, %1041 : vector<4x8xf32>
    %1043 = vector.extract_strided_slice %1009 {offsets = [0, 8], sizes = [4, 8], strides = [1, 1]} : vector<4x32xbf16> to vector<4x8xbf16>
    %1044 = vector.extract_strided_slice %1011 {offsets = [0, 8], sizes = [8, 8], strides = [1, 1]} : vector<8x64xbf16> to vector<8x8xbf16>
    "tpu.trace_start"() <{level = 10 : i32, message = "id,jd->ij"}> : () -> ()
    %cst_399 = arith.constant dense<0.000000e+00> : vector<4x8xf32>
    %1045 = tpu.matmul %1043, %1044, %cst_399 {dimension_numbers = #tpu.dot_dimension_numbers<[1], [1], [0], [0], [0, 0, 1, 0], [], []>} : vector<4x8xbf16>, vector<8x8xbf16>, vector<4x8xf32> -> vector<4x8xf32>
    "tpu.trace_stop"() : () -> ()
    %1046 = vector.extract_strided_slice %1010 {offsets = [0, 8], sizes = [4, 8], strides = [1, 1]} : vector<4x64xbf16> to vector<4x8xbf16>
    "tpu.trace_start"() <{level = 10 : i32, message = "id,jd->ij"}> : () -> ()
    %cst_400 = arith.constant dense<0.000000e+00> : vector<4x4xf32>
    %1047 = tpu.matmul %1043, %1046, %cst_400 {dimension_numbers = #tpu.dot_dimension_numbers<[1], [1], [0], [0], [0, 0, 1, 0], [], []>} : vector<4x8xbf16>, vector<4x8xbf16>, vector<4x4xf32> -> vector<4x4xf32>
    "tpu.trace_stop"() : () -> ()
    %cst_401 = arith.constant dense<0xFF800000> : vector<4xf32>
    %1048 = vector.multi_reduction <maximumf>, %1045, %cst_401 [1] : vector<4x8xf32> to vector<4xf32>
    %1049 = vector.shape_cast %1048 : vector<4xf32> to vector<4x1xf32>
    %cst_402 = arith.constant dense<0xFF800000> : vector<4xf32>
    %1050 = vector.multi_reduction <maximumf>, %1047, %cst_402 [1] : vector<4x4xf32> to vector<4xf32>
    %1051 = vector.shape_cast %1050 : vector<4xf32> to vector<4x1xf32>
    %1052 = arith.maximumf %1049, %1051 : vector<4x1xf32>
    %1053 = vector.broadcast %1052 : vector<4x1xf32> to vector<4x8xf32>
    %1054 = arith.subf %1045, %1053 : vector<4x8xf32>
    %1055 = math.exp %1054 : vector<4x8xf32>
    %1056 = vector.broadcast %1052 : vector<4x1xf32> to vector<4x4xf32>
    %1057 = arith.subf %1047, %1056 : vector<4x4xf32>
    %1058 = math.exp %1057 : vector<4x4xf32>
    %cst_403 = arith.constant dense<0.000000e+00> : vector<4xf32>
    %1059 = vector.multi_reduction <add>, %1055, %cst_403 [1] : vector<4x8xf32> to vector<4xf32>
    %1060 = vector.shape_cast %1059 : vector<4xf32> to vector<4x1xf32>
    %cst_404 = arith.constant dense<0.000000e+00> : vector<4xf32>
    %1061 = vector.multi_reduction <add>, %1058, %cst_404 [1] : vector<4x4xf32> to vector<4xf32>
    %1062 = vector.shape_cast %1061 : vector<4xf32> to vector<4x1xf32>
    %1063 = arith.addf %1060, %1062 : vector<4x1xf32>
    %1064 = tpu.reciprocal %1063 {approx = true} : vector<4x1xf32> -> vector<4x1xf32>
    %1065 = arith.truncf %1055 : vector<4x8xf32> to vector<4x8xbf16>
    %1066 = vector.extract_strided_slice %1011 {offsets = [0, 40], sizes = [8, 8], strides = [1, 1]} : vector<8x64xbf16> to vector<8x8xbf16>
    %cst_405 = arith.constant dense<0.000000e+00> : vector<4x8xf32>
    %1067 = tpu.matmul %1065, %1066, %cst_405 {dimension_numbers = #tpu.dot_dimension_numbers<[1], [0], [0], [1], [0, 0, 1, 1], [], []>} : vector<4x8xbf16>, vector<8x8xbf16>, vector<4x8xf32> -> vector<4x8xf32>
    %1068 = arith.truncf %1058 : vector<4x4xf32> to vector<4x4xbf16>
    %1069 = vector.extract_strided_slice %1010 {offsets = [0, 40], sizes = [4, 8], strides = [1, 1]} : vector<4x64xbf16> to vector<4x8xbf16>
    %cst_406 = arith.constant dense<0.000000e+00> : vector<4x8xf32>
    %1070 = tpu.matmul %1068, %1069, %cst_406 {dimension_numbers = #tpu.dot_dimension_numbers<[1], [0], [0], [1], [0, 0, 1, 1], [], []>} : vector<4x4xbf16>, vector<4x8xbf16>, vector<4x8xf32> -> vector<4x8xf32>
    %1071 = arith.addf %1067, %1070 : vector<4x8xf32>
    %1072 = vector.broadcast %1064 : vector<4x1xf32> to vector<4x8xf32>
    %1073 = arith.mulf %1071, %1072 : vector<4x8xf32>
    %1074 = vector.extract_strided_slice %1009 {offsets = [0, 16], sizes = [4, 8], strides = [1, 1]} : vector<4x32xbf16> to vector<4x8xbf16>
    %1075 = vector.extract_strided_slice %1011 {offsets = [0, 16], sizes = [8, 8], strides = [1, 1]} : vector<8x64xbf16> to vector<8x8xbf16>
    "tpu.trace_start"() <{level = 10 : i32, message = "id,jd->ij"}> : () -> ()
    %cst_407 = arith.constant dense<0.000000e+00> : vector<4x8xf32>
    %1076 = tpu.matmul %1074, %1075, %cst_407 {dimension_numbers = #tpu.dot_dimension_numbers<[1], [1], [0], [0], [0, 0, 1, 0], [], []>} : vector<4x8xbf16>, vector<8x8xbf16>, vector<4x8xf32> -> vector<4x8xf32>
    "tpu.trace_stop"() : () -> ()
    %1077 = vector.extract_strided_slice %1010 {offsets = [0, 16], sizes = [4, 8], strides = [1, 1]} : vector<4x64xbf16> to vector<4x8xbf16>
    "tpu.trace_start"() <{level = 10 : i32, message = "id,jd->ij"}> : () -> ()
    %cst_408 = arith.constant dense<0.000000e+00> : vector<4x4xf32>
    %1078 = tpu.matmul %1074, %1077, %cst_408 {dimension_numbers = #tpu.dot_dimension_numbers<[1], [1], [0], [0], [0, 0, 1, 0], [], []>} : vector<4x8xbf16>, vector<4x8xbf16>, vector<4x4xf32> -> vector<4x4xf32>
    "tpu.trace_stop"() : () -> ()
    %cst_409 = arith.constant dense<0xFF800000> : vector<4xf32>
    %1079 = vector.multi_reduction <maximumf>, %1076, %cst_409 [1] : vector<4x8xf32> to vector<4xf32>
    %1080 = vector.shape_cast %1079 : vector<4xf32> to vector<4x1xf32>
    %cst_410 = arith.constant dense<0xFF800000> : vector<4xf32>
    %1081 = vector.multi_reduction <maximumf>, %1078, %cst_410 [1] : vector<4x4xf32> to vector<4xf32>
    %1082 = vector.shape_cast %1081 : vector<4xf32> to vector<4x1xf32>
    %1083 = arith.maximumf %1080, %1082 : vector<4x1xf32>
    %1084 = vector.broadcast %1083 : vector<4x1xf32> to vector<4x8xf32>
    %1085 = arith.subf %1076, %1084 : vector<4x8xf32>
    %1086 = math.exp %1085 : vector<4x8xf32>
    %1087 = vector.broadcast %1083 : vector<4x1xf32> to vector<4x4xf32>
    %1088 = arith.subf %1078, %1087 : vector<4x4xf32>
    %1089 = math.exp %1088 : vector<4x4xf32>
    %cst_411 = arith.constant dense<0.000000e+00> : vector<4xf32>
    %1090 = vector.multi_reduction <add>, %1086, %cst_411 [1] : vector<4x8xf32> to vector<4xf32>
    %1091 = vector.shape_cast %1090 : vector<4xf32> to vector<4x1xf32>
    %cst_412 = arith.constant dense<0.000000e+00> : vector<4xf32>
    %1092 = vector.multi_reduction <add>, %1089, %cst_412 [1] : vector<4x4xf32> to vector<4xf32>
    %1093 = vector.shape_cast %1092 : vector<4xf32> to vector<4x1xf32>
    %1094 = arith.addf %1091, %1093 : vector<4x1xf32>
    %1095 = tpu.reciprocal %1094 {approx = true} : vector<4x1xf32> -> vector<4x1xf32>
    %1096 = arith.truncf %1086 : vector<4x8xf32> to vector<4x8xbf16>
    %1097 = vector.extract_strided_slice %1011 {offsets = [0, 48], sizes = [8, 8], strides = [1, 1]} : vector<8x64xbf16> to vector<8x8xbf16>
    %cst_413 = arith.constant dense<0.000000e+00> : vector<4x8xf32>
    %1098 = tpu.matmul %1096, %1097, %cst_413 {dimension_numbers = #tpu.dot_dimension_numbers<[1], [0], [0], [1], [0, 0, 1, 1], [], []>} : vector<4x8xbf16>, vector<8x8xbf16>, vector<4x8xf32> -> vector<4x8xf32>
    %1099 = arith.truncf %1089 : vector<4x4xf32> to vector<4x4xbf16>
    %1100 = vector.extract_strided_slice %1010 {offsets = [0, 48], sizes = [4, 8], strides = [1, 1]} : vector<4x64xbf16> to vector<4x8xbf16>
    %cst_414 = arith.constant dense<0.000000e+00> : vector<4x8xf32>
    %1101 = tpu.matmul %1099, %1100, %cst_414 {dimension_numbers = #tpu.dot_dimension_numbers<[1], [0], [0], [1], [0, 0, 1, 1], [], []>} : vector<4x4xbf16>, vector<4x8xbf16>, vector<4x8xf32> -> vector<4x8xf32>
    %1102 = arith.addf %1098, %1101 : vector<4x8xf32>
    %1103 = vector.broadcast %1095 : vector<4x1xf32> to vector<4x8xf32>
    %1104 = arith.mulf %1102, %1103 : vector<4x8xf32>
    %1105 = vector.extract_strided_slice %1009 {offsets = [0, 24], sizes = [4, 8], strides = [1, 1]} : vector<4x32xbf16> to vector<4x8xbf16>
    %1106 = vector.extract_strided_slice %1011 {offsets = [0, 24], sizes = [8, 8], strides = [1, 1]} : vector<8x64xbf16> to vector<8x8xbf16>
    "tpu.trace_start"() <{level = 10 : i32, message = "id,jd->ij"}> : () -> ()
    %cst_415 = arith.constant dense<0.000000e+00> : vector<4x8xf32>
    %1107 = tpu.matmul %1105, %1106, %cst_415 {dimension_numbers = #tpu.dot_dimension_numbers<[1], [1], [0], [0], [0, 0, 1, 0], [], []>} : vector<4x8xbf16>, vector<8x8xbf16>, vector<4x8xf32> -> vector<4x8xf32>
    "tpu.trace_stop"() : () -> ()
    %1108 = vector.extract_strided_slice %1010 {offsets = [0, 24], sizes = [4, 8], strides = [1, 1]} : vector<4x64xbf16> to vector<4x8xbf16>
    "tpu.trace_start"() <{level = 10 : i32, message = "id,jd->ij"}> : () -> ()
    %cst_416 = arith.constant dense<0.000000e+00> : vector<4x4xf32>
    %1109 = tpu.matmul %1105, %1108, %cst_416 {dimension_numbers = #tpu.dot_dimension_numbers<[1], [1], [0], [0], [0, 0, 1, 0], [], []>} : vector<4x8xbf16>, vector<4x8xbf16>, vector<4x4xf32> -> vector<4x4xf32>
    "tpu.trace_stop"() : () -> ()
    %cst_417 = arith.constant dense<0xFF800000> : vector<4xf32>
    %1110 = vector.multi_reduction <maximumf>, %1107, %cst_417 [1] : vector<4x8xf32> to vector<4xf32>
    %1111 = vector.shape_cast %1110 : vector<4xf32> to vector<4x1xf32>
    %cst_418 = arith.constant dense<0xFF800000> : vector<4xf32>
    %1112 = vector.multi_reduction <maximumf>, %1109, %cst_418 [1] : vector<4x4xf32> to vector<4xf32>
    %1113 = vector.shape_cast %1112 : vector<4xf32> to vector<4x1xf32>
    %1114 = arith.maximumf %1111, %1113 : vector<4x1xf32>
    %1115 = vector.broadcast %1114 : vector<4x1xf32> to vector<4x8xf32>
    %1116 = arith.subf %1107, %1115 : vector<4x8xf32>
    %1117 = math.exp %1116 : vector<4x8xf32>
    %1118 = vector.broadcast %1114 : vector<4x1xf32> to vector<4x4xf32>
    %1119 = arith.subf %1109, %1118 : vector<4x4xf32>
    %1120 = math.exp %1119 : vector<4x4xf32>
    %cst_419 = arith.constant dense<0.000000e+00> : vector<4xf32>
    %1121 = vector.multi_reduction <add>, %1117, %cst_419 [1] : vector<4x8xf32> to vector<4xf32>
    %1122 = vector.shape_cast %1121 : vector<4xf32> to vector<4x1xf32>
    %cst_420 = arith.constant dense<0.000000e+00> : vector<4xf32>
    %1123 = vector.multi_reduction <add>, %1120, %cst_420 [1] : vector<4x4xf32> to vector<4xf32>
    %1124 = vector.shape_cast %1123 : vector<4xf32> to vector<4x1xf32>
    %1125 = arith.addf %1122, %1124 : vector<4x1xf32>
    %1126 = tpu.reciprocal %1125 {approx = true} : vector<4x1xf32> -> vector<4x1xf32>
    %1127 = arith.truncf %1117 : vector<4x8xf32> to vector<4x8xbf16>
    %1128 = vector.extract_strided_slice %1011 {offsets = [0, 56], sizes = [8, 8], strides = [1, 1]} : vector<8x64xbf16> to vector<8x8xbf16>
    %cst_421 = arith.constant dense<0.000000e+00> : vector<4x8xf32>
    %1129 = tpu.matmul %1127, %1128, %cst_421 {dimension_numbers = #tpu.dot_dimension_numbers<[1], [0], [0], [1], [0, 0, 1, 1], [], []>} : vector<4x8xbf16>, vector<8x8xbf16>, vector<4x8xf32> -> vector<4x8xf32>
    %1130 = arith.truncf %1120 : vector<4x4xf32> to vector<4x4xbf16>
    %1131 = vector.extract_strided_slice %1010 {offsets = [0, 56], sizes = [4, 8], strides = [1, 1]} : vector<4x64xbf16> to vector<4x8xbf16>
    %cst_422 = arith.constant dense<0.000000e+00> : vector<4x8xf32>
    %1132 = tpu.matmul %1130, %1131, %cst_422 {dimension_numbers = #tpu.dot_dimension_numbers<[1], [0], [0], [1], [0, 0, 1, 1], [], []>} : vector<4x4xbf16>, vector<4x8xbf16>, vector<4x8xf32> -> vector<4x8xf32>
    %1133 = arith.addf %1129, %1132 : vector<4x8xf32>
    %1134 = vector.broadcast %1126 : vector<4x1xf32> to vector<4x8xf32>
    %1135 = arith.mulf %1133, %1134 : vector<4x8xf32>
    %1136 = tpu.concatenate %1042, %1073, %1104, %1135 in 1 : vector<4x8xf32>, vector<4x8xf32>, vector<4x8xf32>, vector<4x8xf32> -> vector<4x32xf32>
    %1137 = arith.truncf %1136 : vector<4x32xf32> to vector<4x32xbf16>
    %c1_423 = arith.constant 1 : index
    %c0_424 = arith.constant 0 : index
    %c0_425 = arith.constant 0 : index
    %1138 = vector.load %arg12[%c1_423, %c0_424, %c0_425] : memref<2x32x32xbf16, #tpu.memory_space<vmem>>, vector<1x32x32xbf16>
    %1139 = vector.shape_cast %1138 : vector<1x32x32xbf16> to vector<32x32xbf16>
    %cst_426 = arith.constant dense<0.000000e+00> : vector<4x32xf32>
    %1140 = tpu.matmul %1137, %1139, %cst_426 {dimension_numbers = #tpu.dot_dimension_numbers<[1], [0], [0], [1], [0, 0, 1, 1], [], []>} : vector<4x32xbf16>, vector<32x32xbf16>, vector<4x32xf32> -> vector<4x32xf32>
    %1141 = arith.addf %1140, %503 : vector<4x32xf32>
    %cst_427 = arith.constant dense<0.000000e+00> : vector<4xf32>
    %1142 = vector.multi_reduction <add>, %1141, %cst_427 [1] : vector<4x32xf32> to vector<4xf32>
    %1143 = vector.shape_cast %1142 : vector<4xf32> to vector<4x1xf32>
    %cst_428 = arith.constant 3.200000e+01 : f32
    %1144 = vector.broadcast %cst_428 : f32 to vector<4x1xf32>
    %1145 = arith.divf %1143, %1144 : vector<4x1xf32>
    %1146 = vector.broadcast %1145 : vector<4x1xf32> to vector<4x32xf32>
    %1147 = arith.subf %1141, %1146 : vector<4x32xf32>
    %1148 = arith.mulf %1147, %1147 : vector<4x32xf32>
    %cst_429 = arith.constant dense<0.000000e+00> : vector<4xf32>
    %1149 = vector.multi_reduction <add>, %1148, %cst_429 [1] : vector<4x32xf32> to vector<4xf32>
    %1150 = vector.shape_cast %1149 : vector<4xf32> to vector<4x1xf32>
    %cst_430 = arith.constant 3.200000e+01 : f32
    %1151 = vector.broadcast %cst_430 : f32 to vector<4x1xf32>
    %1152 = arith.divf %1150, %1151 : vector<4x1xf32>
    %cst_431 = arith.constant 9.99999974E-6 : f32
    %1153 = vector.broadcast %cst_431 : f32 to vector<4x1xf32>
    %1154 = arith.addf %1152, %1153 : vector<4x1xf32>
    %1155 = math.rsqrt %1154 : vector<4x1xf32>
    %1156 = vector.broadcast %1155 : vector<4x1xf32> to vector<4x32xf32>
    %1157 = arith.mulf %1147, %1156 : vector<4x32xf32>
    %1158 = arith.truncf %1157 : vector<4x32xf32> to vector<4x32xbf16>
    %c1_432 = arith.constant 1 : index
    %c0_433 = arith.constant 0 : index
    %c0_434 = arith.constant 0 : index
    %1159 = vector.load %arg13[%c1_432, %c0_433, %c0_434] : memref<2x32x128xbf16, #tpu.memory_space<vmem>>, vector<1x32x128xbf16>
    %1160 = vector.shape_cast %1159 : vector<1x32x128xbf16> to vector<32x128xbf16>
    %cst_435 = arith.constant dense<0.000000e+00> : vector<4x128xf32>
    %1161 = tpu.matmul %1158, %1160, %cst_435 {dimension_numbers = #tpu.dot_dimension_numbers<[1], [0], [0], [1], [0, 0, 1, 1], [], []>} : vector<4x32xbf16>, vector<32x128xbf16>, vector<4x128xf32> -> vector<4x128xf32>
    %c1_436 = arith.constant 1 : index
    %c0_437 = arith.constant 0 : index
    %c0_438 = arith.constant 0 : index
    %1162 = vector.load %arg14[%c1_436, %c0_437, %c0_438] : memref<2x1x128xf32, #tpu.memory_space<vmem>>, vector<1x1x128xf32>
    %1163 = vector.shape_cast %1162 : vector<1x1x128xf32> to vector<1x128xf32>
    %1164 = vector.broadcast %1163 : vector<1x128xf32> to vector<4x128xf32>
    %1165 = arith.addf %1161, %1164 : vector<4x128xf32>
    %cst_439 = arith.constant 0.707106769 : f32
    %1166 = vector.broadcast %cst_439 : f32 to vector<4x128xf32>
    %1167 = arith.mulf %1165, %1166 : vector<4x128xf32>
    %1168 = math.absf %1167 : vector<4x128xf32>
    %cst_440 = arith.constant 0.327591091 : f32
    %1169 = vector.broadcast %cst_440 : f32 to vector<4x128xf32>
    %1170 = arith.mulf %1169, %1168 : vector<4x128xf32>
    %cst_441 = arith.constant 1.000000e+00 : f32
    %1171 = vector.broadcast %cst_441 : f32 to vector<4x128xf32>
    %1172 = arith.addf %1171, %1170 : vector<4x128xf32>
    %cst_442 = arith.constant 1.000000e+00 : f32
    %1173 = vector.broadcast %cst_442 : f32 to vector<4x128xf32>
    %1174 = arith.divf %1173, %1172 : vector<4x128xf32>
    %cst_443 = arith.constant 1.06140542 : f32
    %1175 = vector.broadcast %cst_443 : f32 to vector<4x128xf32>
    %1176 = arith.mulf %1175, %1174 : vector<4x128xf32>
    %cst_444 = arith.constant -1.45315206 : f32
    %1177 = vector.broadcast %cst_444 : f32 to vector<4x128xf32>
    %1178 = arith.addf %1176, %1177 : vector<4x128xf32>
    %1179 = arith.mulf %1178, %1174 : vector<4x128xf32>
    %cst_445 = arith.constant 1.42141378 : f32
    %1180 = vector.broadcast %cst_445 : f32 to vector<4x128xf32>
    %1181 = arith.addf %1179, %1180 : vector<4x128xf32>
    %1182 = arith.mulf %1181, %1174 : vector<4x128xf32>
    %cst_446 = arith.constant -0.284496725 : f32
    %1183 = vector.broadcast %cst_446 : f32 to vector<4x128xf32>
    %1184 = arith.addf %1182, %1183 : vector<4x128xf32>
    %1185 = arith.mulf %1184, %1174 : vector<4x128xf32>
    %cst_447 = arith.constant 0.254829586 : f32
    %1186 = vector.broadcast %cst_447 : f32 to vector<4x128xf32>
    %1187 = arith.addf %1185, %1186 : vector<4x128xf32>
    %1188 = arith.mulf %1187, %1174 : vector<4x128xf32>
    %1189 = arith.mulf %1168, %1168 : vector<4x128xf32>
    %cst_448 = arith.constant 0.000000e+00 : f32
    %1190 = vector.broadcast %cst_448 : f32 to vector<4x128xf32>
    %1191 = arith.subf %1190, %1189 : vector<4x128xf32>
    %1192 = math.exp %1191 : vector<4x128xf32>
    %1193 = arith.mulf %1188, %1192 : vector<4x128xf32>
    %cst_449 = arith.constant 1.000000e+00 : f32
    %1194 = vector.broadcast %cst_449 : f32 to vector<4x128xf32>
    %1195 = arith.subf %1194, %1193 : vector<4x128xf32>
    %cst_450 = arith.constant 0.000000e+00 : f32
    %1196 = vector.broadcast %cst_450 : f32 to vector<4x128xf32>
    %1197 = arith.cmpf olt, %1167, %1196 : vector<4x128xf32>
    %cst_451 = arith.constant 0.000000e+00 : f32
    %1198 = vector.broadcast %cst_451 : f32 to vector<4x128xf32>
    %1199 = arith.subf %1198, %1195 : vector<4x128xf32>
    %1200 = arith.select %1197, %1199, %1195 : vector<4x128xi1>, vector<4x128xf32>
    %cst_452 = arith.constant 1.000000e+00 : f32
    %1201 = vector.broadcast %cst_452 : f32 to vector<4x128xf32>
    %1202 = arith.addf %1201, %1200 : vector<4x128xf32>
    %cst_453 = arith.constant 5.000000e-01 : f32
    %1203 = vector.broadcast %cst_453 : f32 to vector<4x128xf32>
    %1204 = arith.mulf %1203, %1202 : vector<4x128xf32>
    %1205 = arith.mulf %1165, %1204 : vector<4x128xf32>
    %1206 = arith.truncf %1205 : vector<4x128xf32> to vector<4x128xbf16>
    %c1_454 = arith.constant 1 : index
    %c0_455 = arith.constant 0 : index
    %c0_456 = arith.constant 0 : index
    %1207 = vector.load %arg15[%c1_454, %c0_455, %c0_456] : memref<2x128x32xbf16, #tpu.memory_space<vmem>>, vector<1x128x32xbf16>
    %1208 = vector.shape_cast %1207 : vector<1x128x32xbf16> to vector<128x32xbf16>
    %cst_457 = arith.constant dense<0.000000e+00> : vector<4x32xf32>
    %1209 = tpu.matmul %1206, %1208, %cst_457 {dimension_numbers = #tpu.dot_dimension_numbers<[1], [0], [0], [1], [0, 0, 1, 1], [], []>} : vector<4x128xbf16>, vector<128x32xbf16>, vector<4x32xf32> -> vector<4x32xf32>
    %1210 = arith.addf %1209, %1141 : vector<4x32xf32>
    %cst_458 = arith.constant dense<0.000000e+00> : vector<4xf32>
    %1211 = vector.multi_reduction <add>, %736, %cst_458 [1] : vector<4x32xf32> to vector<4xf32>
    %1212 = vector.shape_cast %1211 : vector<4xf32> to vector<4x1xf32>
    %cst_459 = arith.constant 3.200000e+01 : f32
    %1213 = vector.broadcast %cst_459 : f32 to vector<4x1xf32>
    %1214 = arith.divf %1212, %1213 : vector<4x1xf32>
    %1215 = vector.broadcast %1214 : vector<4x1xf32> to vector<4x32xf32>
    %1216 = arith.subf %736, %1215 : vector<4x32xf32>
    %1217 = arith.mulf %1216, %1216 : vector<4x32xf32>
    %cst_460 = arith.constant dense<0.000000e+00> : vector<4xf32>
    %1218 = vector.multi_reduction <add>, %1217, %cst_460 [1] : vector<4x32xf32> to vector<4xf32>
    %1219 = vector.shape_cast %1218 : vector<4xf32> to vector<4x1xf32>
    %cst_461 = arith.constant 3.200000e+01 : f32
    %1220 = vector.broadcast %cst_461 : f32 to vector<4x1xf32>
    %1221 = arith.divf %1219, %1220 : vector<4x1xf32>
    %cst_462 = arith.constant 9.99999974E-6 : f32
    %1222 = vector.broadcast %cst_462 : f32 to vector<4x1xf32>
    %1223 = arith.addf %1221, %1222 : vector<4x1xf32>
    %1224 = math.rsqrt %1223 : vector<4x1xf32>
    %1225 = vector.broadcast %1224 : vector<4x1xf32> to vector<4x32xf32>
    %1226 = arith.mulf %1216, %1225 : vector<4x32xf32>
    %1227 = arith.truncf %1226 : vector<4x32xf32> to vector<4x32xbf16>
    %c1_463 = arith.constant 1 : index
    %c0_464 = arith.constant 0 : index
    %c0_465 = arith.constant 0 : index
    %1228 = vector.load %arg6[%c1_463, %c0_464, %c0_465] : memref<2x32x32xbf16, #tpu.memory_space<vmem>>, vector<1x32x32xbf16>
    %1229 = vector.shape_cast %1228 : vector<1x32x32xbf16> to vector<32x32xbf16>
    %cst_466 = arith.constant dense<0.000000e+00> : vector<4x32xf32>
    %1230 = tpu.matmul %1227, %1229, %cst_466 {dimension_numbers = #tpu.dot_dimension_numbers<[1], [0], [0], [1], [0, 0, 1, 1], [], []>} : vector<4x32xbf16>, vector<32x32xbf16>, vector<4x32xf32> -> vector<4x32xf32>
    %c1_467 = arith.constant 1 : index
    %c0_468 = arith.constant 0 : index
    %c0_469 = arith.constant 0 : index
    %1231 = vector.load %arg7[%c1_467, %c0_468, %c0_469] : memref<2x1x32xf32, #tpu.memory_space<vmem>>, vector<1x1x32xf32>
    %1232 = vector.shape_cast %1231 : vector<1x1x32xf32> to vector<1x32xf32>
    %1233 = vector.broadcast %1232 : vector<1x32xf32> to vector<4x32xf32>
    %1234 = arith.addf %1230, %1233 : vector<4x32xf32>
    %c1_470 = arith.constant 1 : index
    %c0_471 = arith.constant 0 : index
    %c0_472 = arith.constant 0 : index
    %1235 = vector.load %arg10[%c1_470, %c0_471, %c0_472] : memref<2x32x64xbf16, #tpu.memory_space<vmem>>, vector<1x32x64xbf16>
    %1236 = vector.shape_cast %1235 : vector<1x32x64xbf16> to vector<32x64xbf16>
    %cst_473 = arith.constant dense<0.000000e+00> : vector<4x64xf32>
    %1237 = tpu.matmul %1227, %1236, %cst_473 {dimension_numbers = #tpu.dot_dimension_numbers<[1], [0], [0], [1], [0, 0, 1, 1], [], []>} : vector<4x32xbf16>, vector<32x64xbf16>, vector<4x64xf32> -> vector<4x64xf32>
    %c1_474 = arith.constant 1 : index
    %c0_475 = arith.constant 0 : index
    %c0_476 = arith.constant 0 : index
    %1238 = vector.load %arg11[%c1_474, %c0_475, %c0_476] : memref<2x1x64xf32, #tpu.memory_space<vmem>>, vector<1x1x64xf32>
    %1239 = vector.shape_cast %1238 : vector<1x1x64xf32> to vector<1x64xf32>
    %1240 = vector.broadcast %1239 : vector<1x64xf32> to vector<4x64xf32>
    %1241 = arith.addf %1237, %1240 : vector<4x64xf32>
    %1242 = arith.truncf %1234 : vector<4x32xf32> to vector<4x32xbf16>
    %1243 = arith.truncf %1241 : vector<4x64xf32> to vector<4x64xbf16>
    %1244 = vector.extract_strided_slice %744 {offsets = [16, 0], sizes = [8, 64], strides = [1, 1]} : vector<24x64xbf16> to vector<8x64xbf16>
    %1245 = vector.extract_strided_slice %1242 {offsets = [0, 0], sizes = [4, 8], strides = [1, 1]} : vector<4x32xbf16> to vector<4x8xbf16>
    %1246 = vector.extract_strided_slice %1244 {offsets = [0, 0], sizes = [8, 8], strides = [1, 1]} : vector<8x64xbf16> to vector<8x8xbf16>
    "tpu.trace_start"() <{level = 10 : i32, message = "id,jd->ij"}> : () -> ()
    %cst_477 = arith.constant dense<0.000000e+00> : vector<4x8xf32>
    %1247 = tpu.matmul %1245, %1246, %cst_477 {dimension_numbers = #tpu.dot_dimension_numbers<[1], [1], [0], [0], [0, 0, 1, 0], [], []>} : vector<4x8xbf16>, vector<8x8xbf16>, vector<4x8xf32> -> vector<4x8xf32>
    "tpu.trace_stop"() : () -> ()
    %1248 = vector.extract_strided_slice %1243 {offsets = [0, 0], sizes = [4, 8], strides = [1, 1]} : vector<4x64xbf16> to vector<4x8xbf16>
    "tpu.trace_start"() <{level = 10 : i32, message = "id,jd->ij"}> : () -> ()
    %cst_478 = arith.constant dense<0.000000e+00> : vector<4x4xf32>
    %1249 = tpu.matmul %1245, %1248, %cst_478 {dimension_numbers = #tpu.dot_dimension_numbers<[1], [1], [0], [0], [0, 0, 1, 0], [], []>} : vector<4x8xbf16>, vector<4x8xbf16>, vector<4x4xf32> -> vector<4x4xf32>
    "tpu.trace_stop"() : () -> ()
    %cst_479 = arith.constant dense<0xFF800000> : vector<4xf32>
    %1250 = vector.multi_reduction <maximumf>, %1247, %cst_479 [1] : vector<4x8xf32> to vector<4xf32>
    %1251 = vector.shape_cast %1250 : vector<4xf32> to vector<4x1xf32>
    %cst_480 = arith.constant dense<0xFF800000> : vector<4xf32>
    %1252 = vector.multi_reduction <maximumf>, %1249, %cst_480 [1] : vector<4x4xf32> to vector<4xf32>
    %1253 = vector.shape_cast %1252 : vector<4xf32> to vector<4x1xf32>
    %1254 = arith.maximumf %1251, %1253 : vector<4x1xf32>
    %1255 = vector.broadcast %1254 : vector<4x1xf32> to vector<4x8xf32>
    %1256 = arith.subf %1247, %1255 : vector<4x8xf32>
    %1257 = math.exp %1256 : vector<4x8xf32>
    %1258 = vector.broadcast %1254 : vector<4x1xf32> to vector<4x4xf32>
    %1259 = arith.subf %1249, %1258 : vector<4x4xf32>
    %1260 = math.exp %1259 : vector<4x4xf32>
    %cst_481 = arith.constant dense<0.000000e+00> : vector<4xf32>
    %1261 = vector.multi_reduction <add>, %1257, %cst_481 [1] : vector<4x8xf32> to vector<4xf32>
    %1262 = vector.shape_cast %1261 : vector<4xf32> to vector<4x1xf32>
    %cst_482 = arith.constant dense<0.000000e+00> : vector<4xf32>
    %1263 = vector.multi_reduction <add>, %1260, %cst_482 [1] : vector<4x4xf32> to vector<4xf32>
    %1264 = vector.shape_cast %1263 : vector<4xf32> to vector<4x1xf32>
    %1265 = arith.addf %1262, %1264 : vector<4x1xf32>
    %1266 = tpu.reciprocal %1265 {approx = true} : vector<4x1xf32> -> vector<4x1xf32>
    %1267 = arith.truncf %1257 : vector<4x8xf32> to vector<4x8xbf16>
    %1268 = vector.extract_strided_slice %1244 {offsets = [0, 32], sizes = [8, 8], strides = [1, 1]} : vector<8x64xbf16> to vector<8x8xbf16>
    %cst_483 = arith.constant dense<0.000000e+00> : vector<4x8xf32>
    %1269 = tpu.matmul %1267, %1268, %cst_483 {dimension_numbers = #tpu.dot_dimension_numbers<[1], [0], [0], [1], [0, 0, 1, 1], [], []>} : vector<4x8xbf16>, vector<8x8xbf16>, vector<4x8xf32> -> vector<4x8xf32>
    %1270 = arith.truncf %1260 : vector<4x4xf32> to vector<4x4xbf16>
    %1271 = vector.extract_strided_slice %1243 {offsets = [0, 32], sizes = [4, 8], strides = [1, 1]} : vector<4x64xbf16> to vector<4x8xbf16>
    %cst_484 = arith.constant dense<0.000000e+00> : vector<4x8xf32>
    %1272 = tpu.matmul %1270, %1271, %cst_484 {dimension_numbers = #tpu.dot_dimension_numbers<[1], [0], [0], [1], [0, 0, 1, 1], [], []>} : vector<4x4xbf16>, vector<4x8xbf16>, vector<4x8xf32> -> vector<4x8xf32>
    %1273 = arith.addf %1269, %1272 : vector<4x8xf32>
    %1274 = vector.broadcast %1266 : vector<4x1xf32> to vector<4x8xf32>
    %1275 = arith.mulf %1273, %1274 : vector<4x8xf32>
    %1276 = vector.extract_strided_slice %1242 {offsets = [0, 8], sizes = [4, 8], strides = [1, 1]} : vector<4x32xbf16> to vector<4x8xbf16>
    %1277 = vector.extract_strided_slice %1244 {offsets = [0, 8], sizes = [8, 8], strides = [1, 1]} : vector<8x64xbf16> to vector<8x8xbf16>
    "tpu.trace_start"() <{level = 10 : i32, message = "id,jd->ij"}> : () -> ()
    %cst_485 = arith.constant dense<0.000000e+00> : vector<4x8xf32>
    %1278 = tpu.matmul %1276, %1277, %cst_485 {dimension_numbers = #tpu.dot_dimension_numbers<[1], [1], [0], [0], [0, 0, 1, 0], [], []>} : vector<4x8xbf16>, vector<8x8xbf16>, vector<4x8xf32> -> vector<4x8xf32>
    "tpu.trace_stop"() : () -> ()
    %1279 = vector.extract_strided_slice %1243 {offsets = [0, 8], sizes = [4, 8], strides = [1, 1]} : vector<4x64xbf16> to vector<4x8xbf16>
    "tpu.trace_start"() <{level = 10 : i32, message = "id,jd->ij"}> : () -> ()
    %cst_486 = arith.constant dense<0.000000e+00> : vector<4x4xf32>
    %1280 = tpu.matmul %1276, %1279, %cst_486 {dimension_numbers = #tpu.dot_dimension_numbers<[1], [1], [0], [0], [0, 0, 1, 0], [], []>} : vector<4x8xbf16>, vector<4x8xbf16>, vector<4x4xf32> -> vector<4x4xf32>
    "tpu.trace_stop"() : () -> ()
    %cst_487 = arith.constant dense<0xFF800000> : vector<4xf32>
    %1281 = vector.multi_reduction <maximumf>, %1278, %cst_487 [1] : vector<4x8xf32> to vector<4xf32>
    %1282 = vector.shape_cast %1281 : vector<4xf32> to vector<4x1xf32>
    %cst_488 = arith.constant dense<0xFF800000> : vector<4xf32>
    %1283 = vector.multi_reduction <maximumf>, %1280, %cst_488 [1] : vector<4x4xf32> to vector<4xf32>
    %1284 = vector.shape_cast %1283 : vector<4xf32> to vector<4x1xf32>
    %1285 = arith.maximumf %1282, %1284 : vector<4x1xf32>
    %1286 = vector.broadcast %1285 : vector<4x1xf32> to vector<4x8xf32>
    %1287 = arith.subf %1278, %1286 : vector<4x8xf32>
    %1288 = math.exp %1287 : vector<4x8xf32>
    %1289 = vector.broadcast %1285 : vector<4x1xf32> to vector<4x4xf32>
    %1290 = arith.subf %1280, %1289 : vector<4x4xf32>
    %1291 = math.exp %1290 : vector<4x4xf32>
    %cst_489 = arith.constant dense<0.000000e+00> : vector<4xf32>
    %1292 = vector.multi_reduction <add>, %1288, %cst_489 [1] : vector<4x8xf32> to vector<4xf32>
    %1293 = vector.shape_cast %1292 : vector<4xf32> to vector<4x1xf32>
    %cst_490 = arith.constant dense<0.000000e+00> : vector<4xf32>
    %1294 = vector.multi_reduction <add>, %1291, %cst_490 [1] : vector<4x4xf32> to vector<4xf32>
    %1295 = vector.shape_cast %1294 : vector<4xf32> to vector<4x1xf32>
    %1296 = arith.addf %1293, %1295 : vector<4x1xf32>
    %1297 = tpu.reciprocal %1296 {approx = true} : vector<4x1xf32> -> vector<4x1xf32>
    %1298 = arith.truncf %1288 : vector<4x8xf32> to vector<4x8xbf16>
    %1299 = vector.extract_strided_slice %1244 {offsets = [0, 40], sizes = [8, 8], strides = [1, 1]} : vector<8x64xbf16> to vector<8x8xbf16>
    %cst_491 = arith.constant dense<0.000000e+00> : vector<4x8xf32>
    %1300 = tpu.matmul %1298, %1299, %cst_491 {dimension_numbers = #tpu.dot_dimension_numbers<[1], [0], [0], [1], [0, 0, 1, 1], [], []>} : vector<4x8xbf16>, vector<8x8xbf16>, vector<4x8xf32> -> vector<4x8xf32>
    %1301 = arith.truncf %1291 : vector<4x4xf32> to vector<4x4xbf16>
    %1302 = vector.extract_strided_slice %1243 {offsets = [0, 40], sizes = [4, 8], strides = [1, 1]} : vector<4x64xbf16> to vector<4x8xbf16>
    %cst_492 = arith.constant dense<0.000000e+00> : vector<4x8xf32>
    %1303 = tpu.matmul %1301, %1302, %cst_492 {dimension_numbers = #tpu.dot_dimension_numbers<[1], [0], [0], [1], [0, 0, 1, 1], [], []>} : vector<4x4xbf16>, vector<4x8xbf16>, vector<4x8xf32> -> vector<4x8xf32>
    %1304 = arith.addf %1300, %1303 : vector<4x8xf32>
    %1305 = vector.broadcast %1297 : vector<4x1xf32> to vector<4x8xf32>
    %1306 = arith.mulf %1304, %1305 : vector<4x8xf32>
    %1307 = vector.extract_strided_slice %1242 {offsets = [0, 16], sizes = [4, 8], strides = [1, 1]} : vector<4x32xbf16> to vector<4x8xbf16>
    %1308 = vector.extract_strided_slice %1244 {offsets = [0, 16], sizes = [8, 8], strides = [1, 1]} : vector<8x64xbf16> to vector<8x8xbf16>
    "tpu.trace_start"() <{level = 10 : i32, message = "id,jd->ij"}> : () -> ()
    %cst_493 = arith.constant dense<0.000000e+00> : vector<4x8xf32>
    %1309 = tpu.matmul %1307, %1308, %cst_493 {dimension_numbers = #tpu.dot_dimension_numbers<[1], [1], [0], [0], [0, 0, 1, 0], [], []>} : vector<4x8xbf16>, vector<8x8xbf16>, vector<4x8xf32> -> vector<4x8xf32>
    "tpu.trace_stop"() : () -> ()
    %1310 = vector.extract_strided_slice %1243 {offsets = [0, 16], sizes = [4, 8], strides = [1, 1]} : vector<4x64xbf16> to vector<4x8xbf16>
    "tpu.trace_start"() <{level = 10 : i32, message = "id,jd->ij"}> : () -> ()
    %cst_494 = arith.constant dense<0.000000e+00> : vector<4x4xf32>
    %1311 = tpu.matmul %1307, %1310, %cst_494 {dimension_numbers = #tpu.dot_dimension_numbers<[1], [1], [0], [0], [0, 0, 1, 0], [], []>} : vector<4x8xbf16>, vector<4x8xbf16>, vector<4x4xf32> -> vector<4x4xf32>
    "tpu.trace_stop"() : () -> ()
    %cst_495 = arith.constant dense<0xFF800000> : vector<4xf32>
    %1312 = vector.multi_reduction <maximumf>, %1309, %cst_495 [1] : vector<4x8xf32> to vector<4xf32>
    %1313 = vector.shape_cast %1312 : vector<4xf32> to vector<4x1xf32>
    %cst_496 = arith.constant dense<0xFF800000> : vector<4xf32>
    %1314 = vector.multi_reduction <maximumf>, %1311, %cst_496 [1] : vector<4x4xf32> to vector<4xf32>
    %1315 = vector.shape_cast %1314 : vector<4xf32> to vector<4x1xf32>
    %1316 = arith.maximumf %1313, %1315 : vector<4x1xf32>
    %1317 = vector.broadcast %1316 : vector<4x1xf32> to vector<4x8xf32>
    %1318 = arith.subf %1309, %1317 : vector<4x8xf32>
    %1319 = math.exp %1318 : vector<4x8xf32>
    %1320 = vector.broadcast %1316 : vector<4x1xf32> to vector<4x4xf32>
    %1321 = arith.subf %1311, %1320 : vector<4x4xf32>
    %1322 = math.exp %1321 : vector<4x4xf32>
    %cst_497 = arith.constant dense<0.000000e+00> : vector<4xf32>
    %1323 = vector.multi_reduction <add>, %1319, %cst_497 [1] : vector<4x8xf32> to vector<4xf32>
    %1324 = vector.shape_cast %1323 : vector<4xf32> to vector<4x1xf32>
    %cst_498 = arith.constant dense<0.000000e+00> : vector<4xf32>
    %1325 = vector.multi_reduction <add>, %1322, %cst_498 [1] : vector<4x4xf32> to vector<4xf32>
    %1326 = vector.shape_cast %1325 : vector<4xf32> to vector<4x1xf32>
    %1327 = arith.addf %1324, %1326 : vector<4x1xf32>
    %1328 = tpu.reciprocal %1327 {approx = true} : vector<4x1xf32> -> vector<4x1xf32>
    %1329 = arith.truncf %1319 : vector<4x8xf32> to vector<4x8xbf16>
    %1330 = vector.extract_strided_slice %1244 {offsets = [0, 48], sizes = [8, 8], strides = [1, 1]} : vector<8x64xbf16> to vector<8x8xbf16>
    %cst_499 = arith.constant dense<0.000000e+00> : vector<4x8xf32>
    %1331 = tpu.matmul %1329, %1330, %cst_499 {dimension_numbers = #tpu.dot_dimension_numbers<[1], [0], [0], [1], [0, 0, 1, 1], [], []>} : vector<4x8xbf16>, vector<8x8xbf16>, vector<4x8xf32> -> vector<4x8xf32>
    %1332 = arith.truncf %1322 : vector<4x4xf32> to vector<4x4xbf16>
    %1333 = vector.extract_strided_slice %1243 {offsets = [0, 48], sizes = [4, 8], strides = [1, 1]} : vector<4x64xbf16> to vector<4x8xbf16>
    %cst_500 = arith.constant dense<0.000000e+00> : vector<4x8xf32>
    %1334 = tpu.matmul %1332, %1333, %cst_500 {dimension_numbers = #tpu.dot_dimension_numbers<[1], [0], [0], [1], [0, 0, 1, 1], [], []>} : vector<4x4xbf16>, vector<4x8xbf16>, vector<4x8xf32> -> vector<4x8xf32>
    %1335 = arith.addf %1331, %1334 : vector<4x8xf32>
    %1336 = vector.broadcast %1328 : vector<4x1xf32> to vector<4x8xf32>
    %1337 = arith.mulf %1335, %1336 : vector<4x8xf32>
    %1338 = vector.extract_strided_slice %1242 {offsets = [0, 24], sizes = [4, 8], strides = [1, 1]} : vector<4x32xbf16> to vector<4x8xbf16>
    %1339 = vector.extract_strided_slice %1244 {offsets = [0, 24], sizes = [8, 8], strides = [1, 1]} : vector<8x64xbf16> to vector<8x8xbf16>
    "tpu.trace_start"() <{level = 10 : i32, message = "id,jd->ij"}> : () -> ()
    %cst_501 = arith.constant dense<0.000000e+00> : vector<4x8xf32>
    %1340 = tpu.matmul %1338, %1339, %cst_501 {dimension_numbers = #tpu.dot_dimension_numbers<[1], [1], [0], [0], [0, 0, 1, 0], [], []>} : vector<4x8xbf16>, vector<8x8xbf16>, vector<4x8xf32> -> vector<4x8xf32>
    "tpu.trace_stop"() : () -> ()
    %1341 = vector.extract_strided_slice %1243 {offsets = [0, 24], sizes = [4, 8], strides = [1, 1]} : vector<4x64xbf16> to vector<4x8xbf16>
    "tpu.trace_start"() <{level = 10 : i32, message = "id,jd->ij"}> : () -> ()
    %cst_502 = arith.constant dense<0.000000e+00> : vector<4x4xf32>
    %1342 = tpu.matmul %1338, %1341, %cst_502 {dimension_numbers = #tpu.dot_dimension_numbers<[1], [1], [0], [0], [0, 0, 1, 0], [], []>} : vector<4x8xbf16>, vector<4x8xbf16>, vector<4x4xf32> -> vector<4x4xf32>
    "tpu.trace_stop"() : () -> ()
    %cst_503 = arith.constant dense<0xFF800000> : vector<4xf32>
    %1343 = vector.multi_reduction <maximumf>, %1340, %cst_503 [1] : vector<4x8xf32> to vector<4xf32>
    %1344 = vector.shape_cast %1343 : vector<4xf32> to vector<4x1xf32>
    %cst_504 = arith.constant dense<0xFF800000> : vector<4xf32>
    %1345 = vector.multi_reduction <maximumf>, %1342, %cst_504 [1] : vector<4x4xf32> to vector<4xf32>
    %1346 = vector.shape_cast %1345 : vector<4xf32> to vector<4x1xf32>
    %1347 = arith.maximumf %1344, %1346 : vector<4x1xf32>
    %1348 = vector.broadcast %1347 : vector<4x1xf32> to vector<4x8xf32>
    %1349 = arith.subf %1340, %1348 : vector<4x8xf32>
    %1350 = math.exp %1349 : vector<4x8xf32>
    %1351 = vector.broadcast %1347 : vector<4x1xf32> to vector<4x4xf32>
    %1352 = arith.subf %1342, %1351 : vector<4x4xf32>
    %1353 = math.exp %1352 : vector<4x4xf32>
    %cst_505 = arith.constant dense<0.000000e+00> : vector<4xf32>
    %1354 = vector.multi_reduction <add>, %1350, %cst_505 [1] : vector<4x8xf32> to vector<4xf32>
    %1355 = vector.shape_cast %1354 : vector<4xf32> to vector<4x1xf32>
    %cst_506 = arith.constant dense<0.000000e+00> : vector<4xf32>
    %1356 = vector.multi_reduction <add>, %1353, %cst_506 [1] : vector<4x4xf32> to vector<4xf32>
    %1357 = vector.shape_cast %1356 : vector<4xf32> to vector<4x1xf32>
    %1358 = arith.addf %1355, %1357 : vector<4x1xf32>
    %1359 = tpu.reciprocal %1358 {approx = true} : vector<4x1xf32> -> vector<4x1xf32>
    %1360 = arith.truncf %1350 : vector<4x8xf32> to vector<4x8xbf16>
    %1361 = vector.extract_strided_slice %1244 {offsets = [0, 56], sizes = [8, 8], strides = [1, 1]} : vector<8x64xbf16> to vector<8x8xbf16>
    %cst_507 = arith.constant dense<0.000000e+00> : vector<4x8xf32>
    %1362 = tpu.matmul %1360, %1361, %cst_507 {dimension_numbers = #tpu.dot_dimension_numbers<[1], [0], [0], [1], [0, 0, 1, 1], [], []>} : vector<4x8xbf16>, vector<8x8xbf16>, vector<4x8xf32> -> vector<4x8xf32>
    %1363 = arith.truncf %1353 : vector<4x4xf32> to vector<4x4xbf16>
    %1364 = vector.extract_strided_slice %1243 {offsets = [0, 56], sizes = [4, 8], strides = [1, 1]} : vector<4x64xbf16> to vector<4x8xbf16>
    %cst_508 = arith.constant dense<0.000000e+00> : vector<4x8xf32>
    %1365 = tpu.matmul %1363, %1364, %cst_508 {dimension_numbers = #tpu.dot_dimension_numbers<[1], [0], [0], [1], [0, 0, 1, 1], [], []>} : vector<4x4xbf16>, vector<4x8xbf16>, vector<4x8xf32> -> vector<4x8xf32>
    %1366 = arith.addf %1362, %1365 : vector<4x8xf32>
    %1367 = vector.broadcast %1359 : vector<4x1xf32> to vector<4x8xf32>
    %1368 = arith.mulf %1366, %1367 : vector<4x8xf32>
    %1369 = tpu.concatenate %1275, %1306, %1337, %1368 in 1 : vector<4x8xf32>, vector<4x8xf32>, vector<4x8xf32>, vector<4x8xf32> -> vector<4x32xf32>
    %1370 = arith.truncf %1369 : vector<4x32xf32> to vector<4x32xbf16>
    %c1_509 = arith.constant 1 : index
    %c0_510 = arith.constant 0 : index
    %c0_511 = arith.constant 0 : index
    %1371 = vector.load %arg12[%c1_509, %c0_510, %c0_511] : memref<2x32x32xbf16, #tpu.memory_space<vmem>>, vector<1x32x32xbf16>
    %1372 = vector.shape_cast %1371 : vector<1x32x32xbf16> to vector<32x32xbf16>
    %cst_512 = arith.constant dense<0.000000e+00> : vector<4x32xf32>
    %1373 = tpu.matmul %1370, %1372, %cst_512 {dimension_numbers = #tpu.dot_dimension_numbers<[1], [0], [0], [1], [0, 0, 1, 1], [], []>} : vector<4x32xbf16>, vector<32x32xbf16>, vector<4x32xf32> -> vector<4x32xf32>
    %1374 = arith.addf %1373, %736 : vector<4x32xf32>
    %cst_513 = arith.constant dense<0.000000e+00> : vector<4xf32>
    %1375 = vector.multi_reduction <add>, %1374, %cst_513 [1] : vector<4x32xf32> to vector<4xf32>
    %1376 = vector.shape_cast %1375 : vector<4xf32> to vector<4x1xf32>
    %cst_514 = arith.constant 3.200000e+01 : f32
    %1377 = vector.broadcast %cst_514 : f32 to vector<4x1xf32>
    %1378 = arith.divf %1376, %1377 : vector<4x1xf32>
    %1379 = vector.broadcast %1378 : vector<4x1xf32> to vector<4x32xf32>
    %1380 = arith.subf %1374, %1379 : vector<4x32xf32>
    %1381 = arith.mulf %1380, %1380 : vector<4x32xf32>
    %cst_515 = arith.constant dense<0.000000e+00> : vector<4xf32>
    %1382 = vector.multi_reduction <add>, %1381, %cst_515 [1] : vector<4x32xf32> to vector<4xf32>
    %1383 = vector.shape_cast %1382 : vector<4xf32> to vector<4x1xf32>
    %cst_516 = arith.constant 3.200000e+01 : f32
    %1384 = vector.broadcast %cst_516 : f32 to vector<4x1xf32>
    %1385 = arith.divf %1383, %1384 : vector<4x1xf32>
    %cst_517 = arith.constant 9.99999974E-6 : f32
    %1386 = vector.broadcast %cst_517 : f32 to vector<4x1xf32>
    %1387 = arith.addf %1385, %1386 : vector<4x1xf32>
    %1388 = math.rsqrt %1387 : vector<4x1xf32>
    %1389 = vector.broadcast %1388 : vector<4x1xf32> to vector<4x32xf32>
    %1390 = arith.mulf %1380, %1389 : vector<4x32xf32>
    %1391 = arith.truncf %1390 : vector<4x32xf32> to vector<4x32xbf16>
    %c1_518 = arith.constant 1 : index
    %c0_519 = arith.constant 0 : index
    %c0_520 = arith.constant 0 : index
    %1392 = vector.load %arg13[%c1_518, %c0_519, %c0_520] : memref<2x32x128xbf16, #tpu.memory_space<vmem>>, vector<1x32x128xbf16>
    %1393 = vector.shape_cast %1392 : vector<1x32x128xbf16> to vector<32x128xbf16>
    %cst_521 = arith.constant dense<0.000000e+00> : vector<4x128xf32>
    %1394 = tpu.matmul %1391, %1393, %cst_521 {dimension_numbers = #tpu.dot_dimension_numbers<[1], [0], [0], [1], [0, 0, 1, 1], [], []>} : vector<4x32xbf16>, vector<32x128xbf16>, vector<4x128xf32> -> vector<4x128xf32>
    %c1_522 = arith.constant 1 : index
    %c0_523 = arith.constant 0 : index
    %c0_524 = arith.constant 0 : index
    %1395 = vector.load %arg14[%c1_522, %c0_523, %c0_524] : memref<2x1x128xf32, #tpu.memory_space<vmem>>, vector<1x1x128xf32>
    %1396 = vector.shape_cast %1395 : vector<1x1x128xf32> to vector<1x128xf32>
    %1397 = vector.broadcast %1396 : vector<1x128xf32> to vector<4x128xf32>
    %1398 = arith.addf %1394, %1397 : vector<4x128xf32>
    %cst_525 = arith.constant 0.707106769 : f32
    %1399 = vector.broadcast %cst_525 : f32 to vector<4x128xf32>
    %1400 = arith.mulf %1398, %1399 : vector<4x128xf32>
    %1401 = math.absf %1400 : vector<4x128xf32>
    %cst_526 = arith.constant 0.327591091 : f32
    %1402 = vector.broadcast %cst_526 : f32 to vector<4x128xf32>
    %1403 = arith.mulf %1402, %1401 : vector<4x128xf32>
    %cst_527 = arith.constant 1.000000e+00 : f32
    %1404 = vector.broadcast %cst_527 : f32 to vector<4x128xf32>
    %1405 = arith.addf %1404, %1403 : vector<4x128xf32>
    %cst_528 = arith.constant 1.000000e+00 : f32
    %1406 = vector.broadcast %cst_528 : f32 to vector<4x128xf32>
    %1407 = arith.divf %1406, %1405 : vector<4x128xf32>
    %cst_529 = arith.constant 1.06140542 : f32
    %1408 = vector.broadcast %cst_529 : f32 to vector<4x128xf32>
    %1409 = arith.mulf %1408, %1407 : vector<4x128xf32>
    %cst_530 = arith.constant -1.45315206 : f32
    %1410 = vector.broadcast %cst_530 : f32 to vector<4x128xf32>
    %1411 = arith.addf %1409, %1410 : vector<4x128xf32>
    %1412 = arith.mulf %1411, %1407 : vector<4x128xf32>
    %cst_531 = arith.constant 1.42141378 : f32
    %1413 = vector.broadcast %cst_531 : f32 to vector<4x128xf32>
    %1414 = arith.addf %1412, %1413 : vector<4x128xf32>
    %1415 = arith.mulf %1414, %1407 : vector<4x128xf32>
    %cst_532 = arith.constant -0.284496725 : f32
    %1416 = vector.broadcast %cst_532 : f32 to vector<4x128xf32>
    %1417 = arith.addf %1415, %1416 : vector<4x128xf32>
    %1418 = arith.mulf %1417, %1407 : vector<4x128xf32>
    %cst_533 = arith.constant 0.254829586 : f32
    %1419 = vector.broadcast %cst_533 : f32 to vector<4x128xf32>
    %1420 = arith.addf %1418, %1419 : vector<4x128xf32>
    %1421 = arith.mulf %1420, %1407 : vector<4x128xf32>
    %1422 = arith.mulf %1401, %1401 : vector<4x128xf32>
    %cst_534 = arith.constant 0.000000e+00 : f32
    %1423 = vector.broadcast %cst_534 : f32 to vector<4x128xf32>
    %1424 = arith.subf %1423, %1422 : vector<4x128xf32>
    %1425 = math.exp %1424 : vector<4x128xf32>
    %1426 = arith.mulf %1421, %1425 : vector<4x128xf32>
    %cst_535 = arith.constant 1.000000e+00 : f32
    %1427 = vector.broadcast %cst_535 : f32 to vector<4x128xf32>
    %1428 = arith.subf %1427, %1426 : vector<4x128xf32>
    %cst_536 = arith.constant 0.000000e+00 : f32
    %1429 = vector.broadcast %cst_536 : f32 to vector<4x128xf32>
    %1430 = arith.cmpf olt, %1400, %1429 : vector<4x128xf32>
    %cst_537 = arith.constant 0.000000e+00 : f32
    %1431 = vector.broadcast %cst_537 : f32 to vector<4x128xf32>
    %1432 = arith.subf %1431, %1428 : vector<4x128xf32>
    %1433 = arith.select %1430, %1432, %1428 : vector<4x128xi1>, vector<4x128xf32>
    %cst_538 = arith.constant 1.000000e+00 : f32
    %1434 = vector.broadcast %cst_538 : f32 to vector<4x128xf32>
    %1435 = arith.addf %1434, %1433 : vector<4x128xf32>
    %cst_539 = arith.constant 5.000000e-01 : f32
    %1436 = vector.broadcast %cst_539 : f32 to vector<4x128xf32>
    %1437 = arith.mulf %1436, %1435 : vector<4x128xf32>
    %1438 = arith.mulf %1398, %1437 : vector<4x128xf32>
    %1439 = arith.truncf %1438 : vector<4x128xf32> to vector<4x128xbf16>
    %c1_540 = arith.constant 1 : index
    %c0_541 = arith.constant 0 : index
    %c0_542 = arith.constant 0 : index
    %1440 = vector.load %arg15[%c1_540, %c0_541, %c0_542] : memref<2x128x32xbf16, #tpu.memory_space<vmem>>, vector<1x128x32xbf16>
    %1441 = vector.shape_cast %1440 : vector<1x128x32xbf16> to vector<128x32xbf16>
    %cst_543 = arith.constant dense<0.000000e+00> : vector<4x32xf32>
    %1442 = tpu.matmul %1439, %1441, %cst_543 {dimension_numbers = #tpu.dot_dimension_numbers<[1], [0], [0], [1], [0, 0, 1, 1], [], []>} : vector<4x128xbf16>, vector<128x32xbf16>, vector<4x32xf32> -> vector<4x32xf32>
    %1443 = arith.addf %1442, %1374 : vector<4x32xf32>
    %cst_544 = arith.constant dense<0.000000e+00> : vector<4xf32>
    %1444 = vector.multi_reduction <add>, %977, %cst_544 [1] : vector<4x32xf32> to vector<4xf32>
    %1445 = vector.shape_cast %1444 : vector<4xf32> to vector<4x1xf32>
    %cst_545 = arith.constant 3.200000e+01 : f32
    %1446 = vector.broadcast %cst_545 : f32 to vector<4x1xf32>
    %1447 = arith.divf %1445, %1446 : vector<4x1xf32>
    %1448 = vector.broadcast %1447 : vector<4x1xf32> to vector<4x32xf32>
    %1449 = arith.subf %977, %1448 : vector<4x32xf32>
    %1450 = arith.mulf %1449, %1449 : vector<4x32xf32>
    %cst_546 = arith.constant dense<0.000000e+00> : vector<4xf32>
    %1451 = vector.multi_reduction <add>, %1450, %cst_546 [1] : vector<4x32xf32> to vector<4xf32>
    %1452 = vector.shape_cast %1451 : vector<4xf32> to vector<4x1xf32>
    %cst_547 = arith.constant 3.200000e+01 : f32
    %1453 = vector.broadcast %cst_547 : f32 to vector<4x1xf32>
    %1454 = arith.divf %1452, %1453 : vector<4x1xf32>
    %cst_548 = arith.constant 9.99999974E-6 : f32
    %1455 = vector.broadcast %cst_548 : f32 to vector<4x1xf32>
    %1456 = arith.addf %1454, %1455 : vector<4x1xf32>
    %1457 = math.rsqrt %1456 : vector<4x1xf32>
    %1458 = vector.broadcast %1457 : vector<4x1xf32> to vector<4x32xf32>
    %1459 = arith.mulf %1449, %1458 : vector<4x32xf32>
    %c0_549 = arith.constant 0 : index
    %c0_550 = arith.constant 0 : index
    %1460 = vector.load %arg16[%c0_549, %c0_550] : memref<1x32xf32, #tpu.memory_space<vmem>>, vector<1x32xf32>
    %1461 = vector.broadcast %1460 : vector<1x32xf32> to vector<4x32xf32>
    %1462 = arith.mulf %1459, %1461 : vector<4x32xf32>
    %c0_551 = arith.constant 0 : index
    %c0_552 = arith.constant 0 : index
    %1463 = vector.load %arg17[%c0_551, %c0_552] : memref<1x32xf32, #tpu.memory_space<vmem>>, vector<1x32xf32>
    %1464 = vector.broadcast %1463 : vector<1x32xf32> to vector<4x32xf32>
    %1465 = arith.addf %1462, %1464 : vector<4x32xf32>
    %cst_553 = arith.constant dense<0.000000e+00> : vector<4xf32>
    %1466 = vector.multi_reduction <add>, %1465, %cst_553 [1] : vector<4x32xf32> to vector<4xf32>
    %1467 = vector.shape_cast %1466 : vector<4xf32> to vector<4x1xf32>
    %cst_554 = arith.constant 3.200000e+01 : f32
    %1468 = vector.broadcast %cst_554 : f32 to vector<4x1xf32>
    %1469 = arith.divf %1467, %1468 : vector<4x1xf32>
    %1470 = vector.broadcast %1469 : vector<4x1xf32> to vector<4x32xf32>
    %1471 = arith.subf %1465, %1470 : vector<4x32xf32>
    %1472 = arith.mulf %1471, %1471 : vector<4x32xf32>
    %cst_555 = arith.constant dense<0.000000e+00> : vector<4xf32>
    %1473 = vector.multi_reduction <add>, %1472, %cst_555 [1] : vector<4x32xf32> to vector<4xf32>
    %1474 = vector.shape_cast %1473 : vector<4xf32> to vector<4x1xf32>
    %cst_556 = arith.constant 3.200000e+01 : f32
    %1475 = vector.broadcast %cst_556 : f32 to vector<4x1xf32>
    %1476 = arith.divf %1474, %1475 : vector<4x1xf32>
    %cst_557 = arith.constant 9.99999974E-6 : f32
    %1477 = vector.broadcast %cst_557 : f32 to vector<4x1xf32>
    %1478 = arith.addf %1476, %1477 : vector<4x1xf32>
    %1479 = math.rsqrt %1478 : vector<4x1xf32>
    %1480 = vector.broadcast %1479 : vector<4x1xf32> to vector<4x32xf32>
    %1481 = arith.mulf %1471, %1480 : vector<4x32xf32>
    %1482 = arith.truncf %1481 : vector<4x32xf32> to vector<4x32xbf16>
    %c0_558 = arith.constant 0 : index
    %c0_559 = arith.constant 0 : index
    %1483 = vector.load %arg18[%c0_558, %c0_559] : memref<32x48xbf16, #tpu.memory_space<vmem>>, vector<32x48xbf16>
    %cst_560 = arith.constant dense<0.000000e+00> : vector<4x48xf32>
    %1484 = tpu.matmul %1482, %1483, %cst_560 {dimension_numbers = #tpu.dot_dimension_numbers<[1], [0], [0], [1], [0, 0, 1, 1], [], []>} : vector<4x32xbf16>, vector<32x48xbf16>, vector<4x48xf32> -> vector<4x48xf32>
    %c0_561 = arith.constant 0 : index
    %c0_562 = arith.constant 0 : index
    %1485 = vector.load %arg19[%c0_561, %c0_562] : memref<1x48xf32, #tpu.memory_space<vmem>>, vector<1x48xf32>
    %1486 = vector.broadcast %1485 : vector<1x48xf32> to vector<4x48xf32>
    %1487 = arith.addf %1484, %1486 : vector<4x48xf32>
    %c0_563 = arith.constant 0 : index
    %c0_564 = arith.constant 0 : index
    %c0_565 = arith.constant 0 : index
    %1488 = vector.load %arg20[%c0_563, %c0_564, %c0_565] : memref<1x12x48xf32, #tpu.memory_space<vmem>>, vector<1x4x48xf32>
    %1489 = vector.shape_cast %1488 : vector<1x4x48xf32> to vector<4x48xf32>
    %1490 = vector.shape_cast %1487 : vector<4x48xf32> to vector<1x4x48xf32>
    tpu.vector_store %arg20[%c0_563, %c0_564, %c0_565], %1490 {strides = array<i32>} : memref<1x12x48xf32, #tpu.memory_space<vmem>>, vector<1x4x48xf32>,
    %cst_566 = arith.constant dense<0.000000e+00> : vector<4xf32>
    %1491 = vector.multi_reduction <add>, %1210, %cst_566 [1] : vector<4x32xf32> to vector<4xf32>
    %1492 = vector.shape_cast %1491 : vector<4xf32> to vector<4x1xf32>
    %cst_567 = arith.constant 3.200000e+01 : f32
    %1493 = vector.broadcast %cst_567 : f32 to vector<4x1xf32>
    %1494 = arith.divf %1492, %1493 : vector<4x1xf32>
    %1495 = vector.broadcast %1494 : vector<4x1xf32> to vector<4x32xf32>
    %1496 = arith.subf %1210, %1495 : vector<4x32xf32>
    %1497 = arith.mulf %1496, %1496 : vector<4x32xf32>
    %cst_568 = arith.constant dense<0.000000e+00> : vector<4xf32>
    %1498 = vector.multi_reduction <add>, %1497, %cst_568 [1] : vector<4x32xf32> to vector<4xf32>
    %1499 = vector.shape_cast %1498 : vector<4xf32> to vector<4x1xf32>
    %cst_569 = arith.constant 3.200000e+01 : f32
    %1500 = vector.broadcast %cst_569 : f32 to vector<4x1xf32>
    %1501 = arith.divf %1499, %1500 : vector<4x1xf32>
    %cst_570 = arith.constant 9.99999974E-6 : f32
    %1502 = vector.broadcast %cst_570 : f32 to vector<4x1xf32>
    %1503 = arith.addf %1501, %1502 : vector<4x1xf32>
    %1504 = math.rsqrt %1503 : vector<4x1xf32>
    %1505 = vector.broadcast %1504 : vector<4x1xf32> to vector<4x32xf32>
    %1506 = arith.mulf %1496, %1505 : vector<4x32xf32>
    %c0_571 = arith.constant 0 : index
    %c0_572 = arith.constant 0 : index
    %1507 = vector.load %arg16[%c0_571, %c0_572] : memref<1x32xf32, #tpu.memory_space<vmem>>, vector<1x32xf32>
    %1508 = vector.broadcast %1507 : vector<1x32xf32> to vector<4x32xf32>
    %1509 = arith.mulf %1506, %1508 : vector<4x32xf32>
    %c0_573 = arith.constant 0 : index
    %c0_574 = arith.constant 0 : index
    %1510 = vector.load %arg17[%c0_573, %c0_574] : memref<1x32xf32, #tpu.memory_space<vmem>>, vector<1x32xf32>
    %1511 = vector.broadcast %1510 : vector<1x32xf32> to vector<4x32xf32>
    %1512 = arith.addf %1509, %1511 : vector<4x32xf32>
    %cst_575 = arith.constant dense<0.000000e+00> : vector<4xf32>
    %1513 = vector.multi_reduction <add>, %1512, %cst_575 [1] : vector<4x32xf32> to vector<4xf32>
    %1514 = vector.shape_cast %1513 : vector<4xf32> to vector<4x1xf32>
    %cst_576 = arith.constant 3.200000e+01 : f32
    %1515 = vector.broadcast %cst_576 : f32 to vector<4x1xf32>
    %1516 = arith.divf %1514, %1515 : vector<4x1xf32>
    %1517 = vector.broadcast %1516 : vector<4x1xf32> to vector<4x32xf32>
    %1518 = arith.subf %1512, %1517 : vector<4x32xf32>
    %1519 = arith.mulf %1518, %1518 : vector<4x32xf32>
    %cst_577 = arith.constant dense<0.000000e+00> : vector<4xf32>
    %1520 = vector.multi_reduction <add>, %1519, %cst_577 [1] : vector<4x32xf32> to vector<4xf32>
    %1521 = vector.shape_cast %1520 : vector<4xf32> to vector<4x1xf32>
    %cst_578 = arith.constant 3.200000e+01 : f32
    %1522 = vector.broadcast %cst_578 : f32 to vector<4x1xf32>
    %1523 = arith.divf %1521, %1522 : vector<4x1xf32>
    %cst_579 = arith.constant 9.99999974E-6 : f32
    %1524 = vector.broadcast %cst_579 : f32 to vector<4x1xf32>
    %1525 = arith.addf %1523, %1524 : vector<4x1xf32>
    %1526 = math.rsqrt %1525 : vector<4x1xf32>
    %1527 = vector.broadcast %1526 : vector<4x1xf32> to vector<4x32xf32>
    %1528 = arith.mulf %1518, %1527 : vector<4x32xf32>
    %1529 = arith.truncf %1528 : vector<4x32xf32> to vector<4x32xbf16>
    %c0_580 = arith.constant 0 : index
    %c0_581 = arith.constant 0 : index
    %1530 = vector.load %arg18[%c0_580, %c0_581] : memref<32x48xbf16, #tpu.memory_space<vmem>>, vector<32x48xbf16>
    %cst_582 = arith.constant dense<0.000000e+00> : vector<4x48xf32>
    %1531 = tpu.matmul %1529, %1530, %cst_582 {dimension_numbers = #tpu.dot_dimension_numbers<[1], [0], [0], [1], [0, 0, 1, 1], [], []>} : vector<4x32xbf16>, vector<32x48xbf16>, vector<4x48xf32> -> vector<4x48xf32>
    %c0_583 = arith.constant 0 : index
    %c0_584 = arith.constant 0 : index
    %1532 = vector.load %arg19[%c0_583, %c0_584] : memref<1x48xf32, #tpu.memory_space<vmem>>, vector<1x48xf32>
    %1533 = vector.broadcast %1532 : vector<1x48xf32> to vector<4x48xf32>
    %1534 = arith.addf %1531, %1533 : vector<4x48xf32>
    %c0_585 = arith.constant 0 : index
    %c4 = arith.constant 4 : index
    %c0_586 = arith.constant 0 : index
    %1535 = vector.load %arg20[%c0_585, %c4, %c0_586] : memref<1x12x48xf32, #tpu.memory_space<vmem>>, vector<1x4x48xf32>
    %1536 = vector.shape_cast %1535 : vector<1x4x48xf32> to vector<4x48xf32>
    %1537 = vector.shape_cast %1534 : vector<4x48xf32> to vector<1x4x48xf32>
    tpu.vector_store %arg20[%c0_585, %c4, %c0_586], %1537 {strides = array<i32>} : memref<1x12x48xf32, #tpu.memory_space<vmem>>, vector<1x4x48xf32>,
    %cst_587 = arith.constant dense<0.000000e+00> : vector<4xf32>
    %1538 = vector.multi_reduction <add>, %1443, %cst_587 [1] : vector<4x32xf32> to vector<4xf32>
    %1539 = vector.shape_cast %1538 : vector<4xf32> to vector<4x1xf32>
    %cst_588 = arith.constant 3.200000e+01 : f32
    %1540 = vector.broadcast %cst_588 : f32 to vector<4x1xf32>
    %1541 = arith.divf %1539, %1540 : vector<4x1xf32>
    %1542 = vector.broadcast %1541 : vector<4x1xf32> to vector<4x32xf32>
    %1543 = arith.subf %1443, %1542 : vector<4x32xf32>
    %1544 = arith.mulf %1543, %1543 : vector<4x32xf32>
    %cst_589 = arith.constant dense<0.000000e+00> : vector<4xf32>
    %1545 = vector.multi_reduction <add>, %1544, %cst_589 [1] : vector<4x32xf32> to vector<4xf32>
    %1546 = vector.shape_cast %1545 : vector<4xf32> to vector<4x1xf32>
    %cst_590 = arith.constant 3.200000e+01 : f32
    %1547 = vector.broadcast %cst_590 : f32 to vector<4x1xf32>
    %1548 = arith.divf %1546, %1547 : vector<4x1xf32>
    %cst_591 = arith.constant 9.99999974E-6 : f32
    %1549 = vector.broadcast %cst_591 : f32 to vector<4x1xf32>
    %1550 = arith.addf %1548, %1549 : vector<4x1xf32>
    %1551 = math.rsqrt %1550 : vector<4x1xf32>
    %1552 = vector.broadcast %1551 : vector<4x1xf32> to vector<4x32xf32>
    %1553 = arith.mulf %1543, %1552 : vector<4x32xf32>
    %c0_592 = arith.constant 0 : index
    %c0_593 = arith.constant 0 : index
    %1554 = vector.load %arg16[%c0_592, %c0_593] : memref<1x32xf32, #tpu.memory_space<vmem>>, vector<1x32xf32>
    %1555 = vector.broadcast %1554 : vector<1x32xf32> to vector<4x32xf32>
    %1556 = arith.mulf %1553, %1555 : vector<4x32xf32>
    %c0_594 = arith.constant 0 : index
    %c0_595 = arith.constant 0 : index
    %1557 = vector.load %arg17[%c0_594, %c0_595] : memref<1x32xf32, #tpu.memory_space<vmem>>, vector<1x32xf32>
    %1558 = vector.broadcast %1557 : vector<1x32xf32> to vector<4x32xf32>
    %1559 = arith.addf %1556, %1558 : vector<4x32xf32>
    %cst_596 = arith.constant dense<0.000000e+00> : vector<4xf32>
    %1560 = vector.multi_reduction <add>, %1559, %cst_596 [1] : vector<4x32xf32> to vector<4xf32>
    %1561 = vector.shape_cast %1560 : vector<4xf32> to vector<4x1xf32>
    %cst_597 = arith.constant 3.200000e+01 : f32
    %1562 = vector.broadcast %cst_597 : f32 to vector<4x1xf32>
    %1563 = arith.divf %1561, %1562 : vector<4x1xf32>
    %1564 = vector.broadcast %1563 : vector<4x1xf32> to vector<4x32xf32>
    %1565 = arith.subf %1559, %1564 : vector<4x32xf32>
    %1566 = arith.mulf %1565, %1565 : vector<4x32xf32>
    %cst_598 = arith.constant dense<0.000000e+00> : vector<4xf32>
    %1567 = vector.multi_reduction <add>, %1566, %cst_598 [1] : vector<4x32xf32> to vector<4xf32>
    %1568 = vector.shape_cast %1567 : vector<4xf32> to vector<4x1xf32>
    %cst_599 = arith.constant 3.200000e+01 : f32
    %1569 = vector.broadcast %cst_599 : f32 to vector<4x1xf32>
    %1570 = arith.divf %1568, %1569 : vector<4x1xf32>
    %cst_600 = arith.constant 9.99999974E-6 : f32
    %1571 = vector.broadcast %cst_600 : f32 to vector<4x1xf32>
    %1572 = arith.addf %1570, %1571 : vector<4x1xf32>
    %1573 = math.rsqrt %1572 : vector<4x1xf32>
    %1574 = vector.broadcast %1573 : vector<4x1xf32> to vector<4x32xf32>
    %1575 = arith.mulf %1565, %1574 : vector<4x32xf32>
    %1576 = arith.truncf %1575 : vector<4x32xf32> to vector<4x32xbf16>
    %c0_601 = arith.constant 0 : index
    %c0_602 = arith.constant 0 : index
    %1577 = vector.load %arg18[%c0_601, %c0_602] : memref<32x48xbf16, #tpu.memory_space<vmem>>, vector<32x48xbf16>
    %cst_603 = arith.constant dense<0.000000e+00> : vector<4x48xf32>
    %1578 = tpu.matmul %1576, %1577, %cst_603 {dimension_numbers = #tpu.dot_dimension_numbers<[1], [0], [0], [1], [0, 0, 1, 1], [], []>} : vector<4x32xbf16>, vector<32x48xbf16>, vector<4x48xf32> -> vector<4x48xf32>
    %c0_604 = arith.constant 0 : index
    %c0_605 = arith.constant 0 : index
    %1579 = vector.load %arg19[%c0_604, %c0_605] : memref<1x48xf32, #tpu.memory_space<vmem>>, vector<1x48xf32>
    %1580 = vector.broadcast %1579 : vector<1x48xf32> to vector<4x48xf32>
    %1581 = arith.addf %1578, %1580 : vector<4x48xf32>
    %c0_606 = arith.constant 0 : index
    %c8 = arith.constant 8 : index
    %c0_607 = arith.constant 0 : index
    %1582 = vector.load %arg20[%c0_606, %c8, %c0_607] : memref<1x12x48xf32, #tpu.memory_space<vmem>>, vector<1x4x48xf32>
    %1583 = vector.shape_cast %1582 : vector<1x4x48xf32> to vector<4x48xf32>
    %1584 = vector.shape_cast %1581 : vector<4x48xf32> to vector<1x4x48xf32>
    tpu.vector_store %arg20[%c0_606, %c8, %c0_607], %1584 {strides = array<i32>} : memref<1x12x48xf32, #tpu.memory_space<vmem>>, vector<1x4x48xf32>,
    return
  }
  func.func @transform_0(%arg0: i32) -> (i32, i32, i32) {
    %c0_i32 = arith.constant 0 : i32
    %c0_i32_0 = arith.constant 0 : i32
    %c0_i32_1 = arith.constant 0 : i32
    return %arg0, %c0_i32, %c0_i32_0 : i32, i32, i32
  }
  func.func @transform_1(%arg0: i32) -> (i32, i32, i32) {
    %c0_i32 = arith.constant 0 : i32
    %c0_i32_0 = arith.constant 0 : i32
    %c0_i32_1 = arith.constant 0 : i32
    %c0_i32_2 = arith.constant 0 : i32
    return %c0_i32, %c0_i32_0, %c0_i32_1 : i32, i32, i32
  }
  func.func @transform_2(%arg0: i32) -> (i32, i32) {
    %c0_i32 = arith.constant 0 : i32
    %c0_i32_0 = arith.constant 0 : i32
    %c0_i32_1 = arith.constant 0 : i32
    return %c0_i32, %c0_i32_0 : i32, i32
  }
  func.func @transform_3(%arg0: i32) -> (i32, i32) {
    %c0_i32 = arith.constant 0 : i32
    %c0_i32_0 = arith.constant 0 : i32
    %c0_i32_1 = arith.constant 0 : i32
    return %c0_i32, %c0_i32_0 : i32, i32
  }
  func.func @transform_4(%arg0: i32) -> (i32, i32) {
    %c0_i32 = arith.constant 0 : i32
    %c0_i32_0 = arith.constant 0 : i32
    %c0_i32_1 = arith.constant 0 : i32
    return %c0_i32, %c0_i32_0 : i32, i32
  }
  func.func @transform_5(%arg0: i32) -> (i32, i32, i32) {
    %c0_i32 = arith.constant 0 : i32
    %c0_i32_0 = arith.constant 0 : i32
    %c0_i32_1 = arith.constant 0 : i32
    %c0_i32_2 = arith.constant 0 : i32
    return %c0_i32, %c0_i32_0, %c0_i32_1 : i32, i32, i32
  }
  func.func @transform_6(%arg0: i32) -> (i32, i32, i32) {
    %c0_i32 = arith.constant 0 : i32
    %c0_i32_0 = arith.constant 0 : i32
    %c0_i32_1 = arith.constant 0 : i32
    %c0_i32_2 = arith.constant 0 : i32
    return %c0_i32, %c0_i32_0, %c0_i32_1 : i32, i32, i32
  }
  func.func @transform_7(%arg0: i32) -> (i32, i32, i32) {
    %c0_i32 = arith.constant 0 : i32
    %c0_i32_0 = arith.constant 0 : i32
    %c0_i32_1 = arith.constant 0 : i32
    %c0_i32_2 = arith.constant 0 : i32
    return %c0_i32, %c0_i32_0, %c0_i32_1 : i32, i32, i32
  }
  func.func @transform_8(%arg0: i32) -> (i32, i32, i32) {
    %c0_i32 = arith.constant 0 : i32
    %c0_i32_0 = arith.constant 0 : i32
    %c0_i32_1 = arith.constant 0 : i32
    %c0_i32_2 = arith.constant 0 : i32
    return %c0_i32, %c0_i32_0, %c0_i32_1 : i32, i32, i32
  }
  func.func @transform_9(%arg0: i32) -> (i32, i32, i32) {
    %c0_i32 = arith.constant 0 : i32
    %c0_i32_0 = arith.constant 0 : i32
    %c0_i32_1 = arith.constant 0 : i32
    %c0_i32_2 = arith.constant 0 : i32
    return %c0_i32, %c0_i32_0, %c0_i32_1 : i32, i32, i32
  }
  func.func @transform_10(%arg0: i32) -> (i32, i32, i32) {
    %c0_i32 = arith.constant 0 : i32
    %c0_i32_0 = arith.constant 0 : i32
    %c0_i32_1 = arith.constant 0 : i32
    %c0_i32_2 = arith.constant 0 : i32
    return %c0_i32, %c0_i32_0, %c0_i32_1 : i32, i32, i32
  }
  func.func @transform_11(%arg0: i32) -> (i32, i32, i32) {
    %c0_i32 = arith.constant 0 : i32
    %c0_i32_0 = arith.constant 0 : i32
    %c0_i32_1 = arith.constant 0 : i32
    %c0_i32_2 = arith.constant 0 : i32
    return %c0_i32, %c0_i32_0, %c0_i32_1 : i32, i32, i32
  }
  func.func @transform_12(%arg0: i32) -> (i32, i32, i32) {
    %c0_i32 = arith.constant 0 : i32
    %c0_i32_0 = arith.constant 0 : i32
    %c0_i32_1 = arith.constant 0 : i32
    %c0_i32_2 = arith.constant 0 : i32
    return %c0_i32, %c0_i32_0, %c0_i32_1 : i32, i32, i32
  }
  func.func @transform_13(%arg0: i32) -> (i32, i32, i32) {
    %c0_i32 = arith.constant 0 : i32
    %c0_i32_0 = arith.constant 0 : i32
    %c0_i32_1 = arith.constant 0 : i32
    %c0_i32_2 = arith.constant 0 : i32
    return %c0_i32, %c0_i32_0, %c0_i32_1 : i32, i32, i32
  }
  func.func @transform_14(%arg0: i32) -> (i32, i32, i32) {
    %c0_i32 = arith.constant 0 : i32
    %c0_i32_0 = arith.constant 0 : i32
    %c0_i32_1 = arith.constant 0 : i32
    %c0_i32_2 = arith.constant 0 : i32
    return %c0_i32, %c0_i32_0, %c0_i32_1 : i32, i32, i32
  }
  func.func @transform_15(%arg0: i32) -> (i32, i32) {
    %c0_i32 = arith.constant 0 : i32
    %c0_i32_0 = arith.constant 0 : i32
    %c0_i32_1 = arith.constant 0 : i32
    return %c0_i32, %c0_i32_0 : i32, i32
  }
  func.func @transform_16(%arg0: i32) -> (i32, i32) {
    %c0_i32 = arith.constant 0 : i32
    %c0_i32_0 = arith.constant 0 : i32
    %c0_i32_1 = arith.constant 0 : i32
    return %c0_i32, %c0_i32_0 : i32, i32
  }
  func.func @transform_17(%arg0: i32) -> (i32, i32) {
    %c0_i32 = arith.constant 0 : i32
    %c0_i32_0 = arith.constant 0 : i32
    %c0_i32_1 = arith.constant 0 : i32
    return %c0_i32, %c0_i32_0 : i32, i32
  }
  func.func @transform_18(%arg0: i32) -> (i32, i32) {
    %c0_i32 = arith.constant 0 : i32
    %c0_i32_0 = arith.constant 0 : i32
    %c0_i32_1 = arith.constant 0 : i32
    return %c0_i32, %c0_i32_0 : i32, i32
  }
  func.func @transform_19(%arg0: i32) -> (i32, i32, i32) {
    %c0_i32 = arith.constant 0 : i32
    %c0_i32_0 = arith.constant 0 : i32
    %c0_i32_1 = arith.constant 0 : i32
    return %arg0, %c0_i32, %c0_i32_0 : i32, i32, i32
  }
}

</mosaic_0001>

<bundles_post_ra>
// kernel: _lambda_.1
= control target key start
LH: loop header
LB: loop body
LE: loop exit
PB: predicated region body
PF: predicated region fallthrough
CT: control target
= control target key end

     0   :  { %s13260_s0 = inlined_call_operand.vmem [shape: f32[2,24,32], index: 0, kind: input, shape index: {}]   ;;  %s13261_s1 = inlined_call_operand.vmem [shape: f32[2,24,32], index: 1, kind: input, shape index: {}]   ;;  %s13262_s2 = inlined_call_operand.vmem [shape: f32[4,32], index: 2, kind: input, shape index: {}]   ;;  %s13263_s3 = inlined_call_operand.vmem [shape: bf16[32,32], index: 3, kind: input, shape index: {}]   ;;  %s13264_s4 = inlined_call_operand.vmem [shape: f32[1,32], index: 4, kind: input, shape index: {}]   ;;  %s13265_s5 = inlined_call_operand.vmem [shape: bf16[2,32,32], index: 5, kind: input, shape index: {}]   ;;  %s13266_s6 = inlined_call_operand.hbm [shape: f32[2,1,32], index: 6, kind: input, shape index: {}]   ;;  %s13267_s7 = inlined_call_operand.vmem [shape: bf16[2,32,64], index: 7, kind: input, shape index: {}]   ;;  %s13268_s8 = inlined_call_operand.hbm [shape: f32[2,1,64], index: 8, kind: input, shape index: {}]   ;;  %s13269_s9 = inlined_call_operand.vmem [shape: bf16[2,32,64], index: 9, kind: input, shape index: {}]   ;;  %s13270_s10 = inlined_call_operand.hbm [shape: f32[2,1,64], index: 10, kind: input, shape index: {}]   ;;  %s13271_s11 = inlined_call_operand.vmem [shape: bf16[2,32,32], index: 11, kind: input, shape index: {}]   ;;  %s13272_s12 = inlined_call_operand.vmem [shape: bf16[2,32,128], index: 12, kind: input, shape index: {}]   ;;  %s13273_s13 = inlined_call_operand.hbm [shape: f32[2,1,128], index: 13, kind: input, shape index: {}]   ;;  %s13274_s14 = inlined_call_operand.vmem [shape: bf16[2,128,32], index: 14, kind: input, shape index: {}]   ;;  %s13275_s15 = inlined_call_operand.vmem [shape: f32[1,32], index: 15, kind: input, shape index: {}]   ;;  %s13276_s16 = inlined_call_operand.vmem [shape: f32[1,32], index: 16, kind: input, shape index: {}]   ;;  %s13277_s17 = inlined_call_operand.vmem [shape: bf16[32,48], index: 17, kind: input, shape index: {}]   ;;  %s13278_s18 = inlined_call_operand.vmem [shape: f32[1,48], index: 18, kind: input, shape index: {}]   ;;  %s13279_s19 = inlined_call_operand.vmem [shape: f32[2,12,48], index: 19, kind: output, shape index: {}]  }
   0x1   :  { %13303 = sst [smem:[#allocation12_spill]] %s13260_s0 }
   0x2   :  { %13304 = sst [smem:[#allocation13_spill]] %s13261_s1 }
   0x3   :  { %13305 = sst [smem:[#allocation14_spill]] %s13262_s2 }
   0x4   :  { %13306 = sst [smem:[#allocation15_spill]] %s13263_s3 }
   0x5   :  { %13307 = sst [smem:[#allocation16_spill]] %s13264_s4 }
   0x6   :  { %13308 = sst [smem:[#allocation17_spill]] %s13266_s6 }
   0x7   :  { %13309 = sst [smem:[#allocation18_spill]] %s13267_s7 }
   0x8   :  { %13310 = sst [smem:[#allocation19_spill]] %s13268_s8 }
   0x9   :  { %13311 = sst [smem:[#allocation20_spill]] %s13270_s10 }
   0xa   :  { %24 = vsyncpa [#allocation3], 0 }
   0xb   :  { %25 = vsyncpa [#allocation5], 0 }
   0xc   :  { %26 = vsyncpa [#allocation8], 0  ;;  %s11379_s0 = smov 0  }
   0xd LB: > { %s11385_s30 = sadd.s32 4294967295, %s11259_s0   ;;  %p9099_p0 = scmp.ge.s32.totalorder %s11259_s0, 1  ;;  %s11259_s0 = sphi %s11379_s0, %s32_s0  }
   0xe   : > { %p467_p1 = scmp.lt.s32.totalorder %s11259_s0, 3  ;;  %p10788_p2 = scmp.eq.s32.totalorder %s11385_s30, 0 }
   0xf   : > { %s11261_s21 = smov [#allocation4]   ;;  %s11262_s22 = smov [#allocation2]  }
  0x10   : > { %p11390_p3 = pnand %p9099_p0, %p467_p1  ;;  %s510_s1 = sshll.u32 %s11261_s21, 4  ;;  %s511_s1 = int_to_ptr.vmem [resolvable:$true] %s510_s1 }
  0x11   : > { %s494_s2 = sshll.u32 %s11262_s22, 4  ;;  %s11263_s24 = smov [#allocation6]   ;;  %s11396_s2 = int_to_ptr.vmem [resolvable:$true] %s494_s2 }
  0x12   : > { %p10775_p4 = pneg %p11390_p3  ;;  %s526_s25 = sshll.u32 %s11263_s24, 4  ;;  %s11404_s25 = int_to_ptr.vmem [resolvable:$true] %s526_s25 }
  0x13   : > { %s11264_s3 = smov [#allocation7]   ;;  %s11148_s27 = scalar_lea.vmem %s511_s1, 32 }
  0x14   : > { %p11400_p5 = pnand %p10788_p2, %p10775_p4  ;;  %s11406_s26 = sshll.u32 %s11264_s3, 4  ;;  %s546_s26 = int_to_ptr.vmem [resolvable:$true] %s11406_s26 }
  0x15   : > { %p11149_p7 = scmp.ne.s32.totalorder %s511_s1, %s11148_s27  ;;  %p11156_p10 = scmp.lt.s32.totalorder %s511_s1, %s511_s1 }
  0x16   : > { %p11139_p6 = pneg %p11400_p5  ;;  %p11157_p11 = scmp.lt.s32.totalorder %s11148_s27, %s11148_s27 }
  0x18   : > { %p11151_p8 = pnand %p11149_p7, %p11139_p6  ;;  %p11158_p12 = por %p11157_p11, %p11156_p10 }
  0x1a   : > { %p11152_p9 = pneg %p11151_p8 }
  0x1c   : > { %p11159_p13 = pnand %p11158_p12, %p11152_p9 }
  0x1e   : > { %11162 = shalt.err (!%p11159_p13)
}
  0x1f   : > { %s11265_s28 = smov 16   ;;  %s11266_s29 = smov 1  }
  0x20   : > { %s13314_s8 = sld [smem:[#allocation19_spill]]  ;;  %s11174_s24 = scalar_lea.vmem %s11396_s2, 32 }
  0x21   : > { %p11175_p0 = scmp.ne.s32.totalorder %s11396_s2, %s11174_s24  ;;  %p11182_p7 = scmp.lt.s32.totalorder %s11396_s2, %s11396_s2 }
  0x22   : > { %p11183_p8 = scmp.lt.s32.totalorder %s11174_s24, %s11174_s24 }
  0x23   : > { %p11177_p1 = pnand %p11175_p0, %p11139_p6 }
  0x24   : > { %p11184_p9 = por %p11183_p8, %p11182_p7 }
  0x25   : > { %p11178_p4 = pneg %p11177_p1 }
  0x26   : > { %10781 = dma.hbm_to_vmem [thread:$0]  (!%p11400_p5), %s13314_s8, 32, %s511_s1, [#allocation5], %s11265_s28, %s11265_s28, %s11266_s29  }
  0x27   : > { %p11185_p10 = pnand %p11184_p9, %p11178_p4 }
  0x29   : > { %11188 = shalt.err (!%p11185_p10)
}
  0x2a   : > { %s13315_s6 = sld [smem:[#allocation17_spill]]  ;;  %s11200_s27 = scalar_lea.vmem %s11404_s25, 32 }
  0x2b   : > { %p11201_p11 = scmp.ne.s32.totalorder %s11404_s25, %s11200_s27  ;;  %p11208_p0 = scmp.lt.s32.totalorder %s11404_s25, %s11404_s25 }
  0x2c   : > { %p11209_p1 = scmp.lt.s32.totalorder %s11200_s27, %s11200_s27 }
  0x2d   : > { %p11203_p12 = pnand %p11201_p11, %p11139_p6 }
  0x2e   : > { %p11210_p4 = por %p11209_p1, %p11208_p0 }
  0x2f   : > { %p11204_p13 = pneg %p11203_p12 }
  0x30   : > { %10778 = dma.hbm_to_vmem [thread:$0]  (!%p11400_p5), %s13315_s6, 32, %s11396_s2, [#allocation3], %s11265_s28, %s11265_s28, %s11266_s29  }
  0x31   : > { %p11211_p7 = pnand %p11210_p4, %p11204_p13 }
  0x33   : > { %11214 = shalt.err (!%p11211_p7)
}
  0x34   : > { %s13316_s10 = sld [smem:[#allocation20_spill]]  ;;  %s11226_s22 = scalar_lea.vmem %s546_s26, 32 }
  0x35   : > { %p11227_p8 = scmp.ne.s32.totalorder %s546_s26, %s11226_s22  ;;  %p11234_p11 = scmp.lt.s32.totalorder %s546_s26, %s546_s26 }
  0x36   : > { %p11235_p12 = scmp.lt.s32.totalorder %s11226_s22, %s11226_s22 }
  0x37   : > { %p11229_p9 = pnand %p11227_p8, %p11139_p6 }
  0x38   : > { %p11236_p13 = por %p11235_p12, %p11234_p11 }
  0x39   : > { %p11230_p10 = pneg %p11229_p9 }
  0x3a   : > { %10784 = dma.hbm_to_vmem [thread:$0]  (!%p11400_p5), %s13316_s10, 32, %s11404_s25, [#allocation5], %s11265_s28, %s11265_s28, %s11266_s29  }
  0x3b   : > { %p11237_p0 = pnand %p11236_p13, %p11230_p10 }
  0x3d   : > { %11240 = shalt.err (!%p11237_p0)
}
  0x3e   : > { %10787 = dma.hbm_to_vmem [thread:$0]  (!%p11400_p5), %s13273_s13, 32, %s546_s26, [#allocation8], %s11265_s28, %s11265_s28, %s11266_s29  }
  0x3f   : > { %584 = sbr.rel (%p11390_p3) target bundleno = 16772 (0x4184), region = 96 }
  0x44   : > { %11246 = dma.done.wait (%p10788_p2), [#allocation3], 32  }
  0x45   : > { %11248 = vsyncadd (%p10788_p2), [#allocation3], 4294967264 }
  0x46   : > { %11250 = dma.done.wait (%p10788_p2), [#allocation5], 64  }
  0x47   : > { %11252 = vsyncadd (%p10788_p2), [#allocation5], 4294967232 }
  0x48   : > { %11254 = dma.done.wait (%p10788_p2), [#allocation8], 32  }
  0x49   : > { %11256 = vsyncadd (%p10788_p2), [#allocation8], 4294967264  ;;  %p652_p3 = scmp.lt.s32.totalorder %s11385_s30, 1  ;;  %s13317_s28 = sld [smem:[#allocation12_spill]]  ;;  %vm691_vm0 = vcmask 261120   ;;  %vm876_vm1 = vcmask 257024  }
  0x4a   : > { %s13318_s21 = sld [smem:[#allocation15_spill]]  ;;  %s746_s24 = smul.u32 24, %s11385_s30  ;;  %v10826_v48 = vld [vmem:[%s13265_s5 + $0x8] sm:$0xff]   ;;  %v11267_v49 = vmov 0.0   ;;  %v10827_v50 = vld [vmem:[%s13265_s5] sm:$0xff]   ;;  %vm11268_vm2 = vmmov 0  }
  0x4b   : > { %s11481_s20 = scalar_select %p652_p3, %s11385_s30, 1  ;;  %vm1022_vm3 = vcmask 64512   ;;  %vm1194_vm4 = vcmask 1043456   ;;  %vm1112_vm5 = vcmask 60416   ;;  %vm1116_vm6 = vcmask 27648  }
  0x4c   : > { %s13319_s25 = sld [smem:[#allocation13_spill]]  ;;  %s13301_s22 = smov 96   ;;  %vm1144_vm7 = vcmask 1041408   ;;  %vm1140_vm8 = vcmask 31744   ;;  %vm1898_vm9 = vcmask 130048   ;;  %vm1900_vm10 = vcmask 195584  }
  0x4d   : > { %s10758_s23 = smul.u32 24, %s11481_s20  ;;  %s13320_s4 = sld [smem:[#allocation16_spill]] }
  0x4e   : > { %s13321_s2 = sld [smem:[#allocation14_spill]]  ;;  %s13296_s3 = smov 88  }
  0x4f   : > { %s656_s29 = scalar_lea.vmem %s13317_s28, %s10758_s23  ;;  %s13322_s7 = sld [smem:[#allocation18_spill]] }
  0x50   : > { %v10822_v0 = vld [vmem:[%s13318_s21 + $0x8] sm:$0xff]   ;;  %v10823_v1 = vld [vmem:[%s13318_s21] sm:$0xff]   ;;  %v665_v4 = vld [vmem:[%s656_s29 + $0x10] sm:$0xff]  ;;  %s13294_s23 = smov 112   ;;  %s13282_s28 = smov 72  }
  0x51   : > { %9822 = vmatprep.subr.bf16.mxu0 %v10822_v0  ;;  %v663_v2 = vld [vmem:[%s656_s29] sm:$0xff]  ;;  %v664_v3 = vld [vmem:[%s656_s29 + $0x8] sm:$0xff]  ;;  %v667_v6 = vpack.c.bf16 %v665_v4, %v665_v4  ;;  %s13290_s1 = smov 8   ;;  %s13288_s29 = smov 16  }
  0x52   : > { %9823 = vmatpush3.bf16.msra.mxu0 %v10822_v0  ;;  %v666_v5 = vpack.c.bf16 %v664_v3, %v663_v2  ;;  %s747_s26 = scalar_lea.vmem %s13319_s25, %s746_s24  ;;  %s13299_s24 = smov 120  }
  0x53   : > { %9824 = vmatprep.subr.bf16.mxu0 %v10823_v1  ;;  %v9113_v7 = vld [vmem:[%s13320_s4] ss:$0 sm:$0xff]  ;;  %v750_v9 = vld [vmem:[%s747_s26 + $0x10] sm:$0xff]  ;;  %v749_v20 = vld [vmem:[%s747_s26 + $0x8] sm:$0xff]  ;;  %s13292_s25 = smov 80   ;;  %s13286_s27 = smov 24  }
  0x54   : > { %9826 = vmatprep.mubr.msk.bf16.mxu0 %vm691_vm0, %v666_v5  ;;  %v748_v12 = vld [vmem:[%s747_s26] sm:$0xff]  ;;  %s13284_s26 = smov 104   ;;  %s13324_s30 = smov 104  }
  0x55   : > { %v11505_v16 = vld [vmem:[%s13321_s2] sm:$0xf]  ;;  %v10824_v46 = vld [vmem:[%s13322_s7 + $0x8] sm:$0xff]  }
  0x56   : > { %9825 = vmatpush3.bf16.msra.mxu0 %v10823_v1  ;;  %v877_v23 = vsel %vm876_vm1, %v11505_v16, 0.0  ;;  %9830 = vmatprep.subr.bf16.mxu1 %v10824_v46  ;;  %v10825_v47 = vld [vmem:[%s13322_s7] sm:$0xff]  }
  0x57   : > { %9831 = vmatpush3.bf16.msra.mxu1 %v10824_v46  ;;  %9838 = vmatprep.subr.bf16.mxu0 %v11267_v49 }
  0x58   : > { %9832 = vmatprep.subr.bf16.mxu1 %v10825_v47 }
  0x59   : > { %9827 = vmatmul.mubr.msk.bf16.vlgmr.msra.gmra.mxu0 %vm691_vm0, %v667_v6  ;;  %v10828_v6 = vld [vmem:[%s13269_s9 + $0x8] sm:$0xff]  }
  0x5a   : > { %9839 = vmatpush3.bf16.msra.mxu0 %v10826_v48  ;;  %9842 = vmatprep.mubr.msk.bf16.mxu0 %vm11268_vm2, %v11267_v49 }
  0x5b   : > { %9833 = vmatpush3.bf16.msra.mxu1 %v10825_v47  ;;  %9840 = vmatprep.subr.bf16.mxu0 %v11267_v49 }
  0x5c   : > { %9846 = vmatprep.subr.bf16.mxu1 %v11267_v49 }
  0x5e   : > { %9841 = vmatpush3.bf16.msra.mxu0 %v10827_v50 }
  0x5f   : > { %9854 = vmatprep.subr.bf16.mxu0 %v11267_v49 }
 0x119   : > { %v9828_v8 = vpop.f32.mrf.mxu0 }
 0x11a   : > { %v741_v10 = vadd.f32 %v9828_v8, %v9113_v7 }
 0x11b   : > { %v732_v11 = vpop.f32.mrf.mxu0 }
 0x11c   : > { %v733_v13 = vadd.f32 %v9113_v7, %v732_v11  ;;  %v753_v14 = vadd.f32 %v750_v9, %v741_v10  ;;  %v10829_v11 = vld [vmem:[%s13269_s9] sm:$0xff]  }
 0x11d   : > { %v9829_v15 = vpop.f32.mrf.mxu0 }
 0x11e   : > { %v760_v17 = vsel %vm691_vm0, %v753_v14, 0.0  ;;  %v751_v18 = vadd.f32 %v748_v12, %v733_v13  ;;  %v9118_v12 = vld [vmem:[#allocation4] ss:$0 sm:$0xff] }
 0x11f   : > { %761 = vadd.xlane.f32.xlu1 %v760_v17  ;;  %v735_v19 = vpop.f32.mrf.mxu0 }
 0x120   : > { %v736_v21 = vadd.f32 %v9113_v7, %v735_v19  ;;  %v754_v22 = vsel %vm691_vm0, %v751_v18, 0.0 }
 0x121   : > { %755 = vadd.xlane.f32.xlu0 %v754_v22 }
 0x122   : > { %v752_v24 = vadd.f32 %v749_v20, %v736_v21  ;;  %v11565_v21 = vld [vmem:[#allocation6] ss:$0 sm:$0xff] }
 0x123   : > { %878 = vadd.xlane.f32.xlu1 %v877_v23 }
 0x124   : > { %v757_v25 = vsel %vm691_vm0, %v752_v24, 0.0 }
 0x125   : > { %758 = vadd.xlane.f32.xlu0 %v757_v25 }
 0x1a8   : > { %v762_v26 = vpop.xlane.xlu1 %761 }
 0x1a9   : > { %v766_v27 = vmul.f32 0.03125, %v762_v26 }
 0x1aa   : > { %v756_v28 = vpop.xlane.xlu0 %755 }
 0x1ab   : > { %v764_v29 = vmul.f32 0.03125, %v756_v28  ;;  %v769_v31 = vsub.f32 %v753_v14, %v766_v27 }
 0x1ac   : > { %v879_v30 = vpop.xlane.xlu1 %878 }
 0x1ad   : > { %v767_v32 = vsub.f32 %v751_v18, %v764_v29  ;;  %v880_v33 = vmul.f32 0.03125, %v879_v30  ;;  %v772_v40 = vmul.f32 %v769_v31, %v769_v31  ;;  %v11570_v29 = vld [vmem:[#allocation2] ss:$0 sm:$0xff] }
 0x1ae   : > { %v759_v34 = vpop.xlane.xlu0 %758 }
 0x1af   : > { %v765_v35 = vmul.f32 0.03125, %v759_v34  ;;  %v881_v36 = vsub.f32 %v11505_v16, %v880_v33  ;;  %v770_v37 = vmul.f32 %v767_v32, %v767_v32  ;;  %v779_v43 = vsel %vm691_vm0, %v772_v40, 0.0 }
 0x1b1   : > { %v768_v38 = vsub.f32 %v752_v24, %v765_v35  ;;  %v773_v39 = vsel %vm691_vm0, %v770_v37, 0.0  ;;  %v882_v42 = vmul.f32 %v881_v36, %v881_v36 }
 0x1b2   : > { %774 = vadd.xlane.f32.xlu0 %v773_v39 }
 0x1b3   : > { %v771_v41 = vmul.f32 %v768_v38, %v768_v38  ;;  %v883_v45 = vsel %vm876_vm1, %v882_v42, 0.0 }
 0x1b5   : > { %v776_v44 = vsel %vm691_vm0, %v771_v41, 0.0 }
 0x1b6   : > { %780 = vadd.xlane.f32.xlu0 %v779_v43  ;;  %777 = vadd.xlane.f32.xlu1 %v776_v44 }
 0x1ba   : > { %884 = vadd.xlane.f32.xlu1 %v883_v45 }
 0x23b   : > { %v775_v51 = vpop.xlane.xlu0 %774 }
 0x23c   : > { %v782_v52 = vmul.f32 0.03125, %v775_v51 }
 0x23e   : > { %v785_v53 = vadd.f32 1e-05, %v782_v52 }
 0x23f   : > { %v778_v54 = vpop.xlane.xlu1 %777  ;;  %v781_v55 = vpop.xlane.xlu0 %780 }
 0x240   : > { %v783_v56 = vmul.f32 0.03125, %v778_v54  ;;  %v784_v57 = vmul.f32 0.03125, %v781_v55  ;;  %10930 = vrsqrt.f32 %v785_v53 }
 0x242   : > { %v786_v58 = vadd.f32 1e-05, %v783_v56  ;;  %v787_v59 = vadd.f32 1e-05, %v784_v57 }
 0x243   : > { %v885_v60 = vpop.xlane.xlu1 %884 }
 0x244   : > { %10932 = vrsqrt.f32 %v786_v58  ;;  %v886_v61 = vmul.f32 0.03125, %v885_v60 }
 0x245   : > { %10934 = vrsqrt.f32 %v787_v59 }
 0x246   : > { %v887_v62 = vadd.f32 1e-05, %v886_v61 }
 0x248   : > { %10936 = vrsqrt.f32 %v887_v62 }
 0x24d   : > { %v10931_v63 = vpop.eup %10930 }
 0x24e   : > { %v791_v2 = vmul.f32 %v10931_v63, %v767_v32 }
 0x251   : > { %v10933_v0 = vpop.eup %10932 }
 0x252   : > { %v10935_v1 = vpop.eup %10934  ;;  %v792_v3 = vmul.f32 %v10933_v0, %v768_v38 }
 0x253   : > { %v793_v4 = vmul.f32 %v10935_v1, %v769_v31 }
 0x254   : > { %v11535_v5 = vpack.c.bf16 %v792_v3, %v791_v2 }
 0x255   : > { %v10937_v7 = vpop.eup %10936  ;;  %v11540_v8 = vpack.c.bf16 %v793_v4, %v793_v4 }
 0x256   : > { %v889_v9 = vmul.f32 %v10937_v7, %v881_v36  ;;  %9834 = vmatprep.mubr.msk.bf16.mxu1 %vm691_vm0, %v11535_v5 }
 0x257   : > { %9835 = vmatmul.mubr.msk.bf16.vlgmr.msra.gmra.mxu1 %vm691_vm0, %v11540_v8 }
 0x258   : > { %v11546_v10 = vpack.c.bf16 %v889_v9, %v889_v9  ;;  %9847 = vmatpush3.bf16.msra.mxu1 %v10828_v6  ;;  %9850 = vmatprep.mubr.msk.bf16.mxu1 %vm11268_vm2, %v11267_v49 }
 0x259   : > { %9848 = vmatprep.subr.bf16.mxu1 %v11267_v49 }
 0x25a   : > { %9843 = vmatmul.mubr.msk.bf16.vlgmr.msra.gmra.mxu0 %vm691_vm0, %v11546_v10 }
 0x25b   : > { %9856 = vmatprep.mubr.msk.bf16.mxu0 %vm11268_vm2, %v11267_v49 }
 0x25c   : > { %9849 = vmatpush3.bf16.msra.mxu1 %v10829_v11 }
 0x25d   : > { %9860 = vmatprep.subr.bf16.mxu1 %v11267_v49 }
 0x25f   : > { %9851 = vmatmul.mubr.msk.bf16.vlgmr.msra.gmra.mxu1 %vm691_vm0, %v11546_v10 }
 0x260   : > { %9862 = vmatprep.mubr.msk.bf16.mxu1 %vm11268_vm2, %v11267_v49 }
 0x317   : > { %v9836_v13 = vpop.f32.mrf.mxu1 }
 0x318   : > { %v11563_v14 = vadd.f32 %v9836_v13, %v9118_v12 }
 0x319   : > { %v860_v15 = vpop.f32.mrf.mxu1 }
 0x31a   : > { %v951_v17 = vpop.f32.mrf.mxu0  ;;  %v861_v22 = vadd.f32 %v9118_v12, %v860_v15 }
 0x31b   : > { %v9837_v18 = vpop.f32.mrf.mxu1  ;;  %v952_v34 = vadd.f32 %v11570_v29, %v951_v17 }
 0x31c   : > { %v9844_v19 = vpop.f32.mrf.mxu0 }
 0x31d   : > { %v863_v20 = vpop.f32.mrf.mxu1  ;;  %v11585_v37 = vpack.c.bf16 %v952_v34, %v952_v34 }
 0x31e   : > { %v864_v23 = vadd.f32 %v9118_v12, %v863_v20  ;;  %v954_v24 = vpop.f32.mrf.mxu0 }
 0x31f   : > { %v1014_v25 = vpop.f32.mrf.mxu1 }
 0x320   : > { %v11567_v26 = vpack.c.bf16 %v864_v23, %v861_v22  ;;  %v1015_v27 = vadd.f32 %v11565_v21, %v1014_v25  ;;  %v9845_v28 = vpop.f32.mrf.mxu0 }
 0x321   : > { %v9852_v30 = vpop.f32.mrf.mxu1 }
 0x322   : > { %v11572_v31 = vpack.c.bf16 %v1015_v27, %v1015_v27  ;;  %1189 = vrot.lane.b32.xlu1 %v11567_v26, %s13301_s22  ;;  %v1027_v32 = vsel %vm1022_vm3, %v11567_v26, 0 }
 0x323   : > { %v1017_v33 = vpop.f32.mrf.mxu1  ;;  %9855 = vmatpush3.bf16.xpose.msra.mxu0 %v1027_v32 }
 0x324   : > { %v1070_v35 = vsel %vm1022_vm3, %v11572_v31, 0  ;;  %9866 = vmatprep.subr.bf16.mxu0 %v11267_v49 }
 0x325   : > { %v9853_v36 = vpop.f32.mrf.mxu1  ;;  %9861 = vmatpush3.bf16.xpose.msra.mxu1 %v1070_v35 }
 0x326   : > { %1242 = vrot.lane.b32.xlu1 %v11567_v26, %s13299_s24  ;;  %9872 = vmatprep.subr.bf16.mxu1 %v11267_v49 }
 0x32a   : > { %9857 = vmatmul.mubr.msk.bf16.vlgmr.msra.gmra.mxu0 %vm1022_vm3, %v11585_v37 }
 0x32b   : > { %9868 = vmatprep.mubr.msk.bf16.mxu0 %vm11268_vm2, %v11267_v49 }
 0x32c   : > { %9863 = vmatmul.mubr.msk.bf16.vlgmr.msra.gmra.mxu1 %vm1022_vm3, %v11585_v37 }
 0x32d   : > { %9874 = vmatprep.mubr.msk.bf16.mxu1 %vm11268_vm2, %v11267_v49 }
 0x394   : > { %v1190_v38 = vpop.permute.xlu1 %1189 }
 0x395   : > { %v1196_v39 = vsel %vm1194_vm4, %v1190_v38, 0 }
 0x396   : > { %9873 = vmatpush3.bf16.msra.mxu1 %v1196_v39 }
 0x397   : > { %9884 = vmatprep.subr.bf16.mxu1 %v11267_v49 }
 0x398   : > { %v1243_v51 = vpop.permute.xlu1 %1242 }
 0x399   : > { %v1248_v3 = vsel %vm1022_vm3, %v1243_v51, 0 }
 0x3ea   : > { %v1063_v40 = vpop.f32.mrf.mxu0 }
 0x3eb   : > { %v1113_v41 = vsel %vm1112_vm5, %v1063_v40, -inf }
 0x3ec   : > { %v1106_v42 = vpop.f32.mrf.mxu1  ;;  %1114 = vmax.xlane.f32.xlu0 %v1113_v41  ;;  %v9858_v43 = vpop.f32.mrf.mxu0 }
 0x3ed   : > { %v1117_v44 = vsel %vm1116_vm6, %v1106_v42, -inf }
 0x3ee   : > { %v9864_v45 = vpop.f32.mrf.mxu1  ;;  %1118 = vmax.xlane.f32.xlu1 %v1117_v44  ;;  %v1066_v46 = vpop.f32.mrf.mxu0 }
 0x3f0   : > { %v9859_v47 = vpop.f32.mrf.mxu0  ;;  %v1109_v48 = vpop.f32.mrf.mxu1 }
 0x3f2   : > { %v9865_v50 = vpop.f32.mrf.mxu1 }
 0x3ff   : > { %1290 = vrot.lane.b32.xlu1 %v11572_v31, %s13299_s24 }
 0x402   : > { %1138 = vrot.lane.b32.xlu0 %v11572_v31, %s13301_s22 }
 0x406   : > { %1240 = vrot.lane.b32.xlu0 %v11585_v37, %s13299_s24 }
 0x475   : > { %v1115_v52 = vpop.xlane.xlu0 %1114 }
 0x477   : > { %v1119_v53 = vpop.xlane.xlu1 %1118 }
 0x478   : > { %v1120_v54 = vmax.f32 %v1115_v52, %v1119_v53 }
 0x479   : > { %v1139_v55 = vpop.permute.xlu0 %1138 }
 0x47a   : > { %v1121_v56 = vsub.f32 %v1063_v40, %v1120_v54  ;;  %v1124_v57 = vsub.f32 %v1106_v42, %v1120_v54  ;;  %v1146_v58 = vsel %vm1144_vm7, %v1139_v55, 0 }
 0x47b   : > { %9867 = vmatpush3.bf16.msra.mxu0 %v1146_v58  ;;  %v1291_v62 = vpop.permute.xlu1 %1290 }
 0x47c   : > { %v1122_v59 = vmul.f32 1.442695, %v1121_v56  ;;  %v1125_v60 = vmul.f32 1.442695, %v1124_v57  ;;  %9878 = vmatprep.subr.bf16.mxu0 %v11267_v49  ;;  %v1293_v2 = vsel %vm1022_vm3, %v1291_v62, 0 }
 0x47d   : > { %v1241_v4 = vpop.permute.xlu0 %1240 }
 0x47e   : > { %10938 = vpow2.f32 %v1122_v59 }
 0x47f   : > { %10940 = vpow2.f32 %v1125_v60 }
 0x48b   : > { %v11607_v61 = vpop.eup %10938 }
 0x48c   : > { %v11609_v63 = vpop.eup %10940  ;;  %v1135_v0 = vpack.c.bf16 %v11607_v61, %v11607_v61 }
 0x48d   : > { %v1136_v1 = vpack.c.bf16 %v11609_v63, %v11609_v63 }
 0x48e   : > { %9875 = vmatmul.mubr.msk.bf16.vlgmr.msra.gmra.mxu1 %vm1022_vm3, %v1135_v0 }
 0x48f   : > { %9869 = vmatmul.mubr.msk.bf16.vlgmr.msra.gmra.mxu0 %vm1140_vm8, %v1136_v1  ;;  %9885 = vmatpush3.bf16.xpose.msra.mxu1 %v1293_v2 }
 0x490   : > { %9879 = vmatpush3.bf16.xpose.msra.mxu0 %v1248_v3  ;;  %9880 = vmatprep.mubr.msk.bf16.mxu0 %vm11268_vm2, %v11267_v49 }
 0x491   : > { %9886 = vmatprep.mubr.msk.bf16.mxu1 %vm11268_vm2, %v11267_v49  ;;  %9890 = vmatprep.subr.bf16.mxu0 %v11267_v49 }
 0x492   : > { %9896 = vmatprep.subr.bf16.mxu1 %v11267_v49 }
 0x496   : > { %9887 = vmatmul.mubr.msk.bf16.vlgmr.msra.gmra.mxu1 %vm1022_vm3, %v1241_v4 }
 0x497   : > { %9881 = vmatmul.mubr.msk.bf16.vlgmr.msra.gmra.mxu0 %vm1022_vm3, %v1241_v4  ;;  %9898 = vmatprep.mubr.msk.bf16.mxu1 %vm11268_vm2, %v11267_v49 }
 0x498   : > { %9892 = vmatprep.mubr.msk.bf16.mxu0 %vm11268_vm2, %v11267_v49 }
 0x54e   : > { %v1232_v6 = vpop.f32.mrf.mxu1 }
 0x54f   : > { %v1182_v7 = vpop.f32.mrf.mxu0 }
 0x550   : > { %v11631_v9 = vadd.f32 %v1232_v6, %v1182_v7  ;;  %v9876_v11 = vpop.f32.mrf.mxu1 }
 0x551   : > { %v9870_v12 = vpop.f32.mrf.mxu0 }
 0x552   : > { %v1235_v13 = vpop.f32.mrf.mxu1 }
 0x553   : > { %v1185_v15 = vpop.f32.mrf.mxu0 }
 0x554   : > { %v9877_v17 = vpop.f32.mrf.mxu1 }
 0x555   : > { %v9871_v18 = vpop.f32.mrf.mxu0 }
 0x556   : > { %v1329_v19 = vpop.f32.mrf.mxu1 }
 0x557   : > { %v1284_v20 = vpop.f32.mrf.mxu0  ;;  %v1338_v22 = vsel %vm1116_vm6, %v1329_v19, -inf }
 0x558   : > { %1339 = vmax.xlane.f32.xlu0 %v1338_v22  ;;  %v9888_v23 = vpop.f32.mrf.mxu1  ;;  %v1335_v24 = vsel %vm1112_vm5, %v1284_v20, -inf }
 0x559   : > { %1336 = vmax.xlane.f32.xlu1 %v1335_v24  ;;  %v9882_v25 = vpop.f32.mrf.mxu0 }
 0x55a   : > { %v1332_v27 = vpop.f32.mrf.mxu1 }
 0x55b   : > { %v1287_v28 = vpop.f32.mrf.mxu0 }
 0x55c   : > { %v9889_v30 = vpop.f32.mrf.mxu1 }
 0x55d   : > { %v9883_v32 = vpop.f32.mrf.mxu0 }
 0x56a   : > { %1406 = vrot.lane.b32.xlu1 %v11567_v26, %s13296_s3 }
 0x56e   : > { %1457 = vrot.lane.b32.xlu1 %v11567_v26, %s13294_s23  ;;  %1358 = vrot.lane.b32.xlu0 %v11572_v31, %s13296_s3 }
 0x572   : > { %1455 = vrot.lane.b32.xlu1 %v11585_v37, %s13294_s23  ;;  %1505 = vrot.lane.b32.xlu0 %v11572_v31, %s13294_s23 }
 0x576   : > { %1621 = vrot.lane.b32.xlu1 %v11567_v26, %s13292_s25 }
 0x5e1   : > { %v1340_v33 = vpop.xlane.xlu0 %1339 }
 0x5e2   : > { %v1337_v34 = vpop.xlane.xlu1 %1336 }
 0x5e3   : > { %v1341_v35 = vmax.f32 %v1337_v34, %v1340_v33 }
 0x5e5   : > { %v1342_v36 = vsub.f32 %v1284_v20, %v1341_v35  ;;  %v1345_v38 = vsub.f32 %v1329_v19, %v1341_v35  ;;  %v1359_v39 = vpop.permute.xlu0 %1358 }
 0x5e6   : > { %v1364_v40 = vsel %vm1144_vm7, %v1359_v39, 0  ;;  %v1407_v41 = vpop.permute.xlu1 %1406 }
 0x5e7   : > { %v1343_v42 = vmul.f32 1.442695, %v1342_v36  ;;  %v1346_v43 = vmul.f32 1.442695, %v1345_v38  ;;  %v1412_v44 = vsel %vm1194_vm4, %v1407_v41, 0  ;;  %9891 = vmatpush3.bf16.msra.mxu0 %v1364_v40 }
 0x5e8   : > { %9897 = vmatpush3.bf16.msra.mxu1 %v1412_v44  ;;  %9902 = vmatprep.subr.bf16.mxu0 %v11267_v49 }
 0x5e9   : > { %10942 = vpow2.f32 %v1343_v42  ;;  %9908 = vmatprep.subr.bf16.mxu1 %v11267_v49  ;;  %v1506_v47 = vpop.permute.xlu0 %1505 }
 0x5ea   : > { %10944 = vpow2.f32 %v1346_v43  ;;  %v1458_v45 = vpop.permute.xlu1 %1457  ;;  %v1508_v53 = vsel %vm1022_vm3, %v1506_v47, 0 }
 0x5eb   : > { %v1463_v54 = vsel %vm1022_vm3, %v1458_v45, 0 }
 0x5ee   : > { %v1456_v51 = vpop.permute.xlu1 %1455 }
 0x5f2   : > { %v1622_v55 = vpop.permute.xlu1 %1621 }
 0x5f3   : > { %v1627_v56 = vsel %vm1194_vm4, %v1622_v55, 0 }
 0x5f6   : > { %v11651_v46 = vpop.eup %10942 }
 0x5f7   : > { %v11653_v48 = vpop.eup %10944  ;;  %v1356_v50 = vpack.c.bf16 %v11651_v46, %v11651_v46 }
 0x5f8   : > { %v1357_v52 = vpack.c.bf16 %v11653_v48, %v11653_v48 }
 0x5f9   : > { %9899 = vmatmul.mubr.msk.bf16.vlgmr.msra.gmra.mxu1 %vm1022_vm3, %v1356_v50 }
 0x5fa   : > { %9893 = vmatmul.mubr.msk.bf16.vlgmr.msra.gmra.mxu0 %vm1140_vm8, %v1357_v52  ;;  %9909 = vmatpush3.bf16.xpose.msra.mxu1 %v1508_v53 }
 0x5fb   : > { %9903 = vmatpush3.bf16.xpose.msra.mxu0 %v1463_v54  ;;  %9904 = vmatprep.mubr.msk.bf16.mxu0 %vm11268_vm2, %v11267_v49 }
 0x5fc   : > { %9910 = vmatprep.mubr.msk.bf16.mxu1 %vm11268_vm2, %v11267_v49  ;;  %9920 = vmatprep.subr.bf16.mxu1 %v11267_v49 }
 0x5fd   : > { %9914 = vmatprep.subr.bf16.mxu0 %v11267_v49 }
 0x601   : > { %9911 = vmatmul.mubr.msk.bf16.vlgmr.msra.gmra.mxu1 %vm1022_vm3, %v1456_v51 }
 0x602   : > { %9905 = vmatmul.mubr.msk.bf16.vlgmr.msra.gmra.mxu0 %vm1022_vm3, %v1456_v51  ;;  %9921 = vmatpush3.bf16.msra.mxu1 %v1627_v56 }
 0x603   : > { %9916 = vmatprep.mubr.msk.bf16.mxu0 %vm11268_vm2, %v11267_v49  ;;  %9922 = vmatprep.mubr.msk.bf16.mxu1 %vm11268_vm2, %v11267_v49 }
 0x604   : > { %9932 = vmatprep.subr.bf16.mxu1 %v11267_v49 }
 0x6b9   : > { %v1448_v57 = vpop.f32.mrf.mxu1 }
 0x6ba   : > { %v1400_v58 = vpop.f32.mrf.mxu0 }
 0x6bb   : > { %v11677_v59 = vadd.f32 %v1448_v57, %v1400_v58  ;;  %v9900_v60 = vpop.f32.mrf.mxu1 }
 0x6bc   : > { %v9894_v62 = vpop.f32.mrf.mxu0 }
 0x6bd   : > { %v1451_v0 = vpop.f32.mrf.mxu1 }
 0x6be   : > { %v1403_v1 = vpop.f32.mrf.mxu0 }
 0x6bf   : > { %v9901_v2 = vpop.f32.mrf.mxu1 }
 0x6c0   : > { %v9895_v3 = vpop.f32.mrf.mxu0 }
 0x6c1   : > { %v1544_v4 = vpop.f32.mrf.mxu1  ;;  %v1351_v3 = vsel %vm1116_vm6, %v11653_v48, 0.0 }
 0x6c2   : > { %v1499_v6 = vpop.f32.mrf.mxu0  ;;  %v1553_v7 = vsel %vm1116_vm6, %v1544_v4, -inf }
 0x6c3   : > { %1554 = vmax.xlane.f32.xlu1 %v1553_v7  ;;  %v9912_v11 = vpop.f32.mrf.mxu1  ;;  %v1550_v12 = vsel %vm1112_vm5, %v1499_v6, -inf }
 0x6c4   : > { %1551 = vmax.xlane.f32.xlu0 %v1550_v12  ;;  %v9906_v13 = vpop.f32.mrf.mxu0 }
 0x6c5   : > { %v1547_v15 = vpop.f32.mrf.mxu1 }
 0x6c6   : > { %v1502_v17 = vpop.f32.mrf.mxu0 }
 0x6c7   : > { %v9913_v18 = vpop.f32.mrf.mxu1 }
 0x6c8   : > { %v9907_v19 = vpop.f32.mrf.mxu0 }
 0x6d4   : > { %1720 = vrot.lane.b32.xlu1 %v11572_v31, %s13284_s26 }
 0x6da   : > { %1573 = vrot.lane.b32.xlu0 %v11572_v31, %s13292_s25  ;;  %s13327_s25 = smov 16  }
 0x6de   : > { %1672 = vrot.lane.b32.xlu0 %v11567_v26, %s13284_s26 }
 0x6e2   : > { %1670 = vrot.lane.b32.xlu0 %v11585_v37, %s13284_s26 }
 0x74c   : > { %v1555_v20 = vpop.xlane.xlu1 %1554 }
 0x74d   : > { %v1552_v22 = vpop.xlane.xlu0 %1551 }
 0x74e   : > { %v1556_v23 = vmax.f32 %v1552_v22, %v1555_v20 }
 0x750   : > { %v1557_v24 = vsub.f32 %v1499_v6, %v1556_v23  ;;  %v1560_v25 = vsub.f32 %v1544_v4, %v1556_v23  ;;  %v1721_v34 = vpop.permute.xlu1 %1720  ;;  %v1348_v4 = vsel %vm1112_vm5, %v11651_v46, 0.0 }
 0x751   : > { %v1574_v27 = vpop.permute.xlu0 %1573  ;;  %v1723_v39 = vsel %vm1022_vm3, %v1721_v34, 0 }
 0x752   : > { %v1558_v28 = vmul.f32 1.442695, %v1557_v24  ;;  %v1561_v30 = vmul.f32 1.442695, %v1560_v25  ;;  %v1579_v32 = vsel %vm1144_vm7, %v1574_v27, 0 }
 0x753   : > { %9915 = vmatpush3.bf16.msra.mxu0 %v1579_v32  ;;  %v1130_v32 = vsel %vm1116_vm6, %v11609_v63, 0.0  ;;  %v10830_v63 = vld [vmem:[%s13271_s11 + $0x8] sm:$0xff]  }
 0x754   : > { %10946 = vpow2.f32 %v1558_v28  ;;  %9926 = vmatprep.subr.bf16.mxu0 %v11267_v49 }
 0x755   : > { %10948 = vpow2.f32 %v1561_v30  ;;  %v1673_v36 = vpop.permute.xlu0 %1672  ;;  %v1127_v30 = vsel %vm1112_vm5, %v11607_v61, 0.0 }
 0x756   : > { %v1678_v40 = vsel %vm1022_vm3, %v1673_v36, 0 }
 0x759   : > { %v1671_v41 = vpop.permute.xlu0 %1670 }
 0x761   : > { %v10947_v33 = vpop.eup %10946 }
 0x762   : > { %v10949_v35 = vpop.eup %10948  ;;  %v1571_v37 = vpack.c.bf16 %v10947_v33, %v10947_v33  ;;  %v1563_v6 = vsel %vm1112_vm5, %v10947_v33, 0.0 }
 0x763   : > { %v1572_v38 = vpack.c.bf16 %v10949_v35, %v10949_v35  ;;  %v1566_v7 = vsel %vm1116_vm6, %v10949_v35, 0.0 }
 0x764   : > { %9923 = vmatmul.mubr.msk.bf16.vlgmr.msra.gmra.mxu1 %vm1022_vm3, %v1571_v37 }
 0x765   : > { %9917 = vmatmul.mubr.msk.bf16.vlgmr.msra.gmra.mxu0 %vm1140_vm8, %v1572_v38  ;;  %9933 = vmatpush3.bf16.xpose.msra.mxu1 %v1723_v39 }
 0x766   : > { %9927 = vmatpush3.bf16.xpose.msra.mxu0 %v1678_v40  ;;  %9928 = vmatprep.mubr.msk.bf16.mxu0 %vm11268_vm2, %v11267_v49 }
 0x767   : > { %9934 = vmatprep.mubr.msk.bf16.mxu1 %vm11268_vm2, %v11267_v49  ;;  %9938 = vmatprep.subr.bf16.mxu0 %v11267_v49 }
 0x768   : > { %9944 = vmatprep.subr.bf16.mxu1 %v11267_v49 }
 0x76c   : > { %9935 = vmatmul.mubr.msk.bf16.vlgmr.msra.gmra.mxu1 %vm1022_vm3, %v1671_v41 }
 0x76d   : > { %9929 = vmatmul.mubr.msk.bf16.vlgmr.msra.gmra.mxu0 %vm1022_vm3, %v1671_v41  ;;  %9946 = vmatprep.mubr.msk.bf16.mxu1 %vm11268_vm2, %v11267_v49 }
 0x76e   : > { %9940 = vmatprep.mubr.msk.bf16.mxu0 %vm11268_vm2, %v11267_v49 }
 0x824   : > { %v1663_v42 = vpop.f32.mrf.mxu1 }
 0x825   : > { %v1615_v43 = vpop.f32.mrf.mxu0 }
 0x826   : > { %v11707_v44 = vadd.f32 %v1663_v42, %v1615_v43  ;;  %v9924_v45 = vpop.f32.mrf.mxu1 }
 0x827   : > { %v9918_v47 = vpop.f32.mrf.mxu0 }
 0x828   : > { %v1666_v50 = vpop.f32.mrf.mxu1 }
 0x829   : > { %v1618_v51 = vpop.f32.mrf.mxu0 }
 0x82a   : > { %v9925_v52 = vpop.f32.mrf.mxu1 }
 0x82b   : > { %v9919_v53 = vpop.f32.mrf.mxu0 }
 0x82c   : > { %v1759_v54 = vpop.f32.mrf.mxu1 }
 0x82d   : > { %v1714_v55 = vpop.f32.mrf.mxu0  ;;  %v1768_v56 = vsel %vm1116_vm6, %v1759_v54, -inf }
 0x82e   : > { %1769 = vmax.xlane.f32.xlu0 %v1768_v56  ;;  %v9936_v57 = vpop.f32.mrf.mxu1  ;;  %v1765_v58 = vsel %vm1112_vm5, %v1714_v55, -inf }
 0x82f   : > { %1766 = vmax.xlane.f32.xlu1 %v1765_v58  ;;  %v9930_v60 = vpop.f32.mrf.mxu0 }
 0x830   : > { %v1762_v62 = vpop.f32.mrf.mxu1 }
 0x831   : > { %v1717_v0 = vpop.f32.mrf.mxu0 }
 0x832   : > { %v9937_v1 = vpop.f32.mrf.mxu1 }
 0x833   : > { %v9931_v2 = vpop.f32.mrf.mxu0 }
 0x840   : > { %1836 = vrot.lane.b32.xlu1 %v11567_v26, %s13282_s28 }
 0x844   : > { %1788 = vrot.lane.b32.xlu0 %v11572_v31, %s13282_s28  ;;  %s13323_s28 = smov 80  }
 0x863   : > { %1352 = vadd.xlane.f32.xlu0 %v1351_v3 }
 0x864   : > { %1349 = vadd.xlane.f32.xlu1 %v1348_v4 }
 0x867   : > { %1564 = vadd.xlane.f32.xlu0 %v1563_v6 }
 0x86b   : > { %1567 = vadd.xlane.f32.xlu0 %v1566_v7 }
 0x8b7   : > { %v1770_v11 = vpop.xlane.xlu0 %1769 }
 0x8b8   : > { %v1767_v12 = vpop.xlane.xlu1 %1766 }
 0x8b9   : > { %v1771_v13 = vmax.f32 %v1767_v12, %v1770_v11 }
 0x8bb   : > { %v1772_v15 = vsub.f32 %v1714_v55, %v1771_v13  ;;  %v1775_v17 = vsub.f32 %v1759_v54, %v1771_v13  ;;  %v1789_v31 = vpop.permute.xlu0 %1788 }
 0x8bc   : > { %v1794_v18 = vsel %vm1144_vm7, %v1789_v31, 0  ;;  %v1837_v48 = vpop.permute.xlu1 %1836 }
 0x8bd   : > { %v1773_v19 = vmul.f32 1.442695, %v1772_v15  ;;  %v1776_v20 = vmul.f32 1.442695, %v1775_v17  ;;  %v1842_v46 = vsel %vm1194_vm4, %v1837_v48, 0  ;;  %9939 = vmatpush3.bf16.msra.mxu0 %v1794_v18 }
 0x8be   : > { %9945 = vmatpush3.bf16.msra.mxu1 %v1842_v46  ;;  %9950 = vmatprep.subr.bf16.mxu0 %v11267_v49 }
 0x8bf   : > { %10950 = vpow2.f32 %v1773_v19  ;;  %9958 = vmatprep.subr.bf16.mxu1 %v11267_v49  ;;  %v11763_v19 = vrot.slane %v11567_v26, 4  ;;  %v10833_v26 = vld [vmem:[%s13272_s12] sm:$0xff]  }
 0x8c0   : > { %10952 = vpow2.f32 %v1776_v20 }
 0x8cc   : > { %v10951_v22 = vpop.eup %10950 }
 0x8cd   : > { %v10953_v23 = vpop.eup %10952  ;;  %v1778_v24 = vsel %vm1112_vm5, %v10951_v22, 0.0  ;;  %v1786_v25 = vpack.c.bf16 %v10951_v22, %v10951_v22 }
 0x8ce   : > { %v1781_v27 = vsel %vm1116_vm6, %v10953_v23, 0.0  ;;  %1779 = vadd.xlane.f32.xlu1 %v1778_v24  ;;  %v1787_v28 = vpack.c.bf16 %v10953_v23, %v10953_v23  ;;  %v10832_v24 = vld [vmem:[%s13272_s12 + $0x8] sm:$0xff]  }
 0x8cf   : > { %1782 = vadd.xlane.f32.xlu0 %v1781_v27  ;;  %9947 = vmatmul.mubr.msk.bf16.vlgmr.msra.gmra.mxu1 %vm1022_vm3, %v1786_v25 }
 0x8d0   : > { %9941 = vmatmul.mubr.msk.bf16.vlgmr.msra.gmra.mxu0 %vm1140_vm8, %v1787_v28  ;;  %9962 = vmatprep.mubr.msk.bf16.mxu1 %vm11268_vm2, %v11267_v49 }
 0x8d1   : > { %9954 = vmatprep.mubr.msk.bf16.mxu0 %vm11268_vm2, %v11267_v49  ;;  %9951 = vmatpush3.bf16.msra.mxu0 %v10830_v63  ;;  %v10842_v63 = vld [vmem:[%s13274_s14 + $0x18] sm:$0xff]  }
 0x8d2   : > { %1128 = vadd.xlane.f32.xlu1 %v1127_v30  ;;  %9952 = vmatprep.subr.bf16.mxu0 %v11267_v49 }
 0x8d3   : > { %1131 = vadd.xlane.f32.xlu0 %v1130_v32  ;;  %9959 = vmatpush3.bf16.msra.mxu1 %v10832_v24 }
 0x8d4   : > { %9960 = vmatprep.subr.bf16.mxu1 %v11267_v49 }
 0x8d7   : > { %9961 = vmatpush3.bf16.msra.mxu1 %v10833_v26 }
 0x8d8   : > { %9986 = vmatprep.subr.bf16.mxu1 %v11267_v49 }
 0x8ec   : > { %v1353_v33 = vpop.xlane.xlu0 %1352 }
 0x8ed   : > { %v1350_v34 = vpop.xlane.xlu1 %1349 }
 0x8ee   : > { %v1354_v35 = vadd.f32 %v1353_v33, %v1350_v34  ;;  %v10834_v33 = vld [vmem:[%s13265_s5 + $0x8] sm:$0xff]  }
 0x8f0   : > { %10954 = vrcp.f32 %v1354_v35  ;;  %v1565_v36 = vpop.xlane.xlu0 %1564  ;;  %v10835_v35 = vld [vmem:[%s13265_s5] sm:$0xff]  }
 0x8f4   : > { %v1568_v37 = vpop.xlane.xlu0 %1567 }
 0x8f5   : > { %v1569_v38 = vadd.f32 %v1568_v37, %v1565_v36  ;;  %v10836_v36 = vld [vmem:[%s13269_s9 + $0x8] sm:$0xff]   ;;  %v10837_v37 = vld [vmem:[%s13269_s9] sm:$0xff]  }
 0x8f7   : > { %10956 = vrcp.f32 %v1569_v38  ;;  %v2307_v38 = vsel %vm1022_vm3, %v11763_v19, 0 }
 0x8fd   : > { %v10955_v39 = vpop.eup %10954 }
 0x8fe   : > { %v1454_v40 = vmul.f32 %v10955_v39, %v11677_v59  ;;  %v10831_v59 = vld [vmem:[%s13271_s11] sm:$0xff]   ;;  %v10838_v39 = vld [vmem:[%s13274_s14 + $0x38] sm:$0xff]  }
 0x8ff   : > { %9953 = vmatpush3.bf16.msra.mxu0 %v10831_v59  ;;  %v11841_v59 = vld [vmem:[#allocation7] ss:$0 sm:$0xff] }
 0x900   : > { %1886 = vrot.lane.b32.xlu1 %v1454_v40, %s13290_s1  ;;  %9966 = vmatprep.subr.bf16.mxu0 %v11267_v49  ;;  %v10839_v40 = vld [vmem:[%s13274_s14 + $0x30] sm:$0xff]   ;;  %s13325_s1 = smov 72  }
 0x904   : > { %v10957_v61 = vpop.eup %10956 }
 0x905   : > { %v1669_v41 = vmul.f32 %v10957_v61, %v11707_v44  ;;  %v10840_v61 = vld [vmem:[%s13274_s14 + $0x28] sm:$0xff]  }
 0x907   : > { %1890 = vrot.lane.b32.xlu0 %v1669_v41, %s13288_s29  ;;  %v10841_v41 = vld [vmem:[%s13274_s14 + $0x20] sm:$0xff]   ;;  %s13326_s29 = smov 8  }
 0x957   : > { %v1780_v43 = vpop.xlane.xlu1 %1779 }
 0x958   : > { %v1783_v42 = vpop.xlane.xlu0 %1782 }
 0x959   : > { %v1784_v45 = vadd.f32 %v1783_v42, %v1780_v43  ;;  %v10843_v42 = vld [vmem:[%s13274_s14 + $0x10] sm:$0xff]   ;;  %v10844_v43 = vld [vmem:[%s13274_s14 + $0x8] sm:$0xff]  }
 0x95b   : > { %10958 = vrcp.f32 %v1784_v45  ;;  %v1129_v62 = vpop.xlane.xlu1 %1128  ;;  %v10845_v45 = vld [vmem:[%s13274_s14] sm:$0xff]  }
 0x95c   : > { %v1132_v60 = vpop.xlane.xlu0 %1131 }
 0x95d   : > { %v1133_v0 = vadd.f32 %v1132_v60, %v1129_v62 }
 0x95f   : > { %10960 = vrcp.f32 %v1133_v0 }
 0x968   : > { %v10959_v52 = vpop.eup %10958 }
 0x96c   : > { %v10961_v1 = vpop.eup %10960 }
 0x96d   : > { %v1238_v3 = vmul.f32 %v10961_v1, %v11631_v9 }
 0x972   : > { %v1887_v2 = vpop.permute.xlu1 %1886 }
 0x973   : > { %v1897_v6 = vsel %vm1022_vm3, %v1238_v3, %v1887_v2 }
 0x979   : > { %v1891_v4 = vpop.permute.xlu0 %1890 }
 0x97a   : > { %v1899_v7 = vsel %vm1898_vm9, %v1897_v6, %v1891_v4 }
 0x98f   : > { %v1878_v44 = vpop.f32.mrf.mxu1 }
 0x990   : > { %v1830_v47 = vpop.f32.mrf.mxu0 }
 0x991   : > { %v1879_v50 = vadd.f32 %v1878_v44, %v1830_v47  ;;  %v9948_v51 = vpop.f32.mrf.mxu1 }
 0x992   : > { %v9942_v53 = vpop.f32.mrf.mxu0 }
 0x993   : > { %v1884_v54 = vmul.f32 %v10959_v52, %v1879_v50  ;;  %v1881_v55 = vpop.f32.mrf.mxu1 }
 0x994   : > { %v1833_v56 = vpop.f32.mrf.mxu0 }
 0x995   : > { %1894 = vrot.lane.b32.xlu1 %v1884_v54, %s13286_s27  ;;  %v9949_v57 = vpop.f32.mrf.mxu1  ;;  %s13328_s27 = smov 24  }
 0x996   : > { %v9943_v58 = vpop.f32.mrf.mxu0 }
 0xa07   : > { %v1895_v11 = vpop.permute.xlu1 %1894 }
 0xa08   : > { %v1901_v12 = vsel %vm1900_vm10, %v1899_v7, %v1895_v11 }
 0xa09   : > { %v1902_v13 = vpack.c.bf16 %v1901_v12, %v1901_v12 }
 0xa0b   : > { %9955 = vmatmul.mubr.msk.bf16.vlgmr.msra.gmra.mxu0 %vm691_vm0, %v1902_v13 }
 0xa0c   : > { %9982 = vmatprep.mubr.msk.bf16.mxu0 %vm11268_vm2, %v11267_v49  ;;  %9967 = vmatpush3.bf16.msra.mxu0 %v10838_v39 }
 0xa0d   : > { %9968 = vmatprep.subr.bf16.mxu0 %v11267_v49 }
 0xa10   : > { %9969 = vmatpush3.bf16.msra.mxu0 %v10839_v40 }
 0xa11   : > { %9970 = vmatprep.subr.bf16.mxu0 %v11267_v49 }
 0xa14   : > { %9971 = vmatpush3.bf16.msra.mxu0 %v10840_v61 }
 0xa15   : > { %9972 = vmatprep.subr.bf16.mxu0 %v11267_v49 }
 0xa18   : > { %9973 = vmatpush3.bf16.msra.mxu0 %v10841_v41 }
 0xa19   : > { %9974 = vmatprep.subr.bf16.mxu0 %v11267_v49 }
 0xa1c   : > { %9975 = vmatpush3.bf16.msra.mxu0 %v10842_v63 }
 0xa1d   : > { %9976 = vmatprep.subr.bf16.mxu0 %v11267_v49 }
 0xa20   : > { %9977 = vmatpush3.bf16.msra.mxu0 %v10843_v42 }
 0xa21   : > { %9978 = vmatprep.subr.bf16.mxu0 %v11267_v49 }
 0xa24   : > { %9979 = vmatpush3.bf16.msra.mxu0 %v10844_v43 }
 0xa25   : > { %9980 = vmatprep.subr.bf16.mxu0 %v11267_v49 }
 0xa28   : > { %9981 = vmatpush3.bf16.msra.mxu0 %v10845_v45 }
 0xa29   : > { %10014 = vmatprep.subr.bf16.mxu0 %v11267_v49 }
 0xacb   : > { %v1956_v15 = vpop.f32.mrf.mxu0 }
 0xacc   : > { %v11758_v17 = vadd.f32 %v1956_v15, %v11505_v16 }
 0xacd   : > { %v9956_v9 = vpop.f32.mrf.mxu0 }
 0xace   : > { %v1962_v31 = vsel %vm876_vm1, %v11758_v17, 0.0 }
 0xacf   : > { %1963 = vadd.xlane.f32.xlu1 %v1962_v31  ;;  %v1959_v18 = vpop.f32.mrf.mxu0 }
 0xad1   : > { %v9957_v48 = vpop.f32.mrf.mxu0 }
 0xae0   : > { %2464 = vrot.lane.b32.xlu1 %v11763_v19, %s13301_s22 }
 0xae4   : > { %2516 = vrot.lane.b32.xlu1 %v11763_v19, %s13299_s24 }
 0xb58   : > { %v1964_v20 = vpop.xlane.xlu1 %1963 }
 0xb59   : > { %v1965_v46 = vmul.f32 0.03125, %v1964_v20 }
 0xb5b   : > { %v1966_v16 = vsub.f32 %v11758_v17, %v1965_v46 }
 0xb5c   : > { %v2465_v18 = vpop.permute.xlu1 %2464 }
 0xb5d   : > { %v1967_v22 = vmul.f32 %v1966_v16, %v1966_v16  ;;  %v2470_v20 = vsel %vm1194_vm4, %v2465_v18, 0 }
 0xb5f   : > { %v1968_v23 = vsel %vm876_vm1, %v1967_v22, 0.0 }
 0xb60   : > { %1969 = vadd.xlane.f32.xlu0 %v1968_v23 }
 0xbe9   : > { %v1970_v25 = vpop.xlane.xlu0 %1969 }
 0xbea   : > { %v1971_v27 = vmul.f32 0.03125, %v1970_v25 }
 0xbec   : > { %v1972_v28 = vadd.f32 1e-05, %v1971_v27 }
 0xbee   : > { %10962 = vrsqrt.f32 %v1972_v28 }
 0xbfb   : > { %v10963_v30 = vpop.eup %10962 }
 0xbfc   : > { %v1974_v32 = vmul.f32 %v10963_v30, %v1966_v16 }
 0xbfe   : > { %v1975_v34 = vpack.c.bf16 %v1974_v32, %v1974_v32 }
 0xc00   : > { %9963 = vmatmul.mubr.msk.bf16.vlgmr.msra.gmra.mxu1 %vm691_vm0, %v1975_v34 }
 0xc01   : > { %9987 = vmatpush3.bf16.msra.mxu1 %v10834_v33  ;;  %9990 = vmatprep.mubr.msk.bf16.mxu1 %vm11268_vm2, %v11267_v49 }
 0xc02   : > { %9988 = vmatprep.subr.bf16.mxu1 %v11267_v49 }
 0xc05   : > { %9989 = vmatpush3.bf16.msra.mxu1 %v10835_v35 }
 0xc06   : > { %9994 = vmatprep.subr.bf16.mxu1 %v11267_v49 }
 0xc08   : > { %9991 = vmatmul.mubr.msk.bf16.vlgmr.msra.gmra.mxu1 %vm691_vm0, %v11546_v10 }
 0xc09   : > { %9995 = vmatpush3.bf16.msra.mxu1 %v10836_v36  ;;  %9998 = vmatprep.mubr.msk.bf16.mxu1 %vm11268_vm2, %v11267_v49 }
 0xc0a   : > { %9996 = vmatprep.subr.bf16.mxu1 %v11267_v49 }
 0xc0d   : > { %9997 = vmatpush3.bf16.msra.mxu1 %v10837_v37 }
 0xc0e   : > { %10002 = vmatprep.subr.bf16.mxu1 %v11267_v49 }
 0xc10   : > { %9999 = vmatmul.mubr.msk.bf16.vlgmr.msra.gmra.mxu1 %vm691_vm0, %v11546_v10 }
 0xc11   : > { %10003 = vmatpush3.bf16.xpose.msra.mxu1 %v2307_v38  ;;  %10004 = vmatprep.mubr.msk.bf16.mxu1 %vm11268_vm2, %v11267_v49 }
 0xc12   : > { %10008 = vmatprep.subr.bf16.mxu1 %v11267_v49 }
 0xcc0   : > { %v2036_v44 = vpop.f32.mrf.mxu1 }
 0xcc1   : > { %v2037_v47 = vadd.f32 %v11841_v59, %v2036_v44 }
 0xcc2   : > { %v9964_v50 = vpop.f32.mrf.mxu1 }
 0xcc3   : > { %v2042_v51 = vmul.f32 0.70710677, %v2037_v47 }
 0xcc4   : > { %v2039_v52 = vpop.f32.mrf.mxu1 }
 0xcc5   : > { %v2043_v53 = vand.u32 2147483647, %v2042_v51  ;;  %vm2063_vm11 = vcmp.lt.f32.partialorder %v2042_v51, 0.0 }
 0xcc6   : > { %v9965_v54 = vpop.f32.mrf.mxu1 }
 0xcc7   : > { %v2044_v55 = vmul.f32 0.3275911, %v2043_v53  ;;  %v2057_v3 = vmul.f32 %v2043_v53, %v2043_v53 }
 0xcc8   : > { %v2231_v56 = vpop.f32.mrf.mxu1 }
 0xcc9   : > { %v2045_v57 = vadd.f32 1.0, %v2044_v55  ;;  %v2232_v58 = vadd.f32 %v11570_v29, %v2231_v56  ;;  %v2058_v11 = vsub.f32 0.0, %v2057_v3  ;;  %v2517_v55 = vpop.permute.xlu1 %2516 }
 0xcca   : > { %v9992_v60 = vpop.f32.mrf.mxu1 }
 0xccb   : > { %10964 = vrcp.f32 %v2045_v57  ;;  %v11845_v62 = vpack.c.bf16 %v2232_v58, %v2232_v58  ;;  %v2059_v31 = vmul.f32 1.442695, %v2058_v11 }
 0xccc   : > { %v2234_v0 = vpop.f32.mrf.mxu1 }
 0xccd   : > { %10005 = vmatmul.mubr.msk.bf16.vlgmr.msra.gmra.mxu1 %vm1022_vm3, %v11845_v62  ;;  %10966 = vpow2.f32 %v2059_v31 }
 0xcce   : > { %v9993_v1 = vpop.f32.mrf.mxu1  ;;  %10010 = vmatprep.mubr.msk.bf16.mxu1 %vm11268_vm2, %v11267_v49 }
 0xcd0   : > { %v2294_v2 = vpop.f32.mrf.mxu1 }
 0xcd1   : > { %v2295_v4 = vadd.f32 %v11565_v21, %v2294_v2 }
 0xcd2   : > { %v10000_v6 = vpop.f32.mrf.mxu1 }
 0xcd3   : > { %v11852_v7 = vpack.c.bf16 %v2295_v4, %v2295_v4 }
 0xcd4   : > { %v2297_v29 = vpop.f32.mrf.mxu1 }
 0xcd5   : > { %v2350_v12 = vsel %vm1022_vm3, %v11852_v7, 0 }
 0xcd6   : > { %v10001_v13 = vpop.f32.mrf.mxu1  ;;  %10009 = vmatpush3.bf16.xpose.msra.mxu1 %v2350_v12  ;;  %v2522_v12 = vsel %vm1022_vm3, %v2517_v55, 0 }
 0xcd7   : > { %10020 = vmatprep.subr.bf16.mxu1 %v11267_v49 }
 0xcd8   : > { %v10965_v15 = vpop.eup %10964 }
 0xcd9   : > { %v2048_v9 = vmul.f32 1.0614054, %v10965_v15 }
 0xcda   : > { %v10967_v25 = vpop.eup %10966 }
 0xcdb   : > { %v2049_v48 = vadd.f32 -1.4531521, %v2048_v9 }
 0xcdd   : > { %v2050_v21 = vmul.f32 %v10965_v15, %v2049_v48  ;;  %10011 = vmatmul.mubr.msk.bf16.vlgmr.msra.gmra.mxu1 %vm1022_vm3, %v11845_v62 }
 0xcde   : > { %10021 = vmatpush3.bf16.msra.mxu1 %v2470_v20  ;;  %10022 = vmatprep.mubr.msk.bf16.mxu1 %vm11268_vm2, %v11267_v49 }
 0xcdf   : > { %v2051_v46 = vadd.f32 1.4214138, %v2050_v21  ;;  %10032 = vmatprep.subr.bf16.mxu1 %v11267_v49 }
 0xce1   : > { %v2052_v16 = vmul.f32 %v10965_v15, %v2051_v46 }
 0xce3   : > { %v2053_v22 = vadd.f32 -0.28449672, %v2052_v16 }
 0xce5   : > { %v2054_v23 = vmul.f32 %v10965_v15, %v2053_v22 }
 0xce7   : > { %v2055_v24 = vadd.f32 0.2548296, %v2054_v23 }
 0xce9   : > { %v2056_v26 = vmul.f32 %v10965_v15, %v2055_v24 }
 0xceb   : > { %v2061_v27 = vmul.f32 %v10967_v25, %v2056_v26 }
 0xced   : > { %v2062_v28 = vsub.f32 1.0, %v2061_v27 }
 0xcef   : > { %v2064_v30 = vsub.f32 0.0, %v2062_v28 }
 0xcf1   : > { %v2065_v32 = vsel %vm2063_vm11, %v2064_v30, %v2062_v28 }
 0xcf2   : > { %v2066_v33 = vadd.f32 1.0, %v2065_v32 }
 0xcf4   : > { %v2067_v34 = vmul.f32 0.5, %v2066_v33 }
 0xcf6   : > { %v2068_v35 = vmul.f32 %v2067_v34, %v2037_v47 }
 0xcf8   : > { %v2069_v36 = vpack.c.bf16 %v2068_v35, %v2068_v35 }
 0xcfa   : > { %9983 = vmatmul.mubr.bf16.vlgmr.msra.gmra.mxu0 %v2069_v36 }
 0xcfb   : > { %10016 = vmatprep.mubr.msk.bf16.mxu0 %vm11268_vm2, %v11267_v49 }
 0xd8d   : > { %v2343_v37 = vpop.f32.mrf.mxu1 }
 0xd8e   : > { %v2392_v38 = vsel %vm1112_vm5, %v2343_v37, -inf }
 0xd8f   : > { %2393 = vmax.xlane.f32.xlu0 %v2392_v38  ;;  %v10006_v39 = vpop.f32.mrf.mxu1 }
 0xd91   : > { %v2346_v40 = vpop.f32.mrf.mxu1 }
 0xd93   : > { %v10007_v61 = vpop.f32.mrf.mxu1 }
 0xd9d   : > { %v2386_v41 = vpop.f32.mrf.mxu1 }
 0xd9e   : > { %v2395_v63 = vsel %vm1116_vm6, %v2386_v41, -inf }
 0xd9f   : > { %2396 = vmax.xlane.f32.xlu1 %v2395_v63  ;;  %v10012_v42 = vpop.f32.mrf.mxu1 }
 0xda1   : > { %v2389_v43 = vpop.f32.mrf.mxu1 }
 0xda3   : > { %v10013_v45 = vpop.f32.mrf.mxu1 }
 0xda5   : > { %2416 = vrot.lane.b32.xlu0 %v11852_v7, %s13301_s22 }
 0xda9   : > { %2514 = vrot.lane.b32.xlu0 %v11845_v62, %s13299_s24 }
 0xdb0   : > { %2564 = vrot.lane.b32.xlu1 %v11852_v7, %s13299_s24 }
 0xdba   : > { %v11873_v44 = vpop.f32.mrf.mxu0 }
 0xdbc   : > { %v9984_v47 = vpop.f32.mrf.mxu0 }
 0xdbe   : > { %v2171_v50 = vpop.f32.mrf.mxu0 }
 0xdc0   : > { %v9985_v51 = vpop.f32.mrf.mxu0 }
 0xe18   : > { %v2394_v52 = vpop.xlane.xlu0 %2393 }
 0xe1c   : > { %v2417_v53 = vpop.permute.xlu0 %2416 }
 0xe1d   : > { %v2422_v54 = vsel %vm1144_vm7, %v2417_v53, 0 }
 0xe1e   : > { %10015 = vmatpush3.bf16.msra.mxu0 %v2422_v54 }
 0xe1f   : > { %10026 = vmatprep.subr.bf16.mxu0 %v11267_v49 }
 0xe20   : > { %v2515_v13 = vpop.permute.xlu0 %2514 }
 0xe28   : > { %v2397_v56 = vpop.xlane.xlu1 %2396 }
 0xe29   : > { %v2398_v57 = vmax.f32 %v2394_v52, %v2397_v56 }
 0xe2b   : > { %v2399_v58 = vsub.f32 %v2343_v37, %v2398_v57  ;;  %v2402_v60 = vsub.f32 %v2386_v41, %v2398_v57 }
 0xe2c   : > { %v2565_v3 = vpop.permute.xlu1 %2564 }
 0xe2d   : > { %v2400_v0 = vmul.f32 1.442695, %v2399_v58  ;;  %v2403_v1 = vmul.f32 1.442695, %v2402_v60  ;;  %v2567_v11 = vsel %vm1022_vm3, %v2565_v3, 0 }
 0xe2f   : > { %10968 = vpow2.f32 %v2400_v0 }
 0xe30   : > { %10970 = vpow2.f32 %v2403_v1 }
 0xe3c   : > { %v11877_v2 = vpop.eup %10968 }
 0xe3d   : > { %v11879_v4 = vpop.eup %10970  ;;  %v2413_v6 = vpack.c.bf16 %v11877_v2, %v11877_v2 }
 0xe3e   : > { %v2414_v29 = vpack.c.bf16 %v11879_v4, %v11879_v4 }
 0xe3f   : > { %10023 = vmatmul.mubr.msk.bf16.vlgmr.msra.gmra.mxu1 %vm1022_vm3, %v2413_v6 }
 0xe40   : > { %10017 = vmatmul.mubr.msk.bf16.vlgmr.msra.gmra.mxu0 %vm1140_vm8, %v2414_v29  ;;  %10033 = vmatpush3.bf16.xpose.msra.mxu1 %v2567_v11 }
 0xe41   : > { %10027 = vmatpush3.bf16.xpose.msra.mxu0 %v2522_v12  ;;  %10028 = vmatprep.mubr.msk.bf16.mxu0 %vm11268_vm2, %v11267_v49 }
 0xe42   : > { %10034 = vmatprep.mubr.msk.bf16.mxu1 %vm11268_vm2, %v11267_v49  ;;  %10038 = vmatprep.subr.bf16.mxu0 %v11267_v49 }
 0xe43   : > { %10044 = vmatprep.subr.bf16.mxu1 %v11267_v49 }
 0xe47   : > { %10035 = vmatmul.mubr.msk.bf16.vlgmr.msra.gmra.mxu1 %vm1022_vm3, %v2515_v13 }
 0xe48   : > { %10029 = vmatmul.mubr.msk.bf16.vlgmr.msra.gmra.mxu0 %vm1022_vm3, %v2515_v13  ;;  %10046 = vmatprep.mubr.msk.bf16.mxu1 %vm11268_vm2, %v11267_v49 }
 0xe49   : > { %10040 = vmatprep.mubr.msk.bf16.mxu0 %vm11268_vm2, %v11267_v49 }
 0xeff   : > { %v2506_v15 = vpop.f32.mrf.mxu1 }
 0xf00   : > { %v2458_v9 = vpop.f32.mrf.mxu0 }
 0xf01   : > { %v11901_v31 = vadd.f32 %v2506_v15, %v2458_v9  ;;  %v10024_v18 = vpop.f32.mrf.mxu1 }
 0xf02   : > { %v10018_v48 = vpop.f32.mrf.mxu0 }
 0xf03   : > { %v2509_v20 = vpop.f32.mrf.mxu1 }
 0xf04   : > { %v2461_v21 = vpop.f32.mrf.mxu0 }
 0xf05   : > { %v10025_v46 = vpop.f32.mrf.mxu1 }
 0xf06   : > { %v10019_v16 = vpop.f32.mrf.mxu0 }
 0xf07   : > { %v2603_v22 = vpop.f32.mrf.mxu1 }
 0xf08   : > { %v2558_v23 = vpop.f32.mrf.mxu0  ;;  %v2612_v24 = vsel %vm1116_vm6, %v2603_v22, -inf }
 0xf09   : > { %2613 = vmax.xlane.f32.xlu0 %v2612_v24  ;;  %v10036_v26 = vpop.f32.mrf.mxu1  ;;  %v2609_v25 = vsel %vm1112_vm5, %v2558_v23, -inf }
 0xf0a   : > { %2610 = vmax.xlane.f32.xlu1 %v2609_v25  ;;  %v10030_v27 = vpop.f32.mrf.mxu0 }
 0xf0b   : > { %v2606_v28 = vpop.f32.mrf.mxu1 }
 0xf0c   : > { %v2561_v30 = vpop.f32.mrf.mxu0 }
 0xf0d   : > { %v10037_v32 = vpop.f32.mrf.mxu1 }
 0xf0e   : > { %v10031_v33 = vpop.f32.mrf.mxu0 }
 0xf1b   : > { %2680 = vrot.lane.b32.xlu1 %v11763_v19, %s13296_s3 }
 0xf1f   : > { %2731 = vrot.lane.b32.xlu1 %v11763_v19, %s13294_s23  ;;  %2632 = vrot.lane.b32.xlu0 %v11852_v7, %s13296_s3  ;;  %s13329_s3 = smov 96  }
 0xf23   : > { %2729 = vrot.lane.b32.xlu1 %v11845_v62, %s13294_s23  ;;  %2779 = vrot.lane.b32.xlu0 %v11852_v7, %s13294_s23  ;;  %s13330_s23 = smov 120  }
 0xf27   : > { %2895 = vrot.lane.b32.xlu1 %v11763_v19, %s13323_s28 }
 0xf92   : > { %v2614_v34 = vpop.xlane.xlu0 %2613 }
 0xf93   : > { %v2611_v35 = vpop.xlane.xlu1 %2610 }
 0xf94   : > { %v2615_v36 = vmax.f32 %v2611_v35, %v2614_v34 }
 0xf96   : > { %v2616_v37 = vsub.f32 %v2558_v23, %v2615_v36  ;;  %v2619_v38 = vsub.f32 %v2603_v22, %v2615_v36  ;;  %v2633_v39 = vpop.permute.xlu0 %2632 }
 0xf97   : > { %v2638_v40 = vsel %vm1144_vm7, %v2633_v39, 0  ;;  %v2681_v61 = vpop.permute.xlu1 %2680 }
 0xf98   : > { %v2617_v41 = vmul.f32 1.442695, %v2616_v37  ;;  %v2620_v63 = vmul.f32 1.442695, %v2619_v38  ;;  %v2686_v42 = vsel %vm1194_vm4, %v2681_v61, 0  ;;  %10039 = vmatpush3.bf16.msra.mxu0 %v2638_v40 }
 0xf99   : > { %10045 = vmatpush3.bf16.msra.mxu1 %v2686_v42  ;;  %10050 = vmatprep.subr.bf16.mxu0 %v11267_v49 }
 0xf9a   : > { %10972 = vpow2.f32 %v2617_v41  ;;  %10056 = vmatprep.subr.bf16.mxu1 %v11267_v49  ;;  %v2780_v47 = vpop.permute.xlu0 %2779 }
 0xf9b   : > { %10974 = vpow2.f32 %v2620_v63  ;;  %v2732_v43 = vpop.permute.xlu1 %2731  ;;  %v2782_v54 = vsel %vm1022_vm3, %v2780_v47, 0 }
 0xf9c   : > { %v2737_v55 = vsel %vm1022_vm3, %v2732_v43, 0 }
 0xf9f   : > { %v2730_v52 = vpop.permute.xlu1 %2729 }
 0xfa3   : > { %v2896_v56 = vpop.permute.xlu1 %2895 }
 0xfa4   : > { %v2901_v57 = vsel %vm1194_vm4, %v2896_v56, 0 }
 0xfa7   : > { %v11921_v45 = vpop.eup %10972 }
 0xfa8   : > { %v11923_v50 = vpop.eup %10974  ;;  %v2630_v51 = vpack.c.bf16 %v11921_v45, %v11921_v45 }
 0xfa9   : > { %v2631_v53 = vpack.c.bf16 %v11923_v50, %v11923_v50 }
 0xfaa   : > { %10047 = vmatmul.mubr.msk.bf16.vlgmr.msra.gmra.mxu1 %vm1022_vm3, %v2630_v51 }
 0xfab   : > { %10041 = vmatmul.mubr.msk.bf16.vlgmr.msra.gmra.mxu0 %vm1140_vm8, %v2631_v53  ;;  %10057 = vmatpush3.bf16.xpose.msra.mxu1 %v2782_v54 }
 0xfac   : > { %10051 = vmatpush3.bf16.xpose.msra.mxu0 %v2737_v55  ;;  %10052 = vmatprep.mubr.msk.bf16.mxu0 %vm11268_vm2, %v11267_v49 }
 0xfad   : > { %10058 = vmatprep.mubr.msk.bf16.mxu1 %vm11268_vm2, %v11267_v49  ;;  %10068 = vmatprep.subr.bf16.mxu1 %v11267_v49 }
 0xfae   : > { %10062 = vmatprep.subr.bf16.mxu0 %v11267_v49 }
 0xfb2   : > { %10059 = vmatmul.mubr.msk.bf16.vlgmr.msra.gmra.mxu1 %vm1022_vm3, %v2730_v52 }
 0xfb3   : > { %10053 = vmatmul.mubr.msk.bf16.vlgmr.msra.gmra.mxu0 %vm1022_vm3, %v2730_v52  ;;  %10069 = vmatpush3.bf16.msra.mxu1 %v2901_v57 }
 0xfb4   : > { %10064 = vmatprep.mubr.msk.bf16.mxu0 %vm11268_vm2, %v11267_v49  ;;  %10070 = vmatprep.mubr.msk.bf16.mxu1 %vm11268_vm2, %v11267_v49 }
 0xfb5   : > { %10080 = vmatprep.subr.bf16.mxu1 %v11267_v49 }
0x106a   : > { %v2722_v58 = vpop.f32.mrf.mxu1 }
0x106b   : > { %v2674_v60 = vpop.f32.mrf.mxu0 }
0x106c   : > { %v11947_v0 = vadd.f32 %v2722_v58, %v2674_v60  ;;  %v10048_v1 = vpop.f32.mrf.mxu1 }
0x106d   : > { %v10042_v3 = vpop.f32.mrf.mxu0 }
0x106e   : > { %v2725_v6 = vpop.f32.mrf.mxu1 }
0x106f   : > { %v2677_v29 = vpop.f32.mrf.mxu0 }
0x1070   : > { %v10049_v11 = vpop.f32.mrf.mxu1 }
0x1071   : > { %v10043_v12 = vpop.f32.mrf.mxu0 }
0x1072   : > { %v2818_v13 = vpop.f32.mrf.mxu1  ;;  %v2625_v12 = vsel %vm1116_vm6, %v11923_v50, 0.0 }
0x1073   : > { %v2773_v15 = vpop.f32.mrf.mxu0  ;;  %v2827_v9 = vsel %vm1116_vm6, %v2818_v13, -inf }
0x1074   : > { %2828 = vmax.xlane.f32.xlu1 %v2827_v9  ;;  %v10060_v18 = vpop.f32.mrf.mxu1  ;;  %v2824_v48 = vsel %vm1112_vm5, %v2773_v15, -inf }
0x1075   : > { %2825 = vmax.xlane.f32.xlu0 %v2824_v48  ;;  %v10054_v20 = vpop.f32.mrf.mxu0 }
0x1076   : > { %v2821_v21 = vpop.f32.mrf.mxu1 }
0x1077   : > { %v2776_v46 = vpop.f32.mrf.mxu0 }
0x1078   : > { %v10061_v16 = vpop.f32.mrf.mxu1 }
0x1079   : > { %v10055_v22 = vpop.f32.mrf.mxu0 }
0x1085   : > { %2994 = vrot.lane.b32.xlu1 %v11852_v7, %s13324_s30 }
0x108b   : > { %2847 = vrot.lane.b32.xlu0 %v11852_v7, %s13323_s28 }
0x108f   : > { %2946 = vrot.lane.b32.xlu0 %v11763_v19, %s13324_s30 }
0x1093   : > { %2944 = vrot.lane.b32.xlu0 %v11845_v62, %s13324_s30 }
0x10fd   : > { %v2829_v23 = vpop.xlane.xlu1 %2828 }
0x10fe   : > { %v2826_v24 = vpop.xlane.xlu0 %2825 }
0x10ff   : > { %v2830_v26 = vmax.f32 %v2826_v24, %v2829_v23 }
0x1101   : > { %v2831_v25 = vsub.f32 %v2773_v15, %v2830_v26  ;;  %v2834_v27 = vsub.f32 %v2818_v13, %v2830_v26  ;;  %v2995_v35 = vpop.permute.xlu1 %2994  ;;  %v2622_v13 = vsel %vm1112_vm5, %v11921_v45, 0.0 }
0x1102   : > { %v2848_v28 = vpop.permute.xlu0 %2847  ;;  %v2997_v39 = vsel %vm1022_vm3, %v2995_v35, 0 }
0x1103   : > { %v2832_v30 = vmul.f32 1.442695, %v2831_v25  ;;  %v2835_v32 = vmul.f32 1.442695, %v2834_v27  ;;  %v2853_v33 = vsel %vm1144_vm7, %v2848_v28, 0 }
0x1104   : > { %10063 = vmatpush3.bf16.msra.mxu0 %v2853_v33 }
0x1105   : > { %10976 = vpow2.f32 %v2832_v30  ;;  %10074 = vmatprep.subr.bf16.mxu0 %v11267_v49  ;;  %v2405_v30 = vsel %vm1112_vm5, %v11877_v2, 0.0 }
0x1106   : > { %10978 = vpow2.f32 %v2835_v32  ;;  %v2947_v37 = vpop.permute.xlu0 %2946  ;;  %v2408_v32 = vsel %vm1116_vm6, %v11879_v4, 0.0  ;;  %v10846_v4 = vld [vmem:[%s13271_s11 + $0x8] sm:$0xff]  }
0x1107   : > { %v2952_v40 = vsel %vm1022_vm3, %v2947_v37, 0 }
0x110a   : > { %v2945_v61 = vpop.permute.xlu0 %2944 }
0x1112   : > { %v10977_v34 = vpop.eup %10976 }
0x1113   : > { %v10979_v36 = vpop.eup %10978  ;;  %v2845_v62 = vpack.c.bf16 %v10977_v34, %v10977_v34  ;;  %v2837_v15 = vsel %vm1112_vm5, %v10977_v34, 0.0 }
0x1114   : > { %v2846_v38 = vpack.c.bf16 %v10979_v36, %v10979_v36  ;;  %v2840_v9 = vsel %vm1116_vm6, %v10979_v36, 0.0 }
0x1115   : > { %10071 = vmatmul.mubr.msk.bf16.vlgmr.msra.gmra.mxu1 %vm1022_vm3, %v2845_v62 }
0x1116   : > { %10065 = vmatmul.mubr.msk.bf16.vlgmr.msra.gmra.mxu0 %vm1140_vm8, %v2846_v38  ;;  %10081 = vmatpush3.bf16.xpose.msra.mxu1 %v2997_v39 }
0x1117   : > { %10075 = vmatpush3.bf16.xpose.msra.mxu0 %v2952_v40  ;;  %10076 = vmatprep.mubr.msk.bf16.mxu0 %vm11268_vm2, %v11267_v49 }
0x1118   : > { %10082 = vmatprep.mubr.msk.bf16.mxu1 %vm11268_vm2, %v11267_v49  ;;  %10086 = vmatprep.subr.bf16.mxu0 %v11267_v49 }
0x1119   : > { %10092 = vmatprep.subr.bf16.mxu1 %v11267_v49 }
0x111d   : > { %10083 = vmatmul.mubr.msk.bf16.vlgmr.msra.gmra.mxu1 %vm1022_vm3, %v2945_v61 }
0x111e   : > { %10077 = vmatmul.mubr.msk.bf16.vlgmr.msra.gmra.mxu0 %vm1022_vm3, %v2945_v61  ;;  %10094 = vmatprep.mubr.msk.bf16.mxu1 %vm11268_vm2, %v11267_v49 }
0x111f   : > { %10088 = vmatprep.mubr.msk.bf16.mxu0 %vm11268_vm2, %v11267_v49 }
0x11d5   : > { %v2937_v41 = vpop.f32.mrf.mxu1 }
0x11d6   : > { %v2889_v63 = vpop.f32.mrf.mxu0 }
0x11d7   : > { %v11977_v42 = vadd.f32 %v2937_v41, %v2889_v63  ;;  %v10072_v43 = vpop.f32.mrf.mxu1 }
0x11d8   : > { %v10066_v47 = vpop.f32.mrf.mxu0 }
0x11d9   : > { %v2940_v51 = vpop.f32.mrf.mxu1 }
0x11da   : > { %v2892_v52 = vpop.f32.mrf.mxu0 }
0x11db   : > { %v10073_v53 = vpop.f32.mrf.mxu1 }
0x11dc   : > { %v10067_v54 = vpop.f32.mrf.mxu0 }
0x11dd   : > { %v3033_v55 = vpop.f32.mrf.mxu1 }
0x11de   : > { %v2988_v56 = vpop.f32.mrf.mxu0  ;;  %v3042_v57 = vsel %vm1116_vm6, %v3033_v55, -inf }
0x11df   : > { %3043 = vmax.xlane.f32.xlu0 %v3042_v57  ;;  %v10084_v58 = vpop.f32.mrf.mxu1  ;;  %v3039_v60 = vsel %vm1112_vm5, %v2988_v56, -inf }
0x11e0   : > { %3040 = vmax.xlane.f32.xlu1 %v3039_v60  ;;  %v10078_v1 = vpop.f32.mrf.mxu0 }
0x11e1   : > { %v3036_v3 = vpop.f32.mrf.mxu1 }
0x11e2   : > { %v2991_v6 = vpop.f32.mrf.mxu0 }
0x11e3   : > { %v10085_v29 = vpop.f32.mrf.mxu1 }
0x11e4   : > { %v10079_v11 = vpop.f32.mrf.mxu0 }
0x11f1   : > { %3110 = vrot.lane.b32.xlu1 %v11763_v19, %s13325_s1 }
0x11f5   : > { %3062 = vrot.lane.b32.xlu0 %v11852_v7, %s13325_s1 }
0x1214   : > { %2626 = vadd.xlane.f32.xlu0 %v2625_v12 }
0x1215   : > { %2623 = vadd.xlane.f32.xlu1 %v2622_v13 }
0x1218   : > { %2838 = vadd.xlane.f32.xlu0 %v2837_v15 }
0x121c   : > { %2841 = vadd.xlane.f32.xlu0 %v2840_v9 }
0x1268   : > { %v3044_v18 = vpop.xlane.xlu0 %3043 }
0x1269   : > { %v3041_v48 = vpop.xlane.xlu1 %3040 }
0x126a   : > { %v3045_v19 = vmax.f32 %v3041_v48, %v3044_v18 }
0x126c   : > { %v3046_v20 = vsub.f32 %v2988_v56, %v3045_v19  ;;  %v3049_v21 = vsub.f32 %v3033_v55, %v3045_v19  ;;  %v3063_v7 = vpop.permute.xlu0 %3062 }
0x126d   : > { %v3068_v46 = vsel %vm1144_vm7, %v3063_v7, 0  ;;  %v3111_v50 = vpop.permute.xlu1 %3110 }
0x126e   : > { %v3047_v16 = vmul.f32 1.442695, %v3046_v20  ;;  %v3050_v22 = vmul.f32 1.442695, %v3049_v21  ;;  %v3116_v45 = vsel %vm1194_vm4, %v3111_v50, 0  ;;  %10087 = vmatpush3.bf16.msra.mxu0 %v3068_v46 }
0x126f   : > { %10093 = vmatpush3.bf16.msra.mxu1 %v3116_v45  ;;  %10098 = vmatprep.subr.bf16.mxu0 %v11267_v49  ;;  %v12030_v20 = vld [vmem:[%s13321_s2] sm:$0xf] }
0x1270   : > { %10980 = vpow2.f32 %v3047_v16  ;;  %10106 = vmatprep.subr.bf16.mxu1 %v11267_v49  ;;  %v12039_v16 = vpack.c.bf16 %v11563_v14, %v11563_v14  ;;  %v10849_v14 = vld [vmem:[%s13272_s12] sm:$0xff]  }
0x1271   : > { %10982 = vpow2.f32 %v3050_v22 }
0x127d   : > { %v10981_v23 = vpop.eup %10980 }
0x127e   : > { %v10983_v24 = vpop.eup %10982  ;;  %v3052_v26 = vsel %vm1112_vm5, %v10981_v23, 0.0  ;;  %v3060_v25 = vpack.c.bf16 %v10981_v23, %v10981_v23 }
0x127f   : > { %v3055_v27 = vsel %vm1116_vm6, %v10983_v24, 0.0  ;;  %3053 = vadd.xlane.f32.xlu1 %v3052_v26  ;;  %v3061_v28 = vpack.c.bf16 %v10983_v24, %v10983_v24 }
0x1280   : > { %3056 = vadd.xlane.f32.xlu0 %v3055_v27  ;;  %10095 = vmatmul.mubr.msk.bf16.vlgmr.msra.gmra.mxu1 %vm1022_vm3, %v3060_v25  ;;  %v10848_v25 = vld [vmem:[%s13272_s12 + $0x8] sm:$0xff]  }
0x1281   : > { %10089 = vmatmul.mubr.msk.bf16.vlgmr.msra.gmra.mxu0 %vm1140_vm8, %v3061_v28  ;;  %10110 = vmatprep.mubr.msk.bf16.mxu1 %vm11268_vm2, %v11267_v49 }
0x1282   : > { %10102 = vmatprep.mubr.msk.bf16.mxu0 %vm11268_vm2, %v11267_v49  ;;  %10099 = vmatpush3.bf16.msra.mxu0 %v10846_v4  ;;  %v10858_v4 = vld [vmem:[%s13274_s14 + $0x18] sm:$0xff]  }
0x1283   : > { %2406 = vadd.xlane.f32.xlu1 %v2405_v30  ;;  %10100 = vmatprep.subr.bf16.mxu0 %v11267_v49 }
0x1284   : > { %2409 = vadd.xlane.f32.xlu0 %v2408_v32  ;;  %10107 = vmatpush3.bf16.msra.mxu1 %v10848_v25 }
0x1285   : > { %10108 = vmatprep.subr.bf16.mxu1 %v11267_v49 }
0x1288   : > { %10109 = vmatpush3.bf16.msra.mxu1 %v10849_v14 }
0x1289   : > { %10134 = vmatprep.subr.bf16.mxu1 %v11267_v49 }
0x129d   : > { %v2627_v33 = vpop.xlane.xlu0 %2626 }
0x129e   : > { %v2624_v34 = vpop.xlane.xlu1 %2623 }
0x129f   : > { %v2628_v35 = vadd.f32 %v2627_v33, %v2624_v34  ;;  %v10850_v34 = vld [vmem:[%s13265_s5 + $0x8] sm:$0xff]  }
0x12a1   : > { %10984 = vrcp.f32 %v2628_v35  ;;  %v2839_v36 = vpop.xlane.xlu0 %2838 }
0x12a5   : > { %v2842_v37 = vpop.xlane.xlu0 %2841 }
0x12a6   : > { %v2843_v62 = vadd.f32 %v2842_v37, %v2839_v36  ;;  %v10851_v36 = vld [vmem:[%s13265_s5] sm:$0xff]   ;;  %v10852_v37 = vld [vmem:[%s13269_s9 + $0x8] sm:$0xff]  }
0x12a8   : > { %10986 = vrcp.f32 %v2843_v62  ;;  %v10853_v62 = vld [vmem:[%s13269_s9] sm:$0xff]  }
0x12ae   : > { %v10985_v38 = vpop.eup %10984 }
0x12af   : > { %v2728_v39 = vmul.f32 %v10985_v38, %v11947_v0  ;;  %v10847_v0 = vld [vmem:[%s13271_s11] sm:$0xff]   ;;  %v3578_v38 = vsel %vm1022_vm3, %v12039_v16, 0 }
0x12b0   : > { %10101 = vmatpush3.bf16.msra.mxu0 %v10847_v0 }
0x12b1   : > { %3160 = vrot.lane.b32.xlu1 %v2728_v39, %s13326_s29  ;;  %10114 = vmatprep.subr.bf16.mxu0 %v11267_v49  ;;  %v10854_v39 = vld [vmem:[%s13274_s14 + $0x38] sm:$0xff]  }
0x12b5   : > { %v10987_v2 = vpop.eup %10986 }
0x12b6   : > { %v2943_v40 = vmul.f32 %v10987_v2, %v11977_v42  ;;  %v10856_v2 = vld [vmem:[%s13274_s14 + $0x28] sm:$0xff]  }
0x12b8   : > { %3164 = vrot.lane.b32.xlu0 %v2943_v40, %s13327_s25  ;;  %v10857_v40 = vld [vmem:[%s13274_s14 + $0x20] sm:$0xff]  }
0x1308   : > { %v3054_v41 = vpop.xlane.xlu1 %3053 }
0x1309   : > { %v3057_v61 = vpop.xlane.xlu0 %3056 }
0x130a   : > { %v3058_v63 = vadd.f32 %v3057_v61, %v3054_v41  ;;  %v10859_v61 = vld [vmem:[%s13274_s14 + $0x10] sm:$0xff]   ;;  %v10860_v41 = vld [vmem:[%s13274_s14 + $0x8] sm:$0xff]  }
0x130c   : > { %10988 = vrcp.f32 %v3058_v63  ;;  %v2407_v1 = vpop.xlane.xlu1 %2406  ;;  %v10861_v63 = vld [vmem:[%s13274_s14] sm:$0xff]  }
0x130d   : > { %v2410_v60 = vpop.xlane.xlu0 %2409 }
0x130e   : > { %v2411_v3 = vadd.f32 %v2410_v60, %v2407_v1 }
0x1310   : > { %10990 = vrcp.f32 %v2411_v3 }
0x1319   : > { %v10989_v52 = vpop.eup %10988 }
0x131d   : > { %v10991_v6 = vpop.eup %10990 }
0x131e   : > { %v2512_v11 = vmul.f32 %v10991_v6, %v11901_v31 }
0x1323   : > { %v3161_v29 = vpop.permute.xlu1 %3160 }
0x1324   : > { %v3171_v13 = vsel %vm1022_vm3, %v2512_v11, %v3161_v29 }
0x132a   : > { %v3165_v12 = vpop.permute.xlu0 %3164 }
0x132b   : > { %v3172_v15 = vsel %vm1898_vm9, %v3171_v13, %v3165_v12 }
0x1340   : > { %v3152_v42 = vpop.f32.mrf.mxu1 }
0x1341   : > { %v3104_v43 = vpop.f32.mrf.mxu0 }
0x1342   : > { %v3153_v47 = vadd.f32 %v3152_v42, %v3104_v43  ;;  %v10096_v51 = vpop.f32.mrf.mxu1 }
0x1343   : > { %v10090_v53 = vpop.f32.mrf.mxu0 }
0x1344   : > { %v3158_v54 = vmul.f32 %v10989_v52, %v3153_v47  ;;  %v3155_v55 = vpop.f32.mrf.mxu1 }
0x1345   : > { %v3107_v56 = vpop.f32.mrf.mxu0 }
0x1346   : > { %3168 = vrot.lane.b32.xlu1 %v3158_v54, %s13328_s27  ;;  %v10097_v57 = vpop.f32.mrf.mxu1  ;;  %v9201_v54 = vld [vmem:[#allocation2] ss:$0 sm:$0xff] }
0x1347   : > { %v10091_v58 = vpop.f32.mrf.mxu0 }
0x13b8   : > { %v3169_v9 = vpop.permute.xlu1 %3168 }
0x13b9   : > { %v3173_v18 = vsel %vm1900_vm10, %v3172_v15, %v3169_v9 }
0x13ba   : > { %v3174_v48 = vpack.c.bf16 %v3173_v18, %v3173_v18 }
0x13bc   : > { %10103 = vmatmul.mubr.msk.bf16.vlgmr.msra.gmra.mxu0 %vm691_vm0, %v3174_v48 }
0x13bd   : > { %10130 = vmatprep.mubr.msk.bf16.mxu0 %vm11268_vm2, %v11267_v49  ;;  %10115 = vmatpush3.bf16.msra.mxu0 %v10854_v39 }
0x13be   : > { %10116 = vmatprep.subr.bf16.mxu0 %v11267_v49 }
0x147c   : > { %v3228_v19 = vpop.f32.mrf.mxu0 }
0x147d   : > { %v12033_v31 = vadd.f32 %v12030_v20, %v3228_v19 }
0x147e   : > { %v10104_v21 = vpop.f32.mrf.mxu0 }
0x147f   : > { %v3234_v7 = vsel %vm876_vm1, %v12033_v31, 0.0 }
0x1480   : > { %3235 = vadd.xlane.f32.xlu1 %v3234_v7  ;;  %v3231_v46 = vpop.f32.mrf.mxu0 }
0x1482   : > { %v10105_v50 = vpop.f32.mrf.mxu0 }
0x1491   : > { %3736 = vrot.lane.b32.xlu1 %v12039_v16, %s13301_s22  ;;  %s13331_s22 = smov 88  }
0x1495   : > { %3788 = vrot.lane.b32.xlu1 %v12039_v16, %s13299_s24  ;;  %s13332_s24 = smov 112  }
0x1509   : > { %v3236_v22 = vpop.xlane.xlu1 %3235 }
0x150a   : > { %v3237_v45 = vmul.f32 0.03125, %v3236_v22 }
0x150c   : > { %v3238_v23 = vsub.f32 %v12033_v31, %v3237_v45 }
0x150d   : > { %v3737_v50 = vpop.permute.xlu1 %3736 }
0x150e   : > { %v3239_v24 = vmul.f32 %v3238_v23, %v3238_v23  ;;  %v3742_v45 = vsel %vm1194_vm4, %v3737_v50, 0 }
0x1510   : > { %v3240_v26 = vsel %vm876_vm1, %v3239_v24, 0.0 }
0x1511   : > { %3241 = vadd.xlane.f32.xlu0 %v3240_v26 }
0x159a   : > { %v3242_v27 = vpop.xlane.xlu0 %3241 }
0x159b   : > { %v3243_v28 = vmul.f32 0.03125, %v3242_v27 }
0x159d   : > { %v3244_v30 = vadd.f32 1e-05, %v3243_v28 }
0x159f   : > { %10992 = vrsqrt.f32 %v3244_v30 }
0x15ac   : > { %v10993_v32 = vpop.eup %10992 }
0x15ad   : > { %v3246_v33 = vmul.f32 %v10993_v32, %v3238_v23 }
0x15af   : > { %v3247_v35 = vpack.c.bf16 %v3246_v33, %v3246_v33 }
0x15b1   : > { %10111 = vmatmul.mubr.msk.bf16.vlgmr.msra.gmra.mxu1 %vm691_vm0, %v3247_v35 }
0x15b2   : > { %10135 = vmatpush3.bf16.msra.mxu1 %v10850_v34  ;;  %10138 = vmatprep.mubr.msk.bf16.mxu1 %vm11268_vm2, %v11267_v49 }
0x15b3   : > { %10136 = vmatprep.subr.bf16.mxu1 %v11267_v49 }
0x15b6   : > { %10137 = vmatpush3.bf16.msra.mxu1 %v10851_v36 }
0x15b7   : > { %10142 = vmatprep.subr.bf16.mxu1 %v11267_v49 }
0x15b9   : > { %10139 = vmatmul.mubr.msk.bf16.vlgmr.msra.gmra.mxu1 %vm691_vm0, %v11546_v10 }
0x15ba   : > { %10143 = vmatpush3.bf16.msra.mxu1 %v10852_v37  ;;  %10146 = vmatprep.mubr.msk.bf16.mxu1 %vm11268_vm2, %v11267_v49 }
0x15bb   : > { %10144 = vmatprep.subr.bf16.mxu1 %v11267_v49 }
0x15be   : > { %10145 = vmatpush3.bf16.msra.mxu1 %v10853_v62 }
0x15bf   : > { %10150 = vmatprep.subr.bf16.mxu1 %v11267_v49 }
0x15c1   : > { %10147 = vmatmul.mubr.msk.bf16.vlgmr.msra.gmra.mxu1 %vm691_vm0, %v11546_v10  ;;  %v10855_v10 = vld [vmem:[%s13274_s14 + $0x30] sm:$0xff]  }
0x15c2   : > { %10151 = vmatpush3.bf16.xpose.msra.mxu1 %v3578_v38  ;;  %10152 = vmatprep.mubr.msk.bf16.mxu1 %vm11268_vm2, %v11267_v49 }
0x15c3   : > { %10156 = vmatprep.subr.bf16.mxu1 %v11267_v49  ;;  %10117 = vmatpush3.bf16.msra.mxu0 %v10855_v10 }
0x15c4   : > { %10118 = vmatprep.subr.bf16.mxu0 %v11267_v49 }
0x15c7   : > { %10119 = vmatpush3.bf16.msra.mxu0 %v10856_v2 }
0x15c8   : > { %10120 = vmatprep.subr.bf16.mxu0 %v11267_v49 }
0x15cb   : > { %10121 = vmatpush3.bf16.msra.mxu0 %v10857_v40 }
0x15cc   : > { %10122 = vmatprep.subr.bf16.mxu0 %v11267_v49 }
0x15cf   : > { %10123 = vmatpush3.bf16.msra.mxu0 %v10858_v4 }
0x15d0   : > { %10124 = vmatprep.subr.bf16.mxu0 %v11267_v49 }
0x15d3   : > { %10125 = vmatpush3.bf16.msra.mxu0 %v10859_v61 }
0x15d4   : > { %10126 = vmatprep.subr.bf16.mxu0 %v11267_v49 }
0x15d7   : > { %10127 = vmatpush3.bf16.msra.mxu0 %v10860_v41 }
0x15d8   : > { %10128 = vmatprep.subr.bf16.mxu0 %v11267_v49 }
0x15db   : > { %10129 = vmatpush3.bf16.msra.mxu0 %v10861_v63 }
0x15dc   : > { %10162 = vmatprep.subr.bf16.mxu0 %v11267_v49 }
0x1671   : > { %v3308_v0 = vpop.f32.mrf.mxu1 }
0x1672   : > { %v3309_v42 = vadd.f32 %v11841_v59, %v3308_v0  ;;  %v9205_v59 = vld [vmem:[#allocation6] ss:$0 sm:$0xff] }
0x1673   : > { %v10112_v43 = vpop.f32.mrf.mxu1 }
0x1674   : > { %v3314_v47 = vmul.f32 0.70710677, %v3309_v42 }
0x1675   : > { %v3311_v51 = vpop.f32.mrf.mxu1 }
0x1676   : > { %v3315_v52 = vand.u32 2147483647, %v3314_v47  ;;  %vm3335_vm12 = vcmp.lt.f32.partialorder %v3314_v47, 0.0 }
0x1677   : > { %v10113_v53 = vpop.f32.mrf.mxu1 }
0x1678   : > { %v3316_v55 = vmul.f32 0.3275911, %v3315_v52  ;;  %v3329_v11 = vmul.f32 %v3315_v52, %v3315_v52 }
0x1679   : > { %v3503_v56 = vpop.f32.mrf.mxu1 }
0x167a   : > { %v3317_v57 = vadd.f32 1.0, %v3316_v55  ;;  %v3504_v58 = vadd.f32 %v9201_v54, %v3503_v56  ;;  %v3330_v18 = vsub.f32 0.0, %v3329_v11  ;;  %v3789_v56 = vpop.permute.xlu1 %3788 }
0x167b   : > { %v10140_v60 = vpop.f32.mrf.mxu1 }
0x167c   : > { %10994 = vrcp.f32 %v3317_v57  ;;  %v12118_v1 = vpack.c.bf16 %v3504_v58, %v3504_v58  ;;  %v3331_v46 = vmul.f32 1.442695, %v3330_v18 }
0x167d   : > { %v3506_v3 = vpop.f32.mrf.mxu1 }
0x167e   : > { %10153 = vmatmul.mubr.msk.bf16.vlgmr.msra.gmra.mxu1 %vm1022_vm3, %v12118_v1  ;;  %10996 = vpow2.f32 %v3331_v46 }
0x167f   : > { %v10141_v6 = vpop.f32.mrf.mxu1  ;;  %10158 = vmatprep.mubr.msk.bf16.mxu1 %vm11268_vm2, %v11267_v49 }
0x1681   : > { %v3566_v29 = vpop.f32.mrf.mxu1 }
0x1682   : > { %v3567_v12 = vadd.f32 %v9205_v59, %v3566_v29 }
0x1683   : > { %v10148_v13 = vpop.f32.mrf.mxu1 }
0x1684   : > { %v12124_v15 = vpack.c.bf16 %v3567_v12, %v3567_v12 }
0x1685   : > { %v3569_v9 = vpop.f32.mrf.mxu1 }
0x1686   : > { %v3621_v48 = vsel %vm1022_vm3, %v12124_v15, 0 }
0x1687   : > { %v10149_v19 = vpop.f32.mrf.mxu1  ;;  %10157 = vmatpush3.bf16.xpose.msra.mxu1 %v3621_v48  ;;  %v3794_v48 = vsel %vm1022_vm3, %v3789_v56, 0 }
0x1688   : > { %10168 = vmatprep.subr.bf16.mxu1 %v11267_v49 }
0x1689   : > { %v10995_v21 = vpop.eup %10994 }
0x168a   : > { %v3320_v7 = vmul.f32 1.0614054, %v10995_v21 }
0x168b   : > { %v10997_v30 = vpop.eup %10996 }
0x168c   : > { %v3321_v22 = vadd.f32 -1.4531521, %v3320_v7 }
0x168e   : > { %v3322_v23 = vmul.f32 %v10995_v21, %v3321_v22  ;;  %10159 = vmatmul.mubr.msk.bf16.vlgmr.msra.gmra.mxu1 %vm1022_vm3, %v12118_v1 }
0x168f   : > { %10169 = vmatpush3.bf16.msra.mxu1 %v3742_v45  ;;  %10170 = vmatprep.mubr.msk.bf16.mxu1 %vm11268_vm2, %v11267_v49 }
0x1690   : > { %v3323_v24 = vadd.f32 1.4214138, %v3322_v23  ;;  %10180 = vmatprep.subr.bf16.mxu1 %v11267_v49 }
0x1692   : > { %v3324_v26 = vmul.f32 %v10995_v21, %v3323_v24 }
0x1694   : > { %v3325_v25 = vadd.f32 -0.28449672, %v3324_v26 }
0x1696   : > { %v3326_v14 = vmul.f32 %v10995_v21, %v3325_v25 }
0x1698   : > { %v3327_v27 = vadd.f32 0.2548296, %v3326_v14 }
0x169a   : > { %v3328_v28 = vmul.f32 %v10995_v21, %v3327_v27 }
0x169c   : > { %v3333_v32 = vmul.f32 %v10997_v30, %v3328_v28 }
0x169e   : > { %v3334_v33 = vsub.f32 1.0, %v3333_v32 }
0x16a0   : > { %v3336_v34 = vsub.f32 0.0, %v3334_v33 }
0x16a2   : > { %v3337_v35 = vsel %vm3335_vm12, %v3336_v34, %v3334_v33 }
0x16a3   : > { %v3338_v36 = vadd.f32 1.0, %v3337_v35 }
0x16a5   : > { %v3339_v37 = vmul.f32 0.5, %v3338_v36 }
0x16a7   : > { %v3340_v62 = vmul.f32 %v3339_v37, %v3309_v42 }
0x16a9   : > { %v3341_v38 = vpack.c.bf16 %v3340_v62, %v3340_v62 }
0x16ab   : > { %10131 = vmatmul.mubr.bf16.vlgmr.msra.gmra.mxu0 %v3341_v38 }
0x16ac   : > { %10164 = vmatprep.mubr.msk.bf16.mxu0 %vm11268_vm2, %v11267_v49 }
0x173e   : > { %v3614_v39 = vpop.f32.mrf.mxu1 }
0x173f   : > { %v3663_v10 = vsel %vm1112_vm5, %v3614_v39, -inf }
0x1740   : > { %3664 = vmax.xlane.f32.xlu0 %v3663_v10  ;;  %v10154_v2 = vpop.f32.mrf.mxu1 }
0x1742   : > { %v3617_v40 = vpop.f32.mrf.mxu1 }
0x1744   : > { %v10155_v4 = vpop.f32.mrf.mxu1 }
0x174e   : > { %v3657_v61 = vpop.f32.mrf.mxu1 }
0x174f   : > { %v3666_v41 = vsel %vm1116_vm6, %v3657_v61, -inf }
0x1750   : > { %3667 = vmax.xlane.f32.xlu1 %v3666_v41  ;;  %v10160_v63 = vpop.f32.mrf.mxu1 }
0x1752   : > { %v3660_v0 = vpop.f32.mrf.mxu1 }
0x1754   : > { %v10161_v43 = vpop.f32.mrf.mxu1 }
0x1756   : > { %3687 = vrot.lane.b32.xlu0 %v12124_v15, %s13329_s3 }
0x175a   : > { %3786 = vrot.lane.b32.xlu0 %v12118_v1, %s13330_s23 }
0x1761   : > { %3836 = vrot.lane.b32.xlu1 %v12124_v15, %s13330_s23 }
0x176b   : > { %v12145_v42 = vpop.f32.mrf.mxu0 }
0x176d   : > { %v10132_v47 = vpop.f32.mrf.mxu0 }
0x176f   : > { %v3443_v51 = vpop.f32.mrf.mxu0 }
0x1771   : > { %v10133_v52 = vpop.f32.mrf.mxu0 }
0x17c9   : > { %v3665_v53 = vpop.xlane.xlu0 %3664 }
0x17cd   : > { %v3688_v54 = vpop.permute.xlu0 %3687 }
0x17ce   : > { %v3693_v55 = vsel %vm1144_vm7, %v3688_v54, 0 }
0x17cf   : > { %10163 = vmatpush3.bf16.msra.mxu0 %v3693_v55 }
0x17d0   : > { %10174 = vmatprep.subr.bf16.mxu0 %v11267_v49 }
0x17d1   : > { %v3787_v19 = vpop.permute.xlu0 %3786 }
0x17d9   : > { %v3668_v57 = vpop.xlane.xlu1 %3667 }
0x17da   : > { %v3669_v58 = vmax.f32 %v3665_v53, %v3668_v57 }
0x17dc   : > { %v3670_v60 = vsub.f32 %v3614_v39, %v3669_v58  ;;  %v3673_v3 = vsub.f32 %v3657_v61, %v3669_v58 }
0x17dd   : > { %v3837_v11 = vpop.permute.xlu1 %3836 }
0x17de   : > { %v3671_v6 = vmul.f32 1.442695, %v3670_v60  ;;  %v3674_v59 = vmul.f32 1.442695, %v3673_v3  ;;  %v3839_v18 = vsel %vm1022_vm3, %v3837_v11, 0 }
0x17e0   : > { %10998 = vpow2.f32 %v3671_v6 }
0x17e1   : > { %11000 = vpow2.f32 %v3674_v59 }
0x17ed   : > { %v12149_v29 = vpop.eup %10998 }
0x17ee   : > { %v12151_v12 = vpop.eup %11000  ;;  %v3684_v13 = vpack.c.bf16 %v12149_v29, %v12149_v29 }
0x17ef   : > { %v3685_v9 = vpack.c.bf16 %v12151_v12, %v12151_v12 }
0x17f0   : > { %10171 = vmatmul.mubr.msk.bf16.vlgmr.msra.gmra.mxu1 %vm1022_vm3, %v3684_v13 }
0x17f1   : > { %10165 = vmatmul.mubr.msk.bf16.vlgmr.msra.gmra.mxu0 %vm1140_vm8, %v3685_v9  ;;  %10181 = vmatpush3.bf16.xpose.msra.mxu1 %v3839_v18 }
0x17f2   : > { %10175 = vmatpush3.bf16.xpose.msra.mxu0 %v3794_v48  ;;  %10176 = vmatprep.mubr.msk.bf16.mxu0 %vm11268_vm2, %v11267_v49 }
0x17f3   : > { %10182 = vmatprep.mubr.msk.bf16.mxu1 %vm11268_vm2, %v11267_v49  ;;  %10186 = vmatprep.subr.bf16.mxu0 %v11267_v49 }
0x17f4   : > { %10192 = vmatprep.subr.bf16.mxu1 %v11267_v49 }
0x17f8   : > { %10183 = vmatmul.mubr.msk.bf16.vlgmr.msra.gmra.mxu1 %vm1022_vm3, %v3787_v19 }
0x17f9   : > { %10177 = vmatmul.mubr.msk.bf16.vlgmr.msra.gmra.mxu0 %vm1022_vm3, %v3787_v19  ;;  %10194 = vmatprep.mubr.msk.bf16.mxu1 %vm11268_vm2, %v11267_v49 }
0x17fa   : > { %10188 = vmatprep.mubr.msk.bf16.mxu0 %vm11268_vm2, %v11267_v49 }
0x18b0   : > { %v3778_v21 = vpop.f32.mrf.mxu1 }
0x18b1   : > { %v3729_v7 = vpop.f32.mrf.mxu0 }
0x18b2   : > { %v12173_v46 = vadd.f32 %v3778_v21, %v3729_v7  ;;  %v10172_v50 = vpop.f32.mrf.mxu1 }
0x18b3   : > { %v10166_v22 = vpop.f32.mrf.mxu0 }
0x18b4   : > { %v3781_v45 = vpop.f32.mrf.mxu1 }
0x18b5   : > { %v3732_v23 = vpop.f32.mrf.mxu0 }
0x18b6   : > { %v10173_v24 = vpop.f32.mrf.mxu1 }
0x18b7   : > { %v10167_v26 = vpop.f32.mrf.mxu0 }
0x18b8   : > { %v3875_v25 = vpop.f32.mrf.mxu1 }
0x18b9   : > { %v3830_v14 = vpop.f32.mrf.mxu0  ;;  %v3884_v27 = vsel %vm1116_vm6, %v3875_v25, -inf }
0x18ba   : > { %3885 = vmax.xlane.f32.xlu0 %v3884_v27  ;;  %v10184_v28 = vpop.f32.mrf.mxu1  ;;  %v3881_v30 = vsel %vm1112_vm5, %v3830_v14, -inf }
0x18bb   : > { %3882 = vmax.xlane.f32.xlu1 %v3881_v30  ;;  %v10178_v32 = vpop.f32.mrf.mxu0 }
0x18bc   : > { %v3878_v33 = vpop.f32.mrf.mxu1 }
0x18bd   : > { %v3833_v34 = vpop.f32.mrf.mxu0 }
0x18be   : > { %v10185_v35 = vpop.f32.mrf.mxu1 }
0x18bf   : > { %v10179_v36 = vpop.f32.mrf.mxu0 }
0x18cc   : > { %3952 = vrot.lane.b32.xlu1 %v12039_v16, %s13331_s22 }
0x18d0   : > { %4003 = vrot.lane.b32.xlu1 %v12039_v16, %s13332_s24  ;;  %3904 = vrot.lane.b32.xlu0 %v12124_v15, %s13331_s22 }
0x18d4   : > { %4001 = vrot.lane.b32.xlu1 %v12118_v1, %s13332_s24  ;;  %4051 = vrot.lane.b32.xlu0 %v12124_v15, %s13332_s24 }
0x18d8   : > { %4167 = vrot.lane.b32.xlu1 %v12039_v16, %s13323_s28 }
0x1943   : > { %v3886_v37 = vpop.xlane.xlu0 %3885 }
0x1944   : > { %v3883_v62 = vpop.xlane.xlu1 %3882 }
0x1945   : > { %v3887_v38 = vmax.f32 %v3883_v62, %v3886_v37 }
0x1947   : > { %v3888_v39 = vsub.f32 %v3830_v14, %v3887_v38  ;;  %v3891_v10 = vsub.f32 %v3875_v25, %v3887_v38  ;;  %v3905_v2 = vpop.permute.xlu0 %3904 }
0x1948   : > { %v3910_v40 = vsel %vm1144_vm7, %v3905_v2, 0  ;;  %v3953_v4 = vpop.permute.xlu1 %3952 }
0x1949   : > { %v3889_v61 = vmul.f32 1.442695, %v3888_v39  ;;  %v3892_v41 = vmul.f32 1.442695, %v3891_v10  ;;  %v3958_v63 = vsel %vm1194_vm4, %v3953_v4, 0  ;;  %10187 = vmatpush3.bf16.msra.mxu0 %v3910_v40 }
0x194a   : > { %10193 = vmatpush3.bf16.msra.mxu1 %v3958_v63  ;;  %10198 = vmatprep.subr.bf16.mxu0 %v11267_v49 }
0x194b   : > { %11002 = vpow2.f32 %v3889_v61  ;;  %10204 = vmatprep.subr.bf16.mxu1 %v11267_v49  ;;  %v4052_v47 = vpop.permute.xlu0 %4051 }
0x194c   : > { %11004 = vpow2.f32 %v3892_v41  ;;  %v4004_v0 = vpop.permute.xlu1 %4003  ;;  %v4054_v55 = vsel %vm1022_vm3, %v4052_v47, 0 }
0x194d   : > { %v4009_v56 = vsel %vm1022_vm3, %v4004_v0, 0 }
0x1950   : > { %v4002_v53 = vpop.permute.xlu1 %4001 }
0x1954   : > { %v4168_v57 = vpop.permute.xlu1 %4167 }
0x1955   : > { %v4173_v58 = vsel %vm1194_vm4, %v4168_v57, 0 }
0x1958   : > { %v12193_v43 = vpop.eup %11002 }
0x1959   : > { %v12195_v51 = vpop.eup %11004  ;;  %v3902_v52 = vpack.c.bf16 %v12193_v43, %v12193_v43 }
0x195a   : > { %v3903_v54 = vpack.c.bf16 %v12195_v51, %v12195_v51 }
0x195b   : > { %10195 = vmatmul.mubr.msk.bf16.vlgmr.msra.gmra.mxu1 %vm1022_vm3, %v3902_v52 }
0x195c   : > { %10189 = vmatmul.mubr.msk.bf16.vlgmr.msra.gmra.mxu0 %vm1140_vm8, %v3903_v54  ;;  %10205 = vmatpush3.bf16.xpose.msra.mxu1 %v4054_v55 }
0x195d   : > { %10199 = vmatpush3.bf16.xpose.msra.mxu0 %v4009_v56  ;;  %10200 = vmatprep.mubr.msk.bf16.mxu0 %vm11268_vm2, %v11267_v49 }
0x195e   : > { %10206 = vmatprep.mubr.msk.bf16.mxu1 %vm11268_vm2, %v11267_v49  ;;  %10216 = vmatprep.subr.bf16.mxu1 %v11267_v49 }
0x195f   : > { %10210 = vmatprep.subr.bf16.mxu0 %v11267_v49 }
0x1963   : > { %10207 = vmatmul.mubr.msk.bf16.vlgmr.msra.gmra.mxu1 %vm1022_vm3, %v4002_v53 }
0x1964   : > { %10201 = vmatmul.mubr.msk.bf16.vlgmr.msra.gmra.mxu0 %vm1022_vm3, %v4002_v53  ;;  %10217 = vmatpush3.bf16.msra.mxu1 %v4173_v58 }
0x1965   : > { %10212 = vmatprep.mubr.msk.bf16.mxu0 %vm11268_vm2, %v11267_v49  ;;  %10218 = vmatprep.mubr.msk.bf16.mxu1 %vm11268_vm2, %v11267_v49 }
0x1966   : > { %10228 = vmatprep.subr.bf16.mxu1 %v11267_v49 }
0x1a1b   : > { %v3994_v60 = vpop.f32.mrf.mxu1 }
0x1a1c   : > { %v3946_v3 = vpop.f32.mrf.mxu0 }
0x1a1d   : > { %v12219_v6 = vadd.f32 %v3994_v60, %v3946_v3  ;;  %v10196_v59 = vpop.f32.mrf.mxu1 }
0x1a1e   : > { %v10190_v11 = vpop.f32.mrf.mxu0 }
0x1a1f   : > { %v3997_v13 = vpop.f32.mrf.mxu1 }
0x1a20   : > { %v3949_v9 = vpop.f32.mrf.mxu0 }
0x1a21   : > { %v10197_v18 = vpop.f32.mrf.mxu1 }
0x1a22   : > { %v10191_v48 = vpop.f32.mrf.mxu0 }
0x1a23   : > { %v4090_v19 = vpop.f32.mrf.mxu1  ;;  %v3897_v48 = vsel %vm1116_vm6, %v12195_v51, 0.0 }
0x1a24   : > { %v4045_v21 = vpop.f32.mrf.mxu0  ;;  %v4099_v7 = vsel %vm1116_vm6, %v4090_v19, -inf }
0x1a25   : > { %4100 = vmax.xlane.f32.xlu1 %v4099_v7  ;;  %v10208_v50 = vpop.f32.mrf.mxu1  ;;  %v4096_v22 = vsel %vm1112_vm5, %v4045_v21, -inf }
0x1a26   : > { %4097 = vmax.xlane.f32.xlu0 %v4096_v22  ;;  %v10202_v45 = vpop.f32.mrf.mxu0 }
0x1a27   : > { %v4093_v23 = vpop.f32.mrf.mxu1 }
0x1a28   : > { %v4048_v24 = vpop.f32.mrf.mxu0 }
0x1a29   : > { %v10209_v26 = vpop.f32.mrf.mxu1 }
0x1a2a   : > { %v10203_v25 = vpop.f32.mrf.mxu0 }
0x1a36   : > { %4266 = vrot.lane.b32.xlu1 %v12124_v15, %s13324_s30 }
0x1a3c   : > { %4119 = vrot.lane.b32.xlu0 %v12124_v15, %s13323_s28 }
0x1a40   : > { %4218 = vrot.lane.b32.xlu0 %v12039_v16, %s13324_s30 }
0x1a44   : > { %4216 = vrot.lane.b32.xlu0 %v12118_v1, %s13324_s30 }
0x1aae   : > { %v4101_v14 = vpop.xlane.xlu1 %4100 }
0x1aaf   : > { %v4098_v27 = vpop.xlane.xlu0 %4097 }
0x1ab0   : > { %v4102_v28 = vmax.f32 %v4098_v27, %v4101_v14 }
0x1ab2   : > { %v4103_v30 = vsub.f32 %v4045_v21, %v4102_v28  ;;  %v4106_v32 = vsub.f32 %v4090_v19, %v4102_v28  ;;  %v4267_v62 = vpop.permute.xlu1 %4266  ;;  %v3894_v19 = vsel %vm1112_vm5, %v12193_v43, 0.0 }
0x1ab3   : > { %v4120_v33 = vpop.permute.xlu0 %4119  ;;  %v4269_v2 = vsel %vm1022_vm3, %v4267_v62, 0 }
0x1ab4   : > { %v4104_v34 = vmul.f32 1.442695, %v4103_v30  ;;  %v4107_v35 = vmul.f32 1.442695, %v4106_v32  ;;  %v4125_v36 = vsel %vm1144_vm7, %v4120_v33, 0 }
0x1ab5   : > { %10211 = vmatpush3.bf16.msra.mxu0 %v4125_v36 }
0x1ab6   : > { %11006 = vpow2.f32 %v4104_v34  ;;  %10222 = vmatprep.subr.bf16.mxu0 %v11267_v49  ;;  %v3676_v34 = vsel %vm1112_vm5, %v12149_v29, 0.0 }
0x1ab7   : > { %11008 = vpow2.f32 %v4107_v35  ;;  %v4219_v39 = vpop.permute.xlu0 %4218  ;;  %v3679_v35 = vsel %vm1116_vm6, %v12151_v12, 0.0  ;;  %v12285_v12 = vadd.f32 %v11873_v44, %v11758_v17  ;;  %v10863_v17 = vld [vmem:[%s13271_s11] sm:$0xff]  }
0x1ab8   : > { %v4224_v40 = vsel %vm1022_vm3, %v4219_v39, 0 }
0x1abb   : > { %v4217_v4 = vpop.permute.xlu0 %4216 }
0x1ac3   : > { %v11007_v37 = vpop.eup %11006 }
0x1ac4   : > { %v11009_v38 = vpop.eup %11008  ;;  %v4117_v1 = vpack.c.bf16 %v11007_v37, %v11007_v37  ;;  %v4109_v21 = vsel %vm1112_vm5, %v11007_v37, 0.0 }
0x1ac5   : > { %v4118_v10 = vpack.c.bf16 %v11009_v38, %v11009_v38  ;;  %v4112_v7 = vsel %vm1116_vm6, %v11009_v38, 0.0 }
0x1ac6   : > { %10219 = vmatmul.mubr.msk.bf16.vlgmr.msra.gmra.mxu1 %vm1022_vm3, %v4117_v1 }
0x1ac7   : > { %10213 = vmatmul.mubr.msk.bf16.vlgmr.msra.gmra.mxu0 %vm1140_vm8, %v4118_v10  ;;  %10229 = vmatpush3.bf16.xpose.msra.mxu1 %v4269_v2 }
0x1ac8   : > { %10223 = vmatpush3.bf16.xpose.msra.mxu0 %v4224_v40  ;;  %10224 = vmatprep.mubr.msk.bf16.mxu0 %vm11268_vm2, %v11267_v49 }
0x1ac9   : > { %10230 = vmatprep.mubr.msk.bf16.mxu1 %vm11268_vm2, %v11267_v49  ;;  %10234 = vmatprep.subr.bf16.mxu0 %v11267_v49 }
0x1aca   : > { %10240 = vmatprep.subr.bf16.mxu1 %v11267_v49 }
0x1ace   : > { %10231 = vmatmul.mubr.msk.bf16.vlgmr.msra.gmra.mxu1 %vm1022_vm3, %v4217_v4 }
0x1acf   : > { %10225 = vmatmul.mubr.msk.bf16.vlgmr.msra.gmra.mxu0 %vm1022_vm3, %v4217_v4  ;;  %10242 = vmatprep.mubr.msk.bf16.mxu1 %vm11268_vm2, %v11267_v49  ;;  %v4793_v4 = vsel %vm876_vm1, %v12285_v12, 0.0 }
0x1ad0   : > { %10236 = vmatprep.mubr.msk.bf16.mxu0 %vm11268_vm2, %v11267_v49 }
0x1b86   : > { %v4209_v61 = vpop.f32.mrf.mxu1 }
0x1b87   : > { %v4161_v41 = vpop.f32.mrf.mxu0 }
0x1b88   : > { %v12249_v63 = vadd.f32 %v4209_v61, %v4161_v41  ;;  %v10220_v0 = vpop.f32.mrf.mxu1  ;;  %v10862_v61 = vld [vmem:[%s13271_s11 + $0x8] sm:$0xff]  }
0x1b89   : > { %v10214_v47 = vpop.f32.mrf.mxu0 }
0x1b8a   : > { %v4212_v52 = vpop.f32.mrf.mxu1 }
0x1b8b   : > { %v4164_v53 = vpop.f32.mrf.mxu0 }
0x1b8c   : > { %v10221_v54 = vpop.f32.mrf.mxu1 }
0x1b8d   : > { %v10215_v55 = vpop.f32.mrf.mxu0 }
0x1b8e   : > { %v4305_v56 = vpop.f32.mrf.mxu1 }
0x1b8f   : > { %v4260_v57 = vpop.f32.mrf.mxu0  ;;  %v4314_v58 = vsel %vm1116_vm6, %v4305_v56, -inf }
0x1b90   : > { %4315 = vmax.xlane.f32.xlu0 %v4314_v58  ;;  %v10232_v60 = vpop.f32.mrf.mxu1  ;;  %v4311_v3 = vsel %vm1112_vm5, %v4260_v57, -inf }
0x1b91   : > { %4312 = vmax.xlane.f32.xlu1 %v4311_v3  ;;  %v10226_v59 = vpop.f32.mrf.mxu0 }
0x1b92   : > { %v4308_v11 = vpop.f32.mrf.mxu1 }
0x1b93   : > { %v4263_v13 = vpop.f32.mrf.mxu0 }
0x1b94   : > { %v10233_v9 = vpop.f32.mrf.mxu1 }
0x1b95   : > { %v10227_v18 = vpop.f32.mrf.mxu0 }
0x1ba2   : > { %4382 = vrot.lane.b32.xlu1 %v12039_v16, %s13325_s1 }
0x1ba6   : > { %4334 = vrot.lane.b32.xlu0 %v12124_v15, %s13325_s1 }
0x1bc5   : > { %3898 = vadd.xlane.f32.xlu0 %v3897_v48 }
0x1bc6   : > { %3895 = vadd.xlane.f32.xlu1 %v3894_v19 }
0x1bc9   : > { %4110 = vadd.xlane.f32.xlu0 %v4109_v21 }
0x1bcd   : > { %4113 = vadd.xlane.f32.xlu0 %v4112_v7 }
0x1c19   : > { %v4316_v50 = vpop.xlane.xlu0 %4315 }
0x1c1a   : > { %v4313_v22 = vpop.xlane.xlu1 %4312 }
0x1c1b   : > { %v4317_v16 = vmax.f32 %v4313_v22, %v4316_v50 }
0x1c1d   : > { %v4318_v45 = vsub.f32 %v4260_v57, %v4317_v16  ;;  %v4321_v23 = vsub.f32 %v4305_v56, %v4317_v16  ;;  %v4335_v15 = vpop.permute.xlu0 %4334 }
0x1c1e   : > { %v4340_v24 = vsel %vm1144_vm7, %v4335_v15, 0  ;;  %v4383_v51 = vpop.permute.xlu1 %4382 }
0x1c1f   : > { %v4319_v26 = vmul.f32 1.442695, %v4318_v45  ;;  %v4322_v25 = vmul.f32 1.442695, %v4321_v23  ;;  %v4388_v43 = vsel %vm1194_vm4, %v4383_v51, 0  ;;  %10235 = vmatpush3.bf16.msra.mxu0 %v4340_v24 }
0x1c20   : > { %10241 = vmatpush3.bf16.msra.mxu1 %v4388_v43  ;;  %10246 = vmatprep.subr.bf16.mxu0 %v11267_v49 }
0x1c21   : > { %11010 = vpow2.f32 %v4319_v26  ;;  %10254 = vmatprep.subr.bf16.mxu1 %v11267_v49 }
0x1c22   : > { %11012 = vpow2.f32 %v4322_v25 }
0x1c2e   : > { %v11011_v14 = vpop.eup %11010 }
0x1c2f   : > { %v11013_v27 = vpop.eup %11012  ;;  %v4324_v28 = vsel %vm1112_vm5, %v11011_v14, 0.0  ;;  %v4332_v30 = vpack.c.bf16 %v11011_v14, %v11011_v14 }
0x1c30   : > { %v4327_v32 = vsel %vm1116_vm6, %v11013_v27, 0.0  ;;  %4325 = vadd.xlane.f32.xlu1 %v4324_v28  ;;  %v4333_v33 = vpack.c.bf16 %v11013_v27, %v11013_v27 }
0x1c31   : > { %4328 = vadd.xlane.f32.xlu0 %v4327_v32  ;;  %10243 = vmatmul.mubr.msk.bf16.vlgmr.msra.gmra.mxu1 %vm1022_vm3, %v4332_v30 }
0x1c32   : > { %10237 = vmatmul.mubr.msk.bf16.vlgmr.msra.gmra.mxu0 %vm1140_vm8, %v4333_v33  ;;  %10258 = vmatprep.mubr.msk.bf16.mxu1 %vm11268_vm2, %v11267_v49 }
0x1c33   : > { %10250 = vmatprep.mubr.msk.bf16.mxu0 %vm11268_vm2, %v11267_v49  ;;  %10247 = vmatpush3.bf16.msra.mxu0 %v10862_v61 }
0x1c34   : > { %3677 = vadd.xlane.f32.xlu1 %v3676_v34  ;;  %10248 = vmatprep.subr.bf16.mxu0 %v11267_v49  ;;  %v10865_v34 = vld [vmem:[%s13272_s12] sm:$0xff]  }
0x1c35   : > { %3680 = vadd.xlane.f32.xlu0 %v3679_v35  ;;  %v10866_v35 = vld [vmem:[%s13322_s7 + $0x18] sm:$0xff]  }
0x1c37   : > { %10249 = vmatpush3.bf16.msra.mxu0 %v10863_v17  ;;  %v10872_v17 = vld [vmem:[%s13274_s14 + $0x38] sm:$0xff]  }
0x1c38   : > { %10262 = vmatprep.subr.bf16.mxu0 %v11267_v49 }
0x1c4e   : > { %v3899_v36 = vpop.xlane.xlu0 %3898 }
0x1c4f   : > { %v3896_v37 = vpop.xlane.xlu1 %3895 }
0x1c50   : > { %v3900_v62 = vadd.f32 %v3899_v36, %v3896_v37 }
0x1c52   : > { %11014 = vrcp.f32 %v3900_v62  ;;  %v4111_v38 = vpop.xlane.xlu0 %4110 }
0x1c56   : > { %v4114_v39 = vpop.xlane.xlu0 %4113 }
0x1c57   : > { %v4115_v1 = vadd.f32 %v4114_v39, %v4111_v38 }
0x1c59   : > { %11016 = vrcp.f32 %v4115_v1 }
0x1c5f   : > { %v11015_v10 = vpop.eup %11014 }
0x1c60   : > { %v4000_v2 = vmul.f32 %v11015_v10, %v12219_v6 }
0x1c62   : > { %4432 = vrot.lane.b32.xlu1 %v4000_v2, %s13326_s29 }
0x1c66   : > { %v11017_v29 = vpop.eup %11016 }
0x1c67   : > { %v4215_v40 = vmul.f32 %v11017_v29, %v12249_v63 }
0x1c69   : > { %4436 = vrot.lane.b32.xlu0 %v4215_v40, %s13327_s25  ;;  %v10867_v40 = vld [vmem:[%s13322_s7 + $0x10] sm:$0xff]  }
0x1c88   : > { %4794 = vadd.xlane.f32.xlu0 %v4793_v4  ;;  %v10868_v4 = vld [vmem:[%s13265_s5 + $0x18] sm:$0xff]  }
0x1cb9   : > { %v4326_v41 = vpop.xlane.xlu1 %4325 }
0x1cba   : > { %v4329_v6 = vpop.xlane.xlu0 %4328 }
0x1cbb   : > { %v4330_v63 = vadd.f32 %v4329_v6, %v4326_v41  ;;  %v10869_v6 = vld [vmem:[%s13265_s5 + $0x10] sm:$0xff]   ;;  %v10870_v41 = vld [vmem:[%s13269_s9 + $0x18] sm:$0xff]  }
0x1cbd   : > { %11018 = vrcp.f32 %v4330_v63  ;;  %v3678_v59 = vpop.xlane.xlu1 %3677 }
0x1cbe   : > { %v3681_v3 = vpop.xlane.xlu0 %3680 }
0x1cbf   : > { %v3682_v11 = vadd.f32 %v3681_v3, %v3678_v59 }
0x1cc1   : > { %11020 = vrcp.f32 %v3682_v11 }
0x1cca   : > { %v11019_v53 = vpop.eup %11018 }
0x1cce   : > { %v11021_v13 = vpop.eup %11020 }
0x1ccf   : > { %v3784_v18 = vmul.f32 %v11021_v13, %v12173_v46 }
0x1cd4   : > { %v4433_v9 = vpop.permute.xlu1 %4432 }
0x1cd5   : > { %v4443_v19 = vsel %vm1022_vm3, %v3784_v18, %v4433_v9  ;;  %v9244_v9 = vld [vmem:[#allocation4 + $0x1] ss:$0 sm:$0xff] }
0x1cdb   : > { %v4437_v48 = vpop.permute.xlu0 %4436 }
0x1cdc   : > { %v4444_v21 = vsel %vm1898_vm9, %v4443_v19, %v4437_v48 }
0x1cf1   : > { %v4424_v44 = vpop.f32.mrf.mxu1 }
0x1cf2   : > { %v4376_v0 = vpop.f32.mrf.mxu0 }
0x1cf3   : > { %v4425_v47 = vadd.f32 %v4424_v44, %v4376_v0  ;;  %v10244_v52 = vpop.f32.mrf.mxu1  ;;  %v10873_v44 = vld [vmem:[%s13274_s14 + $0x30] sm:$0xff]   ;;  %v10874_v0 = vld [vmem:[%s13274_s14 + $0x28] sm:$0xff]  }
0x1cf4   : > { %v10238_v54 = vpop.f32.mrf.mxu0  ;;  %v10876_v52 = vld [vmem:[%s13274_s14 + $0x18] sm:$0xff]  }
0x1cf5   : > { %v4430_v55 = vmul.f32 %v11019_v53, %v4425_v47  ;;  %v4427_v56 = vpop.f32.mrf.mxu1  ;;  %v10875_v47 = vld [vmem:[%s13274_s14 + $0x20] sm:$0xff]   ;;  %v10877_v53 = vld [vmem:[%s13274_s14 + $0x10] sm:$0xff]   ;;  %v10878_v54 = vld [vmem:[%s13274_s14 + $0x8] sm:$0xff]  }
0x1cf6   : > { %v4379_v57 = vpop.f32.mrf.mxu0  ;;  %v9228_v56 = vld [vmem:[#allocation7] ss:$0 sm:$0xff] }
0x1cf7   : > { %4440 = vrot.lane.b32.xlu1 %v4430_v55, %s13328_s27  ;;  %v10245_v58 = vpop.f32.mrf.mxu1  ;;  %v10879_v55 = vld [vmem:[%s13274_s14] sm:$0xff]  }
0x1cf8   : > { %v10239_v60 = vpop.f32.mrf.mxu0 }
0x1d11   : > { %v4795_v16 = vpop.xlane.xlu0 %4794 }
0x1d12   : > { %v4796_v45 = vmul.f32 0.03125, %v4795_v16 }
0x1d14   : > { %v4797_v23 = vsub.f32 %v12285_v12, %v4796_v45 }
0x1d16   : > { %v4798_v26 = vmul.f32 %v4797_v23, %v4797_v23 }
0x1d18   : > { %v4799_v14 = vsel %vm876_vm1, %v4798_v26, 0.0 }
0x1d69   : > { %v4441_v7 = vpop.permute.xlu1 %4440 }
0x1d6a   : > { %v4445_v50 = vsel %vm1900_vm10, %v4444_v21, %v4441_v7 }
0x1d6b   : > { %v4446_v22 = vpack.c.bf16 %v4445_v50, %v4445_v50 }
0x1d6d   : > { %10251 = vmatmul.mubr.msk.bf16.vlgmr.msra.gmra.mxu0 %vm691_vm0, %v4446_v22 }
0x1d6e   : > { %10278 = vmatprep.mubr.msk.bf16.mxu0 %vm11268_vm2, %v11267_v49  ;;  %10263 = vmatpush3.bf16.msra.mxu0 %v10872_v17 }
0x1d6f   : > { %10264 = vmatprep.subr.bf16.mxu0 %v11267_v49 }
0x1d72   : > { %10265 = vmatpush3.bf16.msra.mxu0 %v10873_v44 }
0x1d73   : > { %10266 = vmatprep.subr.bf16.mxu0 %v11267_v49 }
0x1d76   : > { %10267 = vmatpush3.bf16.msra.mxu0 %v10874_v0 }
0x1d77   : > { %10268 = vmatprep.subr.bf16.mxu0 %v11267_v49 }
0x1d7a   : > { %10269 = vmatpush3.bf16.msra.mxu0 %v10875_v47 }
0x1d7b   : > { %10270 = vmatprep.subr.bf16.mxu0 %v11267_v49 }
0x1d7e   : > { %10271 = vmatpush3.bf16.msra.mxu0 %v10876_v52 }
0x1d7f   : > { %10272 = vmatprep.subr.bf16.mxu0 %v11267_v49 }
0x1d82   : > { %10273 = vmatpush3.bf16.msra.mxu0 %v10877_v53 }
0x1d83   : > { %10274 = vmatprep.subr.bf16.mxu0 %v11267_v49 }
0x1d86   : > { %10275 = vmatpush3.bf16.msra.mxu0 %v10878_v54 }
0x1d87   : > { %10276 = vmatprep.subr.bf16.mxu0 %v11267_v49 }
0x1d8a   : > { %10277 = vmatpush3.bf16.msra.mxu0 %v10879_v55 }
0x1d8b   : > { %10312 = vmatprep.subr.bf16.mxu0 %v11267_v49 }
0x1e2d   : > { %v4500_v15 = vpop.f32.mrf.mxu0 }
0x1e2e   : > { %v12307_v46 = vadd.f32 %v12030_v20, %v4500_v15  ;;  %v10864_v20 = vld [vmem:[%s13272_s12 + $0x8] sm:$0xff]  }
0x1e2f   : > { %v10252_v24 = vpop.f32.mrf.mxu0  ;;  %10255 = vmatpush3.bf16.msra.mxu1 %v10864_v20 }
0x1e30   : > { %v4506_v51 = vsel %vm876_vm1, %v12307_v46, 0.0  ;;  %10256 = vmatprep.subr.bf16.mxu1 %v11267_v49 }
0x1e31   : > { %4507 = vadd.xlane.f32.xlu1 %v4506_v51  ;;  %v4503_v25 = vpop.f32.mrf.mxu0  ;;  %v12393_v51 = vld [vmem:[#allocation2 + $0x1] ss:$0 sm:$0xff] }
0x1e33   : > { %v10253_v43 = vpop.f32.mrf.mxu0  ;;  %10257 = vmatpush3.bf16.msra.mxu1 %v10865_v34 }
0x1e34   : > { %10282 = vmatprep.subr.bf16.mxu1 %v10866_v35 }
0x1e35   : > { %4800 = vadd.xlane.f32.xlu1 %v4799_v14 }
0x1eba   : > { %v4508_v27 = vpop.xlane.xlu1 %4507 }
0x1ebb   : > { %v4509_v28 = vmul.f32 0.03125, %v4508_v27 }
0x1ebd   : > { %v4510_v30 = vsub.f32 %v12307_v46, %v4509_v28 }
0x1ebe   : > { %v4801_v38 = vpop.xlane.xlu1 %4800 }
0x1ebf   : > { %v4511_v32 = vmul.f32 %v4510_v30, %v4510_v30  ;;  %v4802_v39 = vmul.f32 0.03125, %v4801_v38 }
0x1ec1   : > { %v4512_v33 = vsel %vm876_vm1, %v4511_v32, 0.0  ;;  %v4803_v1 = vadd.f32 1e-05, %v4802_v39 }
0x1ec2   : > { %4513 = vadd.xlane.f32.xlu0 %v4512_v33 }
0x1f4b   : > { %v4514_v36 = vpop.xlane.xlu0 %4513 }
0x1f4c   : > { %v4515_v37 = vmul.f32 0.03125, %v4514_v36 }
0x1f4e   : > { %v4516_v62 = vadd.f32 1e-05, %v4515_v37 }
0x1f50   : > { %11022 = vrsqrt.f32 %v4516_v62 }
0x1f51   : > { %11024 = vrsqrt.f32 %v4803_v1 }
0x1f5d   : > { %v11023_v10 = vpop.eup %11022 }
0x1f5e   : > { %v4518_v2 = vmul.f32 %v11023_v10, %v4510_v30  ;;  %v11025_v61 = vpop.eup %11024 }
0x1f60   : > { %v4519_v29 = vpack.c.bf16 %v4518_v2, %v4518_v2 }
0x1f62   : > { %10259 = vmatmul.mubr.msk.bf16.vlgmr.msra.gmra.mxu1 %vm691_vm0, %v4519_v29 }
0x1f63   : > { %10283 = vmatpush3.bf16.msra.mxu1 %v10866_v35  ;;  %10286 = vmatprep.mubr.msk.bf16.mxu1 %vm691_vm0, %v11535_v5  ;;  %v4805_v5 = vmul.f32 %v11025_v61, %v4797_v23 }
0x1f64   : > { %10284 = vmatprep.subr.bf16.mxu1 %v10867_v40 }
0x1f65   : > { %v4806_v63 = vpack.c.bf16 %v4805_v5, %v4805_v5 }
0x1f67   : > { %10285 = vmatpush3.bf16.msra.mxu1 %v10867_v40 }
0x1f68   : > { %10290 = vmatprep.subr.bf16.mxu1 %v11267_v49 }
0x1f6a   : > { %10287 = vmatmul.mubr.msk.bf16.vlgmr.msra.gmra.mxu1 %vm691_vm0, %v11540_v8  ;;  %v10871_v8 = vld [vmem:[%s13269_s9 + $0x10] sm:$0xff]  }
0x1f6b   : > { %10291 = vmatpush3.bf16.msra.mxu1 %v10868_v4  ;;  %10294 = vmatprep.mubr.msk.bf16.mxu1 %vm11268_vm2, %v11267_v49 }
0x1f6c   : > { %10292 = vmatprep.subr.bf16.mxu1 %v11267_v49 }
0x1f6f   : > { %10293 = vmatpush3.bf16.msra.mxu1 %v10869_v6 }
0x1f70   : > { %10298 = vmatprep.subr.bf16.mxu1 %v11267_v49 }
0x1f72   : > { %10295 = vmatmul.mubr.msk.bf16.vlgmr.msra.gmra.mxu1 %vm691_vm0, %v4806_v63 }
0x1f73   : > { %10299 = vmatpush3.bf16.msra.mxu1 %v10870_v41  ;;  %10302 = vmatprep.mubr.msk.bf16.mxu1 %vm11268_vm2, %v11267_v49  ;;  %v12409_v41 = vld [vmem:[#allocation6 + $0x1] ss:$0 sm:$0xff] }
0x1f74   : > { %10300 = vmatprep.subr.bf16.mxu1 %v11267_v49 }
0x1f77   : > { %10301 = vmatpush3.bf16.msra.mxu1 %v10871_v8 }
0x1f78   : > { %10306 = vmatprep.subr.bf16.mxu1 %v11267_v49 }
0x1f7a   : > { %10303 = vmatmul.mubr.msk.bf16.vlgmr.msra.gmra.mxu1 %vm691_vm0, %v4806_v63 }
0x1f7b   : > { %10308 = vmatprep.mubr.msk.bf16.mxu1 %vm11268_vm2, %v11267_v49 }
0x2022   : > { %v4580_v57 = vpop.f32.mrf.mxu1 }
0x2023   : > { %v4581_v58 = vadd.f32 %v9228_v56, %v4580_v57 }
0x2024   : > { %v10260_v60 = vpop.f32.mrf.mxu1 }
0x2025   : > { %v4586_v3 = vmul.f32 0.70710677, %v4581_v58 }
0x2026   : > { %v4583_v59 = vpop.f32.mrf.mxu1 }
0x2027   : > { %v4587_v11 = vand.u32 2147483647, %v4586_v3  ;;  %vm4607_vm13 = vcmp.lt.f32.partialorder %v4586_v3, 0.0 }
0x2028   : > { %v10261_v13 = vpop.f32.mrf.mxu1 }
0x2029   : > { %v4588_v18 = vmul.f32 0.3275911, %v4587_v11  ;;  %v4601_v15 = vmul.f32 %v4587_v11, %v4587_v11 }
0x202a   : > { %v10288_v48 = vpop.f32.mrf.mxu1 }
0x202b   : > { %v4589_v19 = vadd.f32 1.0, %v4588_v18  ;;  %v12389_v21 = vadd.f32 %v10288_v48, %v9244_v9  ;;  %v4602_v14 = vsub.f32 0.0, %v4601_v15 }
0x202c   : > { %v4777_v7 = vpop.f32.mrf.mxu1 }
0x202d   : > { %11026 = vrcp.f32 %v4589_v19  ;;  %v4778_v16 = vadd.f32 %v9244_v9, %v4777_v7  ;;  %v4603_v20 = vmul.f32 1.442695, %v4602_v14 }
0x202e   : > { %v10289_v50 = vpop.f32.mrf.mxu1 }
0x202f   : > { %11028 = vpow2.f32 %v4603_v20 }
0x2030   : > { %v4780_v22 = vpop.f32.mrf.mxu1 }
0x2031   : > { %v4781_v45 = vadd.f32 %v9244_v9, %v4780_v22 }
0x2032   : > { %v4869_v23 = vpop.f32.mrf.mxu1 }
0x2033   : > { %v12391_v24 = vpack.c.bf16 %v4781_v45, %v4778_v16  ;;  %v4870_v27 = vadd.f32 %v12393_v51, %v4869_v23 }
0x2034   : > { %v10296_v26 = vpop.f32.mrf.mxu1 }
0x2035   : > { %5104 = vrot.lane.b32.xlu1 %v12391_v24, %s13329_s3  ;;  %v4946_v25 = vsel %vm1022_vm3, %v12391_v24, 0  ;;  %v12403_v34 = vpack.c.bf16 %v4870_v27, %v4870_v27 }
0x2036   : > { %v4872_v43 = vpop.f32.mrf.mxu1  ;;  %10307 = vmatpush3.bf16.xpose.msra.mxu1 %v4946_v25 }
0x2037   : > { %10318 = vmatprep.subr.bf16.mxu1 %v11267_v49 }
0x2038   : > { %v10297_v28 = vpop.f32.mrf.mxu1 }
0x2039   : > { %5156 = vrot.lane.b32.xlu1 %v12391_v24, %s13330_s23 }
0x203a   : > { %v11027_v30 = vpop.eup %11026  ;;  %v4934_v32 = vpop.f32.mrf.mxu1 }
0x203b   : > { %v4592_v33 = vmul.f32 1.0614054, %v11027_v30  ;;  %v4935_v17 = vadd.f32 %v12409_v41, %v4934_v32 }
0x203c   : > { %v10304_v35 = vpop.f32.mrf.mxu1  ;;  %v11029_v4 = vpop.eup %11028 }
0x203d   : > { %v4593_v36 = vadd.f32 -1.4531521, %v4592_v33  ;;  %10309 = vmatmul.mubr.msk.bf16.vlgmr.msra.gmra.mxu1 %vm1022_vm3, %v12403_v34  ;;  %v12412_v47 = vpack.c.bf16 %v4935_v17, %v4935_v17 }
0x203e   : > { %v4937_v37 = vpop.f32.mrf.mxu1  ;;  %10320 = vmatprep.mubr.msk.bf16.mxu1 %vm11268_vm2, %v11267_v49 }
0x203f   : > { %v4594_v62 = vmul.f32 %v11027_v30, %v4593_v36  ;;  %v4989_v53 = vsel %vm1022_vm3, %v12412_v47, 0 }
0x2040   : > { %v10305_v38 = vpop.f32.mrf.mxu1 }
0x2041   : > { %v4595_v39 = vadd.f32 1.4214138, %v4594_v62 }
0x2043   : > { %v4596_v1 = vmul.f32 %v11027_v30, %v4595_v39 }
0x2045   : > { %v4597_v10 = vadd.f32 -0.28449672, %v4596_v1 }
0x2047   : > { %v4598_v2 = vmul.f32 %v11027_v30, %v4597_v10 }
0x2049   : > { %v4599_v29 = vadd.f32 0.2548296, %v4598_v2 }
0x204b   : > { %v4600_v40 = vmul.f32 %v11027_v30, %v4599_v29 }
0x204d   : > { %v4605_v61 = vmul.f32 %v11029_v4, %v4600_v40 }
0x204f   : > { %v4606_v6 = vsub.f32 1.0, %v4605_v61 }
0x2051   : > { %v4608_v5 = vsub.f32 0.0, %v4606_v6 }
0x2053   : > { %v4609_v63 = vsel %vm4607_vm13, %v4608_v5, %v4606_v6 }
0x2054   : > { %v4610_v8 = vadd.f32 1.0, %v4609_v63 }
0x2056   : > { %v4611_v44 = vmul.f32 0.5, %v4610_v8 }
0x2058   : > { %v4612_v0 = vmul.f32 %v4611_v44, %v4581_v58 }
0x205a   : > { %v4613_v52 = vpack.c.bf16 %v4612_v0, %v4612_v0 }
0x205c   : > { %10279 = vmatmul.mubr.bf16.vlgmr.msra.gmra.mxu0 %v4613_v52 }
0x205d   : > { %10313 = vmatpush3.bf16.xpose.msra.mxu0 %v4989_v53  ;;  %10314 = vmatprep.mubr.msk.bf16.mxu0 %vm11268_vm2, %v11267_v49 }
0x205e   : > { %10324 = vmatprep.subr.bf16.mxu0 %v11267_v49 }
0x2064   : > { %10315 = vmatmul.mubr.msk.bf16.vlgmr.msra.gmra.mxu0 %vm1022_vm3, %v12403_v34 }
0x2065   : > { %10326 = vmatprep.mubr.msk.bf16.mxu0 %vm11268_vm2, %v11267_v49 }
0x20a7   : > { %v5105_v54 = vpop.permute.xlu1 %5104 }
0x20a8   : > { %v5110_v55 = vsel %vm1194_vm4, %v5105_v54, 0 }
0x20a9   : > { %10325 = vmatpush3.bf16.msra.mxu0 %v5110_v55 }
0x20aa   : > { %10336 = vmatprep.subr.bf16.mxu0 %v11267_v49 }
0x20ab   : > { %v5157_v23 = vpop.permute.xlu1 %5156 }
0x20ac   : > { %v5162_v36 = vsel %vm1022_vm3, %v5157_v23, 0 }
0x20fd   : > { %v4982_v56 = vpop.f32.mrf.mxu1 }
0x20fe   : > { %v5031_v57 = vsel %vm1112_vm5, %v4982_v56, -inf }
0x20ff   : > { %5032 = vmax.xlane.f32.xlu0 %v5031_v57  ;;  %v10310_v58 = vpop.f32.mrf.mxu1 }
0x2101   : > { %v4985_v60 = vpop.f32.mrf.mxu1 }
0x2103   : > { %v10311_v3 = vpop.f32.mrf.mxu1 }
0x2115   : > { %5055 = vrot.lane.b32.xlu0 %v12412_v47, %s13329_s3 }
0x2119   : > { %5154 = vrot.lane.b32.xlu0 %v12403_v34, %s13330_s23 }
0x211c   : > { %v12430_v59 = vpop.f32.mrf.mxu0 }
0x211e   : > { %v10280_v11 = vpop.f32.mrf.mxu0 }
0x2120   : > { %v4715_v13 = vpop.f32.mrf.mxu0 }
0x2122   : > { %v10281_v9 = vpop.f32.mrf.mxu0 }
0x2124   : > { %v5025_v18 = vpop.f32.mrf.mxu0 }
0x2125   : > { %v5034_v48 = vsel %vm1116_vm6, %v5025_v18, -inf }
0x2126   : > { %5035 = vmax.xlane.f32.xlu1 %v5034_v48  ;;  %v10316_v19 = vpop.f32.mrf.mxu0 }
0x2128   : > { %v5028_v7 = vpop.f32.mrf.mxu0 }
0x212a   : > { %v10317_v50 = vpop.f32.mrf.mxu0 }
0x2137   : > { %5204 = vrot.lane.b32.xlu1 %v12412_v47, %s13330_s23 }
0x2188   : > { %v5033_v22 = vpop.xlane.xlu0 %5032 }
0x218c   : > { %v5056_v16 = vpop.permute.xlu0 %5055 }
0x218d   : > { %v5061_v45 = vsel %vm1144_vm7, %v5056_v16, 0 }
0x218e   : > { %10319 = vmatpush3.bf16.msra.mxu1 %v5061_v45 }
0x218f   : > { %10330 = vmatprep.subr.bf16.mxu1 %v11267_v49 }
0x2190   : > { %v5155_v37 = vpop.permute.xlu0 %5154 }
0x21af   : > { %v5036_v15 = vpop.xlane.xlu1 %5035 }
0x21b0   : > { %v5037_v26 = vmax.f32 %v5033_v22, %v5036_v15 }
0x21b2   : > { %v5038_v25 = vsub.f32 %v4982_v56, %v5037_v26  ;;  %v5041_v43 = vsub.f32 %v5025_v18, %v5037_v26 }
0x21b3   : > { %v5205_v30 = vpop.permute.xlu1 %5204 }
0x21b4   : > { %v5039_v14 = vmul.f32 1.442695, %v5038_v25  ;;  %v5042_v27 = vmul.f32 1.442695, %v5041_v43  ;;  %v5207_v35 = vsel %vm1022_vm3, %v5205_v30, 0 }
0x21b6   : > { %11030 = vpow2.f32 %v5039_v14 }
0x21b7   : > { %11032 = vpow2.f32 %v5042_v27 }
0x21c3   : > { %v12437_v28 = vpop.eup %11030 }
0x21c4   : > { %v12439_v32 = vpop.eup %11032  ;;  %v5052_v33 = vpack.c.bf16 %v12437_v28, %v12437_v28 }
0x21c5   : > { %v5053_v20 = vpack.c.bf16 %v12439_v32, %v12439_v32 }
0x21c6   : > { %10327 = vmatmul.mubr.msk.bf16.vlgmr.msra.gmra.mxu0 %vm1022_vm3, %v5052_v33 }
0x21c7   : > { %10321 = vmatmul.mubr.msk.bf16.vlgmr.msra.gmra.mxu1 %vm1140_vm8, %v5053_v20  ;;  %10337 = vmatpush3.bf16.xpose.msra.mxu0 %v5207_v35 }
0x21c8   : > { %10331 = vmatpush3.bf16.xpose.msra.mxu1 %v5162_v36  ;;  %10332 = vmatprep.mubr.msk.bf16.mxu1 %vm11268_vm2, %v11267_v49 }
0x21c9   : > { %10338 = vmatprep.mubr.msk.bf16.mxu0 %vm11268_vm2, %v11267_v49  ;;  %10342 = vmatprep.subr.bf16.mxu1 %v11267_v49 }
0x21ca   : > { %10348 = vmatprep.subr.bf16.mxu0 %v11267_v49 }
0x21ce   : > { %10339 = vmatmul.mubr.msk.bf16.vlgmr.msra.gmra.mxu0 %vm1022_vm3, %v5155_v37 }
0x21cf   : > { %10333 = vmatmul.mubr.msk.bf16.vlgmr.msra.gmra.mxu1 %vm1022_vm3, %v5155_v37  ;;  %10350 = vmatprep.mubr.msk.bf16.mxu0 %vm11268_vm2, %v11267_v49 }
0x21d0   : > { %10344 = vmatprep.mubr.msk.bf16.mxu1 %vm11268_vm2, %v11267_v49 }
0x2286   : > { %v5146_v62 = vpop.f32.mrf.mxu0 }
0x2287   : > { %v5097_v38 = vpop.f32.mrf.mxu1 }
0x2288   : > { %v12461_v39 = vadd.f32 %v5146_v62, %v5097_v38  ;;  %v10328_v1 = vpop.f32.mrf.mxu0 }
0x2289   : > { %v10322_v10 = vpop.f32.mrf.mxu1 }
0x228a   : > { %v5149_v2 = vpop.f32.mrf.mxu0 }
0x228b   : > { %v5100_v29 = vpop.f32.mrf.mxu1 }
0x228c   : > { %v10329_v40 = vpop.f32.mrf.mxu0 }
0x228d   : > { %v10323_v4 = vpop.f32.mrf.mxu1 }
0x228e   : > { %v5243_v61 = vpop.f32.mrf.mxu0 }
0x228f   : > { %v5198_v6 = vpop.f32.mrf.mxu1  ;;  %v5252_v5 = vsel %vm1116_vm6, %v5243_v61, -inf }
0x2290   : > { %v5249_v63 = vsel %vm1112_vm5, %v5198_v6, -inf  ;;  %5253 = vmax.xlane.f32.xlu0 %v5252_v5  ;;  %v10340_v8 = vpop.f32.mrf.mxu0 }
0x2291   : > { %5250 = vmax.xlane.f32.xlu1 %v5249_v63  ;;  %v10334_v17 = vpop.f32.mrf.mxu1 }
0x2292   : > { %v5246_v44 = vpop.f32.mrf.mxu0 }
0x2293   : > { %v5201_v0 = vpop.f32.mrf.mxu1 }
0x2294   : > { %v10341_v52 = vpop.f32.mrf.mxu0 }
0x2295   : > { %v10335_v53 = vpop.f32.mrf.mxu1 }
0x22a2   : > { %5320 = vrot.lane.b32.xlu1 %v12391_v24, %s13331_s22 }
0x22a6   : > { %5371 = vrot.lane.b32.xlu1 %v12391_v24, %s13332_s24  ;;  %5272 = vrot.lane.b32.xlu0 %v12412_v47, %s13331_s22 }
0x22aa   : > { %5369 = vrot.lane.b32.xlu1 %v12403_v34, %s13332_s24  ;;  %5419 = vrot.lane.b32.xlu0 %v12412_v47, %s13332_s24 }
0x22ae   : > { %5535 = vrot.lane.b32.xlu1 %v12391_v24, %s13323_s28 }
0x2319   : > { %v5254_v54 = vpop.xlane.xlu0 %5253 }
0x231a   : > { %v5251_v55 = vpop.xlane.xlu1 %5250 }
0x231b   : > { %v5255_v56 = vmax.f32 %v5251_v55, %v5254_v54 }
0x231d   : > { %v5256_v57 = vsub.f32 %v5198_v6, %v5255_v56  ;;  %v5259_v58 = vsub.f32 %v5243_v61, %v5255_v56  ;;  %v5273_v60 = vpop.permute.xlu0 %5272 }
0x231e   : > { %v5321_v3 = vpop.permute.xlu1 %5320  ;;  %v5278_v11 = vsel %vm1144_vm7, %v5273_v60, 0 }
0x231f   : > { %v5257_v13 = vmul.f32 1.442695, %v5256_v57  ;;  %v5260_v9 = vmul.f32 1.442695, %v5259_v58  ;;  %v5326_v18 = vsel %vm1194_vm4, %v5321_v3, 0  ;;  %10343 = vmatpush3.bf16.msra.mxu1 %v5278_v11 }
0x2320   : > { %10349 = vmatpush3.bf16.msra.mxu0 %v5326_v18  ;;  %10354 = vmatprep.subr.bf16.mxu1 %v11267_v49 }
0x2321   : > { %11034 = vpow2.f32 %v5257_v13  ;;  %10360 = vmatprep.subr.bf16.mxu0 %v11267_v49  ;;  %v5420_v7 = vpop.permute.xlu0 %5419 }
0x2322   : > { %11036 = vpow2.f32 %v5260_v9  ;;  %v5372_v48 = vpop.permute.xlu1 %5371  ;;  %v5422_v23 = vsel %vm1022_vm3, %v5420_v7, 0 }
0x2323   : > { %v5377_v15 = vsel %vm1022_vm3, %v5372_v48, 0 }
0x2326   : > { %v5370_v16 = vpop.permute.xlu1 %5369 }
0x232a   : > { %v5536_v26 = vpop.permute.xlu1 %5535 }
0x232b   : > { %v5541_v25 = vsel %vm1194_vm4, %v5536_v26, 0 }
0x232e   : > { %v12481_v19 = vpop.eup %11034 }
0x232f   : > { %v12483_v50 = vpop.eup %11036  ;;  %v5270_v22 = vpack.c.bf16 %v12481_v19, %v12481_v19 }
0x2330   : > { %v5271_v45 = vpack.c.bf16 %v12483_v50, %v12483_v50 }
0x2331   : > { %10351 = vmatmul.mubr.msk.bf16.vlgmr.msra.gmra.mxu0 %vm1022_vm3, %v5270_v22 }
0x2332   : > { %10345 = vmatmul.mubr.msk.bf16.vlgmr.msra.gmra.mxu1 %vm1140_vm8, %v5271_v45  ;;  %10361 = vmatpush3.bf16.xpose.msra.mxu0 %v5422_v23 }
0x2333   : > { %10355 = vmatpush3.bf16.xpose.msra.mxu1 %v5377_v15  ;;  %10356 = vmatprep.mubr.msk.bf16.mxu1 %vm11268_vm2, %v11267_v49 }
0x2334   : > { %10362 = vmatprep.mubr.msk.bf16.mxu0 %vm11268_vm2, %v11267_v49  ;;  %10372 = vmatprep.subr.bf16.mxu0 %v11267_v49 }
0x2335   : > { %10366 = vmatprep.subr.bf16.mxu1 %v11267_v49 }
0x2339   : > { %10363 = vmatmul.mubr.msk.bf16.vlgmr.msra.gmra.mxu0 %vm1022_vm3, %v5370_v16 }
0x233a   : > { %10357 = vmatmul.mubr.msk.bf16.vlgmr.msra.gmra.mxu1 %vm1022_vm3, %v5370_v16  ;;  %10373 = vmatpush3.bf16.msra.mxu0 %v5541_v25 }
0x233b   : > { %10368 = vmatprep.mubr.msk.bf16.mxu1 %vm11268_vm2, %v11267_v49  ;;  %10374 = vmatprep.mubr.msk.bf16.mxu0 %vm11268_vm2, %v11267_v49 }
0x233c   : > { %10384 = vmatprep.subr.bf16.mxu0 %v11267_v49 }
0x23f1   : > { %v5362_v43 = vpop.f32.mrf.mxu0 }
0x23f2   : > { %v5314_v14 = vpop.f32.mrf.mxu1 }
0x23f3   : > { %v12507_v27 = vadd.f32 %v5362_v43, %v5314_v14  ;;  %v10352_v30 = vpop.f32.mrf.mxu0 }
0x23f4   : > { %v10346_v33 = vpop.f32.mrf.mxu1 }
0x23f5   : > { %v5365_v20 = vpop.f32.mrf.mxu0 }
0x23f6   : > { %v5317_v35 = vpop.f32.mrf.mxu1 }
0x23f7   : > { %v10353_v36 = vpop.f32.mrf.mxu0 }
0x23f8   : > { %v10347_v37 = vpop.f32.mrf.mxu1 }
0x23f9   : > { %v5458_v62 = vpop.f32.mrf.mxu0 }
0x23fa   : > { %v5413_v38 = vpop.f32.mrf.mxu1  ;;  %v5467_v1 = vsel %vm1116_vm6, %v5458_v62, -inf }
0x23fb   : > { %v5464_v10 = vsel %vm1112_vm5, %v5413_v38, -inf  ;;  %5468 = vmax.xlane.f32.xlu1 %v5467_v1  ;;  %v10364_v2 = vpop.f32.mrf.mxu0 }
0x23fc   : > { %5465 = vmax.xlane.f32.xlu0 %v5464_v10  ;;  %v10358_v29 = vpop.f32.mrf.mxu1 }
0x23fd   : > { %v5461_v40 = vpop.f32.mrf.mxu0 }
0x23fe   : > { %v5416_v4 = vpop.f32.mrf.mxu1 }
0x23ff   : > { %v10365_v61 = vpop.f32.mrf.mxu0 }
0x2400   : > { %v10359_v6 = vpop.f32.mrf.mxu1 }
0x240c   : > { %5634 = vrot.lane.b32.xlu1 %v12412_v47, %s13324_s30 }
0x2412   : > { %5487 = vrot.lane.b32.xlu0 %v12412_v47, %s13323_s28 }
0x2416   : > { %5586 = vrot.lane.b32.xlu0 %v12391_v24, %s13324_s30 }
0x241a   : > { %5584 = vrot.lane.b32.xlu0 %v12403_v34, %s13324_s30 }
0x2484   : > { %v5469_v5 = vpop.xlane.xlu1 %5468 }
0x2485   : > { %v5466_v63 = vpop.xlane.xlu0 %5465 }
0x2486   : > { %v5470_v8 = vmax.f32 %v5466_v63, %v5469_v5 }
0x2488   : > { %v5471_v17 = vsub.f32 %v5413_v38, %v5470_v8  ;;  %v5474_v44 = vsub.f32 %v5458_v62, %v5470_v8  ;;  %v5635_v56 = vpop.permute.xlu1 %5634  ;;  %v5265_v62 = vsel %vm1116_vm6, %v12483_v50, 0.0  ;;  %v5262_v38 = vsel %vm1112_vm5, %v12481_v19, 0.0 }
0x2489   : > { %v5488_v0 = vpop.permute.xlu0 %5487  ;;  %v5637_v3 = vsel %vm1022_vm3, %v5635_v56, 0 }
0x248a   : > { %v5472_v52 = vmul.f32 1.442695, %v5471_v17  ;;  %v5475_v53 = vmul.f32 1.442695, %v5474_v44  ;;  %v5493_v54 = vsel %vm1144_vm7, %v5488_v0, 0 }
0x248b   : > { %10367 = vmatpush3.bf16.msra.mxu1 %v5493_v54  ;;  %v5044_v54 = vsel %vm1112_vm5, %v12437_v28, 0.0 }
0x248c   : > { %11038 = vpow2.f32 %v5472_v52  ;;  %10378 = vmatprep.subr.bf16.mxu1 %v11267_v49 }
0x248d   : > { %11040 = vpow2.f32 %v5475_v53  ;;  %v5587_v58 = vpop.permute.xlu0 %5586 }
0x248e   : > { %v5592_v11 = vsel %vm1022_vm3, %v5587_v58, 0 }
0x2491   : > { %v5585_v13 = vpop.permute.xlu0 %5584 }
0x2499   : > { %v11039_v55 = vpop.eup %11038 }
0x249a   : > { %v11041_v57 = vpop.eup %11040  ;;  %v5485_v34 = vpack.c.bf16 %v11039_v55, %v11039_v55  ;;  %v5477_v1 = vsel %vm1112_vm5, %v11039_v55, 0.0  ;;  %v5047_v55 = vsel %vm1116_vm6, %v12439_v32, 0.0  ;;  %v12573_v32 = vadd.f32 %v12145_v42, %v12033_v31  ;;  %v10881_v31 = vld [vmem:[%s13271_s11 + $0x10] sm:$0xff]  }
0x249b   : > { %v5486_v60 = vpack.c.bf16 %v11041_v57, %v11041_v57  ;;  %v5480_v10 = vsel %vm1116_vm6, %v11041_v57, 0.0 }
0x249c   : > { %10375 = vmatmul.mubr.msk.bf16.vlgmr.msra.gmra.mxu0 %vm1022_vm3, %v5485_v34 }
0x249d   : > { %10369 = vmatmul.mubr.msk.bf16.vlgmr.msra.gmra.mxu1 %vm1140_vm8, %v5486_v60  ;;  %10385 = vmatpush3.bf16.xpose.msra.mxu0 %v5637_v3 }
0x249e   : > { %10379 = vmatpush3.bf16.xpose.msra.mxu1 %v5592_v11  ;;  %10380 = vmatprep.mubr.msk.bf16.mxu1 %vm11268_vm2, %v11267_v49 }
0x249f   : > { %10386 = vmatprep.mubr.msk.bf16.mxu0 %vm11268_vm2, %v11267_v49  ;;  %10390 = vmatprep.subr.bf16.mxu1 %v11267_v49 }
0x24a0   : > { %10396 = vmatprep.subr.bf16.mxu0 %v11267_v49 }
0x24a4   : > { %10387 = vmatmul.mubr.msk.bf16.vlgmr.msra.gmra.mxu0 %vm1022_vm3, %v5585_v13 }
0x24a5   : > { %10381 = vmatmul.mubr.msk.bf16.vlgmr.msra.gmra.mxu1 %vm1022_vm3, %v5585_v13  ;;  %10398 = vmatprep.mubr.msk.bf16.mxu0 %vm11268_vm2, %v11267_v49 }
0x24a6   : > { %10392 = vmatprep.mubr.msk.bf16.mxu1 %vm11268_vm2, %v11267_v49 }
0x255c   : > { %v5577_v9 = vpop.f32.mrf.mxu0 }
0x255d   : > { %v5529_v18 = vpop.f32.mrf.mxu1 }
0x255e   : > { %v12537_v48 = vadd.f32 %v5577_v9, %v5529_v18  ;;  %v10376_v7 = vpop.f32.mrf.mxu0  ;;  %v6090_v18 = vsel %vm876_vm1, %v12573_v32, 0.0 }
0x255f   : > { %v10370_v22 = vpop.f32.mrf.mxu1  ;;  %v10880_v7 = vld [vmem:[%s13271_s11 + $0x18] sm:$0xff]  }
0x2560   : > { %v5580_v16 = vpop.f32.mrf.mxu0 }
0x2561   : > { %v5532_v45 = vpop.f32.mrf.mxu1 }
0x2562   : > { %v10377_v23 = vpop.f32.mrf.mxu0 }
0x2563   : > { %v10371_v15 = vpop.f32.mrf.mxu1 }
0x2564   : > { %v5673_v26 = vpop.f32.mrf.mxu0 }
0x2565   : > { %v5628_v25 = vpop.f32.mrf.mxu1  ;;  %v5682_v43 = vsel %vm1116_vm6, %v5673_v26, -inf }
0x2566   : > { %v5679_v14 = vsel %vm1112_vm5, %v5628_v25, -inf  ;;  %5683 = vmax.xlane.f32.xlu0 %v5682_v43  ;;  %v10388_v30 = vpop.f32.mrf.mxu0 }
0x2567   : > { %5680 = vmax.xlane.f32.xlu1 %v5679_v14  ;;  %v10382_v33 = vpop.f32.mrf.mxu1 }
0x2568   : > { %v5676_v20 = vpop.f32.mrf.mxu0 }
0x2569   : > { %v5631_v35 = vpop.f32.mrf.mxu1 }
0x256a   : > { %v10389_v36 = vpop.f32.mrf.mxu0 }
0x256b   : > { %v10383_v37 = vpop.f32.mrf.mxu1 }
0x2578   : > { %5750 = vrot.lane.b32.xlu1 %v12391_v24, %s13325_s1 }
0x257c   : > { %5702 = vrot.lane.b32.xlu0 %v12412_v47, %s13325_s1 }
0x259b   : > { %5266 = vadd.xlane.f32.xlu0 %v5265_v62 }
0x259c   : > { %5263 = vadd.xlane.f32.xlu1 %v5262_v38 }
0x259f   : > { %5478 = vadd.xlane.f32.xlu0 %v5477_v1 }
0x25a3   : > { %5481 = vadd.xlane.f32.xlu0 %v5480_v10 }
0x25ef   : > { %v5684_v2 = vpop.xlane.xlu0 %5683 }
0x25f0   : > { %v5681_v29 = vpop.xlane.xlu1 %5680 }
0x25f1   : > { %v5685_v40 = vmax.f32 %v5681_v29, %v5684_v2 }
0x25f3   : > { %v5686_v4 = vsub.f32 %v5628_v25, %v5685_v40  ;;  %v5689_v61 = vsub.f32 %v5673_v26, %v5685_v40  ;;  %v5703_v47 = vpop.permute.xlu0 %5702 }
0x25f4   : > { %v5751_v6 = vpop.permute.xlu1 %5750  ;;  %v5708_v50 = vsel %vm1144_vm7, %v5703_v47, 0 }
0x25f5   : > { %v5687_v5 = vmul.f32 1.442695, %v5686_v4  ;;  %v5690_v63 = vmul.f32 1.442695, %v5689_v61  ;;  %v5756_v19 = vsel %vm1194_vm4, %v5751_v6, 0  ;;  %10391 = vmatpush3.bf16.msra.mxu1 %v5708_v50 }
0x25f6   : > { %10397 = vmatpush3.bf16.msra.mxu0 %v5756_v19  ;;  %10402 = vmatprep.subr.bf16.mxu1 %v11267_v49 }
0x25f7   : > { %11042 = vpow2.f32 %v5687_v5  ;;  %10410 = vmatprep.subr.bf16.mxu0 %v11267_v49 }
0x25f8   : > { %11044 = vpow2.f32 %v5690_v63 }
0x2604   : > { %v11043_v8 = vpop.eup %11042 }
0x2605   : > { %v11045_v17 = vpop.eup %11044  ;;  %v5692_v44 = vsel %vm1112_vm5, %v11043_v8, 0.0  ;;  %v5700_v0 = vpack.c.bf16 %v11043_v8, %v11043_v8 }
0x2606   : > { %v5695_v52 = vsel %vm1116_vm6, %v11045_v17, 0.0  ;;  %5693 = vadd.xlane.f32.xlu1 %v5692_v44  ;;  %v5701_v53 = vpack.c.bf16 %v11045_v17, %v11045_v17 }
0x2607   : > { %5696 = vadd.xlane.f32.xlu0 %v5695_v52  ;;  %10399 = vmatmul.mubr.msk.bf16.vlgmr.msra.gmra.mxu0 %vm1022_vm3, %v5700_v0  ;;  %v12601_v0 = vrot.slane %v12391_v24, 4  ;;  %v10883_v24 = vld [vmem:[%s13272_s12 + $0x10] sm:$0xff]  }
0x2608   : > { %10393 = vmatmul.mubr.msk.bf16.vlgmr.msra.gmra.mxu1 %vm1140_vm8, %v5701_v53  ;;  %10414 = vmatprep.mubr.msk.bf16.mxu0 %vm11268_vm2, %v11267_v49 }
0x2609   : > { %10406 = vmatprep.mubr.msk.bf16.mxu1 %vm11268_vm2, %v11267_v49  ;;  %10403 = vmatpush3.bf16.msra.mxu1 %v10880_v7 }
0x260a   : > { %5045 = vadd.xlane.f32.xlu1 %v5044_v54  ;;  %10404 = vmatprep.subr.bf16.mxu1 %v11267_v49 }
0x260b   : > { %5048 = vadd.xlane.f32.xlu0 %v5047_v55 }
0x260d   : > { %10405 = vmatpush3.bf16.msra.mxu1 %v10881_v31 }
0x260e   : > { %10418 = vmatprep.subr.bf16.mxu1 %v11267_v49 }
0x2624   : > { %v5267_v56 = vpop.xlane.xlu0 %5266 }
0x2625   : > { %v5264_v57 = vpop.xlane.xlu1 %5263 }
0x2626   : > { %v5268_v58 = vadd.f32 %v5267_v56, %v5264_v57  ;;  %v10882_v56 = vld [vmem:[%s13272_s12 + $0x18] sm:$0xff]  }
0x2627   : > { %10411 = vmatpush3.bf16.msra.mxu0 %v10882_v56 }
0x2628   : > { %11046 = vrcp.f32 %v5268_v58  ;;  %v5479_v34 = vpop.xlane.xlu0 %5478  ;;  %10412 = vmatprep.subr.bf16.mxu0 %v11267_v49 }
0x262b   : > { %10413 = vmatpush3.bf16.msra.mxu0 %v10883_v24 }
0x262c   : > { %v5482_v60 = vpop.xlane.xlu0 %5481  ;;  %10438 = vmatprep.subr.bf16.mxu0 %v11267_v49 }
0x262d   : > { %v5483_v3 = vadd.f32 %v5482_v60, %v5479_v34 }
0x262f   : > { %11048 = vrcp.f32 %v5483_v3 }
0x2635   : > { %v11047_v11 = vpop.eup %11046 }
0x2636   : > { %v5368_v13 = vmul.f32 %v11047_v11, %v12507_v27 }
0x2638   : > { %5800 = vrot.lane.b32.xlu1 %v5368_v13, %s13326_s29 }
0x263c   : > { %v11049_v28 = vpop.eup %11048 }
0x263d   : > { %v5583_v9 = vmul.f32 %v11049_v28, %v12537_v48 }
0x263f   : > { %5804 = vrot.lane.b32.xlu0 %v5583_v9, %s13327_s25  ;;  %v10884_v9 = vld [vmem:[%s13265_s5 + $0x18] sm:$0xff]  }
0x265e   : > { %6091 = vadd.xlane.f32.xlu0 %v6090_v18 }
0x268f   : > { %v5694_v27 = vpop.xlane.xlu1 %5693 }
0x2690   : > { %v5697_v22 = vpop.xlane.xlu0 %5696 }
0x2691   : > { %v5698_v48 = vadd.f32 %v5697_v22, %v5694_v27  ;;  %v10885_v27 = vld [vmem:[%s13265_s5 + $0x10] sm:$0xff]  }
0x2693   : > { %11050 = vrcp.f32 %v5698_v48  ;;  %v5046_v20 = vpop.xlane.xlu1 %5045  ;;  %v10886_v48 = vld [vmem:[%s13269_s9 + $0x18] sm:$0xff]  }
0x2694   : > { %v5049_v35 = vpop.xlane.xlu0 %5048 }
0x2695   : > { %v5050_v36 = vadd.f32 %v5049_v35, %v5046_v20 }
0x2697   : > { %11052 = vrcp.f32 %v5050_v36 }
0x26a0   : > { %v11051_v15 = vpop.eup %11050 }
0x26a4   : > { %v11053_v37 = vpop.eup %11052 }
0x26a5   : > { %v5152_v38 = vmul.f32 %v11053_v37, %v12461_v39 }
0x26aa   : > { %v5801_v62 = vpop.permute.xlu1 %5800 }
0x26ab   : > { %v5811_v10 = vsel %vm1022_vm3, %v5152_v38, %v5801_v62 }
0x26b1   : > { %v5805_v1 = vpop.permute.xlu0 %5804 }
0x26b2   : > { %v5812_v2 = vsel %vm1898_vm9, %v5811_v10, %v5805_v1 }
0x26c7   : > { %v5792_v42 = vpop.f32.mrf.mxu0 }
0x26c8   : > { %v5744_v16 = vpop.f32.mrf.mxu1 }
0x26c9   : > { %v5793_v45 = vadd.f32 %v5792_v42, %v5744_v16  ;;  %v10400_v23 = vpop.f32.mrf.mxu0  ;;  %v10887_v42 = vld [vmem:[%s13269_s9 + $0x10] sm:$0xff]   ;;  %v6240_v16 = vsel %vm1022_vm3, %v12601_v0, 0 }
0x26ca   : > { %v10394_v26 = vpop.f32.mrf.mxu1  ;;  %v10889_v23 = vld [vmem:[%s13274_s14 + $0x70] sm:$0xff]  }
0x26cb   : > { %v5798_v25 = vmul.f32 %v11051_v15, %v5793_v45  ;;  %v5795_v43 = vpop.f32.mrf.mxu0  ;;  %v10888_v45 = vld [vmem:[%s13274_s14 + $0x78] sm:$0xff]   ;;  %v10890_v15 = vld [vmem:[%s13274_s14 + $0x68] sm:$0xff]   ;;  %v10891_v26 = vld [vmem:[%s13274_s14 + $0x60] sm:$0xff]  }
0x26cc   : > { %v5747_v14 = vpop.f32.mrf.mxu1  ;;  %v10893_v43 = vld [vmem:[%s13274_s14 + $0x50] sm:$0xff]  }
0x26cd   : > { %5808 = vrot.lane.b32.xlu1 %v5798_v25, %s13328_s27  ;;  %v10401_v30 = vpop.f32.mrf.mxu0  ;;  %v10892_v25 = vld [vmem:[%s13274_s14 + $0x58] sm:$0xff]   ;;  %v10894_v14 = vld [vmem:[%s13274_s14 + $0x48] sm:$0xff]  }
0x26ce   : > { %v10395_v33 = vpop.f32.mrf.mxu1  ;;  %v10895_v30 = vld [vmem:[%s13274_s14 + $0x40] sm:$0xff]  }
0x26cf   : > { %v12677_v33 = vld [vmem:[#allocation7 + $0x1] ss:$0 sm:$0xff] }
0x26e7   : > { %v6092_v61 = vpop.xlane.xlu0 %6091 }
0x26e8   : > { %v6093_v47 = vmul.f32 0.03125, %v6092_v61 }
0x26ea   : > { %v6094_v6 = vsub.f32 %v12573_v32, %v6093_v47 }
0x26ec   : > { %v6095_v19 = vmul.f32 %v6094_v6, %v6094_v6 }
0x26ee   : > { %v6096_v44 = vsel %vm876_vm1, %v6095_v19, 0.0 }
0x273f   : > { %v5809_v29 = vpop.permute.xlu1 %5808 }
0x2740   : > { %v5813_v40 = vsel %vm1900_vm10, %v5812_v2, %v5809_v29 }
0x2741   : > { %v5814_v4 = vpack.c.bf16 %v5813_v40, %v5813_v40 }
0x2743   : > { %10407 = vmatmul.mubr.msk.bf16.vlgmr.msra.gmra.mxu1 %vm691_vm0, %v5814_v4 }
0x2744   : > { %10434 = vmatprep.mubr.msk.bf16.mxu1 %vm11268_vm2, %v11267_v49  ;;  %10419 = vmatpush3.bf16.msra.mxu1 %v10888_v45 }
0x2745   : > { %10420 = vmatprep.subr.bf16.mxu1 %v11267_v49 }
0x2748   : > { %10421 = vmatpush3.bf16.msra.mxu1 %v10889_v23 }
0x2749   : > { %10422 = vmatprep.subr.bf16.mxu1 %v11267_v49 }
0x274c   : > { %10423 = vmatpush3.bf16.msra.mxu1 %v10890_v15 }
0x274d   : > { %10424 = vmatprep.subr.bf16.mxu1 %v11267_v49 }
0x2750   : > { %10425 = vmatpush3.bf16.msra.mxu1 %v10891_v26 }
0x2751   : > { %10426 = vmatprep.subr.bf16.mxu1 %v11267_v49 }
0x2754   : > { %10427 = vmatpush3.bf16.msra.mxu1 %v10892_v25 }
0x2755   : > { %10428 = vmatprep.subr.bf16.mxu1 %v11267_v49 }
0x2758   : > { %10429 = vmatpush3.bf16.msra.mxu1 %v10893_v43 }
0x2759   : > { %10430 = vmatprep.subr.bf16.mxu1 %v11267_v49 }
0x275c   : > { %10431 = vmatpush3.bf16.msra.mxu1 %v10894_v14 }
0x275d   : > { %10432 = vmatprep.subr.bf16.mxu1 %v11267_v49 }
0x2760   : > { %10433 = vmatpush3.bf16.msra.mxu1 %v10895_v30 }
0x2761   : > { %10466 = vmatprep.subr.bf16.mxu1 %v11267_v49 }
0x2803   : > { %v5869_v50 = vpop.f32.mrf.mxu1 }
0x2804   : > { %v12595_v39 = vadd.f32 %v5869_v50, %v12285_v12 }
0x2805   : > { %v10408_v5 = vpop.f32.mrf.mxu1 }
0x2806   : > { %v5875_v63 = vsel %vm876_vm1, %v12595_v39, 0.0 }
0x2807   : > { %5876 = vadd.xlane.f32.xlu1 %v5875_v63  ;;  %v5872_v8 = vpop.f32.mrf.mxu1 }
0x2809   : > { %v10409_v17 = vpop.f32.mrf.mxu1 }
0x280b   : > { %6097 = vadd.xlane.f32.xlu1 %v6096_v44 }
0x281c   : > { %6397 = vrot.lane.b32.xlu1 %v12601_v0, %s13329_s3 }
0x2820   : > { %6449 = vrot.lane.b32.xlu1 %v12601_v0, %s13330_s23 }
0x2890   : > { %v5877_v12 = vpop.xlane.xlu1 %5876 }
0x2891   : > { %v5878_v52 = vmul.f32 0.03125, %v5877_v12 }
0x2893   : > { %v5879_v53 = vsub.f32 %v12595_v39, %v5878_v52 }
0x2894   : > { %v6098_v57 = vpop.xlane.xlu1 %6097 }
0x2895   : > { %v5880_v54 = vmul.f32 %v5879_v53, %v5879_v53  ;;  %v6099_v34 = vmul.f32 0.03125, %v6098_v57 }
0x2897   : > { %v5881_v55 = vsel %vm876_vm1, %v5880_v54, 0.0  ;;  %v6100_v11 = vadd.f32 1e-05, %v6099_v34 }
0x2898   : > { %5882 = vadd.xlane.f32.xlu0 %v5881_v55  ;;  %v6398_v55 = vpop.permute.xlu1 %6397 }
0x2899   : > { %v6403_v24 = vsel %vm1194_vm4, %v6398_v55, 0 }
0x2921   : > { %v5883_v58 = vpop.xlane.xlu0 %5882 }
0x2922   : > { %v5884_v60 = vmul.f32 0.03125, %v5883_v58 }
0x2924   : > { %v5885_v3 = vadd.f32 1e-05, %v5884_v60 }
0x2926   : > { %11054 = vrsqrt.f32 %v5885_v3 }
0x2927   : > { %11056 = vrsqrt.f32 %v6100_v11 }
0x2933   : > { %v11055_v13 = vpop.eup %11054 }
0x2934   : > { %v5887_v28 = vmul.f32 %v11055_v13, %v5879_v53  ;;  %v11057_v7 = vpop.eup %11056 }
0x2935   : > { %v6102_v22 = vmul.f32 %v11057_v7, %v6094_v6 }
0x2936   : > { %v5888_v18 = vpack.c.bf16 %v5887_v28, %v5887_v28 }
0x2937   : > { %v6103_v31 = vpack.c.bf16 %v6102_v22, %v6102_v22 }
0x2938   : > { %10415 = vmatmul.mubr.msk.bf16.vlgmr.msra.gmra.mxu0 %vm691_vm0, %v5888_v18 }
0x2939   : > { %10439 = vmatpush3.bf16.msra.mxu0 %v10884_v9  ;;  %10442 = vmatprep.mubr.msk.bf16.mxu0 %vm11268_vm2, %v11267_v49 }
0x293a   : > { %10440 = vmatprep.subr.bf16.mxu0 %v11267_v49 }
0x293d   : > { %10441 = vmatpush3.bf16.msra.mxu0 %v10885_v27 }
0x293e   : > { %10446 = vmatprep.subr.bf16.mxu0 %v11267_v49 }
0x2940   : > { %10443 = vmatmul.mubr.msk.bf16.vlgmr.msra.gmra.mxu0 %vm691_vm0, %v6103_v31 }
0x2941   : > { %10447 = vmatpush3.bf16.msra.mxu0 %v10886_v48  ;;  %10450 = vmatprep.mubr.msk.bf16.mxu0 %vm11268_vm2, %v11267_v49 }
0x2942   : > { %10448 = vmatprep.subr.bf16.mxu0 %v11267_v49 }
0x2945   : > { %10449 = vmatpush3.bf16.msra.mxu0 %v10887_v42 }
0x2946   : > { %10454 = vmatprep.subr.bf16.mxu0 %v11267_v49 }
0x2948   : > { %10451 = vmatmul.mubr.msk.bf16.vlgmr.msra.gmra.mxu0 %vm691_vm0, %v6103_v31 }
0x2949   : > { %10455 = vmatpush3.bf16.xpose.msra.mxu0 %v6240_v16  ;;  %10456 = vmatprep.mubr.msk.bf16.mxu0 %vm11268_vm2, %v11267_v49 }
0x294a   : > { %10460 = vmatprep.subr.bf16.mxu0 %v11267_v49 }
0x29f8   : > { %v5951_v20 = vpop.f32.mrf.mxu0 }
0x29f9   : > { %v5952_v35 = vadd.f32 %v12677_v33, %v5951_v20 }
0x29fa   : > { %v10416_v36 = vpop.f32.mrf.mxu0 }
0x29fb   : > { %v5957_v37 = vmul.f32 0.70710677, %v5952_v35 }
0x29fc   : > { %v5954_v62 = vpop.f32.mrf.mxu0 }
0x29fd   : > { %v5958_v38 = vand.u32 2147483647, %v5957_v37  ;;  %vm5978_vm14 = vcmp.lt.f32.partialorder %v5957_v37, 0.0 }
0x29fe   : > { %v10417_v1 = vpop.f32.mrf.mxu0 }
0x29ff   : > { %v5959_v10 = vmul.f32 0.3275911, %v5958_v38  ;;  %v5972_v5 = vmul.f32 %v5958_v38, %v5958_v38 }
0x2a00   : > { %v6164_v2 = vpop.f32.mrf.mxu0 }
0x2a01   : > { %v5960_v29 = vadd.f32 1.0, %v5959_v10  ;;  %v6165_v40 = vadd.f32 %v12393_v51, %v6164_v2  ;;  %v5973_v17 = vsub.f32 0.0, %v5972_v5  ;;  %v6450_v10 = vpop.permute.xlu1 %6449 }
0x2a02   : > { %v10444_v4 = vpop.f32.mrf.mxu0 }
0x2a03   : > { %11058 = vrcp.f32 %v5960_v29  ;;  %v12681_v61 = vpack.c.bf16 %v6165_v40, %v6165_v40  ;;  %v5974_v54 = vmul.f32 1.442695, %v5973_v17 }
0x2a04   : > { %v6167_v47 = vpop.f32.mrf.mxu0 }
0x2a05   : > { %10457 = vmatmul.mubr.msk.bf16.vlgmr.msra.gmra.mxu0 %vm1022_vm3, %v12681_v61  ;;  %11060 = vpow2.f32 %v5974_v54 }
0x2a06   : > { %v10445_v6 = vpop.f32.mrf.mxu0  ;;  %10462 = vmatprep.mubr.msk.bf16.mxu0 %vm11268_vm2, %v11267_v49 }
0x2a08   : > { %v6227_v50 = vpop.f32.mrf.mxu0 }
0x2a09   : > { %v6228_v63 = vadd.f32 %v12409_v41, %v6227_v50 }
0x2a0a   : > { %v10452_v19 = vpop.f32.mrf.mxu0 }
0x2a0b   : > { %v12688_v8 = vpack.c.bf16 %v6228_v63, %v6228_v63 }
0x2a0c   : > { %v6230_v51 = vpop.f32.mrf.mxu0 }
0x2a0d   : > { %v6283_v44 = vsel %vm1022_vm3, %v12688_v8, 0 }
0x2a0e   : > { %v10453_v12 = vpop.f32.mrf.mxu0  ;;  %10461 = vmatpush3.bf16.xpose.msra.mxu0 %v6283_v44  ;;  %v6455_v44 = vsel %vm1022_vm3, %v6450_v10, 0 }
0x2a0f   : > { %10472 = vmatprep.subr.bf16.mxu0 %v11267_v49 }
0x2a10   : > { %v11059_v52 = vpop.eup %11058 }
0x2a11   : > { %v5963_v53 = vmul.f32 1.0614054, %v11059_v52 }
0x2a12   : > { %v11061_v13 = vpop.eup %11060 }
0x2a13   : > { %v5964_v56 = vadd.f32 -1.4531521, %v5963_v53 }
0x2a15   : > { %v5965_v41 = vmul.f32 %v11059_v52, %v5964_v56  ;;  %10463 = vmatmul.mubr.msk.bf16.vlgmr.msra.gmra.mxu0 %vm1022_vm3, %v12681_v61 }
0x2a16   : > { %10473 = vmatpush3.bf16.msra.mxu0 %v6403_v24  ;;  %10474 = vmatprep.mubr.msk.bf16.mxu0 %vm11268_vm2, %v11267_v49 }
0x2a17   : > { %v5966_v57 = vadd.f32 1.4214138, %v5965_v41  ;;  %10484 = vmatprep.subr.bf16.mxu0 %v11267_v49 }
0x2a19   : > { %v5967_v58 = vmul.f32 %v11059_v52, %v5966_v57 }
0x2a1b   : > { %v5968_v34 = vadd.f32 -0.28449672, %v5967_v58 }
0x2a1d   : > { %v5969_v60 = vmul.f32 %v11059_v52, %v5968_v34 }
0x2a1f   : > { %v5970_v3 = vadd.f32 0.2548296, %v5969_v60 }
0x2a21   : > { %v5971_v11 = vmul.f32 %v11059_v52, %v5970_v3 }
0x2a23   : > { %v5976_v28 = vmul.f32 %v11061_v13, %v5971_v11 }
0x2a25   : > { %v5977_v9 = vsub.f32 1.0, %v5976_v28 }
0x2a27   : > { %v5979_v18 = vsub.f32 0.0, %v5977_v9 }
0x2a29   : > { %v5980_v7 = vsel %vm5978_vm14, %v5979_v18, %v5977_v9 }
0x2a2a   : > { %v5981_v27 = vadd.f32 1.0, %v5980_v7 }
0x2a2c   : > { %v5982_v22 = vmul.f32 0.5, %v5981_v27 }
0x2a2e   : > { %v5983_v48 = vmul.f32 %v5982_v22, %v5952_v35 }
0x2a30   : > { %v5984_v31 = vpack.c.bf16 %v5983_v48, %v5983_v48 }
0x2a32   : > { %10435 = vmatmul.mubr.bf16.vlgmr.msra.gmra.mxu1 %v5984_v31 }
0x2a33   : > { %10468 = vmatprep.mubr.msk.bf16.mxu1 %vm11268_vm2, %v11267_v49 }
0x2ac5   : > { %v6276_v42 = vpop.f32.mrf.mxu0 }
0x2ac6   : > { %v6325_v16 = vsel %vm1112_vm5, %v6276_v42, -inf }
0x2ac7   : > { %6326 = vmax.xlane.f32.xlu0 %v6325_v16  ;;  %v10458_v45 = vpop.f32.mrf.mxu0 }
0x2ac9   : > { %v6279_v23 = vpop.f32.mrf.mxu0 }
0x2acb   : > { %v10459_v15 = vpop.f32.mrf.mxu0 }
0x2ad5   : > { %v6319_v26 = vpop.f32.mrf.mxu0 }
0x2ad6   : > { %v6328_v25 = vsel %vm1116_vm6, %v6319_v26, -inf }
0x2ad7   : > { %6329 = vmax.xlane.f32.xlu1 %v6328_v25  ;;  %v10464_v43 = vpop.f32.mrf.mxu0 }
0x2ad9   : > { %v6322_v14 = vpop.f32.mrf.mxu0 }
0x2adb   : > { %v10465_v30 = vpop.f32.mrf.mxu0 }
0x2add   : > { %6349 = vrot.lane.b32.xlu0 %v12688_v8, %s13329_s3 }
0x2ae1   : > { %6447 = vrot.lane.b32.xlu0 %v12681_v61, %s13330_s23 }
0x2ae8   : > { %6497 = vrot.lane.b32.xlu1 %v12688_v8, %s13330_s23 }
0x2af2   : > { %v12709_v20 = vpop.f32.mrf.mxu1 }
0x2af4   : > { %v10436_v35 = vpop.f32.mrf.mxu1 }
0x2af6   : > { %v6087_v36 = vpop.f32.mrf.mxu1 }
0x2af8   : > { %v10437_v37 = vpop.f32.mrf.mxu1 }
0x2b50   : > { %v6327_v62 = vpop.xlane.xlu0 %6326 }
0x2b54   : > { %v6350_v38 = vpop.permute.xlu0 %6349 }
0x2b55   : > { %v6355_v1 = vsel %vm1144_vm7, %v6350_v38, 0 }
0x2b56   : > { %10467 = vmatpush3.bf16.msra.mxu1 %v6355_v1 }
0x2b57   : > { %10478 = vmatprep.subr.bf16.mxu1 %v11267_v49 }
0x2b58   : > { %v6448_v12 = vpop.permute.xlu0 %6447 }
0x2b60   : > { %v6330_v2 = vpop.xlane.xlu1 %6329 }
0x2b61   : > { %v6331_v29 = vmax.f32 %v6327_v62, %v6330_v2 }
0x2b63   : > { %v6332_v40 = vsub.f32 %v6276_v42, %v6331_v29  ;;  %v6335_v4 = vsub.f32 %v6319_v26, %v6331_v29 }
0x2b64   : > { %v6498_v5 = vpop.permute.xlu1 %6497 }
0x2b65   : > { %v6333_v47 = vmul.f32 1.442695, %v6332_v40  ;;  %v6336_v6 = vmul.f32 1.442695, %v6335_v4  ;;  %v6500_v17 = vsel %vm1022_vm3, %v6498_v5, 0 }
0x2b67   : > { %11062 = vpow2.f32 %v6333_v47 }
0x2b68   : > { %11064 = vpow2.f32 %v6336_v6 }
0x2b74   : > { %v12713_v50 = vpop.eup %11062 }
0x2b75   : > { %v12715_v63 = vpop.eup %11064  ;;  %v6346_v19 = vpack.c.bf16 %v12713_v50, %v12713_v50 }
0x2b76   : > { %v6347_v51 = vpack.c.bf16 %v12715_v63, %v12715_v63 }
0x2b77   : > { %10475 = vmatmul.mubr.msk.bf16.vlgmr.msra.gmra.mxu0 %vm1022_vm3, %v6346_v19 }
0x2b78   : > { %10469 = vmatmul.mubr.msk.bf16.vlgmr.msra.gmra.mxu1 %vm1140_vm8, %v6347_v51  ;;  %10485 = vmatpush3.bf16.xpose.msra.mxu0 %v6500_v17 }
0x2b79   : > { %10479 = vmatpush3.bf16.xpose.msra.mxu1 %v6455_v44  ;;  %10480 = vmatprep.mubr.msk.bf16.mxu1 %vm11268_vm2, %v11267_v49 }
0x2b7a   : > { %10486 = vmatprep.mubr.msk.bf16.mxu0 %vm11268_vm2, %v11267_v49  ;;  %10490 = vmatprep.subr.bf16.mxu1 %v11267_v49 }
0x2b7b   : > { %10496 = vmatprep.subr.bf16.mxu0 %v11267_v49 }
0x2b7f   : > { %10487 = vmatmul.mubr.msk.bf16.vlgmr.msra.gmra.mxu0 %vm1022_vm3, %v6448_v12 }
0x2b80   : > { %10481 = vmatmul.mubr.msk.bf16.vlgmr.msra.gmra.mxu1 %vm1022_vm3, %v6448_v12  ;;  %10498 = vmatprep.mubr.msk.bf16.mxu0 %vm11268_vm2, %v11267_v49 }
0x2b81   : > { %10492 = vmatprep.mubr.msk.bf16.mxu1 %vm11268_vm2, %v11267_v49 }
0x2c37   : > { %v6439_v52 = vpop.f32.mrf.mxu0 }
0x2c38   : > { %v6391_v53 = vpop.f32.mrf.mxu1 }
0x2c39   : > { %v12737_v54 = vadd.f32 %v6439_v52, %v6391_v53  ;;  %v10476_v55 = vpop.f32.mrf.mxu0 }
0x2c3a   : > { %v10470_v56 = vpop.f32.mrf.mxu1 }
0x2c3b   : > { %v6442_v24 = vpop.f32.mrf.mxu0 }
0x2c3c   : > { %v6394_v41 = vpop.f32.mrf.mxu1 }
0x2c3d   : > { %v10477_v57 = vpop.f32.mrf.mxu0 }
0x2c3e   : > { %v10471_v58 = vpop.f32.mrf.mxu1 }
0x2c3f   : > { %v6536_v34 = vpop.f32.mrf.mxu0 }
0x2c40   : > { %v6491_v60 = vpop.f32.mrf.mxu1  ;;  %v6545_v3 = vsel %vm1116_vm6, %v6536_v34, -inf }
0x2c41   : > { %v6542_v11 = vsel %vm1112_vm5, %v6491_v60, -inf  ;;  %6546 = vmax.xlane.f32.xlu0 %v6545_v3  ;;  %v10488_v13 = vpop.f32.mrf.mxu0 }
0x2c42   : > { %6543 = vmax.xlane.f32.xlu1 %v6542_v11  ;;  %v10482_v28 = vpop.f32.mrf.mxu1 }
0x2c43   : > { %v6539_v9 = vpop.f32.mrf.mxu0 }
0x2c44   : > { %v6494_v18 = vpop.f32.mrf.mxu1 }
0x2c45   : > { %v10489_v7 = vpop.f32.mrf.mxu0 }
0x2c46   : > { %v10483_v27 = vpop.f32.mrf.mxu1 }
0x2c53   : > { %6613 = vrot.lane.b32.xlu1 %v12601_v0, %s13331_s22 }
0x2c57   : > { %6664 = vrot.lane.b32.xlu1 %v12601_v0, %s13332_s24  ;;  %6565 = vrot.lane.b32.xlu0 %v12688_v8, %s13331_s22 }
0x2c5b   : > { %6662 = vrot.lane.b32.xlu1 %v12681_v61, %s13332_s24  ;;  %6712 = vrot.lane.b32.xlu0 %v12688_v8, %s13332_s24 }
0x2c5f   : > { %6828 = vrot.lane.b32.xlu1 %v12601_v0, %s13323_s28 }
0x2cca   : > { %v6547_v22 = vpop.xlane.xlu0 %6546 }
0x2ccb   : > { %v6544_v48 = vpop.xlane.xlu1 %6543 }
0x2ccc   : > { %v6548_v31 = vmax.f32 %v6544_v48, %v6547_v22 }
0x2cce   : > { %v6549_v42 = vsub.f32 %v6491_v60, %v6548_v31  ;;  %v6552_v16 = vsub.f32 %v6536_v34, %v6548_v31  ;;  %v6566_v45 = vpop.permute.xlu0 %6565 }
0x2ccf   : > { %v6614_v23 = vpop.permute.xlu1 %6613  ;;  %v6571_v15 = vsel %vm1144_vm7, %v6566_v45, 0 }
0x2cd0   : > { %v6550_v26 = vmul.f32 1.442695, %v6549_v42  ;;  %v6553_v25 = vmul.f32 1.442695, %v6552_v16  ;;  %v6619_v43 = vsel %vm1194_vm4, %v6614_v23, 0  ;;  %10491 = vmatpush3.bf16.msra.mxu1 %v6571_v15 }
0x2cd1   : > { %10497 = vmatpush3.bf16.msra.mxu0 %v6619_v43  ;;  %10502 = vmatprep.subr.bf16.mxu1 %v11267_v49 }
0x2cd2   : > { %11066 = vpow2.f32 %v6550_v26  ;;  %10508 = vmatprep.subr.bf16.mxu0 %v11267_v49  ;;  %v6713_v35 = vpop.permute.xlu0 %6712 }
0x2cd3   : > { %11068 = vpow2.f32 %v6553_v25  ;;  %v6665_v14 = vpop.permute.xlu1 %6664  ;;  %v6715_v1 = vsel %vm1022_vm3, %v6713_v35, 0 }
0x2cd4   : > { %v6670_v10 = vsel %vm1022_vm3, %v6665_v14, 0 }
0x2cd7   : > { %v6663_v62 = vpop.permute.xlu1 %6662 }
0x2cdb   : > { %v6829_v2 = vpop.permute.xlu1 %6828 }
0x2cdc   : > { %v6834_v29 = vsel %vm1194_vm4, %v6829_v2, 0 }
0x2cdf   : > { %v12757_v30 = vpop.eup %11066 }
0x2ce0   : > { %v12759_v36 = vpop.eup %11068  ;;  %v6563_v37 = vpack.c.bf16 %v12757_v30, %v12757_v30 }
0x2ce1   : > { %v6564_v38 = vpack.c.bf16 %v12759_v36, %v12759_v36 }
0x2ce2   : > { %10499 = vmatmul.mubr.msk.bf16.vlgmr.msra.gmra.mxu0 %vm1022_vm3, %v6563_v37 }
0x2ce3   : > { %10493 = vmatmul.mubr.msk.bf16.vlgmr.msra.gmra.mxu1 %vm1140_vm8, %v6564_v38  ;;  %10509 = vmatpush3.bf16.xpose.msra.mxu0 %v6715_v1 }
0x2ce4   : > { %10503 = vmatpush3.bf16.xpose.msra.mxu1 %v6670_v10  ;;  %10504 = vmatprep.mubr.msk.bf16.mxu1 %vm11268_vm2, %v11267_v49 }
0x2ce5   : > { %10510 = vmatprep.mubr.msk.bf16.mxu0 %vm11268_vm2, %v11267_v49  ;;  %10520 = vmatprep.subr.bf16.mxu0 %v11267_v49 }
0x2ce6   : > { %10514 = vmatprep.subr.bf16.mxu1 %v11267_v49 }
0x2cea   : > { %10511 = vmatmul.mubr.msk.bf16.vlgmr.msra.gmra.mxu0 %vm1022_vm3, %v6663_v62 }
0x2ceb   : > { %10505 = vmatmul.mubr.msk.bf16.vlgmr.msra.gmra.mxu1 %vm1022_vm3, %v6663_v62  ;;  %10521 = vmatpush3.bf16.msra.mxu0 %v6834_v29 }
0x2cec   : > { %10516 = vmatprep.mubr.msk.bf16.mxu1 %vm11268_vm2, %v11267_v49  ;;  %10522 = vmatprep.mubr.msk.bf16.mxu0 %vm11268_vm2, %v11267_v49 }
0x2ced   : > { %10532 = vmatprep.subr.bf16.mxu0 %v11267_v49 }
0x2da2   : > { %v6655_v40 = vpop.f32.mrf.mxu0 }
0x2da3   : > { %v6607_v4 = vpop.f32.mrf.mxu1 }
0x2da4   : > { %v12783_v47 = vadd.f32 %v6655_v40, %v6607_v4  ;;  %v10500_v6 = vpop.f32.mrf.mxu0 }
0x2da5   : > { %v10494_v5 = vpop.f32.mrf.mxu1 }
0x2da6   : > { %v6658_v19 = vpop.f32.mrf.mxu0 }
0x2da7   : > { %v6610_v51 = vpop.f32.mrf.mxu1 }
0x2da8   : > { %v10501_v17 = vpop.f32.mrf.mxu0 }
0x2da9   : > { %v10495_v44 = vpop.f32.mrf.mxu1 }
0x2daa   : > { %v6751_v12 = vpop.f32.mrf.mxu0  ;;  %v6558_v44 = vsel %vm1116_vm6, %v12759_v36, 0.0 }
0x2dab   : > { %v6706_v52 = vpop.f32.mrf.mxu1  ;;  %v6760_v53 = vsel %vm1116_vm6, %v6751_v12, -inf }
0x2dac   : > { %v6757_v55 = vsel %vm1112_vm5, %v6706_v52, -inf  ;;  %6761 = vmax.xlane.f32.xlu1 %v6760_v53  ;;  %v10512_v56 = vpop.f32.mrf.mxu0 }
0x2dad   : > { %6758 = vmax.xlane.f32.xlu0 %v6757_v55  ;;  %v10506_v24 = vpop.f32.mrf.mxu1 }
0x2dae   : > { %v6754_v41 = vpop.f32.mrf.mxu0 }
0x2daf   : > { %v6709_v57 = vpop.f32.mrf.mxu1 }
0x2db0   : > { %v10513_v58 = vpop.f32.mrf.mxu0 }
0x2db1   : > { %v10507_v34 = vpop.f32.mrf.mxu1 }
0x2dbd   : > { %6927 = vrot.lane.b32.xlu1 %v12688_v8, %s13324_s30 }
0x2dc3   : > { %6780 = vrot.lane.b32.xlu0 %v12688_v8, %s13323_s28 }
0x2dc7   : > { %6879 = vrot.lane.b32.xlu0 %v12601_v0, %s13324_s30 }
0x2dcb   : > { %6877 = vrot.lane.b32.xlu0 %v12681_v61, %s13324_s30 }
0x2e35   : > { %v6762_v60 = vpop.xlane.xlu1 %6761 }
0x2e36   : > { %v6759_v3 = vpop.xlane.xlu0 %6758 }
0x2e37   : > { %v6763_v11 = vmax.f32 %v6759_v3, %v6762_v60 }
0x2e39   : > { %v6764_v13 = vsub.f32 %v6706_v52, %v6763_v11  ;;  %v6767_v28 = vsub.f32 %v6751_v12, %v6763_v11  ;;  %v6928_v48 = vpop.permute.xlu1 %6927  ;;  %v6555_v12 = vsel %vm1112_vm5, %v12757_v30, 0.0 }
0x2e3a   : > { %v6781_v9 = vpop.permute.xlu0 %6780  ;;  %v6930_v45 = vsel %vm1022_vm3, %v6928_v48, 0 }
0x2e3b   : > { %v6765_v18 = vmul.f32 1.442695, %v6764_v13  ;;  %v6768_v7 = vmul.f32 1.442695, %v6767_v28  ;;  %v6786_v27 = vsel %vm1144_vm7, %v6781_v9, 0 }
0x2e3c   : > { %10515 = vmatpush3.bf16.msra.mxu1 %v6786_v27 }
0x2e3d   : > { %11070 = vpow2.f32 %v6765_v18  ;;  %10526 = vmatprep.subr.bf16.mxu1 %v11267_v49  ;;  %v6338_v18 = vsel %vm1112_vm5, %v12713_v50, 0.0 }
0x2e3e   : > { %11072 = vpow2.f32 %v6768_v7  ;;  %v6880_v42 = vpop.permute.xlu0 %6879  ;;  %v6341_v7 = vsel %vm1116_vm6, %v12715_v63, 0.0  ;;  %v12849_v63 = vadd.f32 %v12430_v59, %v12307_v46  ;;  %v10897_v46 = vld [vmem:[%s13271_s11 + $0x10] sm:$0xff]  }
0x2e3f   : > { %v6885_v23 = vsel %vm1022_vm3, %v6880_v42, 0 }
0x2e42   : > { %v6878_v15 = vpop.permute.xlu0 %6877 }
0x2e4a   : > { %v11071_v22 = vpop.eup %11070 }
0x2e4b   : > { %v11073_v31 = vpop.eup %11072  ;;  %v6778_v61 = vpack.c.bf16 %v11071_v22, %v11071_v22  ;;  %v6770_v52 = vsel %vm1112_vm5, %v11071_v22, 0.0 }
0x2e4c   : > { %v6779_v16 = vpack.c.bf16 %v11073_v31, %v11073_v31  ;;  %v6773_v53 = vsel %vm1116_vm6, %v11073_v31, 0.0 }
0x2e4d   : > { %10523 = vmatmul.mubr.msk.bf16.vlgmr.msra.gmra.mxu0 %vm1022_vm3, %v6778_v61 }
0x2e4e   : > { %10517 = vmatmul.mubr.msk.bf16.vlgmr.msra.gmra.mxu1 %vm1140_vm8, %v6779_v16  ;;  %10533 = vmatpush3.bf16.xpose.msra.mxu0 %v6930_v45 }
0x2e4f   : > { %10527 = vmatpush3.bf16.xpose.msra.mxu1 %v6885_v23  ;;  %10528 = vmatprep.mubr.msk.bf16.mxu1 %vm11268_vm2, %v11267_v49 }
0x2e50   : > { %10534 = vmatprep.mubr.msk.bf16.mxu0 %vm11268_vm2, %v11267_v49  ;;  %10538 = vmatprep.subr.bf16.mxu1 %v11267_v49 }
0x2e51   : > { %10544 = vmatprep.subr.bf16.mxu0 %v11267_v49 }
0x2e55   : > { %10535 = vmatmul.mubr.msk.bf16.vlgmr.msra.gmra.mxu0 %vm1022_vm3, %v6878_v15 }
0x2e56   : > { %10529 = vmatmul.mubr.msk.bf16.vlgmr.msra.gmra.mxu1 %vm1022_vm3, %v6878_v15  ;;  %10546 = vmatprep.mubr.msk.bf16.mxu0 %vm11268_vm2, %v11267_v49  ;;  %v7379_v15 = vsel %vm876_vm1, %v12849_v63, 0.0 }
0x2e57   : > { %10540 = vmatprep.mubr.msk.bf16.mxu1 %vm11268_vm2, %v11267_v49 }
0x2f0d   : > { %v6870_v26 = vpop.f32.mrf.mxu0 }
0x2f0e   : > { %v6822_v25 = vpop.f32.mrf.mxu1 }
0x2f0f   : > { %v12813_v43 = vadd.f32 %v6870_v26, %v6822_v25  ;;  %v10524_v14 = vpop.f32.mrf.mxu0  ;;  %v10896_v26 = vld [vmem:[%s13271_s11 + $0x18] sm:$0xff]  }
0x2f10   : > { %v10518_v35 = vpop.f32.mrf.mxu1 }
0x2f11   : > { %v6873_v37 = vpop.f32.mrf.mxu0 }
0x2f12   : > { %v6825_v62 = vpop.f32.mrf.mxu1 }
0x2f13   : > { %v10525_v38 = vpop.f32.mrf.mxu0 }
0x2f14   : > { %v10519_v1 = vpop.f32.mrf.mxu1 }
0x2f15   : > { %v6966_v10 = vpop.f32.mrf.mxu0 }
0x2f16   : > { %v6921_v2 = vpop.f32.mrf.mxu1  ;;  %v6975_v29 = vsel %vm1116_vm6, %v6966_v10, -inf }
0x2f17   : > { %v6972_v40 = vsel %vm1112_vm5, %v6921_v2, -inf  ;;  %6976 = vmax.xlane.f32.xlu0 %v6975_v29  ;;  %v10536_v4 = vpop.f32.mrf.mxu0 }
0x2f18   : > { %6973 = vmax.xlane.f32.xlu1 %v6972_v40  ;;  %v10530_v6 = vpop.f32.mrf.mxu1 }
0x2f19   : > { %v6969_v5 = vpop.f32.mrf.mxu0 }
0x2f1a   : > { %v6924_v19 = vpop.f32.mrf.mxu1 }
0x2f1b   : > { %v10537_v51 = vpop.f32.mrf.mxu0 }
0x2f1c   : > { %v10531_v17 = vpop.f32.mrf.mxu1 }
0x2f29   : > { %7043 = vrot.lane.b32.xlu1 %v12601_v0, %s13325_s1 }
0x2f2d   : > { %6995 = vrot.lane.b32.xlu0 %v12688_v8, %s13325_s1 }
0x2f4c   : > { %6559 = vadd.xlane.f32.xlu0 %v6558_v44 }
0x2f4d   : > { %6556 = vadd.xlane.f32.xlu1 %v6555_v12 }
0x2f50   : > { %6771 = vadd.xlane.f32.xlu0 %v6770_v52 }
0x2f54   : > { %6774 = vadd.xlane.f32.xlu0 %v6773_v53 }
0x2fa0   : > { %v6977_v55 = vpop.xlane.xlu0 %6976 }
0x2fa1   : > { %v6974_v56 = vpop.xlane.xlu1 %6973 }
0x2fa2   : > { %v6978_v0 = vmax.f32 %v6974_v56, %v6977_v55 }
0x2fa4   : > { %v6979_v24 = vsub.f32 %v6921_v2, %v6978_v0  ;;  %v6982_v41 = vsub.f32 %v6966_v10, %v6978_v0  ;;  %v6996_v8 = vpop.permute.xlu0 %6995 }
0x2fa5   : > { %v7044_v57 = vpop.permute.xlu1 %7043  ;;  %v7001_v36 = vsel %vm1144_vm7, %v6996_v8, 0 }
0x2fa6   : > { %v6980_v58 = vmul.f32 1.442695, %v6979_v24  ;;  %v6983_v34 = vmul.f32 1.442695, %v6982_v41  ;;  %v7049_v30 = vsel %vm1194_vm4, %v7044_v57, 0  ;;  %10539 = vmatpush3.bf16.msra.mxu1 %v7001_v36 }
0x2fa7   : > { %10545 = vmatpush3.bf16.msra.mxu0 %v7049_v30  ;;  %10550 = vmatprep.subr.bf16.mxu1 %v11267_v49 }
0x2fa8   : > { %11074 = vpow2.f32 %v6980_v58  ;;  %10558 = vmatprep.subr.bf16.mxu0 %v11267_v49 }
0x2fa9   : > { %11076 = vpow2.f32 %v6983_v34 }
0x2fb5   : > { %v11075_v60 = vpop.eup %11074 }
0x2fb6   : > { %v11077_v3 = vpop.eup %11076  ;;  %v6985_v11 = vsel %vm1112_vm5, %v11075_v60, 0.0  ;;  %v6993_v13 = vpack.c.bf16 %v11075_v60, %v11075_v60 }
0x2fb7   : > { %v6988_v28 = vsel %vm1116_vm6, %v11077_v3, 0.0  ;;  %6986 = vadd.xlane.f32.xlu1 %v6985_v11  ;;  %v6994_v9 = vpack.c.bf16 %v11077_v3, %v11077_v3  ;;  %v12878_v3 = vpack.c.bf16 %v12389_v21, %v12389_v21  ;;  %v10899_v21 = vld [vmem:[%s13272_s12 + $0x10] sm:$0xff]  }
0x2fb8   : > { %6989 = vadd.xlane.f32.xlu0 %v6988_v28  ;;  %10547 = vmatmul.mubr.msk.bf16.vlgmr.msra.gmra.mxu0 %vm1022_vm3, %v6993_v13 }
0x2fb9   : > { %10541 = vmatmul.mubr.msk.bf16.vlgmr.msra.gmra.mxu1 %vm1140_vm8, %v6994_v9  ;;  %10562 = vmatprep.mubr.msk.bf16.mxu0 %vm11268_vm2, %v11267_v49 }
0x2fba   : > { %10554 = vmatprep.mubr.msk.bf16.mxu1 %vm11268_vm2, %v11267_v49  ;;  %10551 = vmatpush3.bf16.msra.mxu1 %v10896_v26 }
0x2fbb   : > { %6339 = vadd.xlane.f32.xlu1 %v6338_v18  ;;  %10552 = vmatprep.subr.bf16.mxu1 %v11267_v49  ;;  %v10898_v18 = vld [vmem:[%s13272_s12 + $0x18] sm:$0xff]  }
0x2fbc   : > { %6342 = vadd.xlane.f32.xlu0 %v6341_v7  ;;  %10559 = vmatpush3.bf16.msra.mxu0 %v10898_v18 }
0x2fbd   : > { %10560 = vmatprep.subr.bf16.mxu0 %v11267_v49 }
0x2fbe   : > { %10553 = vmatpush3.bf16.msra.mxu1 %v10897_v46  ;;  %v7528_v46 = vsel %vm1022_vm3, %v12878_v3, 0 }
0x2fbf   : > { %10566 = vmatprep.subr.bf16.mxu1 %v11267_v49 }
0x2fc0   : > { %10561 = vmatpush3.bf16.msra.mxu0 %v10899_v21 }
0x2fc1   : > { %10586 = vmatprep.subr.bf16.mxu0 %v11267_v49 }
0x2fd5   : > { %v6560_v27 = vpop.xlane.xlu0 %6559 }
0x2fd6   : > { %v6557_v22 = vpop.xlane.xlu1 %6556 }
0x2fd7   : > { %v6561_v48 = vadd.f32 %v6560_v27, %v6557_v22 }
0x2fd9   : > { %11078 = vrcp.f32 %v6561_v48  ;;  %v6772_v31 = vpop.xlane.xlu0 %6771 }
0x2fdd   : > { %v6775_v42 = vpop.xlane.xlu0 %6774 }
0x2fde   : > { %v6776_v61 = vadd.f32 %v6775_v42, %v6772_v31 }
0x2fe0   : > { %11080 = vrcp.f32 %v6776_v61 }
0x2fe6   : > { %v11079_v16 = vpop.eup %11078 }
0x2fe7   : > { %v6661_v45 = vmul.f32 %v11079_v16, %v12783_v47 }
0x2fe9   : > { %7093 = vrot.lane.b32.xlu1 %v6661_v45, %s13326_s29  ;;  %v10900_v45 = vld [vmem:[%s13265_s5 + $0x18] sm:$0xff]  }
0x2fed   : > { %v11081_v50 = vpop.eup %11080 }
0x2fee   : > { %v6876_v23 = vmul.f32 %v11081_v50, %v12813_v43 }
0x2ff0   : > { %7097 = vrot.lane.b32.xlu0 %v6876_v23, %s13327_s25 }
0x300f   : > { %7380 = vadd.xlane.f32.xlu0 %v7379_v15  ;;  %v10901_v15 = vld [vmem:[%s13265_s5 + $0x10] sm:$0xff]  }
0x3040   : > { %v6987_v47 = vpop.xlane.xlu1 %6986 }
0x3041   : > { %v6990_v25 = vpop.xlane.xlu0 %6989 }
0x3042   : > { %v6991_v43 = vadd.f32 %v6990_v25, %v6987_v47  ;;  %v10902_v47 = vld [vmem:[%s13269_s9 + $0x18] sm:$0xff]  }
0x3044   : > { %11082 = vrcp.f32 %v6991_v43  ;;  %v6340_v4 = vpop.xlane.xlu1 %6339  ;;  %v10903_v43 = vld [vmem:[%s13269_s9 + $0x10] sm:$0xff]  }
0x3045   : > { %v6343_v6 = vpop.xlane.xlu0 %6342 }
0x3046   : > { %v6344_v5 = vadd.f32 %v6343_v6, %v6340_v4 }
0x3048   : > { %11084 = vrcp.f32 %v6344_v5 }
0x3051   : > { %v11083_v62 = vpop.eup %11082 }
0x3055   : > { %v11085_v19 = vpop.eup %11084 }
0x3056   : > { %v6445_v17 = vmul.f32 %v11085_v19, %v12737_v54 }
0x305b   : > { %v7094_v51 = vpop.permute.xlu1 %7093 }
0x305c   : > { %v7104_v12 = vsel %vm1022_vm3, %v6445_v17, %v7094_v51  ;;  %v9395_v51 = vld [vmem:[#allocation2 + $0x1] ss:$0 sm:$0xff] }
0x3062   : > { %v7098_v44 = vpop.permute.xlu0 %7097 }
0x3063   : > { %v7105_v52 = vsel %vm1898_vm9, %v7104_v12, %v7098_v44 }
0x3078   : > { %v7085_v59 = vpop.f32.mrf.mxu0 }
0x3079   : > { %v7037_v14 = vpop.f32.mrf.mxu1 }
0x307a   : > { %v7086_v35 = vadd.f32 %v7085_v59, %v7037_v14  ;;  %v10548_v37 = vpop.f32.mrf.mxu0  ;;  %v10904_v59 = vld [vmem:[%s13274_s14 + $0x78] sm:$0xff]   ;;  %v10905_v14 = vld [vmem:[%s13274_s14 + $0x70] sm:$0xff]  }
0x307b   : > { %v10542_v38 = vpop.f32.mrf.mxu1  ;;  %v10907_v37 = vld [vmem:[%s13274_s14 + $0x60] sm:$0xff]  }
0x307c   : > { %v7091_v1 = vmul.f32 %v11083_v62, %v7086_v35  ;;  %v7088_v10 = vpop.f32.mrf.mxu0  ;;  %v10906_v35 = vld [vmem:[%s13274_s14 + $0x68] sm:$0xff]   ;;  %v10908_v62 = vld [vmem:[%s13274_s14 + $0x58] sm:$0xff]   ;;  %v10909_v38 = vld [vmem:[%s13274_s14 + $0x50] sm:$0xff]  }
0x307d   : > { %v7040_v2 = vpop.f32.mrf.mxu1  ;;  %v10911_v10 = vld [vmem:[%s13274_s14 + $0x40] sm:$0xff]  }
0x307e   : > { %7101 = vrot.lane.b32.xlu1 %v7091_v1, %s13328_s27  ;;  %v10549_v29 = vpop.f32.mrf.mxu0  ;;  %v10910_v1 = vld [vmem:[%s13274_s14 + $0x48] sm:$0xff]  }
0x307f   : > { %v10543_v40 = vpop.f32.mrf.mxu1 }
0x3098   : > { %v7381_v0 = vpop.xlane.xlu0 %7380 }
0x3099   : > { %v7382_v24 = vmul.f32 0.03125, %v7381_v0 }
0x309b   : > { %v7383_v41 = vsub.f32 %v12849_v63, %v7382_v24 }
0x309d   : > { %v7384_v58 = vmul.f32 %v7383_v41, %v7383_v41 }
0x309f   : > { %v7385_v60 = vsel %vm876_vm1, %v7384_v58, 0.0 }
0x30f0   : > { %v7102_v53 = vpop.permute.xlu1 %7101 }
0x30f1   : > { %v7106_v55 = vsel %vm1900_vm10, %v7105_v52, %v7102_v53 }
0x30f2   : > { %v7107_v56 = vpack.c.bf16 %v7106_v55, %v7106_v55 }
0x30f4   : > { %10555 = vmatmul.mubr.msk.bf16.vlgmr.msra.gmra.mxu1 %vm691_vm0, %v7107_v56 }
0x30f5   : > { %10582 = vmatprep.mubr.msk.bf16.mxu1 %vm11268_vm2, %v11267_v49  ;;  %10567 = vmatpush3.bf16.msra.mxu1 %v10904_v59 }
0x30f6   : > { %10568 = vmatprep.subr.bf16.mxu1 %v11267_v49 }
0x30f9   : > { %10569 = vmatpush3.bf16.msra.mxu1 %v10905_v14 }
0x30fa   : > { %10570 = vmatprep.subr.bf16.mxu1 %v11267_v49 }
0x30fd   : > { %10571 = vmatpush3.bf16.msra.mxu1 %v10906_v35 }
0x30fe   : > { %10572 = vmatprep.subr.bf16.mxu1 %v11267_v49 }
0x3101   : > { %10573 = vmatpush3.bf16.msra.mxu1 %v10907_v37 }
0x3102   : > { %10574 = vmatprep.subr.bf16.mxu1 %v11267_v49 }
0x3105   : > { %10575 = vmatpush3.bf16.msra.mxu1 %v10908_v62 }
0x3106   : > { %10576 = vmatprep.subr.bf16.mxu1 %v11267_v49 }
0x3109   : > { %10577 = vmatpush3.bf16.msra.mxu1 %v10909_v38 }
0x310a   : > { %10578 = vmatprep.subr.bf16.mxu1 %v11267_v49 }
0x310d   : > { %10579 = vmatpush3.bf16.msra.mxu1 %v10910_v1 }
0x310e   : > { %10580 = vmatprep.subr.bf16.mxu1 %v11267_v49 }
0x3111   : > { %10581 = vmatpush3.bf16.msra.mxu1 %v10911_v10 }
0x3112   : > { %10614 = vmatprep.subr.bf16.mxu1 %v11267_v49 }
0x31b4   : > { %v7161_v8 = vpop.f32.mrf.mxu1 }
0x31b5   : > { %v12871_v54 = vadd.f32 %v7161_v8, %v12573_v32 }
0x31b6   : > { %v10556_v57 = vpop.f32.mrf.mxu1 }
0x31b7   : > { %v7167_v36 = vsel %vm876_vm1, %v12871_v54, 0.0 }
0x31b8   : > { %7168 = vadd.xlane.f32.xlu1 %v7167_v36  ;;  %v7164_v34 = vpop.f32.mrf.mxu1 }
0x31ba   : > { %v10557_v30 = vpop.f32.mrf.mxu1 }
0x31bc   : > { %7386 = vadd.xlane.f32.xlu1 %v7385_v60 }
0x31cd   : > { %7686 = vrot.lane.b32.xlu1 %v12878_v3, %s13329_s3 }
0x31d1   : > { %7738 = vrot.lane.b32.xlu1 %v12878_v3, %s13330_s23 }
0x3241   : > { %v7169_v32 = vpop.xlane.xlu1 %7168 }
0x3242   : > { %v7170_v11 = vmul.f32 0.03125, %v7169_v32 }
0x3244   : > { %v7171_v13 = vsub.f32 %v12871_v54, %v7170_v11 }
0x3245   : > { %v7387_v7 = vpop.xlane.xlu1 %7386 }
0x3246   : > { %v7172_v28 = vmul.f32 %v7171_v13, %v7171_v13  ;;  %v7388_v22 = vmul.f32 0.03125, %v7387_v7 }
0x3248   : > { %v7173_v9 = vsel %vm876_vm1, %v7172_v28, 0.0  ;;  %v7389_v42 = vadd.f32 1e-05, %v7388_v22 }
0x3249   : > { %7174 = vadd.xlane.f32.xlu0 %v7173_v9  ;;  %v7687_v28 = vpop.permute.xlu1 %7686 }
0x324a   : > { %v7692_v18 = vsel %vm1194_vm4, %v7687_v28, 0 }
0x32d2   : > { %v7175_v27 = vpop.xlane.xlu0 %7174 }
0x32d3   : > { %v7176_v48 = vmul.f32 0.03125, %v7175_v27 }
0x32d5   : > { %v7177_v31 = vadd.f32 1e-05, %v7176_v48 }
0x32d7   : > { %11086 = vrsqrt.f32 %v7177_v31 }
0x32d8   : > { %11088 = vrsqrt.f32 %v7389_v42 }
0x32e4   : > { %v11087_v61 = vpop.eup %11086 }
0x32e5   : > { %v7179_v16 = vmul.f32 %v11087_v61, %v7171_v13  ;;  %v11089_v23 = vpop.eup %11088 }
0x32e6   : > { %v7391_v26 = vmul.f32 %v11089_v23, %v7383_v41 }
0x32e7   : > { %v7180_v50 = vpack.c.bf16 %v7179_v16, %v7179_v16 }
0x32e8   : > { %v7392_v25 = vpack.c.bf16 %v7391_v26, %v7391_v26 }
0x32e9   : > { %10563 = vmatmul.mubr.msk.bf16.vlgmr.msra.gmra.mxu0 %vm691_vm0, %v7180_v50 }
0x32ea   : > { %10587 = vmatpush3.bf16.msra.mxu0 %v10900_v45  ;;  %10590 = vmatprep.mubr.msk.bf16.mxu0 %vm11268_vm2, %v11267_v49 }
0x32eb   : > { %10588 = vmatprep.subr.bf16.mxu0 %v11267_v49 }
0x32ee   : > { %10589 = vmatpush3.bf16.msra.mxu0 %v10901_v15 }
0x32ef   : > { %10594 = vmatprep.subr.bf16.mxu0 %v11267_v49 }
0x32f1   : > { %10591 = vmatmul.mubr.msk.bf16.vlgmr.msra.gmra.mxu0 %vm691_vm0, %v7392_v25 }
0x32f2   : > { %10595 = vmatpush3.bf16.msra.mxu0 %v10902_v47  ;;  %10598 = vmatprep.mubr.msk.bf16.mxu0 %vm11268_vm2, %v11267_v49 }
0x32f3   : > { %10596 = vmatprep.subr.bf16.mxu0 %v11267_v49 }
0x32f6   : > { %10597 = vmatpush3.bf16.msra.mxu0 %v10903_v43 }
0x32f7   : > { %10602 = vmatprep.subr.bf16.mxu0 %v11267_v49 }
0x32f9   : > { %10599 = vmatmul.mubr.msk.bf16.vlgmr.msra.gmra.mxu0 %vm691_vm0, %v7392_v25 }
0x32fa   : > { %10603 = vmatpush3.bf16.xpose.msra.mxu0 %v7528_v46  ;;  %10604 = vmatprep.mubr.msk.bf16.mxu0 %vm11268_vm2, %v11267_v49 }
0x32fb   : > { %10608 = vmatprep.subr.bf16.mxu0 %v11267_v49 }
0x33a9   : > { %v7241_v2 = vpop.f32.mrf.mxu0 }
0x33aa   : > { %v7242_v29 = vadd.f32 %v12677_v33, %v7241_v2  ;;  %v9403_v33 = vld [vmem:[#allocation6 + $0x1] ss:$0 sm:$0xff] }
0x33ab   : > { %v10564_v40 = vpop.f32.mrf.mxu0 }
0x33ac   : > { %v7247_v4 = vmul.f32 0.70710677, %v7242_v29 }
0x33ad   : > { %v7244_v6 = vpop.f32.mrf.mxu0 }
0x33ae   : > { %v7248_v5 = vand.u32 2147483647, %v7247_v4  ;;  %vm7268_vm15 = vcmp.lt.f32.partialorder %v7247_v4, 0.0 }
0x33af   : > { %v10565_v19 = vpop.f32.mrf.mxu0 }
0x33b0   : > { %v7249_v17 = vmul.f32 0.3275911, %v7248_v5  ;;  %v7262_v41 = vmul.f32 %v7248_v5, %v7248_v5 }
0x33b1   : > { %v7453_v44 = vpop.f32.mrf.mxu0 }
0x33b2   : > { %v7250_v12 = vadd.f32 1.0, %v7249_v17  ;;  %v7454_v52 = vadd.f32 %v9395_v51, %v7453_v44  ;;  %v7263_v34 = vsub.f32 0.0, %v7262_v41  ;;  %v7739_v51 = vpop.permute.xlu1 %7738 }
0x33b3   : > { %v10592_v53 = vpop.f32.mrf.mxu0 }
0x33b4   : > { %11090 = vrcp.f32 %v7250_v12  ;;  %v12955_v55 = vpack.c.bf16 %v7454_v52, %v7454_v52  ;;  %v7264_v13 = vmul.f32 1.442695, %v7263_v34 }
0x33b5   : > { %v7456_v56 = vpop.f32.mrf.mxu0 }
0x33b6   : > { %10605 = vmatmul.mubr.msk.bf16.vlgmr.msra.gmra.mxu0 %vm1022_vm3, %v12955_v55  ;;  %11092 = vpow2.f32 %v7264_v13 }
0x33b7   : > { %v10593_v0 = vpop.f32.mrf.mxu0  ;;  %10610 = vmatprep.mubr.msk.bf16.mxu0 %vm11268_vm2, %v11267_v49 }
0x33b9   : > { %v7516_v24 = vpop.f32.mrf.mxu0 }
0x33ba   : > { %v7517_v8 = vadd.f32 %v9403_v33, %v7516_v24 }
0x33bb   : > { %v10600_v57 = vpop.f32.mrf.mxu0 }
0x33bc   : > { %v12961_v36 = vpack.c.bf16 %v7517_v8, %v7517_v8 }
0x33bd   : > { %v7519_v58 = vpop.f32.mrf.mxu0 }
0x33be   : > { %v7571_v30 = vsel %vm1022_vm3, %v12961_v36, 0  ;;  %v7744_v58 = vsel %vm1022_vm3, %v7739_v51, 0 }
0x33bf   : > { %v10601_v60 = vpop.f32.mrf.mxu0  ;;  %10609 = vmatpush3.bf16.xpose.msra.mxu0 %v7571_v30 }
0x33c0   : > { %10620 = vmatprep.subr.bf16.mxu0 %v11267_v49 }
0x33c1   : > { %v11091_v32 = vpop.eup %11090 }
0x33c2   : > { %v7253_v11 = vmul.f32 1.0614054, %v11091_v32 }
0x33c3   : > { %v11093_v61 = vpop.eup %11092 }
0x33c4   : > { %v7254_v9 = vadd.f32 -1.4531521, %v7253_v11 }
0x33c6   : > { %v7255_v21 = vmul.f32 %v11091_v32, %v7254_v9  ;;  %10611 = vmatmul.mubr.msk.bf16.vlgmr.msra.gmra.mxu0 %vm1022_vm3, %v12955_v55 }
0x33c7   : > { %10621 = vmatpush3.bf16.msra.mxu0 %v7692_v18  ;;  %10622 = vmatprep.mubr.msk.bf16.mxu0 %vm11268_vm2, %v11267_v49 }
0x33c8   : > { %v7256_v7 = vadd.f32 1.4214138, %v7255_v21  ;;  %10632 = vmatprep.subr.bf16.mxu0 %v11267_v49 }
0x33ca   : > { %v7257_v27 = vmul.f32 %v11091_v32, %v7256_v7 }
0x33cc   : > { %v7258_v22 = vadd.f32 -0.28449672, %v7257_v27 }
0x33ce   : > { %v7259_v48 = vmul.f32 %v11091_v32, %v7258_v22 }
0x33d0   : > { %v7260_v31 = vadd.f32 0.2548296, %v7259_v48 }
0x33d2   : > { %v7261_v42 = vmul.f32 %v11091_v32, %v7260_v31 }
0x33d4   : > { %v7266_v16 = vmul.f32 %v11093_v61, %v7261_v42 }
0x33d6   : > { %v7267_v45 = vsub.f32 1.0, %v7266_v16 }
0x33d8   : > { %v7269_v50 = vsub.f32 0.0, %v7267_v45 }
0x33da   : > { %v7270_v23 = vsel %vm7268_vm15, %v7269_v50, %v7267_v45 }
0x33db   : > { %v7271_v15 = vadd.f32 1.0, %v7270_v23 }
0x33dd   : > { %v7272_v26 = vmul.f32 0.5, %v7271_v15 }
0x33df   : > { %v7273_v47 = vmul.f32 %v7272_v26, %v7242_v29 }
0x33e1   : > { %v7274_v25 = vpack.c.bf16 %v7273_v47, %v7273_v47 }
0x33e3   : > { %10583 = vmatmul.mubr.bf16.vlgmr.msra.gmra.mxu1 %v7274_v25 }
0x33e4   : > { %10616 = vmatprep.mubr.msk.bf16.mxu1 %vm11268_vm2, %v11267_v49 }
0x3476   : > { %v7564_v43 = vpop.f32.mrf.mxu0 }
0x3477   : > { %v7613_v46 = vsel %vm1112_vm5, %v7564_v43, -inf }
0x3478   : > { %7614 = vmax.xlane.f32.xlu0 %v7613_v46  ;;  %v10606_v59 = vpop.f32.mrf.mxu0 }
0x347a   : > { %v7567_v14 = vpop.f32.mrf.mxu0 }
0x347c   : > { %v10607_v35 = vpop.f32.mrf.mxu0 }
0x3486   : > { %v7607_v37 = vpop.f32.mrf.mxu0 }
0x3487   : > { %v7616_v62 = vsel %vm1116_vm6, %v7607_v37, -inf }
0x3488   : > { %7617 = vmax.xlane.f32.xlu1 %v7616_v62  ;;  %v10612_v38 = vpop.f32.mrf.mxu0 }
0x348a   : > { %v7610_v1 = vpop.f32.mrf.mxu0 }
0x348c   : > { %v10613_v10 = vpop.f32.mrf.mxu0 }
0x348e   : > { %7637 = vrot.lane.b32.xlu0 %v12961_v36, %s13329_s3 }
0x3492   : > { %7736 = vrot.lane.b32.xlu0 %v12955_v55, %s13330_s23 }
0x3499   : > { %7786 = vrot.lane.b32.xlu1 %v12961_v36, %s13330_s23 }
0x34a3   : > { %v12982_v2 = vpop.f32.mrf.mxu1 }
0x34a5   : > { %v10584_v29 = vpop.f32.mrf.mxu1 }
0x34a7   : > { %v7376_v40 = vpop.f32.mrf.mxu1 }
0x34a9   : > { %v10585_v4 = vpop.f32.mrf.mxu1 }
0x3501   : > { %v7615_v6 = vpop.xlane.xlu0 %7614 }
0x3505   : > { %v7638_v5 = vpop.permute.xlu0 %7637 }
0x3506   : > { %v7643_v19 = vsel %vm1144_vm7, %v7638_v5, 0 }
0x3507   : > { %10615 = vmatpush3.bf16.msra.mxu1 %v7643_v19 }
0x3508   : > { %10626 = vmatprep.subr.bf16.mxu1 %v11267_v49 }
0x3509   : > { %v7737_v34 = vpop.permute.xlu0 %7736 }
0x3511   : > { %v7618_v17 = vpop.xlane.xlu1 %7617 }
0x3512   : > { %v7619_v44 = vmax.f32 %v7615_v6, %v7618_v17 }
0x3514   : > { %v7620_v12 = vsub.f32 %v7564_v43, %v7619_v44  ;;  %v7623_v52 = vsub.f32 %v7607_v37, %v7619_v44 }
0x3515   : > { %v7787_v33 = vpop.permute.xlu1 %7786 }
0x3516   : > { %v7621_v53 = vmul.f32 1.442695, %v7620_v12  ;;  %v7624_v56 = vmul.f32 1.442695, %v7623_v52  ;;  %v7789_v57 = vsel %vm1022_vm3, %v7787_v33, 0 }
0x3518   : > { %11094 = vpow2.f32 %v7621_v53 }
0x3519   : > { %11096 = vpow2.f32 %v7624_v56 }
0x3525   : > { %v12986_v0 = vpop.eup %11094 }
0x3526   : > { %v12988_v24 = vpop.eup %11096  ;;  %v7634_v41 = vpack.c.bf16 %v12986_v0, %v12986_v0 }
0x3527   : > { %v7635_v8 = vpack.c.bf16 %v12988_v24, %v12988_v24 }
0x3528   : > { %10623 = vmatmul.mubr.msk.bf16.vlgmr.msra.gmra.mxu0 %vm1022_vm3, %v7634_v41 }
0x3529   : > { %10617 = vmatmul.mubr.msk.bf16.vlgmr.msra.gmra.mxu1 %vm1140_vm8, %v7635_v8  ;;  %10633 = vmatpush3.bf16.xpose.msra.mxu0 %v7789_v57 }
0x352a   : > { %10627 = vmatpush3.bf16.xpose.msra.mxu1 %v7744_v58  ;;  %10628 = vmatprep.mubr.msk.bf16.mxu1 %vm11268_vm2, %v11267_v49 }
0x352b   : > { %10634 = vmatprep.mubr.msk.bf16.mxu0 %vm11268_vm2, %v11267_v49  ;;  %10638 = vmatprep.subr.bf16.mxu1 %v11267_v49 }
0x352c   : > { %10644 = vmatprep.subr.bf16.mxu0 %v11267_v49 }
0x3530   : > { %10635 = vmatmul.mubr.msk.bf16.vlgmr.msra.gmra.mxu0 %vm1022_vm3, %v7737_v34 }
0x3531   : > { %10629 = vmatmul.mubr.msk.bf16.vlgmr.msra.gmra.mxu1 %vm1022_vm3, %v7737_v34  ;;  %10646 = vmatprep.mubr.msk.bf16.mxu0 %vm11268_vm2, %v11267_v49 }
0x3532   : > { %10640 = vmatprep.mubr.msk.bf16.mxu1 %vm11268_vm2, %v11267_v49 }
0x35e8   : > { %v7728_v30 = vpop.f32.mrf.mxu0 }
0x35e9   : > { %v7679_v60 = vpop.f32.mrf.mxu1 }
0x35ea   : > { %v13010_v32 = vadd.f32 %v7728_v30, %v7679_v60  ;;  %v10624_v11 = vpop.f32.mrf.mxu0 }
0x35eb   : > { %v10618_v13 = vpop.f32.mrf.mxu1 }
0x35ec   : > { %v7731_v28 = vpop.f32.mrf.mxu0 }
0x35ed   : > { %v7682_v9 = vpop.f32.mrf.mxu1 }
0x35ee   : > { %v10625_v18 = vpop.f32.mrf.mxu0 }
0x35ef   : > { %v10619_v21 = vpop.f32.mrf.mxu1 }
0x35f0   : > { %v7825_v7 = vpop.f32.mrf.mxu0 }
0x35f1   : > { %v7780_v27 = vpop.f32.mrf.mxu1  ;;  %v7834_v22 = vsel %vm1116_vm6, %v7825_v7, -inf }
0x35f2   : > { %v7831_v48 = vsel %vm1112_vm5, %v7780_v27, -inf  ;;  %7835 = vmax.xlane.f32.xlu0 %v7834_v22  ;;  %v10636_v31 = vpop.f32.mrf.mxu0 }
0x35f3   : > { %7832 = vmax.xlane.f32.xlu1 %v7831_v48  ;;  %v10630_v42 = vpop.f32.mrf.mxu1 }
0x35f4   : > { %v7828_v61 = vpop.f32.mrf.mxu0 }
0x35f5   : > { %v7783_v16 = vpop.f32.mrf.mxu1 }
0x35f6   : > { %v10637_v45 = vpop.f32.mrf.mxu0 }
0x35f7   : > { %v10631_v50 = vpop.f32.mrf.mxu1 }
0x3604   : > { %7902 = vrot.lane.b32.xlu1 %v12878_v3, %s13331_s22 }
0x3608   : > { %7953 = vrot.lane.b32.xlu1 %v12878_v3, %s13332_s24  ;;  %7854 = vrot.lane.b32.xlu0 %v12961_v36, %s13331_s22 }
0x360c   : > { %7951 = vrot.lane.b32.xlu1 %v12955_v55, %s13332_s24  ;;  %8001 = vrot.lane.b32.xlu0 %v12961_v36, %s13332_s24 }
0x3610   : > { %8117 = vrot.lane.b32.xlu1 %v12878_v3, %s13323_s28 }
0x367b   : > { %v7836_v23 = vpop.xlane.xlu0 %7835 }
0x367c   : > { %v7833_v15 = vpop.xlane.xlu1 %7832 }
0x367d   : > { %v7837_v26 = vmax.f32 %v7833_v15, %v7836_v23 }
0x367f   : > { %v7838_v47 = vsub.f32 %v7780_v27, %v7837_v26  ;;  %v7841_v25 = vsub.f32 %v7825_v7, %v7837_v26  ;;  %v7855_v43 = vpop.permute.xlu0 %7854 }
0x3680   : > { %v7903_v46 = vpop.permute.xlu1 %7902  ;;  %v7860_v59 = vsel %vm1144_vm7, %v7855_v43, 0 }
0x3681   : > { %v7839_v14 = vmul.f32 1.442695, %v7838_v47  ;;  %v7842_v35 = vmul.f32 1.442695, %v7841_v25  ;;  %v7908_v37 = vsel %vm1194_vm4, %v7903_v46, 0  ;;  %10639 = vmatpush3.bf16.msra.mxu1 %v7860_v59 }
0x3682   : > { %10645 = vmatpush3.bf16.msra.mxu0 %v7908_v37  ;;  %10650 = vmatprep.subr.bf16.mxu1 %v11267_v49 }
0x3683   : > { %11098 = vpow2.f32 %v7839_v14  ;;  %10656 = vmatprep.subr.bf16.mxu0 %v11267_v49  ;;  %v8002_v1 = vpop.permute.xlu0 %8001 }
0x3684   : > { %11100 = vpow2.f32 %v7842_v35  ;;  %v7954_v62 = vpop.permute.xlu1 %7953  ;;  %v8004_v6 = vsel %vm1022_vm3, %v8002_v1, 0 }
0x3685   : > { %v7959_v5 = vsel %vm1022_vm3, %v7954_v62, 0 }
0x3688   : > { %v7952_v40 = vpop.permute.xlu1 %7951 }
0x368c   : > { %v8118_v19 = vpop.permute.xlu1 %8117 }
0x368d   : > { %v8123_v51 = vsel %vm1194_vm4, %v8118_v19, 0 }
0x3690   : > { %v13030_v38 = vpop.eup %11098 }
0x3691   : > { %v13032_v10 = vpop.eup %11100  ;;  %v7852_v29 = vpack.c.bf16 %v13030_v38, %v13030_v38 }
0x3692   : > { %v7853_v4 = vpack.c.bf16 %v13032_v10, %v13032_v10 }
0x3693   : > { %10647 = vmatmul.mubr.msk.bf16.vlgmr.msra.gmra.mxu0 %vm1022_vm3, %v7852_v29 }
0x3694   : > { %10641 = vmatmul.mubr.msk.bf16.vlgmr.msra.gmra.mxu1 %vm1140_vm8, %v7853_v4  ;;  %10657 = vmatpush3.bf16.xpose.msra.mxu0 %v8004_v6 }
0x3695   : > { %10651 = vmatpush3.bf16.xpose.msra.mxu1 %v7959_v5  ;;  %10652 = vmatprep.mubr.msk.bf16.mxu1 %vm11268_vm2, %v11267_v49 }
0x3696   : > { %10658 = vmatprep.mubr.msk.bf16.mxu0 %vm11268_vm2, %v11267_v49  ;;  %10668 = vmatprep.subr.bf16.mxu0 %v11267_v49 }
0x3697   : > { %10662 = vmatprep.subr.bf16.mxu1 %v11267_v49 }
0x369b   : > { %10659 = vmatmul.mubr.msk.bf16.vlgmr.msra.gmra.mxu0 %vm1022_vm3, %v7952_v40 }
0x369c   : > { %10653 = vmatmul.mubr.msk.bf16.vlgmr.msra.gmra.mxu1 %vm1022_vm3, %v7952_v40  ;;  %10669 = vmatpush3.bf16.msra.mxu0 %v8123_v51 }
0x369d   : > { %10664 = vmatprep.mubr.msk.bf16.mxu1 %vm11268_vm2, %v11267_v49  ;;  %10670 = vmatprep.mubr.msk.bf16.mxu0 %vm11268_vm2, %v11267_v49 }
0x369e   : > { %10680 = vmatprep.subr.bf16.mxu0 %v11267_v49 }
0x3753   : > { %v7944_v17 = vpop.f32.mrf.mxu0 }
0x3754   : > { %v7896_v44 = vpop.f32.mrf.mxu1 }
0x3755   : > { %v13056_v12 = vadd.f32 %v7944_v17, %v7896_v44  ;;  %v10648_v52 = vpop.f32.mrf.mxu0 }
0x3756   : > { %v10642_v53 = vpop.f32.mrf.mxu1 }
0x3757   : > { %v7947_v56 = vpop.f32.mrf.mxu0 }
0x3758   : > { %v7899_v33 = vpop.f32.mrf.mxu1 }
0x3759   : > { %v10649_v41 = vpop.f32.mrf.mxu0  ;;  %v7847_v33 = vsel %vm1116_vm6, %v13032_v10, 0.0 }
0x375a   : > { %v10643_v8 = vpop.f32.mrf.mxu1  ;;  %v7844_v41 = vsel %vm1112_vm5, %v13030_v38, 0.0 }
0x375b   : > { %v8040_v57 = vpop.f32.mrf.mxu0 }
0x375c   : > { %v7995_v58 = vpop.f32.mrf.mxu1  ;;  %v8049_v34 = vsel %vm1116_vm6, %v8040_v57, -inf }
0x375d   : > { %v8046_v30 = vsel %vm1112_vm5, %v7995_v58, -inf  ;;  %8050 = vmax.xlane.f32.xlu1 %v8049_v34  ;;  %v10660_v60 = vpop.f32.mrf.mxu0 }
0x375e   : > { %8047 = vmax.xlane.f32.xlu0 %v8046_v30  ;;  %v10654_v11 = vpop.f32.mrf.mxu1 }
0x375f   : > { %v8043_v13 = vpop.f32.mrf.mxu0 }
0x3760   : > { %v7998_v28 = vpop.f32.mrf.mxu1 }
0x3761   : > { %v10661_v9 = vpop.f32.mrf.mxu0 }
0x3762   : > { %v10655_v18 = vpop.f32.mrf.mxu1 }
0x376e   : > { %8216 = vrot.lane.b32.xlu1 %v12961_v36, %s13324_s30 }
0x3774   : > { %8069 = vrot.lane.b32.xlu0 %v12961_v36, %s13323_s28 }
0x3778   : > { %8168 = vrot.lane.b32.xlu0 %v12878_v3, %s13324_s30 }
0x377c   : > { %8166 = vrot.lane.b32.xlu0 %v12955_v55, %s13324_s30 }
0x37e6   : > { %v8051_v21 = vpop.xlane.xlu1 %8050 }
0x37e7   : > { %v8048_v7 = vpop.xlane.xlu0 %8047 }
0x37e8   : > { %v8052_v27 = vmax.f32 %v8048_v7, %v8051_v21 }
0x37ea   : > { %v8053_v22 = vsub.f32 %v7995_v58, %v8052_v27  ;;  %v8056_v48 = vsub.f32 %v8040_v57, %v8052_v27  ;;  %v8217_v50 = vpop.permute.xlu1 %8216 }
0x37eb   : > { %v8070_v31 = vpop.permute.xlu0 %8069  ;;  %v8219_v47 = vsel %vm1022_vm3, %v8217_v50, 0 }
0x37ec   : > { %v8054_v42 = vmul.f32 1.442695, %v8053_v22  ;;  %v8057_v61 = vmul.f32 1.442695, %v8056_v48  ;;  %v8075_v16 = vsel %vm1144_vm7, %v8070_v31, 0  ;;  %v7626_v48 = vsel %vm1112_vm5, %v12986_v0, 0.0 }
0x37ed   : > { %10663 = vmatpush3.bf16.msra.mxu1 %v8075_v16  ;;  %v7629_v31 = vsel %vm1116_vm6, %v12988_v24, 0.0  ;;  %v10912_v24 = vld [vmem:[%s13271_s11 + $0x18] sm:$0xff]  }
0x37ee   : > { %11102 = vpow2.f32 %v8054_v42  ;;  %10674 = vmatprep.subr.bf16.mxu1 %v11267_v49 }
0x37ef   : > { %11104 = vpow2.f32 %v8057_v61  ;;  %v8169_v15 = vpop.permute.xlu0 %8168 }
0x37f0   : > { %v8174_v25 = vsel %vm1022_vm3, %v8169_v15, 0 }
0x37f3   : > { %v8167_v43 = vpop.permute.xlu0 %8166 }
0x37fb   : > { %v11103_v45 = vpop.eup %11102 }
0x37fc   : > { %v11105_v23 = vpop.eup %11104  ;;  %v8067_v55 = vpack.c.bf16 %v11103_v45, %v11103_v45  ;;  %v8059_v8 = vsel %vm1112_vm5, %v11103_v45, 0.0 }
0x37fd   : > { %v8068_v26 = vpack.c.bf16 %v11105_v23, %v11105_v23  ;;  %v8062_v57 = vsel %vm1116_vm6, %v11105_v23, 0.0 }
0x37fe   : > { %10671 = vmatmul.mubr.msk.bf16.vlgmr.msra.gmra.mxu0 %vm1022_vm3, %v8067_v55 }
0x37ff   : > { %10665 = vmatmul.mubr.msk.bf16.vlgmr.msra.gmra.mxu1 %vm1140_vm8, %v8068_v26  ;;  %10681 = vmatpush3.bf16.xpose.msra.mxu0 %v8219_v47 }
0x3800   : > { %10675 = vmatpush3.bf16.xpose.msra.mxu1 %v8174_v25  ;;  %10676 = vmatprep.mubr.msk.bf16.mxu1 %vm11268_vm2, %v11267_v49 }
0x3801   : > { %10682 = vmatprep.mubr.msk.bf16.mxu0 %vm11268_vm2, %v11267_v49  ;;  %10686 = vmatprep.subr.bf16.mxu1 %v11267_v49 }
0x3802   : > { %10692 = vmatprep.subr.bf16.mxu0 %v11267_v49 }
0x3806   : > { %10683 = vmatmul.mubr.msk.bf16.vlgmr.msra.gmra.mxu0 %vm1022_vm3, %v8167_v43 }
0x3807   : > { %10677 = vmatmul.mubr.msk.bf16.vlgmr.msra.gmra.mxu1 %vm1022_vm3, %v8167_v43  ;;  %10694 = vmatprep.mubr.msk.bf16.mxu0 %vm11268_vm2, %v11267_v49 }
0x3808   : > { %10688 = vmatprep.mubr.msk.bf16.mxu1 %vm11268_vm2, %v11267_v49 }
0x38be   : > { %v8159_v46 = vpop.f32.mrf.mxu0 }
0x38bf   : > { %v8111_v59 = vpop.f32.mrf.mxu1 }
0x38c0   : > { %v13086_v14 = vadd.f32 %v8159_v46, %v8111_v59  ;;  %v10672_v35 = vpop.f32.mrf.mxu0 }
0x38c1   : > { %v10666_v37 = vpop.f32.mrf.mxu1 }
0x38c2   : > { %v8162_v62 = vpop.f32.mrf.mxu0 }
0x38c3   : > { %v8114_v1 = vpop.f32.mrf.mxu1 }
0x38c4   : > { %v10673_v29 = vpop.f32.mrf.mxu0 }
0x38c5   : > { %v10667_v40 = vpop.f32.mrf.mxu1 }
0x38c6   : > { %v8255_v4 = vpop.f32.mrf.mxu0 }
0x38c7   : > { %v8210_v6 = vpop.f32.mrf.mxu1  ;;  %v8264_v5 = vsel %vm1116_vm6, %v8255_v4, -inf }
0x38c8   : > { %v8261_v19 = vsel %vm1112_vm5, %v8210_v6, -inf  ;;  %8265 = vmax.xlane.f32.xlu0 %v8264_v5  ;;  %v10684_v51 = vpop.f32.mrf.mxu0 }
0x38c9   : > { %8262 = vmax.xlane.f32.xlu1 %v8261_v19  ;;  %v10678_v17 = vpop.f32.mrf.mxu1 }
0x38ca   : > { %v8258_v44 = vpop.f32.mrf.mxu0 }
0x38cb   : > { %v8213_v52 = vpop.f32.mrf.mxu1 }
0x38cc   : > { %v10685_v53 = vpop.f32.mrf.mxu0 }
0x38cd   : > { %v10679_v56 = vpop.f32.mrf.mxu1 }
0x38da   : > { %8332 = vrot.lane.b32.xlu1 %v12878_v3, %s13325_s1 }
0x38de   : > { %8284 = vrot.lane.b32.xlu0 %v12961_v36, %s13325_s1 }
0x38fd   : > { %7848 = vadd.xlane.f32.xlu0 %v7847_v33 }
0x38fe   : > { %7845 = vadd.xlane.f32.xlu1 %v7844_v41 }
0x3901   : > { %8060 = vadd.xlane.f32.xlu0 %v8059_v8 }
0x3905   : > { %8063 = vadd.xlane.f32.xlu0 %v8062_v57 }
0x3951   : > { %v8266_v58 = vpop.xlane.xlu0 %8265 }
0x3952   : > { %v8263_v34 = vpop.xlane.xlu1 %8262 }
0x3953   : > { %v8267_v3 = vmax.f32 %v8263_v34, %v8266_v58 }
0x3955   : > { %v8268_v30 = vsub.f32 %v8210_v6, %v8267_v3  ;;  %v8271_v60 = vsub.f32 %v8255_v4, %v8267_v3  ;;  %v8285_v36 = vpop.permute.xlu0 %8284 }
0x3956   : > { %v8333_v11 = vpop.permute.xlu1 %8332  ;;  %v8290_v10 = vsel %vm1144_vm7, %v8285_v36, 0 }
0x3957   : > { %v8269_v13 = vmul.f32 1.442695, %v8268_v30  ;;  %v8272_v28 = vmul.f32 1.442695, %v8271_v60  ;;  %v8338_v38 = vsel %vm1194_vm4, %v8333_v11, 0  ;;  %10687 = vmatpush3.bf16.msra.mxu1 %v8290_v10 }
0x3958   : > { %10693 = vmatpush3.bf16.msra.mxu0 %v8338_v38  ;;  %10698 = vmatprep.subr.bf16.mxu1 %v11267_v49  ;;  %v6085_v38 = vadd.f32 %v12709_v20, %v12595_v39 }
0x3959   : > { %11106 = vpow2.f32 %v8269_v13  ;;  %10706 = vmatprep.subr.bf16.mxu0 %v11267_v49 }
0x395a   : > { %11108 = vpow2.f32 %v8272_v28 }
0x3966   : > { %v11107_v9 = vpop.eup %11106 }
0x3967   : > { %v11109_v18 = vpop.eup %11108  ;;  %v8274_v21 = vsel %vm1112_vm5, %v11107_v9, 0.0  ;;  %v8282_v7 = vpack.c.bf16 %v11107_v9, %v11107_v9  ;;  %v10914_v9 = vld [vmem:[%s13272_s12 + $0x18] sm:$0xff]  }
0x3968   : > { %v8277_v27 = vsel %vm1116_vm6, %v11109_v18, 0.0  ;;  %8275 = vadd.xlane.f32.xlu1 %v8274_v21  ;;  %v8283_v22 = vpack.c.bf16 %v11109_v18, %v11109_v18  ;;  %v10915_v18 = vld [vmem:[%s13272_s12 + $0x10] sm:$0xff]  }
0x3969   : > { %8278 = vadd.xlane.f32.xlu0 %v8277_v27  ;;  %10695 = vmatmul.mubr.msk.bf16.vlgmr.msra.gmra.mxu0 %vm1022_vm3, %v8282_v7 }
0x396a   : > { %10689 = vmatmul.mubr.msk.bf16.vlgmr.msra.gmra.mxu1 %vm1140_vm8, %v8283_v22  ;;  %10710 = vmatprep.mubr.msk.bf16.mxu0 %vm11268_vm2, %v11267_v49 }
0x396b   : > { %10702 = vmatprep.mubr.msk.bf16.mxu1 %vm11268_vm2, %v11267_v49  ;;  %10699 = vmatpush3.bf16.msra.mxu1 %v10912_v24  ;;  %v10923_v24 = vld [vmem:[%s13274_s14 + $0x40] sm:$0xff]  }
0x396c   : > { %7627 = vadd.xlane.f32.xlu1 %v7626_v48  ;;  %10700 = vmatprep.subr.bf16.mxu1 %v11267_v49 }
0x396d   : > { %7630 = vadd.xlane.f32.xlu0 %v7629_v31  ;;  %10707 = vmatpush3.bf16.msra.mxu0 %v10914_v9 }
0x396e   : > { %10708 = vmatprep.subr.bf16.mxu0 %v11267_v49 }
0x3971   : > { %10709 = vmatpush3.bf16.msra.mxu0 %v10915_v18  ;;  %v9462_v18 = vld [vmem:[%s13275_s15] ss:$0 sm:$0xff] }
0x3972   : > { %10734 = vmatprep.subr.bf16.mxu0 %v11267_v49 }
0x3986   : > { %v7849_v42 = vpop.xlane.xlu0 %7848 }
0x3987   : > { %v7846_v61 = vpop.xlane.xlu1 %7845 }
0x3988   : > { %v7850_v16 = vadd.f32 %v7849_v42, %v7846_v61 }
0x398a   : > { %11110 = vrcp.f32 %v7850_v16  ;;  %v8061_v45 = vpop.xlane.xlu0 %8060 }
0x398e   : > { %v8064_v50 = vpop.xlane.xlu0 %8063 }
0x398f   : > { %v8065_v23 = vadd.f32 %v8064_v50, %v8061_v45  ;;  %v10916_v45 = vld [vmem:[%s13274_s14 + $0x78] sm:$0xff]   ;;  %v10917_v50 = vld [vmem:[%s13274_s14 + $0x70] sm:$0xff]  }
0x3991   : > { %11112 = vrcp.f32 %v8065_v23  ;;  %v10918_v23 = vld [vmem:[%s13274_s14 + $0x68] sm:$0xff]  }
0x3997   : > { %v11111_v15 = vpop.eup %11110 }
0x3998   : > { %v7950_v55 = vmul.f32 %v11111_v15, %v13056_v12  ;;  %v10913_v12 = vld [vmem:[%s13271_s11 + $0x10] sm:$0xff]   ;;  %v10919_v15 = vld [vmem:[%s13274_s14 + $0x60] sm:$0xff]  }
0x3999   : > { %10701 = vmatpush3.bf16.msra.mxu1 %v10913_v12 }
0x399a   : > { %8382 = vrot.lane.b32.xlu1 %v7950_v55, %s13326_s29  ;;  %10714 = vmatprep.subr.bf16.mxu1 %v11267_v49  ;;  %v10920_v55 = vld [vmem:[%s13274_s14 + $0x58] sm:$0xff]  }
0x399e   : > { %v11113_v0 = vpop.eup %11112 }
0x399f   : > { %v8165_v26 = vmul.f32 %v11113_v0, %v13086_v14  ;;  %v10921_v0 = vld [vmem:[%s13274_s14 + $0x50] sm:$0xff]  }
0x39a1   : > { %8386 = vrot.lane.b32.xlu0 %v8165_v26, %s13327_s25  ;;  %v10922_v26 = vld [vmem:[%s13274_s14 + $0x48] sm:$0xff]  }
0x39f1   : > { %v8276_v47 = vpop.xlane.xlu1 %8275 }
0x39f2   : > { %v8279_v25 = vpop.xlane.xlu0 %8278 }
0x39f3   : > { %v8280_v43 = vadd.f32 %v8279_v25, %v8276_v47  ;;  %v9434_v47 = vld [vmem:[#allocation7 + $0x1] ss:$0 sm:$0xff] }
0x39f5   : > { %11114 = vrcp.f32 %v8280_v43  ;;  %v7628_v5 = vpop.xlane.xlu1 %7627 }
0x39f6   : > { %v7631_v19 = vpop.xlane.xlu0 %7630 }
0x39f7   : > { %v7632_v51 = vadd.f32 %v7631_v19, %v7628_v5 }
0x39f9   : > { %11116 = vrcp.f32 %v7632_v51 }
0x3a02   : > { %v11115_v37 = vpop.eup %11114 }
0x3a06   : > { %v11117_v17 = vpop.eup %11116 }
0x3a07   : > { %v7734_v52 = vmul.f32 %v11117_v17, %v13010_v32  ;;  %v13141_v32 = vadd.f32 %v12982_v2, %v12871_v54  ;;  %v8668_v2 = vsel %vm876_vm1, %v6085_v38, 0.0 }
0x3a09   : > { %v8779_v11 = vsel %vm876_vm1, %v13141_v32, 0.0 }
0x3a0c   : > { %v8383_v44 = vpop.permute.xlu1 %8382 }
0x3a0d   : > { %v8393_v56 = vsel %vm1022_vm3, %v7734_v52, %v8383_v44 }
0x3a13   : > { %v8387_v53 = vpop.permute.xlu0 %8386 }
0x3a14   : > { %v8394_v33 = vsel %vm1898_vm9, %v8393_v56, %v8387_v53 }
0x3a29   : > { %v8374_v46 = vpop.f32.mrf.mxu0 }
0x3a2a   : > { %v8326_v59 = vpop.f32.mrf.mxu1 }
0x3a2b   : > { %v8375_v14 = vadd.f32 %v8374_v46, %v8326_v59  ;;  %v10696_v35 = vpop.f32.mrf.mxu0 }
0x3a2c   : > { %v10690_v62 = vpop.f32.mrf.mxu1 }
0x3a2d   : > { %v8380_v1 = vmul.f32 %v11115_v37, %v8375_v14  ;;  %v8377_v29 = vpop.f32.mrf.mxu0 }
0x3a2e   : > { %v8329_v40 = vpop.f32.mrf.mxu1 }
0x3a2f   : > { %8390 = vrot.lane.b32.xlu1 %v8380_v1, %s13328_s27  ;;  %v10697_v4 = vpop.f32.mrf.mxu0  ;;  %s9482_s27 = sshll.u32 %s11481_s20, 4 }
0x3a30   : > { %v10691_v6 = vpop.f32.mrf.mxu1  ;;  %s661_s8 = scalar_lea.vmem %s13279_s19, %s9482_s27 }
0x3aa1   : > { %v8391_v41 = vpop.permute.xlu1 %8390 }
0x3aa2   : > { %v8395_v8 = vsel %vm1900_vm10, %v8394_v33, %v8391_v41 }
0x3aa3   : > { %v8396_v57 = vpack.c.bf16 %v8395_v8, %v8395_v8 }
0x3aa5   : > { %10703 = vmatmul.mubr.msk.bf16.vlgmr.msra.gmra.mxu1 %vm691_vm0, %v8396_v57 }
0x3aa6   : > { %10730 = vmatprep.mubr.msk.bf16.mxu1 %vm11268_vm2, %v11267_v49  ;;  %10715 = vmatpush3.bf16.msra.mxu1 %v10916_v45 }
0x3aa7   : > { %10716 = vmatprep.subr.bf16.mxu1 %v11267_v49 }
0x3aaa   : > { %10717 = vmatpush3.bf16.msra.mxu1 %v10917_v50 }
0x3aab   : > { %10718 = vmatprep.subr.bf16.mxu1 %v11267_v49 }
0x3aae   : > { %10719 = vmatpush3.bf16.msra.mxu1 %v10918_v23 }
0x3aaf   : > { %10720 = vmatprep.subr.bf16.mxu1 %v11267_v49 }
0x3ab2   : > { %10721 = vmatpush3.bf16.msra.mxu1 %v10919_v15 }
0x3ab3   : > { %10722 = vmatprep.subr.bf16.mxu1 %v11267_v49 }
0x3ab6   : > { %10723 = vmatpush3.bf16.msra.mxu1 %v10920_v55 }
0x3ab7   : > { %10724 = vmatprep.subr.bf16.mxu1 %v11267_v49 }
0x3aba   : > { %10725 = vmatpush3.bf16.msra.mxu1 %v10921_v0 }
0x3abb   : > { %10726 = vmatprep.subr.bf16.mxu1 %v11267_v49 }
0x3abe   : > { %10727 = vmatpush3.bf16.msra.mxu1 %v10922_v26 }
0x3abf   : > { %10728 = vmatprep.subr.bf16.mxu1 %v11267_v49 }
0x3ac2   : > { %10729 = vmatpush3.bf16.msra.mxu1 %v10923_v24 }
0x3b65   : > { %v8450_v58 = vpop.f32.mrf.mxu1 }
0x3b66   : > { %v13137_v34 = vadd.f32 %v8450_v58, %v12849_v63 }
0x3b67   : > { %v10704_v3 = vpop.f32.mrf.mxu1 }
0x3b68   : > { %v8456_v30 = vsel %vm876_vm1, %v13137_v34, 0.0 }
0x3b69   : > { %8457 = vadd.xlane.f32.xlu1 %v8456_v30  ;;  %v8453_v60 = vpop.f32.mrf.mxu1 }
0x3b6b   : > { %v10705_v36 = vpop.f32.mrf.mxu1 }
0x3b6d   : > { %8780 = vadd.xlane.f32.xlu1 %v8779_v11 }
0x3bf2   : > { %v8458_v10 = vpop.xlane.xlu1 %8457 }
0x3bf3   : > { %v8459_v13 = vmul.f32 0.03125, %v8458_v10 }
0x3bf5   : > { %v8460_v63 = vsub.f32 %v13137_v34, %v8459_v13 }
0x3bf6   : > { %v8781_v11 = vpop.xlane.xlu1 %8780 }
0x3bf7   : > { %v8461_v28 = vmul.f32 %v8460_v63, %v8460_v63 }
0x3bf9   : > { %v8462_v54 = vsel %vm876_vm1, %v8461_v28, 0.0  ;;  %v8782_v28 = vmul.f32 0.03125, %v8781_v11 }
0x3bfa   : > { %8463 = vadd.xlane.f32.xlu0 %v8462_v54 }
0x3bfb   : > { %v8783_v54 = vsub.f32 %v13141_v32, %v8782_v28  ;;  %v9463_v32 = vld [vmem:[%s13276_s16] ss:$0 sm:$0xff] }
0x3bfe   : > { %8669 = vadd.xlane.f32.xlu0 %v8668_v2 }
0x3c83   : > { %v8464_v39 = vpop.xlane.xlu0 %8463 }
0x3c84   : > { %v8465_v20 = vmul.f32 0.03125, %v8464_v39 }
0x3c86   : > { %v8466_v21 = vadd.f32 1e-05, %v8465_v20 }
0x3c87   : > { %v8670_v7 = vpop.xlane.xlu0 %8669 }
0x3c88   : > { %11118 = vrsqrt.f32 %v8466_v21  ;;  %v8671_v27 = vmul.f32 0.03125, %v8670_v7  ;;  %v8784_v7 = vmul.f32 %v8783_v54, %v8783_v54 }
0x3c8a   : > { %v13160_v22 = vsub.f32 %v6085_v38, %v8671_v27 }
0x3c8c   : > { %v8673_v48 = vmul.f32 %v13160_v22, %v13160_v22 }
0x3c8e   : > { %v8674_v31 = vsel %vm876_vm1, %v8673_v48, 0.0 }
0x3c8f   : > { %8675 = vadd.xlane.f32.xlu1 %v8674_v31 }
0x3c95   : > { %v11119_v42 = vpop.eup %11118 }
0x3c96   : > { %v8468_v61 = vmul.f32 %v11119_v42, %v8460_v63 }
0x3c98   : > { %v8469_v16 = vpack.c.bf16 %v8468_v61, %v8468_v61 }
0x3c9a   : > { %10711 = vmatmul.mubr.msk.bf16.vlgmr.msra.gmra.mxu0 %vm691_vm0, %v8469_v16 }
0x3c9b   : > { %10738 = vmatprep.mubr.msk.bf16.mxu0 %vm11268_vm2, %v11267_v49 }
0x3d18   : > { %v8676_v10 = vpop.xlane.xlu1 %8675 }
0x3d19   : > { %v8677_v13 = vmul.f32 0.03125, %v8676_v10 }
0x3d1b   : > { %v8678_v63 = vadd.f32 1e-05, %v8677_v13 }
0x3d5a   : > { %v8530_v25 = vpop.f32.mrf.mxu0 }
0x3d5b   : > { %v8531_v43 = vadd.f32 %v9434_v47, %v8530_v25 }
0x3d5c   : > { %v10712_v12 = vpop.f32.mrf.mxu0 }
0x3d5d   : > { %v8536_v46 = vmul.f32 0.70710677, %v8531_v43 }
0x3d5e   : > { %v8533_v59 = vpop.f32.mrf.mxu0 }
0x3d5f   : > { %v8537_v14 = vand.u32 2147483647, %v8536_v46  ;;  %vm8557_vm3 = vcmp.lt.f32.partialorder %v8536_v46, 0.0 }
0x3d60   : > { %v10713_v35 = vpop.f32.mrf.mxu0 }
0x3d61   : > { %v8538_v37 = vmul.f32 0.3275911, %v8537_v14  ;;  %v8551_v1 = vmul.f32 %v8537_v14, %v8537_v14 }
0x3d63   : > { %v8539_v62 = vadd.f32 1.0, %v8538_v37  ;;  %v8552_v29 = vsub.f32 0.0, %v8551_v1  ;;  %v10924_v37 = vld [vmem:[%s13277_s17 + $0x8] sm:$0xff]  }
0x3d64   : > { %10735 = vmatpush3.bf16.msra.mxu0 %v10924_v37 }
0x3d65   : > { %11120 = vrcp.f32 %v8539_v62  ;;  %v8553_v6 = vmul.f32 1.442695, %v8552_v29  ;;  %10736 = vmatprep.subr.bf16.mxu0 %v11267_v49  ;;  %v10925_v62 = vld [vmem:[%s13277_s17] sm:$0xff]  }
0x3d67   : > { %11122 = vpow2.f32 %v8553_v6 }
0x3d68   : > { %11124 = vrsqrt.f32 %v8678_v63  ;;  %10737 = vmatpush3.bf16.msra.mxu0 %v10925_v62 }
0x3d69   : > { %10742 = vmatprep.subr.bf16.mxu0 %v11267_v49 }
0x3d72   : > { %v11121_v40 = vpop.eup %11120 }
0x3d73   : > { %v8542_v4 = vmul.f32 1.0614054, %v11121_v40 }
0x3d74   : > { %v11123_v33 = vpop.eup %11122 }
0x3d75   : > { %v8543_v5 = vadd.f32 -1.4531521, %v8542_v4  ;;  %v11125_v38 = vpop.eup %11124 }
0x3d76   : > { %v8680_v2 = vmul.f32 %v11125_v38, %v13160_v22  ;;  %v8785_v22 = vsel %vm876_vm1, %v8784_v7, 0.0 }
0x3d77   : > { %v8544_v19 = vmul.f32 %v11121_v40, %v8543_v5 }
0x3d78   : > { %v8688_v27 = vmul.f32 %v9462_v18, %v8680_v2 }
0x3d79   : > { %v8545_v51 = vadd.f32 1.4214138, %v8544_v19 }
0x3d7a   : > { %v8696_v42 = vadd.f32 %v9463_v32, %v8688_v27 }
0x3d7b   : > { %v8546_v17 = vmul.f32 %v11121_v40, %v8545_v51 }
0x3d7c   : > { %v8697_v61 = vsel %vm876_vm1, %v8696_v42, 0.0 }
0x3d7d   : > { %v8547_v44 = vadd.f32 -0.28449672, %v8546_v17 }
0x3d7f   : > { %v8548_v52 = vmul.f32 %v11121_v40, %v8547_v44 }
0x3d81   : > { %v8549_v53 = vadd.f32 0.2548296, %v8548_v52 }
0x3d83   : > { %v8550_v56 = vmul.f32 %v11121_v40, %v8549_v53 }
0x3d85   : > { %v8555_v41 = vmul.f32 %v11123_v33, %v8550_v56 }
0x3d87   : > { %v8556_v8 = vsub.f32 1.0, %v8555_v41 }
0x3d89   : > { %v8558_v57 = vsub.f32 0.0, %v8556_v8 }
0x3d8b   : > { %v8559_v58 = vsel %vm8557_vm3, %v8558_v57, %v8556_v8 }
0x3d8c   : > { %v8560_v3 = vadd.f32 1.0, %v8559_v58 }
0x3d8e   : > { %v8561_v30 = vmul.f32 0.5, %v8560_v3 }
0x3d90   : > { %v8562_v60 = vmul.f32 %v8561_v30, %v8531_v43  ;;  %v10926_v30 = vld [vmem:[%s13277_s17 + $0x8] sm:$0xff]  }
0x3d92   : > { %v8563_v36 = vpack.c.bf16 %v8562_v60, %v8562_v60  ;;  %v10927_v60 = vld [vmem:[%s13277_s17] sm:$0xff]  }
0x3d94   : > { %10731 = vmatmul.mubr.bf16.vlgmr.msra.gmra.mxu1 %v8563_v36 }
0x3e54   : > { %v8662_v9 = vpop.f32.mrf.mxu1 }
0x3e55   : > { %v8663_v39 = vadd.f32 %v8662_v9, %v13137_v34 }
0x3e56   : > { %v10732_v20 = vpop.f32.mrf.mxu1 }
0x3e57   : > { %v8889_v21 = vsel %vm876_vm1, %v8663_v39, 0.0  ;;  %v10929_v20 = vld [vmem:[%s13277_s17] sm:$0xff]  }
0x3e58   : > { %8890 = vadd.xlane.f32.xlu0 %v8889_v21  ;;  %v8665_v48 = vpop.f32.mrf.mxu1  ;;  %v9464_v21 = vld [vmem:[%s13278_s18] ss:$0 sm:$0xff] }
0x3e5a   : > { %v10733_v31 = vpop.f32.mrf.mxu1 }
0x3e5c   : > { %8786 = vadd.xlane.f32.xlu0 %v8785_v22 }
0x3e60   : > { %8698 = vadd.xlane.f32.xlu0 %v8697_v61 }
0x3ee1   : > { %v8891_v34 = vpop.xlane.xlu0 %8890 }
0x3ee2   : > { %v8892_v16 = vmul.f32 0.03125, %v8891_v34 }
0x3ee4   : > { %v8893_v45 = vsub.f32 %v8663_v39, %v8892_v16  ;;  %v10928_v39 = vld [vmem:[%s13277_s17 + $0x8] sm:$0xff]  }
0x3ee5   : > { %v8787_v50 = vpop.xlane.xlu0 %8786 }
0x3ee6   : > { %v8788_v23 = vmul.f32 0.03125, %v8787_v50  ;;  %v8894_v15 = vmul.f32 %v8893_v45, %v8893_v45 }
0x3ee8   : > { %v8789_v55 = vadd.f32 1e-05, %v8788_v23  ;;  %v8895_v0 = vsel %vm876_vm1, %v8894_v15, 0.0 }
0x3ee9   : > { %8896 = vadd.xlane.f32.xlu1 %v8895_v0  ;;  %v8699_v26 = vpop.xlane.xlu0 %8698 }
0x3eea   : > { %11126 = vrsqrt.f32 %v8789_v55  ;;  %v8700_v24 = vmul.f32 0.03125, %v8699_v26 }
0x3eec   : > { %v8701_v43 = vsub.f32 %v8696_v42, %v8700_v24 }
0x3eee   : > { %v8702_v14 = vmul.f32 %v8701_v43, %v8701_v43 }
0x3ef0   : > { %v8703_v35 = vsel %vm876_vm1, %v8702_v14, 0.0 }
0x3ef7   : > { %v11127_v47 = vpop.eup %11126 }
0x3ef8   : > { %v8791_v25 = vmul.f32 %v11127_v47, %v8783_v54 }
0x3efa   : > { %v8799_v12 = vmul.f32 %v9462_v18, %v8791_v25 }
0x3efc   : > { %v8807_v46 = vadd.f32 %v9463_v32, %v8799_v12 }
0x3efe   : > { %v8808_v59 = vsel %vm876_vm1, %v8807_v46, 0.0 }
0x3eff   : > { %8809 = vadd.xlane.f32.xlu1 %v8808_v59 }
0x3f03   : > { %8704 = vadd.xlane.f32.xlu1 %v8703_v35 }
0x3f72   : > { %v8897_v1 = vpop.xlane.xlu1 %8896 }
0x3f73   : > { %v8898_v29 = vmul.f32 0.03125, %v8897_v1 }
0x3f75   : > { %v8899_v40 = vadd.f32 1e-05, %v8898_v29 }
0x3f77   : > { %11128 = vrsqrt.f32 %v8899_v40 }
0x3f84   : > { %v11129_v4 = vpop.eup %11128 }
0x3f85   : > { %v8901_v6 = vmul.f32 %v11129_v4, %v8893_v45 }
0x3f87   : > { %v8909_v5 = vmul.f32 %v9462_v18, %v8901_v6 }
0x3f88   : > { %v8810_v19 = vpop.xlane.xlu1 %8809 }
0x3f89   : > { %v8811_v51 = vmul.f32 0.03125, %v8810_v19  ;;  %v8917_v17 = vadd.f32 %v9463_v32, %v8909_v5 }
0x3f8b   : > { %v8812_v44 = vsub.f32 %v8807_v46, %v8811_v51  ;;  %v8918_v52 = vsel %vm876_vm1, %v8917_v17, 0.0 }
0x3f8c   : > { %8919 = vadd.xlane.f32.xlu0 %v8918_v52  ;;  %v8705_v53 = vpop.xlane.xlu1 %8704 }
0x3f8d   : > { %v8706_v56 = vmul.f32 0.03125, %v8705_v53  ;;  %v8813_v33 = vmul.f32 %v8812_v44, %v8812_v44 }
0x3f8f   : > { %v8707_v41 = vadd.f32 1e-05, %v8706_v56  ;;  %v8814_v8 = vsel %vm876_vm1, %v8813_v33, 0.0 }
0x3f90   : > { %8815 = vadd.xlane.f32.xlu0 %v8814_v8 }
0x3f91   : > { %11130 = vrsqrt.f32 %v8707_v41 }
0x3f9e   : > { %v11131_v57 = vpop.eup %11130 }
0x3f9f   : > { %v8709_v58 = vmul.f32 %v11131_v57, %v8701_v43 }
0x3fa1   : > { %v8710_v3 = vpack.c.bf16 %v8709_v58, %v8709_v58 }
0x3fa3   : > { %10739 = vmatmul.mubr.msk.bf16.vlgmr.msra.gmra.mxu0 %vm691_vm0, %v8710_v3 }
0x3fa4   : > { %10746 = vmatprep.mubr.msk.bf16.mxu0 %vm11268_vm2, %v11267_v49  ;;  %10743 = vmatpush3.bf16.msra.mxu0 %v10926_v30 }
0x3fa5   : > { %10744 = vmatprep.subr.bf16.mxu0 %v11267_v49 }
0x3fa8   : > { %10745 = vmatpush3.bf16.msra.mxu0 %v10927_v60 }
0x3fa9   : > { %10750 = vmatprep.subr.bf16.mxu0 %v11267_v49 }
0x4015   : > { %v8920_v36 = vpop.xlane.xlu0 %8919 }
0x4016   : > { %v8921_v11 = vmul.f32 0.03125, %v8920_v36 }
0x4018   : > { %v8922_v10 = vsub.f32 %v8917_v17, %v8921_v11 }
0x4019   : > { %v8816_v13 = vpop.xlane.xlu0 %8815 }
0x401a   : > { %v8817_v63 = vmul.f32 0.03125, %v8816_v13  ;;  %v8923_v28 = vmul.f32 %v8922_v10, %v8922_v10 }
0x401c   : > { %v8818_v38 = vadd.f32 1e-05, %v8817_v63  ;;  %v8924_v54 = vsel %vm876_vm1, %v8923_v28, 0.0  ;;  %vm8777_vm1 = vcmask 388096  }
0x401d   : > { %8925 = vadd.xlane.f32.xlu1 %v8924_v54 }
0x401e   : > { %11132 = vrsqrt.f32 %v8818_v38 }
0x402b   : > { %v11133_v2 = vpop.eup %11132 }
0x402c   : > { %v8820_v9 = vmul.f32 %v11133_v2, %v8812_v44 }
0x402e   : > { %v8821_v18 = vpack.c.bf16 %v8820_v9, %v8820_v9 }
0x4030   : > { %10747 = vmatmul.mubr.msk.bf16.vlgmr.msra.gmra.mxu0 %vm691_vm0, %v8821_v18 }
0x4031   : > { %10754 = vmatprep.mubr.msk.bf16.mxu0 %vm11268_vm2, %v11267_v49  ;;  %10751 = vmatpush3.bf16.msra.mxu0 %v10928_v39 }
0x4032   : > { %10752 = vmatprep.subr.bf16.mxu0 %v11267_v49 }
0x4035   : > { %10753 = vmatpush3.bf16.msra.mxu0 %v10929_v20 }
0x4063   : > { %v8771_v7 = vpop.f32.mrf.mxu0 }
0x4064   : > { %v8772_v27 = vadd.f32 %v9464_v21, %v8771_v7 }
0x4065   : > { %v10740_v48 = vpop.f32.mrf.mxu0 }
0x4066   : > { %8778 = vst.msk [vmem:[%s661_s8] sm:$0xf] %vm8777_vm1, %v8772_v27 }
0x4067   : > { %v8774_v49 = vpop.f32.mrf.mxu0 }
0x4069   : > { %v10741_v32 = vpop.f32.mrf.mxu0 }
0x40a6   : > { %v8926_v31 = vpop.xlane.xlu1 %8925 }
0x40a7   : > { %v8927_v22 = vmul.f32 0.03125, %v8926_v31 }
0x40a9   : > { %v8928_v42 = vadd.f32 1e-05, %v8927_v22 }
0x40ab   : > { %11134 = vrsqrt.f32 %v8928_v42 }
0x40b8   : > { %v11135_v61 = vpop.eup %11134 }
0x40b9   : > { %v8930_v34 = vmul.f32 %v11135_v61, %v8922_v10 }
0x40bb   : > { %v8931_v16 = vpack.c.bf16 %v8930_v34, %v8930_v34 }
0x40bd   : > { %10755 = vmatmul.mubr.msk.bf16.vlgmr.msra.gmra.mxu0 %vm691_vm0, %v8931_v16 }
0x40f0   : > { %v8882_v45 = vpop.f32.mrf.mxu0 }
0x40f1   : > { %v8883_v50 = vadd.f32 %v9464_v21, %v8882_v45 }
0x40f2   : > { %v10748_v23 = vpop.f32.mrf.mxu0 }
0x40f3   : > { %8888 = vst.msk [vmem:[%s661_s8 + $0x4] sm:$0xf] %vm8777_vm1, %v8883_v50 }
0x40f4   : > { %v8885_v15 = vpop.f32.mrf.mxu0 }
0x40f6   : > { %v10749_v55 = vpop.f32.mrf.mxu0 }
0x417d   : > { %v8992_v0 = vpop.f32.mrf.mxu0 }
0x417e   : > { %v8993_v26 = vadd.f32 %v9464_v21, %v8992_v0 }
0x417f   : > { %v10756_v24 = vpop.f32.mrf.mxu0 }
0x4180   : > { %8998 = vst.msk [vmem:[%s661_s8 + $0x8] sm:$0xf] %vm8777_vm1, %v8993_v26 }
0x4181   : > { %v8995_v47 = vpop.f32.mrf.mxu0 }
0x4183   : > { %v10757_v25 = vpop.f32.mrf.mxu0 }
0x4184 PF: > { %s32_s0 = sadd.s32 1, %s11259_s0  }
0x4185   : > { %p29_p2 = scmp.ge.s32.totalorder %s32_s0, 4  }
0x4187   :  { %31 = sbr.rel (!%p29_p2) target bundleno = 13 (0xd), region = 154 }
0x418c   :  { %9020 = vsyncpa [#allocation3], 1 }
0x418d   :  { %9022 = vsyncpa [#allocation3 + $0x1], 1 }
0x418e   :  { %9023 = vsyncpa [#allocation5], 1 }
0x418f   :  { %9024 = vsyncpa [#allocation8], 1 }

</bundles_post_ra>
